<compile_context>
chip_gen: v5e
topology: v5e:2x2
jax: 0.10.0
libtpu: 0.0.40
codegen_flags: <defaults>
</compile_context>

<pallas_src>
import jax
import jax.numpy as jnp
import numpy as np
from jax import lax
from jax.experimental import pallas as pl
from jax.experimental.pallas import tpu as pltpu

EPS = 1e-5


def _gelu(x):
    # exact (erf) GELU, matching torch.nn.GELU() default.
    # TODO(synk): jax.nn.gelu(approximate=True) would route through the EUP (tanh) and relieve
    # the VALU, at a small numerics delta vs torch's erf default.
    return 0.5 * x * (1.0 + lax.erf(x * 0.7071067811865476))


def _fold_matrix(c, w):
    # (w*c, c) one-hot "fold": folded_vec @ F -> per-channel reduce; chan_vec @ F.T -> folded bcast.
    return jnp.tile(jnp.eye(c, dtype=jnp.float32), (w, 1))


def _block_diag_pointwise(wmat, w):
    # 1x1-conv weight (ci, co) -> block-diagonal (w*ci, w*co): the pointwise conv becomes a single
    # matmul in the lane-folded (rows, W*C) layout.
    # TODO(synk): for C >= 128 use plain (B*H*W, C) x (C, C') matmuls instead (block-diag inflates
    # weight bytes by W^2 and MXU FLOPs by W; overflows VMEM at production sizes).
    ci, co = wmat.shape
    eye = jnp.eye(w, dtype=wmat.dtype)
    return jnp.einsum("ij,cd->icjd", eye, wmat).reshape(w * ci, w * co)


def mbconv_forward(x, p):
    """x: (B, H, W, Cin) float32 NHWC -> (B, H, W, Cout)."""
    B, H, W, Cin = x.shape
    Ch = p["w1"].shape[1]
    Cout = p["w2"].shape[1]
    R = B * H                        # sublane rows of the folded layout
    Lin, Lh, Lout = W * Cin, W * Ch, W * Cout
    # lane-dense layout requirement (unmasked vld/vst); pad channels if this ever fails.
    assert R % 8 == 0 and Lin % 128 == 0 and Lh % 128 == 0 and Lout % 128 == 0
    inv_n = 1.0 / float(B * H * W)   # BatchNorm sample count
    inv_hw = 1.0 / float(H * W)
    f32, bf16 = jnp.float32, jnp.bfloat16

    # ---- host-side operand prep (layout plumbing only; HBM bytes unchanged) ----
    x_f = x.reshape(R, Lin)                                   # (B*H, W*Cin)
    w1_big = _block_diag_pointwise(p["w1"], W).astype(bf16)   # bf16 MXU operands
    w2_big = _block_diag_pointwise(p["w2"], W).astype(bf16)
    # depthwise taps tiled over lanes, with the left/right image-border masks folded into the
    # tap weights (removes 6 full-tile VPU multiplies from the kernel).
    w_pos = np.arange(Lh) // Ch
    tap_mask = np.ones((9, Lh), np.float32)
    tap_mask[[0, 3, 6], :] *= (w_pos > 0)                     # taps that read (., w-1)
    tap_mask[[2, 5, 8], :] *= (w_pos < W - 1)                 # taps that read (., w+1)
    wd_t = jnp.tile(p["wd"], (1, W)) * jnp.asarray(tap_mask)  # (9, Lh)
    t_in, t_hid, t_out = _fold_matrix(Cin, W), _fold_matrix(Ch, W), _fold_matrix(Cout, W)
    sel = jnp.repeat(jnp.eye(B, dtype=f32), H, axis=1)        # (B, R): selects rows of image b

    def kernel(x_ref, g0_ref, b0_ref, w1_ref, g1_ref, b1_ref,
               wd_ref, g2_ref, b2_ref, sew1_ref, sew2_ref,
               w2_ref, g3_ref, b3_ref,
               tin_ref, tin_t_ref, th_ref, th_t_ref, tout_ref, tout_t_ref,
               sel_ref, sel_t_ref, o_ref):
        ones_row = jnp.ones((1, R), f32)   # built once; row reductions run on the MXU

        def bn_scale_shift(y, T, Tt, g, b):
            # training-mode BatchNorm2d (biased variance, eps=1e-5), one-pass moments.
            # Sublane reductions as rank-1 MXU matmuls (XLU relief); @T folds the W positions
            # packed into lanes down to per-channel stats; @Tt broadcasts back to the lane layout.
            # TODO(synk): one-pass E[x^2]-E[x]^2 can cancel at production scale; use two-pass there.
            rs1 = jnp.dot(ones_row, y, preferred_element_type=f32)            # (1, L)
            rs2 = jnp.dot(ones_row, y * y, preferred_element_type=f32)        # (1, L)
            mu = jnp.dot(rs1, T, preferred_element_type=f32) * inv_n          # (1, C)
            var = jnp.dot(rs2, T, preferred_element_type=f32) * inv_n - mu * mu
            sc = g * lax.rsqrt(var + EPS)
            sh = b - mu * sc
            return (jnp.dot(sc, Tt, preferred_element_type=f32),              # folded (1, L)
                    jnp.dot(sh, Tt, preferred_element_type=f32))

        xf = x_ref[...]                                                       # (R, Lin)

        # ---- PreNorm BN0 + 1x1 expand (bf16 MXU, f32 accumulation) ----
        s0, t0 = bn_scale_shift(xf, tin_ref[...], tin_t_ref[...], g0_ref[...], b0_ref[...])
        h1 = jnp.dot((xf * s0 + t0).astype(bf16), w1_ref[...],
                     preferred_element_type=f32)                              # (R, Lh)

        # ---- BN1 + GELU ----
        s1, t1 = bn_scale_shift(h1, th_ref[...], th_t_ref[...], g1_ref[...], b1_ref[...])
        a1 = _gelu(h1 * s1 + t1)

        # ---- depthwise 3x3, stride 1, pad 1: lane/sublane rolls; left/right border masks are
        # pre-folded into the tap weights, top/bottom masks are per-row (R,1) multiplies ----
        h_i = lax.broadcasted_iota(jnp.int32, (R, 1), 0) % H
        m_top = (h_i > 0).astype(f32)            # a row above exists within this image
        m_bot = (h_i < H - 1).astype(f32)        # a row below exists within this image

        def dw_row(base, k0, acc):
            acc = acc + pltpu.roll(base, shift=Ch, axis=1) * wd_ref[k0:k0 + 1, :]        # (., w-1)
            acc = acc + base * wd_ref[k0 + 1:k0 + 2, :]                                  # (., w)
            return acc + pltpu.roll(base, shift=Lh - Ch, axis=1) * wd_ref[k0 + 2:k0 + 3, :]  # (., w+1)

        acc = a1 * wd_ref[4:5, :]                                # center tap initializes acc
        acc = acc + pltpu.roll(a1, shift=Ch, axis=1) * wd_ref[3:4, :]
        acc = acc + pltpu.roll(a1, shift=Lh - Ch, axis=1) * wd_ref[5:6, :]
        up = pltpu.roll(a1, shift=1, axis=0) * m_top             # value from (h-1, w)
        acc = dw_row(up, 0, acc)
        dn = pltpu.roll(a1, shift=R - 1, axis=0) * m_bot         # built late -> lower vreg peak
        acc = dw_row(dn, 6, acc)

        # ---- BN2 + GELU ----
        s2, t2 = bn_scale_shift(acc, th_ref[...], th_t_ref[...], g2_ref[...], b2_ref[...])
        a2 = _gelu(acc * s2 + t2)

        # ---- SE: pool, gate and row-broadcast entirely on the MXU (no sublane reshapes) ----
        pooled = jnp.dot(jnp.dot(sel_ref[...], a2, preferred_element_type=f32),
                         th_ref[...], preferred_element_type=f32) * inv_hw    # (B, Ch)
        z = jnp.maximum(jnp.dot(pooled, sew1_ref[...], preferred_element_type=f32), 0.0)
        gate = jax.nn.sigmoid(jnp.dot(z, sew2_ref[...], preferred_element_type=f32))   # (B, Ch)
        gate_f = jnp.dot(gate, th_t_ref[...], preferred_element_type=f32)     # (B, Lh)
        gate_rows = jnp.dot(sel_t_ref[...], gate_f, preferred_element_type=f32)  # (R, Lh)
        h2s = a2 * gate_rows

        # ---- 1x1 project (bf16 MXU) + BN3 + residual (lane-dense store) ----
        out = jnp.dot(h2s.astype(bf16), w2_ref[...], preferred_element_type=f32)  # (R, Lout)
        s3, t3 = bn_scale_shift(out, tout_ref[...], tout_t_ref[...], g3_ref[...], b3_ref[...])
        # re-read x here instead of keeping xf live through the depthwise stage
        o_ref[...] = x_ref[...] + out * s3 + t3

    args = (x_f, p["g0"], p["b0"], w1_big, p["g1"], p["b1"],
            wd_t, p["g2"], p["b2"], p["se_w1"], p["se_w2"],
            w2_big, p["g3"], p["b3"],
            t_in, t_in.T, t_hid, t_hid.T, t_out, t_out.T,
            sel, sel.T)

    out_f = pl.pallas_call(
        kernel,
        out_shape=jax.ShapeDtypeStruct((R, Lout), jnp.float32),
        in_specs=[pl.BlockSpec(memory_space=pltpu.MemorySpace.VMEM) for _ in args],
        out_specs=pl.BlockSpec(memory_space=pltpu.MemorySpace.VMEM),
        compiler_params=pltpu.CompilerParams(vmem_limit_bytes=32 * 1024 * 1024),
    )(*args)
    return out_f.reshape(B, H, W, Cout)


# ---------------- pure-JAX reference (sanity check only) ----------------
def mbconv_ref(x, p, matmul_dtype=None):
    B, H, W, Cin = x.shape

    def bn(t, g, b):
        mu = jnp.mean(t, axis=(0, 1, 2), keepdims=True)
        var = jnp.mean((t - mu) ** 2, axis=(0, 1, 2), keepdims=True)
        return (t - mu) * lax.rsqrt(var + EPS) * g.reshape(1, 1, 1, -1) + b.reshape(1, 1, 1, -1)

    def pw(t, w):
        if matmul_dtype is not None:   # mimic the kernel's bf16 MXU operands
            t, w = t.astype(matmul_dtype), w.astype(matmul_dtype)
        return jnp.einsum("bhwc,cd->bhwd", t, w, preferred_element_type=jnp.float32)

    xn = bn(x, p["g0"], p["b0"])
    h1 = _gelu(bn(pw(xn, p["w1"]), p["g1"], p["b1"]))
    hp = jnp.pad(h1, ((0, 0), (1, 1), (1, 1), (0, 0)))
    wd = p["wd"].reshape(3, 3, -1)
    acc = sum(hp[:, kh:kh + H, kw:kw + W, :] * wd[kh, kw]
              for kh in range(3) for kw in range(3))
    h2 = _gelu(bn(acc, p["g2"], p["b2"]))
    pooled = jnp.mean(h2, axis=(1, 2))
    se = jax.nn.sigmoid(jnp.maximum(pooled @ p["se_w1"], 0.0) @ p["se_w2"])
    h2s = h2 * se[:, None, None, :]
    out = bn(pw(h2s, p["w2"]), p["g3"], p["b3"])
    return x + out


def init_params(key, cin, cout, chid):
    cse = int(chid * 0.25)
    ks = jax.random.split(key, 16)

    def gb(kg, kb, c):
        return (jax.random.uniform(kg, (1, c), jnp.float32, 0.5, 1.5),
                jax.random.normal(kb, (1, c), jnp.float32) * 0.1)

    g0, b0 = gb(ks[0], ks[1], cin)
    g1, b1 = gb(ks[2], ks[3], chid)
    g2, b2 = gb(ks[4], ks[5], chid)
    g3, b3 = gb(ks[6], ks[7], cout)
    return dict(
        g0=g0, b0=b0, g1=g1, b1=b1, g2=g2, b2=b2, g3=g3, b3=b3,
        w1=jax.random.normal(ks[8], (cin, chid), jnp.float32) / np.sqrt(cin),
        wd=jax.random.normal(ks[9], (9, chid), jnp.float32) / 3.0,
        se_w1=jax.random.normal(ks[10], (chid, cse), jnp.float32) / np.sqrt(chid),
        se_w2=jax.random.normal(ks[11], (cse, chid), jnp.float32) / np.sqrt(cse),
        w2=jax.random.normal(ks[12], (chid, cout), jnp.float32) / np.sqrt(chid),
    )


if __name__ == "__main__":
    B, H, W = 2, 16, 16
    inp = oup = 8          # residual branch requires inp == oup (downsample=False)
    expansion = 4
    hidden = inp * expansion

    key = jax.random.PRNGKey(0)
    kx, kp = jax.random.split(key)
    x = jax.random.normal(kx, (B, H, W, inp), jnp.float32)   # NHWC (PyTorch NCHW: (2, 8, 16, 16))
    params = init_params(kp, inp, oup, hidden)

    out = jax.block_until_ready(mbconv_forward(x, params))

    # tight check vs a reference that applies the same bf16 rounding to the two MXU operands
    ref_bf16 = jax.block_until_ready(mbconv_ref(x, params, matmul_dtype=jnp.bfloat16))
    np.testing.assert_allclose(np.asarray(out), np.asarray(ref_bf16), rtol=2e-2, atol=2e-2)
    # full-f32 reference: looser tolerance absorbs the bf16 MXU operands (per perf review)
    ref_f32 = jax.block_until_ready(mbconv_ref(x, params))
    np.testing.assert_allclose(np.asarray(out), np.asarray(ref_f32), rtol=5e-2, atol=5e-2)

    print("KERNEL_OK")
</pallas_src>

<mosaic_0001>
module attributes {stable_mosaic.version = 11 : i64} {
  func.func @kernel(%arg0: memref<32x128xf32, #tpu.memory_space<vmem>>, %arg1: memref<1x8xf32, #tpu.memory_space<vmem>>, %arg2: memref<1x8xf32, #tpu.memory_space<vmem>>, %arg3: memref<128x512xbf16, #tpu.memory_space<vmem>>, %arg4: memref<1x32xf32, #tpu.memory_space<vmem>>, %arg5: memref<1x32xf32, #tpu.memory_space<vmem>>, %arg6: memref<9x512xf32, #tpu.memory_space<vmem>>, %arg7: memref<1x32xf32, #tpu.memory_space<vmem>>, %arg8: memref<1x32xf32, #tpu.memory_space<vmem>>, %arg9: memref<32x8xf32, #tpu.memory_space<vmem>>, %arg10: memref<8x32xf32, #tpu.memory_space<vmem>>, %arg11: memref<512x128xbf16, #tpu.memory_space<vmem>>, %arg12: memref<1x8xf32, #tpu.memory_space<vmem>>, %arg13: memref<1x8xf32, #tpu.memory_space<vmem>>, %arg14: memref<128x8xf32, #tpu.memory_space<vmem>>, %arg15: memref<8x128xf32, #tpu.memory_space<vmem>>, %arg16: memref<512x32xf32, #tpu.memory_space<vmem>>, %arg17: memref<32x512xf32, #tpu.memory_space<vmem>>, %arg18: memref<128x8xf32, #tpu.memory_space<vmem>>, %arg19: memref<8x128xf32, #tpu.memory_space<vmem>>, %arg20: memref<2x32xf32, #tpu.memory_space<vmem>>, %arg21: memref<32x2xf32, #tpu.memory_space<vmem>>, %arg22: memref<32x128xf32, #tpu.memory_space<vmem>>) attributes {dimension_semantics = [], scalar_prefetch = 0 : i64, scratch_operands = 0 : i64, tpu.core_type = #tpu.core_type<tc>} {
    %cst = arith.constant 1.000000e+00 : f32
    %0 = vector.broadcast %cst : f32 to vector<1x32xf32>
    %c0 = arith.constant 0 : index
    %c0_0 = arith.constant 0 : index
    %1 = vector.load %arg0[%c0, %c0_0] : memref<32x128xf32, #tpu.memory_space<vmem>>, vector<32x128xf32>
    %c0_1 = arith.constant 0 : index
    %c0_2 = arith.constant 0 : index
    %2 = vector.load %arg14[%c0_1, %c0_2] : memref<128x8xf32, #tpu.memory_space<vmem>>, vector<128x8xf32>
    %c0_3 = arith.constant 0 : index
    %c0_4 = arith.constant 0 : index
    %3 = vector.load %arg15[%c0_3, %c0_4] : memref<8x128xf32, #tpu.memory_space<vmem>>, vector<8x128xf32>
    %c0_5 = arith.constant 0 : index
    %c0_6 = arith.constant 0 : index
    %4 = vector.load %arg1[%c0_5, %c0_6] : memref<1x8xf32, #tpu.memory_space<vmem>>, vector<1x8xf32>
    %c0_7 = arith.constant 0 : index
    %c0_8 = arith.constant 0 : index
    %5 = vector.load %arg2[%c0_7, %c0_8] : memref<1x8xf32, #tpu.memory_space<vmem>>, vector<1x8xf32>
    %cst_9 = arith.constant dense<0.000000e+00> : vector<1x128xf32>
    %6 = tpu.matmul %0, %1, %cst_9 {dimension_numbers = #tpu.dot_dimension_numbers<[1], [0], [0], [1], [0, 0, 1, 1], [], []>} : vector<1x32xf32>, vector<32x128xf32>, vector<1x128xf32> -> vector<1x128xf32>
    %7 = arith.mulf %1, %1 : vector<32x128xf32>
    %cst_10 = arith.constant dense<0.000000e+00> : vector<1x128xf32>
    %8 = tpu.matmul %0, %7, %cst_10 {dimension_numbers = #tpu.dot_dimension_numbers<[1], [0], [0], [1], [0, 0, 1, 1], [], []>} : vector<1x32xf32>, vector<32x128xf32>, vector<1x128xf32> -> vector<1x128xf32>
    %cst_11 = arith.constant dense<0.000000e+00> : vector<1x8xf32>
    %9 = tpu.matmul %6, %2, %cst_11 {dimension_numbers = #tpu.dot_dimension_numbers<[1], [0], [0], [1], [0, 0, 1, 1], [], []>} : vector<1x128xf32>, vector<128x8xf32>, vector<1x8xf32> -> vector<1x8xf32>
    %cst_12 = arith.constant 0.001953125 : f32
    %10 = vector.broadcast %cst_12 : f32 to vector<1x8xf32>
    %11 = arith.mulf %9, %10 : vector<1x8xf32>
    %cst_13 = arith.constant dense<0.000000e+00> : vector<1x8xf32>
    %12 = tpu.matmul %8, %2, %cst_13 {dimension_numbers = #tpu.dot_dimension_numbers<[1], [0], [0], [1], [0, 0, 1, 1], [], []>} : vector<1x128xf32>, vector<128x8xf32>, vector<1x8xf32> -> vector<1x8xf32>
    %cst_14 = arith.constant 0.001953125 : f32
    %13 = vector.broadcast %cst_14 : f32 to vector<1x8xf32>
    %14 = arith.mulf %12, %13 : vector<1x8xf32>
    %15 = arith.mulf %11, %11 : vector<1x8xf32>
    %16 = arith.subf %14, %15 : vector<1x8xf32>
    %cst_15 = arith.constant 9.99999974E-6 : f32
    %17 = vector.broadcast %cst_15 : f32 to vector<1x8xf32>
    %18 = arith.addf %16, %17 : vector<1x8xf32>
    %19 = math.rsqrt %18 : vector<1x8xf32>
    %20 = arith.mulf %4, %19 : vector<1x8xf32>
    %21 = arith.mulf %11, %20 : vector<1x8xf32>
    %22 = arith.subf %5, %21 : vector<1x8xf32>
    %cst_16 = arith.constant dense<0.000000e+00> : vector<1x128xf32>
    %23 = tpu.matmul %20, %3, %cst_16 {dimension_numbers = #tpu.dot_dimension_numbers<[1], [0], [0], [1], [0, 0, 1, 1], [], []>} : vector<1x8xf32>, vector<8x128xf32>, vector<1x128xf32> -> vector<1x128xf32>
    %cst_17 = arith.constant dense<0.000000e+00> : vector<1x128xf32>
    %24 = tpu.matmul %22, %3, %cst_17 {dimension_numbers = #tpu.dot_dimension_numbers<[1], [0], [0], [1], [0, 0, 1, 1], [], []>} : vector<1x8xf32>, vector<8x128xf32>, vector<1x128xf32> -> vector<1x128xf32>
    %25 = vector.broadcast %23 : vector<1x128xf32> to vector<32x128xf32>
    %26 = arith.mulf %1, %25 : vector<32x128xf32>
    %27 = vector.broadcast %24 : vector<1x128xf32> to vector<32x128xf32>
    %28 = arith.addf %26, %27 : vector<32x128xf32>
    %29 = arith.truncf %28 : vector<32x128xf32> to vector<32x128xbf16>
    %c0_18 = arith.constant 0 : index
    %c0_19 = arith.constant 0 : index
    %30 = vector.load %arg3[%c0_18, %c0_19] : memref<128x512xbf16, #tpu.memory_space<vmem>>, vector<128x512xbf16>
    %cst_20 = arith.constant dense<0.000000e+00> : vector<32x512xf32>
    %31 = tpu.matmul %29, %30, %cst_20 {dimension_numbers = #tpu.dot_dimension_numbers<[1], [0], [0], [1], [0, 0, 1, 1], [], []>} : vector<32x128xbf16>, vector<128x512xbf16>, vector<32x512xf32> -> vector<32x512xf32>
    %c0_21 = arith.constant 0 : index
    %c0_22 = arith.constant 0 : index
    %32 = vector.load %arg16[%c0_21, %c0_22] : memref<512x32xf32, #tpu.memory_space<vmem>>, vector<512x32xf32>
    %c0_23 = arith.constant 0 : index
    %c0_24 = arith.constant 0 : index
    %33 = vector.load %arg17[%c0_23, %c0_24] : memref<32x512xf32, #tpu.memory_space<vmem>>, vector<32x512xf32>
    %c0_25 = arith.constant 0 : index
    %c0_26 = arith.constant 0 : index
    %34 = vector.load %arg4[%c0_25, %c0_26] : memref<1x32xf32, #tpu.memory_space<vmem>>, vector<1x32xf32>
    %c0_27 = arith.constant 0 : index
    %c0_28 = arith.constant 0 : index
    %35 = vector.load %arg5[%c0_27, %c0_28] : memref<1x32xf32, #tpu.memory_space<vmem>>, vector<1x32xf32>
    %cst_29 = arith.constant dense<0.000000e+00> : vector<1x512xf32>
    %36 = tpu.matmul %0, %31, %cst_29 {dimension_numbers = #tpu.dot_dimension_numbers<[1], [0], [0], [1], [0, 0, 1, 1], [], []>} : vector<1x32xf32>, vector<32x512xf32>, vector<1x512xf32> -> vector<1x512xf32>
    %37 = arith.mulf %31, %31 : vector<32x512xf32>
    %cst_30 = arith.constant dense<0.000000e+00> : vector<1x512xf32>
    %38 = tpu.matmul %0, %37, %cst_30 {dimension_numbers = #tpu.dot_dimension_numbers<[1], [0], [0], [1], [0, 0, 1, 1], [], []>} : vector<1x32xf32>, vector<32x512xf32>, vector<1x512xf32> -> vector<1x512xf32>
    %cst_31 = arith.constant dense<0.000000e+00> : vector<1x32xf32>
    %39 = tpu.matmul %36, %32, %cst_31 {dimension_numbers = #tpu.dot_dimension_numbers<[1], [0], [0], [1], [0, 0, 1, 1], [], []>} : vector<1x512xf32>, vector<512x32xf32>, vector<1x32xf32> -> vector<1x32xf32>
    %cst_32 = arith.constant 0.001953125 : f32
    %40 = vector.broadcast %cst_32 : f32 to vector<1x32xf32>
    %41 = arith.mulf %39, %40 : vector<1x32xf32>
    %cst_33 = arith.constant dense<0.000000e+00> : vector<1x32xf32>
    %42 = tpu.matmul %38, %32, %cst_33 {dimension_numbers = #tpu.dot_dimension_numbers<[1], [0], [0], [1], [0, 0, 1, 1], [], []>} : vector<1x512xf32>, vector<512x32xf32>, vector<1x32xf32> -> vector<1x32xf32>
    %cst_34 = arith.constant 0.001953125 : f32
    %43 = vector.broadcast %cst_34 : f32 to vector<1x32xf32>
    %44 = arith.mulf %42, %43 : vector<1x32xf32>
    %45 = arith.mulf %41, %41 : vector<1x32xf32>
    %46 = arith.subf %44, %45 : vector<1x32xf32>
    %cst_35 = arith.constant 9.99999974E-6 : f32
    %47 = vector.broadcast %cst_35 : f32 to vector<1x32xf32>
    %48 = arith.addf %46, %47 : vector<1x32xf32>
    %49 = math.rsqrt %48 : vector<1x32xf32>
    %50 = arith.mulf %34, %49 : vector<1x32xf32>
    %51 = arith.mulf %41, %50 : vector<1x32xf32>
    %52 = arith.subf %35, %51 : vector<1x32xf32>
    %cst_36 = arith.constant dense<0.000000e+00> : vector<1x512xf32>
    %53 = tpu.matmul %50, %33, %cst_36 {dimension_numbers = #tpu.dot_dimension_numbers<[1], [0], [0], [1], [0, 0, 1, 1], [], []>} : vector<1x32xf32>, vector<32x512xf32>, vector<1x512xf32> -> vector<1x512xf32>
    %cst_37 = arith.constant dense<0.000000e+00> : vector<1x512xf32>
    %54 = tpu.matmul %52, %33, %cst_37 {dimension_numbers = #tpu.dot_dimension_numbers<[1], [0], [0], [1], [0, 0, 1, 1], [], []>} : vector<1x32xf32>, vector<32x512xf32>, vector<1x512xf32> -> vector<1x512xf32>
    %55 = vector.broadcast %53 : vector<1x512xf32> to vector<32x512xf32>
    %56 = arith.mulf %31, %55 : vector<32x512xf32>
    %57 = vector.broadcast %54 : vector<1x512xf32> to vector<32x512xf32>
    %58 = arith.addf %56, %57 : vector<32x512xf32>
    %cst_38 = arith.constant 5.000000e-01 : f32
    %59 = vector.broadcast %cst_38 : f32 to vector<32x512xf32>
    %60 = arith.mulf %59, %58 : vector<32x512xf32>
    %cst_39 = arith.constant 0.707106769 : f32
    %61 = vector.broadcast %cst_39 : f32 to vector<32x512xf32>
    %62 = arith.mulf %58, %61 : vector<32x512xf32>
    %63 = math.erf %62 : vector<32x512xf32>
    %cst_40 = arith.constant 1.000000e+00 : f32
    %64 = vector.broadcast %cst_40 : f32 to vector<32x512xf32>
    %65 = arith.addf %64, %63 : vector<32x512xf32>
    %66 = arith.mulf %60, %65 : vector<32x512xf32>
    %67 = tpu.iota {dimensions = array<i32: 0>} : vector<32x1xi32>
    %c16_i32 = arith.constant 16 : i32
    %c0_i32 = arith.constant 0 : i32
    %68 = arith.cmpi eq, %c16_i32, %c0_i32 : i32
    %c1_i32 = arith.constant 1 : i32
    %69 = arith.select %68, %c1_i32, %c16_i32 : i32
    %70 = vector.broadcast %69 : i32 to vector<32x1xi32>
    %71 = arith.remsi %67, %70 : vector<32x1xi32>
    %c0_i32_41 = arith.constant 0 : i32
    %72 = vector.broadcast %c0_i32_41 : i32 to vector<32x1xi32>
    %73 = arith.cmpi ne, %71, %72 : vector<32x1xi32>
    %c0_i32_42 = arith.constant 0 : i32
    %74 = vector.broadcast %c0_i32_42 : i32 to vector<32x1xi32>
    %75 = arith.cmpi slt, %71, %74 : vector<32x1xi32>
    %c0_i32_43 = arith.constant 0 : i32
    %76 = arith.cmpi slt, %69, %c0_i32_43 : i32
    %77 = vector.broadcast %76 : i1 to vector<32x1xi1>
    %78 = vector.broadcast %77 : vector<32x1xi1> to vector<32x1xi1>
    %79 = arith.xori %75, %78 : vector<32x1xi1>
    %80 = arith.andi %79, %73 : vector<32x1xi1>
    %81 = vector.broadcast %69 : i32 to vector<32x1xi32>
    %82 = arith.addi %71, %81 : vector<32x1xi32>
    %83 = arith.select %80, %82, %71 : vector<32x1xi1>, vector<32x1xi32>
    %c0_i32_44 = arith.constant 0 : i32
    %84 = vector.broadcast %c0_i32_44 : i32 to vector<32x1xi32>
    %85 = arith.cmpi sgt, %83, %84 : vector<32x1xi32>
    %86 = arith.extui %85 : vector<32x1xi1> to vector<32x1xi32>
    %87 = arith.sitofp %86 : vector<32x1xi32> to vector<32x1xf32>
    %c15_i32 = arith.constant 15 : i32
    %88 = vector.broadcast %c15_i32 : i32 to vector<32x1xi32>
    %89 = arith.cmpi slt, %83, %88 : vector<32x1xi32>
    %90 = arith.extui %89 : vector<32x1xi1> to vector<32x1xi32>
    %91 = arith.sitofp %90 : vector<32x1xi32> to vector<32x1xf32>
    %c4 = arith.constant 4 : index
    %c0_45 = arith.constant 0 : index
    %92 = vector.load %arg6[%c4, %c0_45] : memref<9x512xf32, #tpu.memory_space<vmem>>, vector<1x512xf32>
    %93 = vector.broadcast %92 : vector<1x512xf32> to vector<32x512xf32>
    %94 = arith.mulf %66, %93 : vector<32x512xf32>
    %c32_i32 = arith.constant 32 : i32
    %95 = tpu.dynamic_rotate %66 by %c32_i32 dim 1 : vector<32x512xf32>, i32 -> vector<32x512xf32>
    %c3 = arith.constant 3 : index
    %c0_46 = arith.constant 0 : index
    %96 = vector.load %arg6[%c3, %c0_46] : memref<9x512xf32, #tpu.memory_space<vmem>>, vector<1x512xf32>
    %97 = vector.broadcast %96 : vector<1x512xf32> to vector<32x512xf32>
    %98 = arith.mulf %95, %97 : vector<32x512xf32>
    %99 = arith.addf %94, %98 : vector<32x512xf32>
    %c480_i32 = arith.constant 480 : i32
    %100 = tpu.dynamic_rotate %66 by %c480_i32 dim 1 : vector<32x512xf32>, i32 -> vector<32x512xf32>
    %c5 = arith.constant 5 : index
    %c0_47 = arith.constant 0 : index
    %101 = vector.load %arg6[%c5, %c0_47] : memref<9x512xf32, #tpu.memory_space<vmem>>, vector<1x512xf32>
    %102 = vector.broadcast %101 : vector<1x512xf32> to vector<32x512xf32>
    %103 = arith.mulf %100, %102 : vector<32x512xf32>
    %104 = arith.addf %99, %103 : vector<32x512xf32>
    %c1_i32_48 = arith.constant 1 : i32
    %105 = tpu.dynamic_rotate %66 by %c1_i32_48 dim 0 : vector<32x512xf32>, i32 -> vector<32x512xf32>
    %106 = vector.broadcast %87 : vector<32x1xf32> to vector<32x512xf32>
    %107 = arith.mulf %105, %106 : vector<32x512xf32>
    %c32_i32_49 = arith.constant 32 : i32
    %108 = tpu.dynamic_rotate %107 by %c32_i32_49 dim 1 : vector<32x512xf32>, i32 -> vector<32x512xf32>
    %c0_50 = arith.constant 0 : index
    %c0_51 = arith.constant 0 : index
    %109 = vector.load %arg6[%c0_50, %c0_51] : memref<9x512xf32, #tpu.memory_space<vmem>>, vector<1x512xf32>
    %110 = vector.broadcast %109 : vector<1x512xf32> to vector<32x512xf32>
    %111 = arith.mulf %108, %110 : vector<32x512xf32>
    %112 = arith.addf %104, %111 : vector<32x512xf32>
    %c1 = arith.constant 1 : index
    %c0_52 = arith.constant 0 : index
    %113 = vector.load %arg6[%c1, %c0_52] : memref<9x512xf32, #tpu.memory_space<vmem>>, vector<1x512xf32>
    %114 = vector.broadcast %113 : vector<1x512xf32> to vector<32x512xf32>
    %115 = arith.mulf %107, %114 : vector<32x512xf32>
    %116 = arith.addf %112, %115 : vector<32x512xf32>
    %c480_i32_53 = arith.constant 480 : i32
    %117 = tpu.dynamic_rotate %107 by %c480_i32_53 dim 1 : vector<32x512xf32>, i32 -> vector<32x512xf32>
    %c2 = arith.constant 2 : index
    %c0_54 = arith.constant 0 : index
    %118 = vector.load %arg6[%c2, %c0_54] : memref<9x512xf32, #tpu.memory_space<vmem>>, vector<1x512xf32>
    %119 = vector.broadcast %118 : vector<1x512xf32> to vector<32x512xf32>
    %120 = arith.mulf %117, %119 : vector<32x512xf32>
    %121 = arith.addf %116, %120 : vector<32x512xf32>
    %c31_i32 = arith.constant 31 : i32
    %122 = tpu.dynamic_rotate %66 by %c31_i32 dim 0 : vector<32x512xf32>, i32 -> vector<32x512xf32>
    %123 = vector.broadcast %91 : vector<32x1xf32> to vector<32x512xf32>
    %124 = arith.mulf %122, %123 : vector<32x512xf32>
    %c32_i32_55 = arith.constant 32 : i32
    %125 = tpu.dynamic_rotate %124 by %c32_i32_55 dim 1 : vector<32x512xf32>, i32 -> vector<32x512xf32>
    %c6 = arith.constant 6 : index
    %c0_56 = arith.constant 0 : index
    %126 = vector.load %arg6[%c6, %c0_56] : memref<9x512xf32, #tpu.memory_space<vmem>>, vector<1x512xf32>
    %127 = vector.broadcast %126 : vector<1x512xf32> to vector<32x512xf32>
    %128 = arith.mulf %125, %127 : vector<32x512xf32>
    %129 = arith.addf %121, %128 : vector<32x512xf32>
    %c7 = arith.constant 7 : index
    %c0_57 = arith.constant 0 : index
    %130 = vector.load %arg6[%c7, %c0_57] : memref<9x512xf32, #tpu.memory_space<vmem>>, vector<1x512xf32>
    %131 = vector.broadcast %130 : vector<1x512xf32> to vector<32x512xf32>
    %132 = arith.mulf %124, %131 : vector<32x512xf32>
    %133 = arith.addf %129, %132 : vector<32x512xf32>
    %c480_i32_58 = arith.constant 480 : i32
    %134 = tpu.dynamic_rotate %124 by %c480_i32_58 dim 1 : vector<32x512xf32>, i32 -> vector<32x512xf32>
    %c8 = arith.constant 8 : index
    %c0_59 = arith.constant 0 : index
    %135 = vector.load %arg6[%c8, %c0_59] : memref<9x512xf32, #tpu.memory_space<vmem>>, vector<1x512xf32>
    %136 = vector.broadcast %135 : vector<1x512xf32> to vector<32x512xf32>
    %137 = arith.mulf %134, %136 : vector<32x512xf32>
    %138 = arith.addf %133, %137 : vector<32x512xf32>
    %c0_60 = arith.constant 0 : index
    %c0_61 = arith.constant 0 : index
    %139 = vector.load %arg16[%c0_60, %c0_61] : memref<512x32xf32, #tpu.memory_space<vmem>>, vector<512x32xf32>
    %c0_62 = arith.constant 0 : index
    %c0_63 = arith.constant 0 : index
    %140 = vector.load %arg17[%c0_62, %c0_63] : memref<32x512xf32, #tpu.memory_space<vmem>>, vector<32x512xf32>
    %c0_64 = arith.constant 0 : index
    %c0_65 = arith.constant 0 : index
    %141 = vector.load %arg7[%c0_64, %c0_65] : memref<1x32xf32, #tpu.memory_space<vmem>>, vector<1x32xf32>
    %c0_66 = arith.constant 0 : index
    %c0_67 = arith.constant 0 : index
    %142 = vector.load %arg8[%c0_66, %c0_67] : memref<1x32xf32, #tpu.memory_space<vmem>>, vector<1x32xf32>
    %cst_68 = arith.constant dense<0.000000e+00> : vector<1x512xf32>
    %143 = tpu.matmul %0, %138, %cst_68 {dimension_numbers = #tpu.dot_dimension_numbers<[1], [0], [0], [1], [0, 0, 1, 1], [], []>} : vector<1x32xf32>, vector<32x512xf32>, vector<1x512xf32> -> vector<1x512xf32>
    %144 = arith.mulf %138, %138 : vector<32x512xf32>
    %cst_69 = arith.constant dense<0.000000e+00> : vector<1x512xf32>
    %145 = tpu.matmul %0, %144, %cst_69 {dimension_numbers = #tpu.dot_dimension_numbers<[1], [0], [0], [1], [0, 0, 1, 1], [], []>} : vector<1x32xf32>, vector<32x512xf32>, vector<1x512xf32> -> vector<1x512xf32>
    %cst_70 = arith.constant dense<0.000000e+00> : vector<1x32xf32>
    %146 = tpu.matmul %143, %139, %cst_70 {dimension_numbers = #tpu.dot_dimension_numbers<[1], [0], [0], [1], [0, 0, 1, 1], [], []>} : vector<1x512xf32>, vector<512x32xf32>, vector<1x32xf32> -> vector<1x32xf32>
    %cst_71 = arith.constant 0.001953125 : f32
    %147 = vector.broadcast %cst_71 : f32 to vector<1x32xf32>
    %148 = arith.mulf %146, %147 : vector<1x32xf32>
    %cst_72 = arith.constant dense<0.000000e+00> : vector<1x32xf32>
    %149 = tpu.matmul %145, %139, %cst_72 {dimension_numbers = #tpu.dot_dimension_numbers<[1], [0], [0], [1], [0, 0, 1, 1], [], []>} : vector<1x512xf32>, vector<512x32xf32>, vector<1x32xf32> -> vector<1x32xf32>
    %cst_73 = arith.constant 0.001953125 : f32
    %150 = vector.broadcast %cst_73 : f32 to vector<1x32xf32>
    %151 = arith.mulf %149, %150 : vector<1x32xf32>
    %152 = arith.mulf %148, %148 : vector<1x32xf32>
    %153 = arith.subf %151, %152 : vector<1x32xf32>
    %cst_74 = arith.constant 9.99999974E-6 : f32
    %154 = vector.broadcast %cst_74 : f32 to vector<1x32xf32>
    %155 = arith.addf %153, %154 : vector<1x32xf32>
    %156 = math.rsqrt %155 : vector<1x32xf32>
    %157 = arith.mulf %141, %156 : vector<1x32xf32>
    %158 = arith.mulf %148, %157 : vector<1x32xf32>
    %159 = arith.subf %142, %158 : vector<1x32xf32>
    %cst_75 = arith.constant dense<0.000000e+00> : vector<1x512xf32>
    %160 = tpu.matmul %157, %140, %cst_75 {dimension_numbers = #tpu.dot_dimension_numbers<[1], [0], [0], [1], [0, 0, 1, 1], [], []>} : vector<1x32xf32>, vector<32x512xf32>, vector<1x512xf32> -> vector<1x512xf32>
    %cst_76 = arith.constant dense<0.000000e+00> : vector<1x512xf32>
    %161 = tpu.matmul %159, %140, %cst_76 {dimension_numbers = #tpu.dot_dimension_numbers<[1], [0], [0], [1], [0, 0, 1, 1], [], []>} : vector<1x32xf32>, vector<32x512xf32>, vector<1x512xf32> -> vector<1x512xf32>
    %162 = vector.broadcast %160 : vector<1x512xf32> to vector<32x512xf32>
    %163 = arith.mulf %138, %162 : vector<32x512xf32>
    %164 = vector.broadcast %161 : vector<1x512xf32> to vector<32x512xf32>
    %165 = arith.addf %163, %164 : vector<32x512xf32>
    %cst_77 = arith.constant 5.000000e-01 : f32
    %166 = vector.broadcast %cst_77 : f32 to vector<32x512xf32>
    %167 = arith.mulf %166, %165 : vector<32x512xf32>
    %cst_78 = arith.constant 0.707106769 : f32
    %168 = vector.broadcast %cst_78 : f32 to vector<32x512xf32>
    %169 = arith.mulf %165, %168 : vector<32x512xf32>
    %170 = math.erf %169 : vector<32x512xf32>
    %cst_79 = arith.constant 1.000000e+00 : f32
    %171 = vector.broadcast %cst_79 : f32 to vector<32x512xf32>
    %172 = arith.addf %171, %170 : vector<32x512xf32>
    %173 = arith.mulf %167, %172 : vector<32x512xf32>
    %c0_80 = arith.constant 0 : index
    %c0_81 = arith.constant 0 : index
    %174 = vector.load %arg20[%c0_80, %c0_81] : memref<2x32xf32, #tpu.memory_space<vmem>>, vector<2x32xf32>
    %cst_82 = arith.constant dense<0.000000e+00> : vector<2x512xf32>
    %175 = tpu.matmul %174, %173, %cst_82 {dimension_numbers = #tpu.dot_dimension_numbers<[1], [0], [0], [1], [0, 0, 1, 1], [], []>} : vector<2x32xf32>, vector<32x512xf32>, vector<2x512xf32> -> vector<2x512xf32>
    %c0_83 = arith.constant 0 : index
    %c0_84 = arith.constant 0 : index
    %176 = vector.load %arg16[%c0_83, %c0_84] : memref<512x32xf32, #tpu.memory_space<vmem>>, vector<512x32xf32>
    %cst_85 = arith.constant dense<0.000000e+00> : vector<2x32xf32>
    %177 = tpu.matmul %175, %176, %cst_85 {dimension_numbers = #tpu.dot_dimension_numbers<[1], [0], [0], [1], [0, 0, 1, 1], [], []>} : vector<2x512xf32>, vector<512x32xf32>, vector<2x32xf32> -> vector<2x32xf32>
    %cst_86 = arith.constant 3.906250e-03 : f32
    %178 = vector.broadcast %cst_86 : f32 to vector<2x32xf32>
    %179 = arith.mulf %177, %178 : vector<2x32xf32>
    %c0_87 = arith.constant 0 : index
    %c0_88 = arith.constant 0 : index
    %180 = vector.load %arg9[%c0_87, %c0_88] : memref<32x8xf32, #tpu.memory_space<vmem>>, vector<32x8xf32>
    %cst_89 = arith.constant dense<0.000000e+00> : vector<2x8xf32>
    %181 = tpu.matmul %179, %180, %cst_89 {dimension_numbers = #tpu.dot_dimension_numbers<[1], [0], [0], [1], [0, 0, 1, 1], [], []>} : vector<2x32xf32>, vector<32x8xf32>, vector<2x8xf32> -> vector<2x8xf32>
    %cst_90 = arith.constant 0.000000e+00 : f32
    %182 = vector.broadcast %cst_90 : f32 to vector<2x8xf32>
    %183 = arith.maximumf %181, %182 : vector<2x8xf32>
    %c0_91 = arith.constant 0 : index
    %c0_92 = arith.constant 0 : index
    %184 = vector.load %arg10[%c0_91, %c0_92] : memref<8x32xf32, #tpu.memory_space<vmem>>, vector<8x32xf32>
    %cst_93 = arith.constant dense<0.000000e+00> : vector<2x32xf32>
    %185 = tpu.matmul %183, %184, %cst_93 {dimension_numbers = #tpu.dot_dimension_numbers<[1], [0], [0], [1], [0, 0, 1, 1], [], []>} : vector<2x8xf32>, vector<8x32xf32>, vector<2x32xf32> -> vector<2x32xf32>
    %186 = arith.negf %185 : vector<2x32xf32>
    %187 = math.exp %186 : vector<2x32xf32>
    %cst_94 = arith.constant 1.000000e+00 : f32
    %188 = vector.broadcast %cst_94 : f32 to vector<2x32xf32>
    %189 = arith.addf %188, %187 : vector<2x32xf32>
    %190 = arith.divf %188, %189 : vector<2x32xf32>
    %c0_95 = arith.constant 0 : index
    %c0_96 = arith.constant 0 : index
    %191 = vector.load %arg17[%c0_95, %c0_96] : memref<32x512xf32, #tpu.memory_space<vmem>>, vector<32x512xf32>
    %cst_97 = arith.constant dense<0.000000e+00> : vector<2x512xf32>
    %192 = tpu.matmul %190, %191, %cst_97 {dimension_numbers = #tpu.dot_dimension_numbers<[1], [0], [0], [1], [0, 0, 1, 1], [], []>} : vector<2x32xf32>, vector<32x512xf32>, vector<2x512xf32> -> vector<2x512xf32>
    %c0_98 = arith.constant 0 : index
    %c0_99 = arith.constant 0 : index
    %193 = vector.load %arg21[%c0_98, %c0_99] : memref<32x2xf32, #tpu.memory_space<vmem>>, vector<32x2xf32>
    %cst_100 = arith.constant dense<0.000000e+00> : vector<32x512xf32>
    %194 = tpu.matmul %193, %192, %cst_100 {dimension_numbers = #tpu.dot_dimension_numbers<[1], [0], [0], [1], [0, 0, 1, 1], [], []>} : vector<32x2xf32>, vector<2x512xf32>, vector<32x512xf32> -> vector<32x512xf32>
    %195 = arith.mulf %173, %194 : vector<32x512xf32>
    %196 = arith.truncf %195 : vector<32x512xf32> to vector<32x512xbf16>
    %c0_101 = arith.constant 0 : index
    %c0_102 = arith.constant 0 : index
    %197 = vector.load %arg11[%c0_101, %c0_102] : memref<512x128xbf16, #tpu.memory_space<vmem>>, vector<512x128xbf16>
    %cst_103 = arith.constant dense<0.000000e+00> : vector<32x128xf32>
    %198 = tpu.matmul %196, %197, %cst_103 {dimension_numbers = #tpu.dot_dimension_numbers<[1], [0], [0], [1], [0, 0, 1, 1], [], []>} : vector<32x512xbf16>, vector<512x128xbf16>, vector<32x128xf32> -> vector<32x128xf32>
    %c0_104 = arith.constant 0 : index
    %c0_105 = arith.constant 0 : index
    %199 = vector.load %arg18[%c0_104, %c0_105] : memref<128x8xf32, #tpu.memory_space<vmem>>, vector<128x8xf32>
    %c0_106 = arith.constant 0 : index
    %c0_107 = arith.constant 0 : index
    %200 = vector.load %arg19[%c0_106, %c0_107] : memref<8x128xf32, #tpu.memory_space<vmem>>, vector<8x128xf32>
    %c0_108 = arith.constant 0 : index
    %c0_109 = arith.constant 0 : index
    %201 = vector.load %arg12[%c0_108, %c0_109] : memref<1x8xf32, #tpu.memory_space<vmem>>, vector<1x8xf32>
    %c0_110 = arith.constant 0 : index
    %c0_111 = arith.constant 0 : index
    %202 = vector.load %arg13[%c0_110, %c0_111] : memref<1x8xf32, #tpu.memory_space<vmem>>, vector<1x8xf32>
    %cst_112 = arith.constant dense<0.000000e+00> : vector<1x128xf32>
    %203 = tpu.matmul %0, %198, %cst_112 {dimension_numbers = #tpu.dot_dimension_numbers<[1], [0], [0], [1], [0, 0, 1, 1], [], []>} : vector<1x32xf32>, vector<32x128xf32>, vector<1x128xf32> -> vector<1x128xf32>
    %204 = arith.mulf %198, %198 : vector<32x128xf32>
    %cst_113 = arith.constant dense<0.000000e+00> : vector<1x128xf32>
    %205 = tpu.matmul %0, %204, %cst_113 {dimension_numbers = #tpu.dot_dimension_numbers<[1], [0], [0], [1], [0, 0, 1, 1], [], []>} : vector<1x32xf32>, vector<32x128xf32>, vector<1x128xf32> -> vector<1x128xf32>
    %cst_114 = arith.constant dense<0.000000e+00> : vector<1x8xf32>
    %206 = tpu.matmul %203, %199, %cst_114 {dimension_numbers = #tpu.dot_dimension_numbers<[1], [0], [0], [1], [0, 0, 1, 1], [], []>} : vector<1x128xf32>, vector<128x8xf32>, vector<1x8xf32> -> vector<1x8xf32>
    %cst_115 = arith.constant 0.001953125 : f32
    %207 = vector.broadcast %cst_115 : f32 to vector<1x8xf32>
    %208 = arith.mulf %206, %207 : vector<1x8xf32>
    %cst_116 = arith.constant dense<0.000000e+00> : vector<1x8xf32>
    %209 = tpu.matmul %205, %199, %cst_116 {dimension_numbers = #tpu.dot_dimension_numbers<[1], [0], [0], [1], [0, 0, 1, 1], [], []>} : vector<1x128xf32>, vector<128x8xf32>, vector<1x8xf32> -> vector<1x8xf32>
    %cst_117 = arith.constant 0.001953125 : f32
    %210 = vector.broadcast %cst_117 : f32 to vector<1x8xf32>
    %211 = arith.mulf %209, %210 : vector<1x8xf32>
    %212 = arith.mulf %208, %208 : vector<1x8xf32>
    %213 = arith.subf %211, %212 : vector<1x8xf32>
    %cst_118 = arith.constant 9.99999974E-6 : f32
    %214 = vector.broadcast %cst_118 : f32 to vector<1x8xf32>
    %215 = arith.addf %213, %214 : vector<1x8xf32>
    %216 = math.rsqrt %215 : vector<1x8xf32>
    %217 = arith.mulf %201, %216 : vector<1x8xf32>
    %218 = arith.mulf %208, %217 : vector<1x8xf32>
    %219 = arith.subf %202, %218 : vector<1x8xf32>
    %cst_119 = arith.constant dense<0.000000e+00> : vector<1x128xf32>
    %220 = tpu.matmul %217, %200, %cst_119 {dimension_numbers = #tpu.dot_dimension_numbers<[1], [0], [0], [1], [0, 0, 1, 1], [], []>} : vector<1x8xf32>, vector<8x128xf32>, vector<1x128xf32> -> vector<1x128xf32>
    %cst_120 = arith.constant dense<0.000000e+00> : vector<1x128xf32>
    %221 = tpu.matmul %219, %200, %cst_120 {dimension_numbers = #tpu.dot_dimension_numbers<[1], [0], [0], [1], [0, 0, 1, 1], [], []>} : vector<1x8xf32>, vector<8x128xf32>, vector<1x128xf32> -> vector<1x128xf32>
    %c0_121 = arith.constant 0 : index
    %c0_122 = arith.constant 0 : index
    %222 = vector.load %arg0[%c0_121, %c0_122] : memref<32x128xf32, #tpu.memory_space<vmem>>, vector<32x128xf32>
    %223 = vector.broadcast %220 : vector<1x128xf32> to vector<32x128xf32>
    %224 = arith.mulf %198, %223 : vector<32x128xf32>
    %225 = arith.addf %222, %224 : vector<32x128xf32>
    %226 = vector.broadcast %221 : vector<1x128xf32> to vector<32x128xf32>
    %227 = arith.addf %225, %226 : vector<32x128xf32>
    %c0_123 = arith.constant 0 : index
    %c0_124 = arith.constant 0 : index
    %228 = vector.load %arg22[%c0_123, %c0_124] : memref<32x128xf32, #tpu.memory_space<vmem>>, vector<32x128xf32>
    tpu.vector_store %arg22[%c0_123, %c0_124], %227 {strides = array<i32>} : memref<32x128xf32, #tpu.memory_space<vmem>>, vector<32x128xf32>,
    return
  }
}

</mosaic_0001>

<bundles_post_ra>
// kernel: tpu_custom_call.1
= control target key start
LH: loop header
LB: loop body
LE: loop exit
PB: predicated region body
PF: predicated region fallthrough
CT: control target
= control target key end

     0   :  { %s10909_s0 = inlined_call_operand.vmem [shape: f32[32,128], index: 0, kind: input, shape index: {}]   ;;  %s10910_s1 = inlined_call_operand.vmem [shape: f32[1,8], index: 1, kind: input, shape index: {}]   ;;  %s10911_s2 = inlined_call_operand.vmem [shape: f32[1,8], index: 2, kind: input, shape index: {}]   ;;  %s10912_s3 = inlined_call_operand.vmem [shape: bf16[128,512], index: 3, kind: input, shape index: {}]   ;;  %s10913_s4 = inlined_call_operand.vmem [shape: f32[1,32], index: 4, kind: input, shape index: {}]   ;;  %s10914_s5 = inlined_call_operand.vmem [shape: f32[1,32], index: 5, kind: input, shape index: {}]   ;;  %s10915_s6 = inlined_call_operand.vmem [shape: f32[9,512], index: 6, kind: input, shape index: {}]   ;;  %s10916_s7 = inlined_call_operand.vmem [shape: f32[1,32], index: 7, kind: input, shape index: {}]   ;;  %s10917_s8 = inlined_call_operand.vmem [shape: f32[1,32], index: 8, kind: input, shape index: {}]   ;;  %s10918_s9 = inlined_call_operand.vmem [shape: f32[32,8], index: 9, kind: input, shape index: {}]   ;;  %s10919_s10 = inlined_call_operand.vmem [shape: f32[8,32], index: 10, kind: input, shape index: {}]   ;;  %s10920_s11 = inlined_call_operand.vmem [shape: bf16[512,128], index: 11, kind: input, shape index: {}]   ;;  %s10921_s12 = inlined_call_operand.vmem [shape: f32[1,8], index: 12, kind: input, shape index: {}]   ;;  %s10922_s13 = inlined_call_operand.vmem [shape: f32[1,8], index: 13, kind: input, shape index: {}]   ;;  %s10923_s14 = inlined_call_operand.vmem [shape: f32[128,8], index: 14, kind: input, shape index: {}]   ;;  %s10924_s15 = inlined_call_operand.vmem [shape: f32[8,128], index: 15, kind: input, shape index: {}]   ;;  %s10925_s16 = inlined_call_operand.vmem [shape: f32[512,32], index: 16, kind: input, shape index: {}]   ;;  %s10926_s17 = inlined_call_operand.vmem [shape: f32[32,512], index: 17, kind: input, shape index: {}]   ;;  %s10927_s18 = inlined_call_operand.vmem [shape: f32[128,8], index: 18, kind: input, shape index: {}]   ;;  %s10928_s19 = inlined_call_operand.vmem [shape: f32[8,128], index: 19, kind: input, shape index: {}]   ;;  %s10929_s20 = inlined_call_operand.vmem [shape: f32[2,32], index: 20, kind: input, shape index: {}]   ;;  %s10930_s21 = inlined_call_operand.vmem [shape: f32[32,2], index: 21, kind: input, shape index: {}]   ;;  %s10931_s22 = inlined_call_operand.hbm [shape: f32[32,128], index: 22, kind: output, shape index: {}]  }
   0x1   :  { %11054 = sst [smem:[#allocation67_spill]] %s10909_s0 }
   0x2   :  { %11055 = sst [smem:[#allocation68_spill]] %s10910_s1 }
   0x3   :  { %11056 = sst [smem:[#allocation69_spill]] %s10911_s2 }
   0x4   :  { %11057 = sst [smem:[#allocation70_spill]] %s10912_s3 }
   0x5   :  { %11058 = sst [smem:[#allocation71_spill]] %s10913_s4 }
   0x6   :  { %11059 = sst [smem:[#allocation72_spill]] %s10914_s5 }
   0x7   :  { %11060 = sst [smem:[#allocation73_spill]] %s10915_s6 }
   0x8   :  { %s11061_s29 = sld [smem:[#allocation67_spill]]  ;;  %v91_v5 = vld [vmem:[%s10923_s14 + $0x78] sm:$0xff]  ;;  %v90_v6 = vld [vmem:[%s10923_s14 + $0x70] sm:$0xff]  ;;  %v89_v9 = vld [vmem:[%s10923_s14 + $0x68] sm:$0xff]  ;;  %vm95_vm0 = vcmask 261120  }
   0x9   :  { %143 = vmatpush.msra.mxu2 %v91_v5  ;;  %164 = vmatpush.msra.mxu3 %v91_v5  ;;  %v88_v11 = vld [vmem:[%s10923_s14 + $0x60] sm:$0xff] }
   0xb   :  { %144 = vmatpush.msra.mxu2 %v90_v6  ;;  %165 = vmatpush.msra.mxu3 %v90_v6 }
   0xd   :  { %145 = vmatpush.msra.mxu2 %v89_v9  ;;  %166 = vmatpush.msra.mxu3 %v89_v9 }
   0xe   :  { %v5834_v0 = vld [vmem:[%s11061_s29 + $0x18] sm:$0xff]  ;;  %v5839_v1 = vld [vmem:[%s11061_s29 + $0x10] sm:$0xff]  ;;  %v5844_v2 = vld [vmem:[%s11061_s29 + $0x8] sm:$0xff] }
   0xf   :  { %111 = vmatpush.msra.mxu0 %v5834_v0  ;;  %v122_v3 = vmul.f32 %v5834_v0, %v5834_v0  ;;  %v121_v4 = vmul.f32 %v5839_v1, %v5839_v1  ;;  %v5860_v7 = vld [vmem:[%s11061_s29] sm:$0xff]  ;;  %v120_v8 = vmul.f32 %v5844_v2, %v5844_v2 }
  0x10   :  { %v119_v10 = vmul.f32 %v5860_v7, %v5860_v7 }
  0x11   :  { %112 = vmatpush.msra.mxu0 %v5839_v1  ;;  %135 = vmatpush.msra.mxu1 %v122_v3 }
  0x13   :  { %113 = vmatpush.msra.mxu0 %v5844_v2  ;;  %136 = vmatpush.msra.mxu1 %v121_v4 }
  0x14   :  { %27 = vsyncpa [#allocation3], 0  ;;  %v87_v12 = vld [vmem:[%s10923_s14 + $0x58] sm:$0xff]  ;;  %v10935_v13 = vmov 1.0   ;;  %146 = vmatpush.msra.mxu2 %v88_v11  ;;  %167 = vmatpush.msra.mxu3 %v88_v11  ;;  %v86_v14 = vld [vmem:[%s10923_s14 + $0x50] sm:$0xff]  ;;  %s11062_s30 = sld [smem:[#allocation70_spill]] }
  0x15   :  { %114 = vmatpush.msra.mxu0 %v5860_v7  ;;  %137 = vmatpush.msra.mxu1 %v120_v8  ;;  %v85_v15 = vld [vmem:[%s10923_s14 + $0x48] sm:$0xff]  ;;  %v84_v16 = vld [vmem:[%s10923_s14 + $0x40] sm:$0xff]  ;;  %v83_v17 = vld [vmem:[%s10923_s14 + $0x38] sm:$0xff]  ;;  %s11063_s1 = sld [smem:[#allocation68_spill]]  ;;  %vm201_vm4 = vcmask 64512   ;;  %s5710_s0 = smov 96  }
  0x16   :  { %5001 = vmatmul.msk.f32.vlgmr.msra.gmra.mxu0 %vm95_vm0, %v10935_v13  ;;  %147 = vmatpush.msra.mxu2 %v87_v12  ;;  %v82_v18 = vld [vmem:[%s10923_s14 + $0x30] sm:$0xff]  ;;  %v81_v19 = vld [vmem:[%s10923_s14 + $0x28] sm:$0xff]  ;;  %v80_v20 = vld [vmem:[%s10923_s14 + $0x20] sm:$0xff]  ;;  %s11064_s6 = sld [smem:[#allocation69_spill]]  ;;  %s5711_s23 = smov 32  }
  0x17   :  { %138 = vmatpush.msra.mxu1 %v119_v10  ;;  %168 = vmatpush.msra.mxu3 %v87_v12  ;;  %v79_v21 = vld [vmem:[%s10923_s14 + $0x18] sm:$0xff]  ;;  %v78_v22 = vld [vmem:[%s10923_s14 + $0x10] sm:$0xff]  ;;  %v77_v23 = vld [vmem:[%s10923_s14 + $0x8] sm:$0xff]  ;;  %s11081_s3 = sld [smem:[#allocation71_spill]]  ;;  %s4989_s25 = sshll.u32 %s10931_s22, 4  ;;  %s4990_s25 = int_to_ptr.hbm [resolvable:$true] %s4989_s25 }
  0x18   :  { %5002 = vmatmul.msk.f32.vlgmr.msra.gmra.mxu1 %vm95_vm0, %v10935_v13  ;;  %148 = vmatpush.msra.mxu2 %v86_v14  ;;  %v76_v24 = vld [vmem:[%s10923_s14] sm:$0xff]  ;;  %s11082_s4 = sld [smem:[#allocation72_spill]]  ;;  %s5714_s26 = smov 128  }
  0x19   :  { %169 = vmatpush.msra.mxu3 %v86_v14  ;;  %v92_v27 = vld [vmem:[%s10924_s15] sm:$0xff]  ;;  %s11203_s5 = sld [smem:[#allocation73_spill]] }
  0x1a   :  { %149 = vmatpush.msra.mxu2 %v85_v15  ;;  %220 = vmatpush.msrb.mxu0 %v92_v27  ;;  %v5119_v30 = vld [vmem:[%s11062_s30 + $0xe0] sm:$0xf]  ;;  %v5402_v31 = vld [vmem:[%s11062_s30 + $0xec] sm:$0xf0]  ;;  %v5400_v34 = vld [vmem:[%s11062_s30 + $0xe4] sm:$0xf] }
  0x1b   :  { %170 = vmatpush.msra.mxu3 %v85_v15  ;;  %243 = vmatpush.msrb.mxu1 %v92_v27  ;;  %v5120_v33 = vor.u32 %v5402_v31, %v5119_v30  ;;  %v5121_v35 = vld [vmem:[%s11062_s30 + $0xf0] sm:$0xf0]  ;;  %v5127_v36 = vld [vmem:[%s11062_s30 + $0xe8] sm:$0xf]  ;;  %v5403_v40 = vld [vmem:[%s11062_s30 + $0xf4] sm:$0xf0] }
  0x1c   :  { %150 = vmatpush.msra.mxu2 %v84_v16  ;;  %v5124_v39 = vor.u32 %v5400_v34, %v5121_v35  ;;  %v5401_v41 = vld [vmem:[%s11062_s30 + $0xec] sm:$0xf]  ;;  %v5128_v42 = vor.u32 %v5403_v40, %v5127_v36  ;;  %v5129_v43 = vld [vmem:[%s11062_s30 + $0xf8] sm:$0xf0]  ;;  %v5103_v44 = vld [vmem:[%s11062_s30 + $0xc0] sm:$0xf] }
  0x1d   :  { %171 = vmatpush.msra.mxu3 %v84_v16  ;;  %452 = vmatpush.bf16.msra.mxu0 %v5120_v33  ;;  %v5398_v45 = vld [vmem:[%s11062_s30 + $0xcc] sm:$0xf0]  ;;  %v5132_v47 = vor.u32 %v5401_v41, %v5129_v43  ;;  %v5396_v49 = vld [vmem:[%s11062_s30 + $0xc4] sm:$0xf]  ;;  %v5105_v50 = vld [vmem:[%s11062_s30 + $0xd0] sm:$0xf0] }
  0x1e   :  { %151 = vmatpush.msra.mxu2 %v83_v17  ;;  %471 = vmatpush.bf16.msra.mxu1 %v5124_v39  ;;  %v5104_v48 = vor.u32 %v5398_v45, %v5103_v44  ;;  %v5111_v51 = vld [vmem:[%s11062_s30 + $0xc8] sm:$0xf]  ;;  %v5108_v52 = vor.u32 %v5396_v49, %v5105_v50  ;;  %v5399_v53 = vld [vmem:[%s11062_s30 + $0xd4] sm:$0xf0]  ;;  %v5397_v54 = vld [vmem:[%s11062_s30 + $0xcc] sm:$0xf] }
  0x1f   :  { %172 = vmatpush.msra.mxu3 %v83_v17  ;;  %v5113_v55 = vld [vmem:[%s11062_s30 + $0xd8] sm:$0xf0]  ;;  %v5112_v57 = vor.u32 %v5399_v53, %v5111_v51  ;;  %v5087_v59 = vld [vmem:[%s11062_s30 + $0xa0] sm:$0xf]  ;;  %v5394_v60 = vld [vmem:[%s11062_s30 + $0xac] sm:$0xf0] }
  0x20   :  { %152 = vmatpush.msra.mxu2 %v82_v18  ;;  %v5116_v58 = vor.u32 %v5397_v54, %v5113_v55  ;;  %v5088_v61 = vor.u32 %v5394_v60, %v5087_v59  ;;  %v5392_v62 = vld [vmem:[%s11062_s30 + $0xa4] sm:$0xf]  ;;  %v5089_v63 = vld [vmem:[%s11062_s30 + $0xb0] sm:$0xf0]  ;;  %v5095_v3 = vld [vmem:[%s11062_s30 + $0xa8] sm:$0xf] }
  0x21   :  { %173 = vmatpush.msra.mxu3 %v82_v18  ;;  %453 = vmatpush.bf16.msra.mxu0 %v5104_v48  ;;  %v5092_v4 = vor.u32 %v5392_v62, %v5089_v63  ;;  %v5395_v5 = vld [vmem:[%s11062_s30 + $0xb4] sm:$0xf0]  ;;  %v5393_v6 = vld [vmem:[%s11062_s30 + $0xac] sm:$0xf]  ;;  %v5097_v8 = vld [vmem:[%s11062_s30 + $0xb8] sm:$0xf0] }
  0x22   :  { %153 = vmatpush.msra.mxu2 %v81_v19  ;;  %472 = vmatpush.bf16.msra.mxu1 %v5108_v52  ;;  %v5096_v9 = vor.u32 %v5395_v5, %v5095_v3  ;;  %v5071_v10 = vld [vmem:[%s11062_s30 + $0x80] sm:$0xf]  ;;  %v5390_v11 = vld [vmem:[%s11062_s30 + $0x8c] sm:$0xf0]  ;;  %v5388_v12 = vld [vmem:[%s11062_s30 + $0x84] sm:$0xf]  ;;  %v5100_v14 = vor.u32 %v5393_v6, %v5097_v8 }
  0x23   :  { %174 = vmatpush.msra.mxu3 %v81_v19  ;;  %v5073_v15 = vld [vmem:[%s11062_s30 + $0x90] sm:$0xf0]  ;;  %v5079_v16 = vld [vmem:[%s11062_s30 + $0x88] sm:$0xf]  ;;  %v5391_v17 = vld [vmem:[%s11062_s30 + $0x94] sm:$0xf0]  ;;  %v5072_v18 = vor.u32 %v5390_v11, %v5071_v10 }
  0x24   :  { %154 = vmatpush.msra.mxu2 %v80_v20  ;;  %v5389_v19 = vld [vmem:[%s11062_s30 + $0x8c] sm:$0xf]  ;;  %v5063_v30 = vld [vmem:[%s11062_s30 + $0x68] sm:$0xf]  ;;  %v5387_v31 = vld [vmem:[%s11062_s30 + $0x74] sm:$0xf0] }
  0x25   :  { %175 = vmatpush.msra.mxu3 %v80_v20  ;;  %454 = vmatpush.bf16.msra.mxu0 %v5088_v61  ;;  %v5081_v20 = vld [vmem:[%s11062_s30 + $0x98] sm:$0xf0]  ;;  %v5385_v34 = vld [vmem:[%s11062_s30 + $0x6c] sm:$0xf]  ;;  %v5039_v49 = vld [vmem:[%s11062_s30 + $0x40] sm:$0xf] }
  0x26   :  { %155 = vmatpush.msra.mxu2 %v79_v21  ;;  %473 = vmatpush.bf16.msra.mxu1 %v5092_v4  ;;  %v5065_v35 = vld [vmem:[%s11062_s30 + $0x78] sm:$0xf0]  ;;  %v5382_v50 = vld [vmem:[%s11062_s30 + $0x4c] sm:$0xf0]  ;;  %v5380_v51 = vld [vmem:[%s11062_s30 + $0x44] sm:$0xf] }
  0x27   :  { %176 = vmatpush.msra.mxu3 %v79_v21  ;;  %v5076_v21 = vor.u32 %v5388_v12, %v5073_v15  ;;  %v5068_v39 = vor.u32 %v5385_v34, %v5065_v35  ;;  %v5040_v52 = vor.u32 %v5382_v50, %v5039_v49  ;;  %v5047_v53 = vld [vmem:[%s11062_s30 + $0x48] sm:$0xf]  ;;  %v5383_v54 = vld [vmem:[%s11062_s30 + $0x54] sm:$0xf0]  ;;  %v5023_v60 = vld [vmem:[%s11062_s30 + $0x20] sm:$0xf] }
  0x28   :  { %156 = vmatpush.msra.mxu2 %v78_v22  ;;  %v5378_v61 = vld [vmem:[%s11062_s30 + $0x2c] sm:$0xf0]  ;;  %v5376_v62 = vld [vmem:[%s11062_s30 + $0x24] sm:$0xf]  ;;  %v5025_v3 = vld [vmem:[%s11062_s30 + $0x30] sm:$0xf0] }
  0x29   :  { %177 = vmatpush.msra.mxu3 %v78_v22  ;;  %v5055_v22 = vld [vmem:[%s11062_s30 + $0x60] sm:$0xf]  ;;  %455 = vmatpush.bf16.msra.mxu0 %v5072_v18  ;;  %v5024_v63 = vor.u32 %v5378_v61, %v5023_v60  ;;  %v5031_v4 = vld [vmem:[%s11062_s30 + $0x28] sm:$0xf]  ;;  %v5379_v5 = vld [vmem:[%s11062_s30 + $0x34] sm:$0xf0]  ;;  %v5028_v6 = vor.u32 %v5376_v62, %v5025_v3 }
  0x2a   :  { %157 = vmatpush.msra.mxu2 %v77_v23  ;;  %474 = vmatpush.bf16.msra.mxu1 %v5076_v21  ;;  %v5032_v8 = vor.u32 %v5379_v5, %v5031_v4  ;;  %v5033_v10 = vld [vmem:[%s11062_s30 + $0x38] sm:$0xf0]  ;;  %v5007_v12 = vld [vmem:[%s11062_s30] sm:$0xf]  ;;  %v5372_v15 = vld [vmem:[%s11062_s30 + $0x4] sm:$0xf] }
  0x2b   :  { %178 = vmatpush.msra.mxu3 %v77_v23  ;;  %v5386_v23 = vld [vmem:[%s11062_s30 + $0x6c] sm:$0xf0]  ;;  %v5015_v18 = vld [vmem:[%s11062_s30 + $0x8] sm:$0xf]  ;;  %v6219_v4 = vld [vmem:[%s10925_s16 + $0x178] sm:$0xff] }
  0x2c   :  { %158 = vmatpush.msra.mxu2 %v76_v24  ;;  %v5056_v33 = vor.u32 %v5386_v23, %v5055_v22  ;;  %v5373_v22 = vld [vmem:[%s11062_s30 + $0xc] sm:$0xf]  ;;  %v5017_v23 = vld [vmem:[%s11062_s30 + $0x18] sm:$0xf0] }
  0x2d   :  { %179 = vmatpush.msra.mxu3 %v76_v24  ;;  %v5080_v24 = vor.u32 %v5391_v17, %v5079_v16  ;;  %v5009_v17 = vld [vmem:[%s11062_s30 + $0x10] sm:$0xf0] }
  0x2e   :  { %490 = vmatpush.bf16.msrb.mxu2 %v5128_v42  ;;  %456 = vmatpush.bf16.msra.mxu0 %v5056_v33  ;;  %v93_v42 = vld [vmem:[%s11063_s1] sm:$0x1] }
  0x2f   :  { %509 = vmatpush.bf16.msrb.mxu3 %v5132_v47 }
  0x32   :  { %491 = vmatpush.bf16.msrb.mxu2 %v5112_v57  ;;  %v5381_v57 = vld [vmem:[%s11062_s30 + $0x4c] sm:$0xf]  ;;  %457 = vmatpush.bf16.msra.mxu0 %v5040_v52 }
  0x33   :  { %510 = vmatpush.bf16.msrb.mxu3 %v5116_v58  ;;  %v5049_v58 = vld [vmem:[%s11062_s30 + $0x58] sm:$0xf0] }
  0x34   :  { %v5052_v59 = vor.u32 %v5381_v57, %v5049_v58 }
  0x36   :  { %492 = vmatpush.bf16.msrb.mxu2 %v5096_v9  ;;  %v5377_v9 = vld [vmem:[%s11062_s30 + $0x2c] sm:$0xf]  ;;  %458 = vmatpush.bf16.msra.mxu0 %v5024_v63 }
  0x37   :  { %511 = vmatpush.bf16.msrb.mxu3 %v5100_v14  ;;  %v5036_v11 = vor.u32 %v5377_v9, %v5033_v10  ;;  %v5374_v14 = vld [vmem:[%s11062_s30 + $0xc] sm:$0xf0]  ;;  %v6242_v10 = vld [vmem:[%s10925_s16 + $0x78] sm:$0xff] }
  0x38   :  { %v5008_v16 = vor.u32 %v5374_v14, %v5007_v12  ;;  %v6237_v9 = vld [vmem:[%s10925_s16 + $0x170] sm:$0xff]  ;;  %v6259_v14 = vld [vmem:[%s10925_s16 + $0x168] sm:$0xff] }
  0x39   :  { %v6253_v12 = vld [vmem:[%s10925_s16 + $0x1f0] sm:$0xff] }
  0x3a   :  { %493 = vmatpush.bf16.msrb.mxu2 %v5080_v24  ;;  %459 = vmatpush.bf16.msra.mxu0 %v5008_v16  ;;  %v5020_v24 = vor.u32 %v5373_v22, %v5017_v23  ;;  %v6273_v16 = vld [vmem:[%s10925_s16 + $0xf0] sm:$0xff]  ;;  %v6311_v22 = vld [vmem:[%s10925_s16 + $0x1e0] sm:$0xff] }
  0x3b   :  { %v6316_v23 = vld [vmem:[%s10925_s16 + $0x60] sm:$0xff] }
  0x93   :  { %v116_v25 = vpop.f32.mrf.mxu0 }
  0x94   :  { %159 = vmatmul.f32.vlgmr.msra.gmra.mxu2 %v116_v25  ;;  %v5384_v25 = vld [vmem:[%s11062_s30 + $0x64] sm:$0xf] }
  0x95   :  { %v140_v26 = vpop.f32.mrf.mxu1 }
  0x96   :  { %180 = vmatmul.f32.vlgmr.msra.gmra.mxu3 %v140_v26  ;;  %v5057_v26 = vld [vmem:[%s11062_s30 + $0x70] sm:$0xf0] }
  0x97   :  { %v5060_v36 = vor.u32 %v5384_v25, %v5057_v26 }
  0x99   :  { %475 = vmatpush.bf16.msra.mxu1 %v5060_v36 }
 0x117   :  { %v160_v28 = vpop.f32.mrf.mxu2 }
 0x118   :  { %v5918_v29 = vmul.f32 0.001953125, %v160_v28  ;;  %v5084_v28 = vor.u32 %v5389_v19, %v5081_v20  ;;  %v5375_v19 = vld [vmem:[%s11062_s30 + $0x14] sm:$0xf0]  ;;  %v5012_v20 = vor.u32 %v5372_v15, %v5009_v17  ;;  %v6266_v15 = vld [vmem:[%s10925_s16 + $0x70] sm:$0xff]  ;;  %v6278_v17 = vld [vmem:[%s10925_s16 + $0x160] sm:$0xff] }
 0x119   :  { %v181_v32 = vpop.f32.mrf.mxu3  ;;  %v5016_v21 = vor.u32 %v5375_v19, %v5015_v18  ;;  %v6286_v18 = vld [vmem:[%s10925_s16 + $0x1e8] sm:$0xff] }
 0x11a   :  { %v185_v37 = vmul.f32 %v5918_v29, %v5918_v29  ;;  %v184_v38 = vmul.f32 0.001953125, %v181_v32  ;;  %512 = vmatpush.bf16.msrb.mxu3 %v5084_v28  ;;  %v6291_v19 = vld [vmem:[%s10925_s16 + $0x68] sm:$0xff] }
 0x11c   :  { %v186_v46 = vsub.f32 %v184_v38, %v185_v37  ;;  %v5064_v38 = vor.u32 %v5387_v31, %v5063_v30 }
 0x11e   :  { %v5970_v56 = vadd.f32 1e-05, %v186_v46  ;;  %494 = vmatpush.bf16.msrb.mxu2 %v5064_v38  ;;  %513 = vmatpush.bf16.msrb.mxu3 %v5068_v39  ;;  %v94_v46 = vld [vmem:[%s11064_s6] sm:$0x1] }
 0x120   :  { %5443 = vrsqrt.f32 %v5970_v56  ;;  %vm194_vm2 = vweird.f32 %v5970_v56 }
 0x122   :  { %514 = vmatpush.bf16.msrb.mxu3 %v5052_v59 }
 0x126   :  { %v5444_v27 = vpop.eup %5443  ;;  %515 = vmatpush.bf16.msrb.mxu3 %v5036_v11  ;;  %v6248_v11 = vld [vmem:[%s10925_s16 + $0xf8] sm:$0xff] }
 0x127   :  { %v189_v32 = vmul.f32 %v5444_v27, %v5970_v56  ;;  %vm195_vm1 = vweird.f32 %v5444_v27  ;;  %v5048_v56 = vor.u32 %v5383_v54, %v5047_v53 }
 0x128   :  { %vm196_vm3 = vmor %vm194_vm2, %vm195_vm1 }
 0x129   :  { %v190_v37 = vmul.f32 %v5444_v27, %v189_v32  ;;  %495 = vmatpush.bf16.msrb.mxu2 %v5048_v56 }
 0x12a   :  { %516 = vmatpush.bf16.msrb.mxu3 %v5020_v24  ;;  %v6323_v24 = vld [vmem:[%s10925_s16 + $0xe0] sm:$0xff] }
 0x12b   :  { %v191_v40 = vmul.f32 0.5, %v190_v37 }
 0x12d   :  { %v192_v41 = vsub.f32 1.5, %v191_v40  ;;  %496 = vmatpush.bf16.msrb.mxu2 %v5032_v8 }
 0x12f   :  { %v193_v43 = vmul.f32 %v5444_v27, %v192_v41 }
 0x131   :  { %v197_v44 = vsel %vm196_vm3, %v5444_v27, %v193_v43  ;;  %497 = vmatpush.bf16.msrb.mxu2 %v5016_v21  ;;  %v6304_v21 = vld [vmem:[%s10925_s16 + $0x158] sm:$0xff] }
 0x132   :  { %v198_v45 = vmul.f32 %v197_v44, %v93_v42 }
 0x134   :  { %5003 = vmatmul.msk.f32.vlgmr.msrb.gmra.mxu0 %vm201_vm4, %v198_v45  ;;  %v199_v47 = vmul.f32 %v198_v45, %v5918_v29  ;;  %v5041_v29 = vld [vmem:[%s11062_s30 + $0x50] sm:$0xf0] }
 0x135   :  { %v5044_v55 = vor.u32 %v5380_v51, %v5041_v29 }
 0x136   :  { %v200_v48 = vsub.f32 %v94_v46, %v199_v47 }
 0x137   :  { %476 = vmatpush.bf16.msra.mxu1 %v5044_v55 }
 0x138   :  { %5004 = vmatmul.msk.f32.vlgmr.msrb.gmra.mxu1 %vm201_vm4, %v200_v48 }
 0x13b   :  { %477 = vmatpush.bf16.msra.mxu1 %v5028_v6  ;;  %v6228_v6 = vld [vmem:[%s10925_s16 + $0x1f8] sm:$0xff] }
 0x13f   :  { %478 = vmatpush.bf16.msra.mxu1 %v5012_v20  ;;  %v6299_v20 = vld [vmem:[%s10925_s16 + $0xe8] sm:$0xff] }
 0x1b1   :  { %v222_v25 = vpop.f32.mrf.mxu0 }
 0x1b2   :  { %v248_v26 = vperm.slane %v222_v25, 0  ;;  %v6328_v25 = vld [vmem:[%s10925_s16 + $0x150] sm:$0xff] }
 0x1b4   :  { %v249_v28 = vmul.f32 %v248_v26, %v5860_v7  ;;  %v250_v30 = vmul.f32 %v248_v26, %v5844_v2  ;;  %v251_v35 = vmul.f32 %v248_v26, %v5839_v1  ;;  %v252_v36 = vmul.f32 %v248_v26, %v5834_v0  ;;  %v6335_v26 = vld [vmem:[%s10925_s16 + $0x1d8] sm:$0xff] }
 0x1b5   :  { %v245_v27 = vpop.f32.mrf.mxu1 }
 0x1b6   :  { %v253_v31 = vperm.slane %v245_v27, 0  ;;  %v6340_v27 = vld [vmem:[%s10925_s16 + $0x58] sm:$0xff] }
 0x1b8   :  { %v254_v32 = vadd.f32 %v253_v31, %v249_v28  ;;  %v255_v33 = vadd.f32 %v253_v31, %v250_v30  ;;  %v256_v37 = vadd.f32 %v253_v31, %v251_v35  ;;  %v257_v38 = vadd.f32 %v253_v31, %v252_v36  ;;  %v6347_v28 = vld [vmem:[%s10925_s16 + $0xd8] sm:$0xff]  ;;  %v6352_v30 = vld [vmem:[%s10925_s16 + $0x148] sm:$0xff]  ;;  %v6359_v31 = vld [vmem:[%s10925_s16 + $0x1d0] sm:$0xff] }
 0x1b9   :  { %v6383_v35 = vld [vmem:[%s10925_s16 + $0x1c8] sm:$0xff] }
 0x1ba   :  { %v258_v34 = vpack.c.bf16 %v255_v33, %v254_v32  ;;  %v259_v39 = vpack.c.bf16 %v257_v38, %v256_v37  ;;  %v6364_v32 = vld [vmem:[%s10925_s16 + $0x50] sm:$0xff]  ;;  %v6388_v36 = vld [vmem:[%s10925_s16 + $0x48] sm:$0xff]  ;;  %v6400_v38 = vld [vmem:[%s10925_s16 + $0x138] sm:$0xff] }
 0x1bb   :  { %v6371_v33 = vld [vmem:[%s10925_s16 + $0xd0] sm:$0xff]  ;;  %v6395_v37 = vld [vmem:[%s10925_s16 + $0xc8] sm:$0xff] }
 0x1bc   :  { %460 = vmatmul.bf16.vlgmr.msra.gmra.mxu0 %v258_v34  ;;  %479 = vmatmul.bf16.vlgmr.msra.gmra.mxu1 %v258_v34 }
 0x1bd   :  { %498 = vmatmul.bf16.vlgmr.msrb.gmra.mxu2 %v258_v34  ;;  %517 = vmatmul.bf16.vlgmr.msrb.gmra.mxu3 %v258_v34  ;;  %v6376_v34 = vld [vmem:[%s10925_s16 + $0x140] sm:$0xff] }
 0x1cc   :  { %465 = vmatmul.bf16.gmra.mxu0 %v259_v39  ;;  %484 = vmatmul.bf16.gmra.mxu1 %v259_v39 }
 0x1cd   :  { %503 = vmatmul.bf16.gmra.mxu2 %v259_v39  ;;  %522 = vmatmul.bf16.gmra.mxu3 %v259_v39  ;;  %v6407_v39 = vld [vmem:[%s10925_s16 + $0x1c0] sm:$0xff] }
 0x239   :  { %v6132_v2 = vpop.f32.mrf.mxu0  ;;  %v6134_v7 = vpop.f32.mrf.mxu1 }
 0x23a   :  { %11065 = vst [vmem:[#allocation5_spill] sm:$0xff] %v6132_v2  ;;  %v691_v5 = vmul.f32 %v6134_v7, %v6134_v7  ;;  %v690_v8 = vmul.f32 %v6132_v2, %v6132_v2 }
 0x23b   :  { %11066 = vst [vmem:[#allocation6_spill] sm:$0xff] %v6134_v7 }
 0x240   :  { %v6136_v40 = vpop.f32.mrf.mxu2  ;;  %v6138_v41 = vpop.f32.mrf.mxu3 }
 0x241   :  { %11067 = vst [vmem:[#allocation7_spill] sm:$0xff] %v6136_v40  ;;  %v6140_v42 = vpop.f32.mrf.mxu0  ;;  %v6142_v1 = vpop.f32.mrf.mxu1  ;;  %v692_v59 = vmul.f32 %v6136_v40, %v6136_v40  ;;  %v693_v60 = vmul.f32 %v6138_v41, %v6138_v41 }
 0x242   :  { %11068 = vst [vmem:[#allocation8_spill] sm:$0xff] %v6138_v41  ;;  %v695_v63 = vmul.f32 %v6142_v1, %v6142_v1  ;;  %v694_v3 = vmul.f32 %v6140_v42, %v6140_v42 }
 0x243   :  { %11069 = vst [vmem:[#allocation9_spill] sm:$0xff] %v6140_v42 }
 0x244   :  { %11070 = vst [vmem:[#allocation10_spill] sm:$0xff] %v6142_v1 }
 0x248   :  { %v6144_v0 = vpop.f32.mrf.mxu2  ;;  %v6146_v43 = vpop.f32.mrf.mxu3 }
 0x249   :  { %11071 = vst [vmem:[#allocation11_spill] sm:$0xff] %v6144_v0  ;;  %v6148_v44 = vpop.f32.mrf.mxu0  ;;  %v6150_v45 = vpop.f32.mrf.mxu1  ;;  %v696_v55 = vmul.f32 %v6144_v0, %v6144_v0  ;;  %v697_v56 = vmul.f32 %v6146_v43, %v6146_v43 }
 0x24a   :  { %11072 = vst [vmem:[#allocation12_spill] sm:$0xff] %v6146_v43  ;;  %v699_v61 = vmul.f32 %v6150_v45, %v6150_v45  ;;  %v698_v62 = vmul.f32 %v6148_v44, %v6148_v44 }
 0x24b   :  { %11073 = vst [vmem:[#allocation13_spill] sm:$0xff] %v6148_v44 }
 0x24c   :  { %11074 = vst [vmem:[#allocation14_spill] sm:$0xff] %v6150_v45 }
 0x250   :  { %v6152_v46 = vpop.f32.mrf.mxu2  ;;  %v6154_v47 = vpop.f32.mrf.mxu3 }
 0x251   :  { %11075 = vst [vmem:[#allocation15_spill] sm:$0xff] %v6152_v46  ;;  %v6156_v48 = vpop.f32.mrf.mxu0  ;;  %v6158_v49 = vpop.f32.mrf.mxu1  ;;  %v700_v53 = vmul.f32 %v6152_v46, %v6152_v46  ;;  %v701_v54 = vmul.f32 %v6154_v47, %v6154_v47 }
 0x252   :  { %11076 = vst [vmem:[#allocation16_spill] sm:$0xff] %v6154_v47  ;;  %622 = vmatpush.msrb.mxu0 %v6156_v48  ;;  %642 = vmatpush.msrb.mxu1 %v6158_v49  ;;  %v702_v57 = vmul.f32 %v6156_v48, %v6156_v48  ;;  %v703_v58 = vmul.f32 %v6158_v49, %v6158_v49 }
 0x253   :  { %11077 = vst [vmem:[#allocation17_spill] sm:$0xff] %v6156_v48  ;;  %v6587_v48 = vld [vmem:[%s10925_s16 + $0x88] sm:$0xff] }
 0x254   :  { %11078 = vst [vmem:[#allocation18_spill] sm:$0xff] %v6158_v49  ;;  %623 = vmatpush.msrb.mxu0 %v6148_v44  ;;  %643 = vmatpush.msrb.mxu1 %v6150_v45  ;;  %v6563_v49 = vld [vmem:[%s10925_s16 + $0x90] sm:$0xff]  ;;  %v6568_v45 = vld [vmem:[%s10925_s16 + $0x100] sm:$0xff] }
 0x255   :  { %v6594_v44 = vld [vmem:[%s10925_s16 + $0x180] sm:$0xff] }
 0x256   :  { %624 = vmatpush.msrb.mxu0 %v6140_v42  ;;  %644 = vmatpush.msrb.mxu1 %v6142_v1  ;;  %v6575_v1 = vld [vmem:[%s10925_s16 + $0x188] sm:$0xff]  ;;  %v6601_v42 = vld [vmem:[%s10925_s16] sm:$0xff] }
 0x258   :  { %v6166_v50 = vpop.f32.mrf.mxu2  ;;  %v6168_v51 = vpop.f32.mrf.mxu3  ;;  %625 = vmatpush.msrb.mxu0 %v6132_v2  ;;  %645 = vmatpush.msrb.mxu1 %v6134_v7  ;;  %v6582_v7 = vld [vmem:[%s10925_s16 + $0x8] sm:$0xff]  ;;  %v6608_v2 = vld [vmem:[%s10925_s16 + $0x80] sm:$0xff] }
 0x259   :  { %11079 = vst [vmem:[#allocation19_spill] sm:$0xff] %v6166_v50  ;;  %v704_v52 = vmul.f32 %v6166_v50, %v6166_v50  ;;  %v705_v29 = vmul.f32 %v6168_v51, %v6168_v51  ;;  %5133 = vmatmul.msk.f32.vlgmr.msrb.gmra.mxu0 %vm95_vm0, %v10935_v13  ;;  %5134 = vmatmul.msk.f32.vlgmr.msrb.gmra.mxu1 %vm95_vm0, %v10935_v13 }
 0x25a   :  { %11080 = vst [vmem:[#allocation20_spill] sm:$0xff] %v6168_v51  ;;  %662 = vmatpush.msra.mxu0 %v6166_v50  ;;  %682 = vmatpush.msra.mxu1 %v6168_v51  ;;  %v6515_v51 = vld [vmem:[%s10925_s16 + $0xa0] sm:$0xff]  ;;  %v6539_v50 = vld [vmem:[%s10925_s16 + $0x98] sm:$0xff] }
 0x25b   :  { %758 = vmatpush.msra.mxu2 %v704_v52  ;;  %778 = vmatpush.msra.mxu3 %v705_v29  ;;  %v6412_v52 = vld [vmem:[%s10925_s16 + $0x40] sm:$0xff] }
 0x25c   :  { %663 = vmatpush.msra.mxu0 %v6152_v46  ;;  %683 = vmatpush.msra.mxu1 %v6154_v47  ;;  %v6419_v29 = vld [vmem:[%s10925_s16 + $0xc0] sm:$0xff]  ;;  %v6520_v47 = vld [vmem:[%s10925_s16 + $0x110] sm:$0xff]  ;;  %v6544_v46 = vld [vmem:[%s10925_s16 + $0x108] sm:$0xff] }
 0x25d   :  { %759 = vmatpush.msra.mxu2 %v700_v53  ;;  %779 = vmatpush.msra.mxu3 %v701_v54  ;;  %v6424_v53 = vld [vmem:[%s10925_s16 + $0x130] sm:$0xff]  ;;  %v6431_v54 = vld [vmem:[%s10925_s16 + $0x1b8] sm:$0xff] }
 0x25e   :  { %664 = vmatpush.msra.mxu0 %v6144_v0  ;;  %684 = vmatpush.msra.mxu1 %v6146_v43  ;;  %v6527_v43 = vld [vmem:[%s10925_s16 + $0x198] sm:$0xff]  ;;  %v6551_v0 = vld [vmem:[%s10925_s16 + $0x190] sm:$0xff] }
 0x25f   :  { %760 = vmatpush.msra.mxu2 %v696_v55  ;;  %780 = vmatpush.msra.mxu3 %v697_v56  ;;  %v6436_v55 = vld [vmem:[%s10925_s16 + $0x38] sm:$0xff] }
 0x260   :  { %665 = vmatpush.msra.mxu0 %v6136_v40  ;;  %685 = vmatpush.msra.mxu1 %v6138_v41  ;;  %v6443_v56 = vld [vmem:[%s10925_s16 + $0xb8] sm:$0xff]  ;;  %v6556_v40 = vld [vmem:[%s10925_s16 + $0x10] sm:$0xff] }
 0x261   :  { %761 = vmatpush.msra.mxu2 %v692_v59  ;;  %781 = vmatpush.msra.mxu3 %v693_v60  ;;  %v6460_v59 = vld [vmem:[%s10925_s16 + $0x30] sm:$0xff]  ;;  %v6532_v41 = vld [vmem:[%s10925_s16 + $0x18] sm:$0xff] }
 0x262   :  { %718 = vmatpush.msrb.mxu0 %v702_v57  ;;  %738 = vmatpush.msrb.mxu1 %v703_v58  ;;  %v6448_v57 = vld [vmem:[%s10925_s16 + $0x128] sm:$0xff]  ;;  %v6455_v58 = vld [vmem:[%s10925_s16 + $0x1b0] sm:$0xff] }
 0x263   :  { %5135 = vmatmul.msk.f32.vlgmr.msra.gmra.mxu0 %vm95_vm0, %v10935_v13  ;;  %5136 = vmatmul.msk.f32.vlgmr.msra.gmra.mxu1 %vm95_vm0, %v10935_v13  ;;  %v6467_v60 = vld [vmem:[%s10925_s16 + $0xb0] sm:$0xff] }
 0x264   :  { %739 = vmatpush.msrb.mxu1 %v699_v61  ;;  %719 = vmatpush.msrb.mxu0 %v698_v62  ;;  %v6472_v61 = vld [vmem:[%s10925_s16 + $0x120] sm:$0xff]  ;;  %v6479_v62 = vld [vmem:[%s10925_s16 + $0x1a8] sm:$0xff] }
 0x265   :  { %5139 = vmatmul.msk.f32.vlgmr.msra.gmra.mxu2 %vm95_vm0, %v10935_v13  ;;  %5140 = vmatmul.msk.f32.vlgmr.msra.gmra.mxu3 %vm95_vm0, %v10935_v13 }
 0x266   :  { %740 = vmatpush.msrb.mxu1 %v695_v63  ;;  %720 = vmatpush.msrb.mxu0 %v694_v3  ;;  %v6484_v63 = vld [vmem:[%s10925_s16 + $0x28] sm:$0xff] }
 0x267   :  { %826 = vmatpush.msrb.mxu2 %v6219_v4  ;;  %846 = vmatpush.msrb.mxu3 %v6228_v6  ;;  %v6491_v3 = vld [vmem:[%s10925_s16 + $0xa8] sm:$0xff] }
 0x268   :  { %741 = vmatpush.msrb.mxu1 %v691_v5  ;;  %721 = vmatpush.msrb.mxu0 %v690_v8  ;;  %v6496_v5 = vld [vmem:[%s10925_s16 + $0x118] sm:$0xff]  ;;  %v6503_v8 = vld [vmem:[%s10925_s16 + $0x1a0] sm:$0xff] }
 0x269   :  { %827 = vmatpush.msrb.mxu2 %v6237_v9  ;;  %847 = vmatpush.msrb.mxu3 %v6253_v12 }
 0x26a   :  { %786 = vmatpush.msra.mxu0 %v6242_v10  ;;  %806 = vmatpush.msra.mxu1 %v6248_v11 }
 0x26b   :  { %5137 = vmatmul.msk.f32.vlgmr.msrb.gmra.mxu0 %vm95_vm0, %v10935_v13  ;;  %828 = vmatpush.msrb.mxu2 %v6259_v14 }
 0x26c   :  { %5138 = vmatmul.msk.f32.vlgmr.msrb.gmra.mxu1 %vm95_vm0, %v10935_v13  ;;  %787 = vmatpush.msra.mxu0 %v6266_v15  ;;  %v6508_v13 = vld [vmem:[%s10925_s16 + $0x20] sm:$0xff] }
 0x26d   :  { %807 = vmatpush.msra.mxu1 %v6273_v16  ;;  %829 = vmatpush.msrb.mxu2 %v6278_v17 }
 0x26e   :  { %848 = vmatpush.msrb.mxu3 %v6286_v18  ;;  %788 = vmatpush.msra.mxu0 %v6291_v19 }
 0x26f   :  { %808 = vmatpush.msra.mxu1 %v6299_v20  ;;  %830 = vmatpush.msrb.mxu2 %v6304_v21 }
 0x270   :  { %849 = vmatpush.msrb.mxu3 %v6311_v22  ;;  %789 = vmatpush.msra.mxu0 %v6316_v23 }
 0x271   :  { %809 = vmatpush.msra.mxu1 %v6323_v24  ;;  %831 = vmatpush.msrb.mxu2 %v6328_v25 }
 0x272   :  { %850 = vmatpush.msrb.mxu3 %v6335_v26  ;;  %790 = vmatpush.msra.mxu0 %v6340_v27 }
 0x273   :  { %810 = vmatpush.msra.mxu1 %v6347_v28  ;;  %832 = vmatpush.msrb.mxu2 %v6352_v30 }
 0x274   :  { %851 = vmatpush.msrb.mxu3 %v6359_v31  ;;  %791 = vmatpush.msra.mxu0 %v6364_v32 }
 0x275   :  { %811 = vmatpush.msra.mxu1 %v6371_v33  ;;  %833 = vmatpush.msrb.mxu2 %v6376_v34 }
 0x276   :  { %852 = vmatpush.msrb.mxu3 %v6383_v35  ;;  %792 = vmatpush.msra.mxu0 %v6388_v36 }
 0x277   :  { %812 = vmatpush.msra.mxu1 %v6395_v37  ;;  %834 = vmatpush.msrb.mxu2 %v6400_v38 }
 0x278   :  { %853 = vmatpush.msrb.mxu3 %v6407_v39  ;;  %793 = vmatpush.msra.mxu0 %v6412_v52 }
 0x279   :  { %813 = vmatpush.msra.mxu1 %v6419_v29  ;;  %835 = vmatpush.msrb.mxu2 %v6424_v53 }
 0x27a   :  { %854 = vmatpush.msrb.mxu3 %v6431_v54  ;;  %794 = vmatpush.msra.mxu0 %v6436_v55 }
 0x27b   :  { %814 = vmatpush.msra.mxu1 %v6443_v56  ;;  %836 = vmatpush.msrb.mxu2 %v6448_v57 }
 0x27c   :  { %855 = vmatpush.msrb.mxu3 %v6455_v58  ;;  %795 = vmatpush.msra.mxu0 %v6460_v59 }
 0x27d   :  { %815 = vmatpush.msra.mxu1 %v6467_v60  ;;  %837 = vmatpush.msrb.mxu2 %v6472_v61 }
 0x27e   :  { %856 = vmatpush.msrb.mxu3 %v6479_v62  ;;  %796 = vmatpush.msra.mxu0 %v6484_v63 }
 0x27f   :  { %816 = vmatpush.msra.mxu1 %v6491_v3  ;;  %838 = vmatpush.msrb.mxu2 %v6496_v5 }
 0x280   :  { %857 = vmatpush.msrb.mxu3 %v6503_v8  ;;  %797 = vmatpush.msra.mxu0 %v6508_v13 }
 0x281   :  { %817 = vmatpush.msra.mxu1 %v6515_v51  ;;  %839 = vmatpush.msrb.mxu2 %v6520_v47 }
 0x282   :  { %858 = vmatpush.msrb.mxu3 %v6527_v43  ;;  %798 = vmatpush.msra.mxu0 %v6532_v41 }
 0x283   :  { %818 = vmatpush.msra.mxu1 %v6539_v50  ;;  %840 = vmatpush.msrb.mxu2 %v6544_v46 }
 0x284   :  { %859 = vmatpush.msrb.mxu3 %v6551_v0  ;;  %799 = vmatpush.msra.mxu0 %v6556_v40 }
 0x285   :  { %819 = vmatpush.msra.mxu1 %v6563_v49  ;;  %841 = vmatpush.msrb.mxu2 %v6568_v45 }
 0x286   :  { %860 = vmatpush.msrb.mxu3 %v6575_v1  ;;  %800 = vmatpush.msra.mxu0 %v6582_v7 }
 0x287   :  { %907 = vmatpush.msra.mxu2 %v6219_v4  ;;  %820 = vmatpush.msra.mxu1 %v6587_v48 }
 0x288   :  { %861 = vmatpush.msrb.mxu3 %v6594_v44  ;;  %801 = vmatpush.msra.mxu0 %v6601_v42 }
 0x289   :  { %908 = vmatpush.msra.mxu2 %v6237_v9  ;;  %821 = vmatpush.msra.mxu1 %v6608_v2  ;;  %v601_v9 = vld [vmem:[%s10926_s17 + $0x48] sm:$0xff] }
 0x28a   :  { %927 = vmatpush.msra.mxu3 %v6228_v6  ;;  %867 = vmatpush.msrb.mxu0 %v6242_v10  ;;  %v600_v6 = vld [vmem:[%s10926_s17 + $0x40] sm:$0xff]  ;;  %v602_v10 = vld [vmem:[%s10926_s17 + $0x50] sm:$0xff] }
 0x28b   :  { %887 = vmatpush.msrb.mxu1 %v6248_v11  ;;  %909 = vmatpush.msra.mxu2 %v6259_v14 }
 0x28c   :  { %928 = vmatpush.msra.mxu3 %v6253_v12  ;;  %868 = vmatpush.msrb.mxu0 %v6266_v15  ;;  %v603_v12 = vld [vmem:[%s10926_s17 + $0x58] sm:$0xff]  ;;  %v596_v15 = vld [vmem:[%s10926_s17 + $0x20] sm:$0xff] }
 0x28d   :  { %888 = vmatpush.msrb.mxu1 %v6273_v16  ;;  %910 = vmatpush.msra.mxu2 %v6278_v17  ;;  %v597_v16 = vld [vmem:[%s10926_s17 + $0x28] sm:$0xff]  ;;  %v598_v17 = vld [vmem:[%s10926_s17 + $0x30] sm:$0xff] }
 0x28e   :  { %929 = vmatpush.msra.mxu3 %v6286_v18  ;;  %869 = vmatpush.msrb.mxu0 %v6291_v19  ;;  %v599_v18 = vld [vmem:[%s10926_s17 + $0x38] sm:$0xff]  ;;  %v592_v19 = vld [vmem:[%s10926_s17] sm:$0xff] }
 0x28f   :  { %889 = vmatpush.msrb.mxu1 %v6299_v20  ;;  %911 = vmatpush.msra.mxu2 %v6304_v21  ;;  %v593_v20 = vld [vmem:[%s10926_s17 + $0x8] sm:$0xff] }
 0x290   :  { %930 = vmatpush.msra.mxu3 %v6311_v22  ;;  %870 = vmatpush.msrb.mxu0 %v6316_v23  ;;  %v594_v23 = vld [vmem:[%s10926_s17 + $0x10] sm:$0xff] }
 0x291   :  { %890 = vmatpush.msrb.mxu1 %v6323_v24  ;;  %912 = vmatpush.msra.mxu2 %v6328_v25  ;;  %v595_v24 = vld [vmem:[%s10926_s17 + $0x18] sm:$0xff] }
 0x292   :  { %931 = vmatpush.msra.mxu3 %v6335_v26  ;;  %871 = vmatpush.msrb.mxu0 %v6340_v27 }
 0x293   :  { %891 = vmatpush.msrb.mxu1 %v6347_v28  ;;  %913 = vmatpush.msra.mxu2 %v6352_v30 }
 0x294   :  { %932 = vmatpush.msra.mxu3 %v6359_v31  ;;  %872 = vmatpush.msrb.mxu0 %v6364_v32 }
 0x295   :  { %892 = vmatpush.msrb.mxu1 %v6371_v33  ;;  %914 = vmatpush.msra.mxu2 %v6376_v34 }
 0x296   :  { %933 = vmatpush.msra.mxu3 %v6383_v35  ;;  %873 = vmatpush.msrb.mxu0 %v6388_v36 }
 0x297   :  { %893 = vmatpush.msrb.mxu1 %v6395_v37  ;;  %915 = vmatpush.msra.mxu2 %v6400_v38 }
 0x298   :  { %934 = vmatpush.msra.mxu3 %v6407_v39  ;;  %874 = vmatpush.msrb.mxu0 %v6412_v52 }
 0x299   :  { %894 = vmatpush.msrb.mxu1 %v6419_v29  ;;  %916 = vmatpush.msra.mxu2 %v6424_v53  ;;  %v608_v29 = vld [vmem:[%s11081_s3] sm:$0x1] }
 0x29a   :  { %935 = vmatpush.msra.mxu3 %v6431_v54  ;;  %875 = vmatpush.msrb.mxu0 %v6436_v55 }
 0x29b   :  { %895 = vmatpush.msrb.mxu1 %v6443_v56  ;;  %917 = vmatpush.msra.mxu2 %v6448_v57  ;;  %v609_v56 = vld [vmem:[%s11082_s4] sm:$0x1] }
 0x29c   :  { %936 = vmatpush.msra.mxu3 %v6455_v58  ;;  %876 = vmatpush.msrb.mxu0 %v6460_v59 }
 0x29d   :  { %896 = vmatpush.msrb.mxu1 %v6467_v60  ;;  %918 = vmatpush.msra.mxu2 %v6472_v61 }
 0x29e   :  { %937 = vmatpush.msra.mxu3 %v6479_v62  ;;  %877 = vmatpush.msrb.mxu0 %v6484_v63  ;;  %v11083_v62 = vld [vmem:[#allocation5_spill] sm:$0xff] }
 0x29f   :  { %897 = vmatpush.msrb.mxu1 %v6491_v3  ;;  %919 = vmatpush.msra.mxu2 %v6496_v5  ;;  %v11084_v3 = vld [vmem:[#allocation9_spill] sm:$0xff] }
 0x2a0   :  { %938 = vmatpush.msra.mxu3 %v6503_v8  ;;  %878 = vmatpush.msrb.mxu0 %v6508_v13  ;;  %v11085_v8 = vld [vmem:[#allocation13_spill] sm:$0xff] }
 0x2a1   :  { %898 = vmatpush.msrb.mxu1 %v6515_v51  ;;  %920 = vmatpush.msra.mxu2 %v6520_v47  ;;  %v605_v47 = vld [vmem:[%s10926_s17 + $0x68] sm:$0xff] }
 0x2a2   :  { %939 = vmatpush.msra.mxu3 %v6527_v43  ;;  %879 = vmatpush.msrb.mxu0 %v6532_v41 }
 0x2a3   :  { %899 = vmatpush.msrb.mxu1 %v6539_v50  ;;  %921 = vmatpush.msra.mxu2 %v6544_v46  ;;  %v607_v50 = vld [vmem:[%s10926_s17 + $0x78] sm:$0xff] }
 0x2a4   :  { %940 = vmatpush.msra.mxu3 %v6551_v0  ;;  %880 = vmatpush.msrb.mxu0 %v6556_v40 }
 0x2a5   :  { %900 = vmatpush.msrb.mxu1 %v6563_v49  ;;  %922 = vmatpush.msra.mxu2 %v6568_v45 }
 0x2a6   :  { %941 = vmatpush.msra.mxu3 %v6575_v1  ;;  %881 = vmatpush.msrb.mxu0 %v6582_v7 }
 0x2a7   :  { %901 = vmatpush.msrb.mxu1 %v6587_v48  ;;  %v606_v48 = vld [vmem:[%s10926_s17 + $0x70] sm:$0xff] }
 0x2a8   :  { %942 = vmatpush.msra.mxu3 %v6594_v44  ;;  %882 = vmatpush.msrb.mxu0 %v6601_v42 }
 0x2a9   :  { %902 = vmatpush.msrb.mxu1 %v6608_v2  ;;  %v604_v2 = vld [vmem:[%s10926_s17 + $0x60] sm:$0xff] }
 0x2d6   :  { %v627_v13 = vpop.f32.mrf.mxu0  ;;  %v647_v41 = vpop.f32.mrf.mxu1 }
 0x2d7   :  { %802 = vmatmul.f32.vlgmr.msra.gmra.mxu0 %v627_v13  ;;  %822 = vmatmul.f32.vlgmr.msra.gmra.mxu1 %v647_v41  ;;  %v11086_v41 = vld [vmem:[#allocation17_spill] sm:$0xff] }
 0x2d8   :  { %979 = vmatpush.msra.mxu0 %v604_v2  ;;  %999 = vmatpush.msra.mxu1 %v605_v47 }
 0x2da   :  { %980 = vmatpush.msra.mxu0 %v600_v6  ;;  %1000 = vmatpush.msra.mxu1 %v601_v9 }
 0x2dc   :  { %981 = vmatpush.msra.mxu0 %v596_v15  ;;  %1001 = vmatpush.msra.mxu1 %v597_v16 }
 0x2de   :  { %982 = vmatpush.msra.mxu0 %v592_v19  ;;  %1002 = vmatpush.msra.mxu1 %v593_v20 }
 0x2e0   :  { %v667_v40 = vpop.f32.mrf.mxu0  ;;  %v687_v0 = vpop.f32.mrf.mxu1 }
 0x2e1   :  { %842 = vmatmul.f32.vlgmr.msrb.gmra.mxu2 %v667_v40  ;;  %862 = vmatmul.f32.vlgmr.msrb.gmra.mxu3 %v687_v0 }
 0x2e2   :  { %1019 = vmatpush.msrb.mxu2 %v606_v48  ;;  %1039 = vmatpush.msrb.mxu3 %v607_v50 }
 0x2e4   :  { %1020 = vmatpush.msrb.mxu2 %v602_v10  ;;  %1040 = vmatpush.msrb.mxu3 %v603_v12 }
 0x2e6   :  { %1021 = vmatpush.msrb.mxu2 %v598_v17  ;;  %1041 = vmatpush.msrb.mxu3 %v599_v18 }
 0x2e8   :  { %v763_v43 = vpop.f32.mrf.mxu2  ;;  %v723_v1 = vpop.f32.mrf.mxu0  ;;  %1022 = vmatpush.msrb.mxu2 %v594_v23  ;;  %1042 = vmatpush.msrb.mxu3 %v595_v24 }
 0x2e9   :  { %923 = vmatmul.f32.vlgmr.msra.gmra.mxu2 %v763_v43  ;;  %v783_v7 = vpop.f32.mrf.mxu3  ;;  %v743_v45 = vpop.f32.mrf.mxu1  ;;  %883 = vmatmul.f32.vlgmr.msrb.gmra.mxu0 %v723_v1 }
 0x2ea   :  { %943 = vmatmul.f32.vlgmr.msra.gmra.mxu3 %v783_v7  ;;  %903 = vmatmul.f32.vlgmr.msrb.gmra.mxu1 %v743_v45 }
 0x2eb   :  { %1062 = vmatpush.msrb.mxu0 %v604_v2  ;;  %1082 = vmatpush.msrb.mxu1 %v605_v47 }
 0x2ec   :  { %1102 = vmatpush.msra.mxu2 %v606_v48  ;;  %1122 = vmatpush.msra.mxu3 %v607_v50 }
 0x2ed   :  { %1063 = vmatpush.msrb.mxu0 %v600_v6  ;;  %1083 = vmatpush.msrb.mxu1 %v601_v9 }
 0x2ee   :  { %1103 = vmatpush.msra.mxu2 %v602_v10  ;;  %1123 = vmatpush.msra.mxu3 %v603_v12 }
 0x2ef   :  { %1064 = vmatpush.msrb.mxu0 %v596_v15  ;;  %1084 = vmatpush.msrb.mxu1 %v597_v16 }
 0x2f0   :  { %1104 = vmatpush.msra.mxu2 %v598_v17  ;;  %1124 = vmatpush.msra.mxu3 %v599_v18 }
 0x2f1   :  { %1065 = vmatpush.msrb.mxu0 %v592_v19  ;;  %1085 = vmatpush.msrb.mxu1 %v593_v20 }
 0x2f2   :  { %1105 = vmatpush.msra.mxu2 %v594_v23  ;;  %1125 = vmatpush.msra.mxu3 %v595_v24 }
 0x354   :  { %v803_v44 = vpop.f32.mrf.mxu0  ;;  %v823_v42 = vpop.f32.mrf.mxu1 }
 0x355   :  { %v824_v46 = vadd.f32 %v823_v42, %v803_v44 }
 0x364   :  { %v843_v49 = vpop.f32.mrf.mxu2  ;;  %v863_v4 = vpop.f32.mrf.mxu3 }
 0x365   :  { %v844_v51 = vadd.f32 %v843_v49, %v824_v46 }
 0x366   :  { %v884_v11 = vpop.f32.mrf.mxu0 }
 0x367   :  { %v904_v14 = vpop.f32.mrf.mxu1  ;;  %v864_v21 = vadd.f32 %v863_v4, %v844_v51 }
 0x368   :  { %v905_v22 = vadd.f32 %v904_v14, %v884_v11 }
 0x369   :  { %v866_v26 = vmul.f32 0.001953125, %v864_v21 }
 0x36b   :  { %v948_v31 = vmul.f32 %v866_v26, %v866_v26 }
 0x36c   :  { %v924_v25 = vpop.f32.mrf.mxu2 }
 0x36d   :  { %v925_v27 = vadd.f32 %v924_v25, %v905_v22  ;;  %v944_v28 = vpop.f32.mrf.mxu3 }
 0x36f   :  { %v945_v30 = vadd.f32 %v944_v28, %v925_v27 }
 0x371   :  { %v947_v32 = vmul.f32 0.001953125, %v945_v30 }
 0x373   :  { %v949_v33 = vsub.f32 %v947_v32, %v948_v31  ;;  %v11087_v32 = vld [vmem:[#allocation6_spill] sm:$0xff] }
 0x375   :  { %v950_v34 = vadd.f32 1e-05, %v949_v33 }
 0x377   :  { %5445 = vrsqrt.f32 %v950_v34  ;;  %vm957_vm6 = vweird.f32 %v950_v34 }
 0x37d   :  { %v5446_v35 = vpop.eup %5445 }
 0x37e   :  { %v952_v36 = vmul.f32 %v5446_v35, %v950_v34  ;;  %vm958_vm5 = vweird.f32 %v5446_v35 }
 0x37f   :  { %vm959_vm7 = vmor %vm957_vm6, %vm958_vm5 }
 0x380   :  { %v953_v37 = vmul.f32 %v5446_v35, %v952_v36 }
 0x382   :  { %v954_v38 = vmul.f32 0.5, %v953_v37 }
 0x384   :  { %v955_v39 = vsub.f32 1.5, %v954_v38 }
 0x386   :  { %v956_v52 = vmul.f32 %v5446_v35, %v955_v39 }
 0x388   :  { %v960_v53 = vsel %vm959_vm7, %v5446_v35, %v956_v52 }
 0x389   :  { %v961_v54 = vmul.f32 %v960_v53, %v608_v29 }
 0x38b   :  { %5141 = vmatmul.msk.f32.vlgmr.msra.gmra.mxu0 %vm95_vm0, %v961_v54  ;;  %5142 = vmatmul.msk.f32.vlgmr.msra.gmra.mxu1 %vm95_vm0, %v961_v54  ;;  %v962_v55 = vmul.f32 %v961_v54, %v866_v26 }
 0x38c   :  { %5143 = vmatmul.msk.f32.vlgmr.msrb.gmra.mxu2 %vm95_vm0, %v961_v54  ;;  %5144 = vmatmul.msk.f32.vlgmr.msrb.gmra.mxu3 %vm95_vm0, %v961_v54 }
 0x38d   :  { %v963_v57 = vsub.f32 %v609_v56, %v962_v55 }
 0x393   :  { %5145 = vmatmul.msk.f32.vlgmr.msrb.gmra.mxu0 %vm95_vm0, %v963_v57  ;;  %5146 = vmatmul.msk.f32.vlgmr.msrb.gmra.mxu1 %vm95_vm0, %v963_v57 }
 0x394   :  { %5147 = vmatmul.msk.f32.vlgmr.msra.gmra.mxu2 %vm95_vm0, %v963_v57  ;;  %5148 = vmatmul.msk.f32.vlgmr.msra.gmra.mxu3 %vm95_vm0, %v963_v57 }
 0x408   :  { %v984_v58 = vpop.f32.mrf.mxu0  ;;  %v1004_v46 = vpop.f32.mrf.mxu1 }
 0x409   :  { %v1130_v59 = vperm.slane %v984_v58, 0  ;;  %v1131_v22 = vperm.slane %v1004_v46, 0  ;;  %v11088_v46 = vld [vmem:[#allocation10_spill] sm:$0xff] }
 0x40b   :  { %v1134_v63 = vmul.f32 %v1130_v59, %v11083_v62  ;;  %v1138_v5 = vmul.f32 %v1130_v59, %v11084_v3  ;;  %v1142_v13 = vmul.f32 %v1130_v59, %v11085_v8  ;;  %v1146_v40 = vmul.f32 %v1130_v59, %v11086_v41 }
 0x40c   :  { %v1135_v33 = vmul.f32 %v1131_v22, %v11087_v32 }
 0x410   :  { %v1067_v60 = vpop.f32.mrf.mxu0  ;;  %v1087_v21 = vpop.f32.mrf.mxu1 }
 0x411   :  { %v1150_v61 = vperm.slane %v1067_v60, 0  ;;  %v6789_v28 = vperm.slane %v1087_v21, 0 }
 0x413   :  { %v6742_v0 = vadd.f32 %v1150_v61, %v1134_v63  ;;  %v6744_v43 = vadd.f32 %v1150_v61, %v1138_v5  ;;  %v6746_v1 = vadd.f32 %v1150_v61, %v1142_v13  ;;  %v6748_v7 = vadd.f32 %v1150_v61, %v1146_v40 }
 0x414   :  { %v6793_v39 = vadd.f32 %v6789_v28, %v1135_v33 }
 0x415   :  { %v6751_v45 = vmul.f32 0.70710677, %v6742_v0  ;;  %v6754_v44 = vmul.f32 0.70710677, %v6744_v43  ;;  %v6757_v42 = vmul.f32 0.70710677, %v6746_v1 }
 0x416   :  { %v6766_v49 = vmul.f32 0.70710677, %v6748_v7  ;;  %v6803_v58 = vmul.f32 0.70710677, %v6793_v39 }
 0x417   :  { %v1202_v2 = vmul.f32 %v6751_v45, %v6751_v45  ;;  %v1362_v47 = vmul.f32 %v6754_v44, %v6754_v44  ;;  %v1522_v48 = vmul.f32 %v6757_v42, %v6757_v42 }
 0x418   :  { %v1682_v11 = vmul.f32 %v6766_v49, %v6766_v49  ;;  %v1242_v13 = vmul.f32 %v6803_v58, %v6803_v58 }
 0x419   :  { %v6768_v50 = vmin.f32 %v1202_v2, 16.0  ;;  %v6770_v51 = vmin.f32 %v1362_v47, 16.0  ;;  %v6772_v4 = vmin.f32 %v1522_v48, 16.0  ;;  %v1139_v2 = vmul.f32 %v1131_v22, %v11088_v46 }
 0x41a   :  { %v6780_v17 = vmin.f32 %v1682_v11, 16.0 }
 0x41b   :  { %v1215_v6 = vmul.f32 3.8918573e-05, %v6768_v50  ;;  %v1375_v9 = vmul.f32 3.8918573e-05, %v6770_v51  ;;  %v1535_v10 = vmul.f32 3.8918573e-05, %v6772_v4 }
 0x41c   :  { %v1204_v18 = vmul.f32 2.1237322e-06, %v6768_v50  ;;  %v1364_v23 = vmul.f32 2.1237322e-06, %v6770_v51  ;;  %v1524_v26 = vmul.f32 2.1237322e-06, %v6772_v4 }
 0x41d   :  { %v1216_v12 = vadd.f32 0.001143296, %v1215_v6  ;;  %v1376_v14 = vadd.f32 0.001143296, %v1375_v9  ;;  %v1536_v15 = vadd.f32 0.001143296, %v1535_v10  ;;  %v1024_v9 = vpop.f32.mrf.mxu2 }
 0x41e   :  { %v1695_v27 = vmul.f32 3.8918573e-05, %v6780_v17  ;;  %v1205_v30 = vadd.f32 0.00028619796, %v1204_v18  ;;  %v1365_v35 = vadd.f32 0.00028619796, %v1364_v23  ;;  %v1044_v23 = vpop.f32.mrf.mxu3 }
 0x41f   :  { %v1217_v16 = vmul.f32 %v1216_v12, %v6768_v50  ;;  %v1377_v20 = vmul.f32 %v1376_v14, %v6770_v51  ;;  %v1537_v24 = vmul.f32 %v1536_v15, %v6772_v4  ;;  %v1525_v37 = vadd.f32 0.00028619796, %v1524_v26 }
 0x420   :  { %v1696_v38 = vadd.f32 0.001143296, %v1695_v27  ;;  %v1206_v52 = vmul.f32 %v1205_v30, %v6768_v50  ;;  %v1366_v54 = vmul.f32 %v1365_v35, %v6770_v51  ;;  %v1684_v5 = vmul.f32 2.1237322e-06, %v6780_v17  ;;  %v11090_v35 = vld [vmem:[#allocation18_spill] sm:$0xff] }
 0x421   :  { %v1218_v19 = vadd.f32 0.014752088, %v1217_v16  ;;  %v1378_v31 = vadd.f32 0.014752088, %v1377_v20  ;;  %v1538_v36 = vadd.f32 0.014752088, %v1537_v24  ;;  %v1526_v56 = vmul.f32 %v1525_v37, %v6772_v4 }
 0x422   :  { %v1697_v57 = vmul.f32 %v1696_v38, %v6780_v17  ;;  %v1207_v59 = vadd.f32 0.0036580483, %v1206_v52  ;;  %v1367_v62 = vadd.f32 0.0036580483, %v1366_v54  ;;  %v1685_v11 = vadd.f32 0.00028619796, %v1684_v5 }
 0x423   :  { %v1219_v25 = vmul.f32 %v1218_v19, %v6768_v50  ;;  %v1379_v29 = vmul.f32 %v1378_v31, %v6770_v51  ;;  %v1539_v55 = vmul.f32 %v1538_v36, %v6772_v4  ;;  %v1527_v3 = vadd.f32 0.0036580483, %v1526_v56  ;;  %v11089_v16 = vld [vmem:[#allocation14_spill] sm:$0xff]  ;;  %v11092_v56 = vld [vmem:[#allocation11_spill] sm:$0xff] }
 0x424   :  { %v1698_v8 = vadd.f32 0.014752088, %v1697_v57  ;;  %v1208_v41 = vmul.f32 %v1207_v59, %v6768_v50  ;;  %v1368_v48 = vmul.f32 %v1367_v62, %v6770_v51  ;;  %v6817_v14 = vadd.f32 %v6789_v28, %v1139_v2  ;;  %v11093_v59 = vld [vmem:[#allocation15_spill] sm:$0xff]  ;;  %v11095_v2 = vld [vmem:[#allocation8_spill] sm:$0xff] }
 0x425   :  { %v1220_v34 = vadd.f32 0.112945676, %v1219_v25  ;;  %v1380_v60 = vadd.f32 0.112945676, %v1379_v29  ;;  %v1540_v63 = vadd.f32 0.112945676, %v1539_v55  ;;  %v1528_v10 = vmul.f32 %v1527_v3, %v6772_v4 }
 0x426   :  { %v1699_v12 = vmul.f32 %v1698_v8, %v6780_v17  ;;  %v6819_v15 = vmin.f32 %v1242_v13, 16.0  ;;  %v1143_v18 = vmul.f32 %v1131_v22, %v11089_v16  ;;  %v1209_v19 = vadd.f32 0.05243302, %v1208_v41  ;;  %v11091_v29 = vld [vmem:[#allocation7_spill] sm:$0xff] }
 0x427   :  { %v1221_v53 = vmul.f32 %v1220_v34, %v6768_v50  ;;  %v1381_v40 = vmul.f32 %v1380_v60, %v6770_v51  ;;  %v1541_v6 = vmul.f32 %v1540_v63, %v6772_v4  ;;  %v1132_v21 = vperm.slane %v1024_v9, 0  ;;  %v11094_v8 = vld [vmem:[#allocation19_spill] sm:$0xff] }
 0x428   :  { %v1369_v25 = vadd.f32 0.05243302, %v1368_v48  ;;  %v1529_v27 = vadd.f32 0.05243302, %v1528_v10  ;;  %v1163_v30 = vadd.f32 %v6789_v28, %v1143_v18  ;;  %v1686_v31 = vmul.f32 %v1685_v11, %v6780_v17  ;;  %v11096_v48 = vld [vmem:[#allocation12_spill] sm:$0xff] }
 0x429   :  { %v1222_v61 = vadd.f32 0.4994258, %v1221_v53  ;;  %v1382_v20 = vadd.f32 0.4994258, %v1381_v40  ;;  %v1542_v26 = vadd.f32 0.4994258, %v1541_v6  ;;  %v1147_v36 = vmul.f32 %v1131_v22, %v11090_v35 }
 0x42a   :  { %v1700_v32 = vadd.f32 0.112945676, %v1699_v12  ;;  %v6827_v33 = vmul.f32 0.70710677, %v6817_v14  ;;  %v1255_v34 = vmul.f32 3.8918573e-05, %v6819_v15  ;;  %v1210_v38 = vmul.f32 %v1209_v19, %v6768_v50 }
 0x42b   :  { %v1223_v47 = vmul.f32 %v1222_v61, %v6768_v50  ;;  %v1133_v37 = vperm.slane %v1044_v23, 0  ;;  %v1383_v52 = vmul.f32 %v1382_v20, %v6770_v51  ;;  %v6834_v53 = vmul.f32 %v1132_v21, %v11091_v29  ;;  %v11097_v11 = vld [vmem:[#allocation16_spill] sm:$0xff] }
 0x42c   :  { %v1370_v54 = vmul.f32 %v1369_v25, %v6770_v51  ;;  %v1543_v55 = vmul.f32 %v1542_v26, %v6772_v4  ;;  %v6840_v57 = vmul.f32 %v1132_v21, %v11092_v56  ;;  %v6843_v60 = vmul.f32 %v1132_v21, %v11093_v59 }
 0x42d   :  { %v6822_v24 = vadd.f32 1.0, %v1223_v47  ;;  %v1530_v22 = vmul.f32 %v1529_v27, %v6772_v4  ;;  %v6846_v61 = vmul.f32 0.70710677, %v1163_v30  ;;  %v1687_v62 = vadd.f32 0.0036580483, %v1686_v31 }
 0x42e   :  { %v1701_v63 = vmul.f32 %v1700_v32, %v6780_v17  ;;  %v1256_v3 = vadd.f32 0.001143296, %v1255_v34  ;;  %v1402_v5 = vmul.f32 %v6827_v33, %v6827_v33  ;;  %v6852_v13 = vmul.f32 %v1132_v21, %v11094_v8 }
 0x42f   :  { %5447 = vrcp.f32 %v6822_v24  ;;  %v1211_v41 = vadd.f32 0.18741608, %v1210_v38  ;;  %v6854_v40 = vadd.f32 1.0, %v1383_v52  ;;  %v1167_v46 = vadd.f32 %v6789_v28, %v1147_v36  ;;  %v11098_v28 = vld [vmem:[#allocation20_spill] sm:$0xff] }
 0x430   :  { %v6858_v47 = vmul.f32 %v1133_v37, %v11095_v2  ;;  %v6861_v6 = vmul.f32 %v1133_v37, %v11096_v48  ;;  %v1371_v9 = vadd.f32 0.18741608, %v1370_v54  ;;  %v6863_v10 = vadd.f32 1.0, %v1543_v55 }
 0x431   :  { %v6866_v12 = vmul.f32 %v1133_v37, %v11097_v11  ;;  %v1531_v16 = vadd.f32 0.18741608, %v1530_v22  ;;  %v1257_v18 = vmul.f32 %v1256_v3, %v6819_v15  ;;  %v1562_v19 = vmul.f32 %v6846_v61, %v6846_v61 }
 0x432   :  { %v6874_v21 = vmul.f32 %v1133_v37, %v11098_v28  ;;  %v1688_v23 = vmul.f32 %v1687_v62, %v6780_v17  ;;  %v1702_v25 = vadd.f32 0.4994258, %v1701_v63  ;;  %v6877_v26 = vmin.f32 %v1402_v5, 16.0 }
 0x433   :  { %v6880_v27 = vmul.f32 0.5, %v6742_v0  ;;  %v1212_v31 = vmul.f32 %v1211_v41, %v6768_v50  ;;  %5449 = vrcp.f32 %v6854_v40  ;;  %v6884_v32 = vmul.f32 0.70710677, %v1167_v46 }
 0x434   :  { %v6887_v34 = vmul.f32 0.5, %v6744_v43  ;;  %v6890_v35 = vmul.f32 0.5, %v6746_v1  ;;  %v1372_v36 = vmul.f32 %v1371_v9, %v6770_v51  ;;  %5451 = vrcp.f32 %v6863_v10 }
 0x435   :  { %v6871_v20 = vpop.eup %5447  ;;  %v1532_v37 = vmul.f32 %v1531_v16, %v6772_v4  ;;  %v1258_v50 = vadd.f32 0.014752088, %v1257_v18  ;;  %v6897_v38 = vmin.f32 %v1562_v19, 16.0  ;;  %v6900_v52 = vmul.f32 0.5, %v6748_v7 }
 0x436   :  { %11099 = vst [vmem:[#allocation5_spill] sm:$0xff] %v6887_v34  ;;  %v1226_v0 = vmul.f32 %v6871_v20, %v6822_v24  ;;  %v1689_v43 = vadd.f32 0.05243302, %v1688_v23  ;;  %v1703_v29 = vmul.f32 %v1702_v25, %v6780_v17  ;;  %v1415_v1 = vmul.f32 3.8918573e-05, %v6877_v26  ;;  %v1107_v34 = vpop.f32.mrf.mxu2 }
 0x437   :  { %v1213_v54 = vadd.f32 1.1283791, %v1212_v31  ;;  %v6905_v51 = vmul.f32 0.5, %v6793_v39  ;;  %v1244_v55 = vmul.f32 2.1237322e-06, %v6819_v15  ;;  %v1722_v4 = vmul.f32 %v6884_v32, %v6884_v32 }
 0x438   :  { %v1373_v56 = vadd.f32 1.1283791, %v1372_v36  ;;  %v6911_v59 = vmul.f32 0.5, %v6817_v14  ;;  %v6913_v7 = vmul.f32 0.5, %v1163_v30  ;;  %v6915_v22 = vmul.f32 0.5, %v1167_v46 }
 0x439   :  { %v6917_v62 = vpop.eup %5449  ;;  %v1227_v63 = vsub.f32 1.0, %v1226_v0  ;;  %v1533_v3 = vadd.f32 1.1283791, %v1532_v37  ;;  %v1259_v39 = vmul.f32 %v1258_v50, %v6819_v15  ;;  %v1575_v5 = vmul.f32 3.8918573e-05, %v6897_v38 }
 0x43a   :  { %v6921_v8 = vpop.eup %5451  ;;  %v1234_v41 = vand.u32 2147483647, %v6822_v24  ;;  %v1690_v2 = vmul.f32 %v1689_v43, %v6780_v17  ;;  %v6925_v14 = vadd.f32 1.0, %v1703_v29  ;;  %v1416_v30 = vadd.f32 0.001143296, %v1415_v1 }
 0x43b   :  { %v6928_v46 = vmul.f32 %v1213_v54, %v6751_v45  ;;  %v1245_v48 = vadd.f32 0.00028619796, %v1244_v55  ;;  %v1404_v9 = vmul.f32 2.1237322e-06, %v6877_v26  ;;  %v6931_v11 = vmin.f32 %v1722_v4, 16.0 }
 0x43c   :  { %vm1230_vm8 = vweird.f32 %v6822_v24  ;;  %v1236_v16 = vand.u32 2147483648, %v6822_v24  ;;  %v6936_v18 = vmul.f32 %v1373_v56, %v6754_v44  ;;  %v1386_v19 = vmul.f32 %v6917_v62, %v6854_v40 }
 0x43d   :  { %v1228_v28 = vmul.f32 %v6871_v20, %v1227_v63  ;;  %v1546_v45 = vmul.f32 %v6921_v8, %v6863_v10  ;;  %v1260_v23 = vadd.f32 0.112945676, %v1259_v39  ;;  %v1576_v25 = vadd.f32 0.001143296, %v1575_v5 }
 0x43e   :  { %v1394_v31 = vand.u32 2147483647, %v6854_v40  ;;  %v1691_v36 = vadd.f32 0.18741608, %v1690_v2  ;;  %5453 = vrcp.f32 %v6925_v14  ;;  %v1417_v0 = vmul.f32 %v1416_v30, %v6877_v26 }
 0x43f   :  { %vm6946_vm9 = vcmp.eq.f32.partialorder %v1234_v41, 8.507059e+37  ;;  %v1396_v37 = vand.u32 2147483648, %v6854_v40  ;;  %v1246_v50 = vmul.f32 %v1245_v48, %v6819_v15  ;;  %v1405_v43 = vadd.f32 0.00028619796, %v1404_v9 }
 0x440   :  { %v1735_v29 = vmul.f32 3.8918573e-05, %v6931_v11  ;;  %vm1231_vm10 = vweird.f32 %v6871_v20  ;;  %v1387_v1 = vsub.f32 1.0, %v1386_v19  ;;  %v6955_v54 = vmul.f32 %v1533_v3, %v6757_v42 }
 0x441   :  { %v1564_v55 = vmul.f32 2.1237322e-06, %v6897_v38  ;;  %v1229_v4 = vadd.f32 %v6871_v20, %v1228_v28  ;;  %v1547_v56 = vsub.f32 1.0, %v1546_v45  ;;  %v1261_v63 = vmul.f32 %v1260_v23, %v6819_v15  ;;  %vm6972_vm13 = vmor %vm1230_vm8, %vm1231_vm10 }
 0x442   :  { %v1577_v39 = vmul.f32 %v1576_v25, %v6897_v38  ;;  %v1237_v5 = vor.u32 1.1754944e-38, %v1236_v16  ;;  %vm1390_vm11 = vweird.f32 %v6854_v40  ;;  %v1692_v41 = vmul.f32 %v1691_v36, %v6780_v17 }
 0x443   :  { %v1418_v2 = vadd.f32 0.014752088, %v1417_v0  ;;  %v1736_v30 = vadd.f32 0.001143296, %v1735_v29  ;;  %vm1550_vm12 = vweird.f32 %v6863_v10  ;;  %v1554_v42 = vand.u32 2147483647, %v6863_v10 }
 0x444   :  { %v1247_v3 = vadd.f32 0.0036580483, %v1246_v50  ;;  %v1406_v48 = vmul.f32 %v1405_v43, %v6877_v26  ;;  %v6966_v9 = vpop.eup %5453  ;;  %v1388_v17 = vmul.f32 %v6917_v62, %v1387_v1  ;;  %v1397_v19 = vor.u32 1.1754944e-38, %v1396_v37 }
 0x445   :  { %v1565_v28 = vadd.f32 0.00028619796, %v1564_v55  ;;  %v1737_v45 = vmul.f32 %v1736_v30, %v6931_v11  ;;  %v1233_v23 = vsel %vm6972_vm13, %v6871_v20, %v1229_v4  ;;  %v1548_v25 = vmul.f32 %v6921_v8, %v1547_v56 }
 0x446   :  { %v1262_v36 = vadd.f32 0.4994258, %v1261_v63  ;;  %v1578_v0 = vadd.f32 0.014752088, %v1577_v39  ;;  %v1556_v24 = vand.u32 2147483648, %v6863_v10  ;;  %v1419_v43 = vmul.f32 %v1418_v2, %v6877_v26 }
 0x447   :  { %v1693_v50 = vadd.f32 1.1283791, %v1692_v41  ;;  %v1738_v29 = vadd.f32 0.014752088, %v1737_v45  ;;  %vm1391_vm14 = vweird.f32 %v6917_v62  ;;  %vm6985_vm15 = vcmp.eq.f32.partialorder %v1394_v31, 8.507059e+37 }
 0x448   :  { %v1706_v20 = vmul.f32 %v6966_v9, %v6925_v14  ;;  %v1248_v1 = vmul.f32 %v1247_v3, %v6819_v15  ;;  %v1407_v55 = vadd.f32 0.0036580483, %v1406_v48  ;;  %v1238_v4 = vsel %vm6946_vm9, %v1237_v5, %v1233_v23  ;;  %vm7015_vm3 = vmor %vm1390_vm11, %vm1391_vm14 }
 0x449   :  { %v1389_v56 = vadd.f32 %v6917_v62, %v1388_v17  ;;  %vm1551_vm1 = vweird.f32 %v6921_v8  ;;  %vm6996_vm2 = vcmp.eq.f32.partialorder %v1554_v42, 8.507059e+37  ;;  %v1566_v31 = vmul.f32 %v1565_v28, %v6897_v38 }
 0x44a   :  { %v1549_v39 = vadd.f32 %v6921_v8, %v1548_v25  ;;  %v1263_v41 = vmul.f32 %v1262_v36, %v6819_v15  ;;  %v1579_v2 = vmul.f32 %v1578_v0, %v6897_v38  ;;  %v7004_v30 = vperm.slane %v1107_v34, 0  ;;  %vm7027_vm5 = vmor %vm1550_vm12, %vm1551_vm1 }
 0x44b   :  { %v1557_v44 = vor.u32 1.1754944e-38, %v1556_v24  ;;  %v7007_v5 = vmul.f32 %v1693_v50, %v6766_v49  ;;  %v1420_v3 = vadd.f32 0.112945676, %v1419_v43  ;;  %v1739_v42 = vmul.f32 %v1738_v29, %v6931_v11 }
 0x44c   :  { %v1239_v48 = vmul.f32 %v1238_v4, %v6928_v46  ;;  %v1707_v17 = vsub.f32 1.0, %v1706_v20  ;;  %v1249_v34 = vadd.f32 0.05243302, %v1248_v1  ;;  %v1408_v28 = vmul.f32 %v1407_v55, %v6877_v26 }
 0x44d   :  { %v1393_v49 = vsel %vm7015_vm3, %v6917_v62, %v1389_v56  ;;  %v1714_v40 = vand.u32 2147483647, %v6925_v14  ;;  %v1716_v45 = vand.u32 2147483648, %v6925_v14  ;;  %v1567_v23 = vadd.f32 0.0036580483, %v1566_v31 }
 0x44e   :  { %v1553_v25 = vsel %vm7027_vm5, %v6921_v8, %v1549_v39  ;;  %v7036_v36 = vadd.f32 1.0, %v1263_v41  ;;  %v1580_v62 = vadd.f32 0.112945676, %v1579_v2  ;;  %v7040_v0 = vadd.f32 %v7004_v30, %v6834_v53 }
 0x44f   :  { %vm1710_vm6 = vweird.f32 %v6925_v14  ;;  %v1421_v10 = vmul.f32 %v1420_v3, %v6877_v26  ;;  %v1740_v24 = vadd.f32 0.112945676, %v1739_v42  ;;  %v7046_v50 = vadd.f32 %v7004_v30, %v6840_v57 }
 0x450   :  { %v7050_v43 = vadd.f32 %v7004_v30, %v6843_v60  ;;  %v5149_v8 = vclamps-f32 %v1239_v48, 1.0  ;;  %v1708_v29 = vmul.f32 %v6966_v9, %v1707_v17  ;;  %v1250_v20 = vmul.f32 %v1249_v34, %v6819_v15 }
 0x451   :  { %v1409_v53 = vadd.f32 0.05243302, %v1408_v28  ;;  %v1398_v1 = vsel %vm6985_vm15, %v1397_v19, %v1393_v49  ;;  %vm1711_vm7 = vweird.f32 %v6966_v9  ;;  %v1568_v55 = vmul.f32 %v1567_v23, %v6897_v38 }
 0x452   :  { %v1724_v57 = vmul.f32 2.1237322e-06, %v6931_v11  ;;  %v1558_v4 = vsel %vm6996_vm2, %v1557_v44, %v1553_v25  ;;  %5455 = vrcp.f32 %v7036_v36  ;;  %v1581_v60 = vmul.f32 %v1580_v62, %v6897_v38  ;;  %vm7100_vm9 = vmor %vm1710_vm6, %vm1711_vm7 }
 0x453   :  { %v7064_v56 = vmul.f32 0.70710677, %v7040_v0  ;;  %v1422_v31 = vadd.f32 0.4994258, %v1421_v10  ;;  %v1741_v37 = vmul.f32 %v1740_v24, %v6931_v11  ;;  %v7068_v19 = vmul.f32 0.70710677, %v7046_v50 }
 0x454   :  { %v7071_v39 = vmul.f32 0.70710677, %v7050_v43  ;;  %v1709_v41 = vadd.f32 %v6966_v9, %v1708_v29  ;;  %v1842_v63 = vadd.f32 1.0, %v5149_v8  ;;  %v1251_v2 = vadd.f32 0.18741608, %v1250_v20 }
 0x455   :  { %v1410_v44 = vmul.f32 %v1409_v53, %v6877_v26  ;;  %v1569_v3 = vadd.f32 0.05243302, %v1568_v55  ;;  %v1725_v42 = vadd.f32 0.00028619796, %v1724_v57  ;;  %v1282_v48 = vmul.f32 %v7064_v56, %v7064_v56 }
 0x456   :  { %v1442_v16 = vmul.f32 %v7068_v19, %v7068_v19  ;;  %v7080_v17 = vmul.f32 %v1398_v1, %v6936_v18  ;;  %vm7082_vm8 = vcmp.eq.f32.partialorder %v1714_v40, 8.507059e+37  ;;  %v1717_v28 = vor.u32 1.1754944e-38, %v1716_v45 }
 0x457   :  { %v1582_v49 = vadd.f32 0.4994258, %v1581_v60  ;;  %v1423_v46 = vmul.f32 %v1422_v31, %v6877_v26  ;;  %v1742_v23 = vadd.f32 0.4994258, %v1741_v37  ;;  %v7087_v25 = vmin.f32 %v1282_v48, 16.0 }
 0x458   :  { %v1602_v62 = vmul.f32 %v7071_v39, %v7071_v39  ;;  %v7091_v10 = vpop.eup %5455  ;;  %v7094_v24 = vmul.f32 %v1558_v4, %v6955_v54  ;;  %v1252_v40 = vmul.f32 %v1251_v2, %v6819_v15  ;;  %v1411_v45 = vadd.f32 0.18741608, %v1410_v44 }
 0x459   :  { %v7105_v8 = vmin.f32 %v1442_v16, 16.0  ;;  %v1713_v29 = vsel %vm7100_vm9, %v6966_v9, %v1709_v41  ;;  %v7111_v54 = vmul.f32 %v1842_v63, %v6880_v27  ;;  %v1570_v20 = vmul.f32 %v1569_v3, %v6897_v38 }
 0x45a   :  { %v1726_v14 = vmul.f32 %v1725_v42, %v6931_v11  ;;  %v1583_v53 = vmul.f32 %v1582_v49, %v6897_v38  ;;  %v7118_v1 = vadd.f32 %v7004_v30, %v6852_v13  ;;  %v1295_v15 = vmul.f32 3.8918573e-05, %v7087_v25 }
 0x45b   :  { %v1455_v55 = vmul.f32 3.8918573e-05, %v7105_v8  ;;  %v1266_v9 = vmul.f32 %v7091_v10, %v7036_v36  ;;  %v7124_v57 = vadd.f32 1.0, %v1423_v46  ;;  %v1743_v27 = vmul.f32 %v1742_v23, %v6931_v11 }
 0x45c   :  { %v7127_v4 = vmin.f32 %v1602_v62, 16.0  ;;  %v1253_v60 = vadd.f32 1.1283791, %v1252_v40  ;;  %v1412_v31 = vmul.f32 %v1411_v45, %v6877_v26  ;;  %v1296_v37 = vadd.f32 0.001143296, %v1295_v15 }
 0x45d   :  { %v1456_v41 = vadd.f32 0.001143296, %v1455_v55  ;;  %v1718_v13 = vsel %vm7082_vm8, %v1717_v28, %v1713_v29  ;;  %v1571_v30 = vadd.f32 0.18741608, %v1570_v20  ;;  %v1727_v63 = vadd.f32 0.0036580483, %v1726_v14  ;;  %v1127_v55 = vpop.f32.mrf.mxu3 }
 0x45e   :  { %v1284_v2 = vmul.f32 2.1237322e-06, %v7087_v25  ;;  %v7133_v44 = vadd.f32 1.0, %v1583_v53  ;;  %v7136_v3 = vmul.f32 0.70710677, %v7118_v1  ;;  %v1297_v42 = vmul.f32 %v1296_v37, %v7087_v25 }
 0x45f   :  { %v1457_v48 = vmul.f32 %v1456_v41, %v7105_v8  ;;  %v1267_v16 = vsub.f32 1.0, %v1266_v9  ;;  %5457 = vrcp.f32 %v7124_v57  ;;  %v7141_v26 = vadd.f32 1.0, %v1743_v27 }
 0x460   :  { %v1615_v34 = vmul.f32 3.8918573e-05, %v7127_v4  ;;  %v7145_v28 = vmul.f32 %v1718_v13, %v7007_v5  ;;  %v1274_v49 = vand.u32 2147483647, %v7036_v36  ;;  %v1413_v46 = vadd.f32 1.1283791, %v1412_v31 }
 0x461   :  { %v1298_v23 = vadd.f32 0.014752088, %v1297_v42  ;;  %v1276_v62 = vand.u32 2147483648, %v7036_v36  ;;  %v1572_v18 = vmul.f32 %v1571_v30, %v6897_v38  ;;  %v1285_v40 = vadd.f32 0.00028619796, %v1284_v2 }
 0x462   :  { %v1444_v45 = vmul.f32 2.1237322e-06, %v7105_v8  ;;  %5459 = vrcp.f32 %v7133_v44  ;;  %v1728_v29 = vmul.f32 %v1727_v63, %v6931_v11  ;;  %v1458_v20 = vadd.f32 0.014752088, %v1457_v48 }
 0x463   :  { %v1762_v5 = vmul.f32 %v7136_v3, %v7136_v3  ;;  %v1268_v14 = vmul.f32 %v7091_v10, %v1267_v16  ;;  %5461 = vrcp.f32 %v7141_v26  ;;  %v1299_v53 = vmul.f32 %v1298_v23, %v7087_v25 }
 0x464   :  { %v1616_v15 = vadd.f32 0.001143296, %v1615_v34  ;;  %v7159_v38 = vmul.f32 %v1253_v60, %v6803_v58  ;;  %vm1270_vm10 = vweird.f32 %v7036_v36  ;;  %v7163_v9 = vmul.f32 %v1413_v46, %v6827_v33 }
 0x465   :  { %v1436_v27 = vand.u32 2147483648, %v7124_v57  ;;  %v7166_v31 = vpop.eup %5457  ;;  %vm7168_vm11 = vcmp.eq.f32.partialorder %v1274_v49, 8.507059e+37  ;;  %v1277_v41 = vor.u32 1.1754944e-38, %v1276_v62  ;;  %v1573_v13 = vadd.f32 1.1283791, %v1572_v18 }
 0x466   :  { %v1286_v30 = vmul.f32 %v1285_v40, %v7087_v25  ;;  %v1445_v63 = vadd.f32 0.00028619796, %v1444_v45  ;;  %v1729_v58 = vadd.f32 0.05243302, %v1728_v29  ;;  %v1459_v60 = vmul.f32 %v1458_v20, %v7105_v8 }
 0x467   :  { %v7174_v2 = vmin.f32 %v1762_v5, 16.0  ;;  %v7176_v33 = vperm.slane %v1127_v55, 0  ;;  %v1269_v42 = vadd.f32 %v7091_v10, %v1268_v14  ;;  %vm1271_vm12 = vweird.f32 %v7091_v10 }
 0x468   :  { %v1300_v48 = vadd.f32 0.112945676, %v1299_v53  ;;  %v1617_v16 = vmul.f32 %v1616_v15, %v7127_v4  ;;  %v7181_v34 = vpop.eup %5459  ;;  %v1426_v49 = vmul.f32 %v7166_v31, %v7124_v57  ;;  %v7186_v23 = vor.u32 1.1754944e-38, %v1436_v27  ;;  %vm7200_vm13 = vmor %vm1270_vm10, %vm1271_vm12 }
 0x469   :  { %v7189_v62 = vmul.f32 0.5, %v7040_v0  ;;  %v7191_v18 = vpop.eup %5461  ;;  %v7194_v40 = vmul.f32 %v1573_v13, %v6846_v61  ;;  %v1287_v45 = vadd.f32 0.0036580483, %v1286_v30  ;;  %v1446_v29 = vmul.f32 %v1445_v63, %v7105_v8 }
 0x46a   :  { %v1604_v20 = vmul.f32 2.1237322e-06, %v7127_v4  ;;  %v1596_v14 = vand.u32 2147483648, %v7133_v44  ;;  %v1730_v0 = vmul.f32 %v1729_v58, %v6931_v11  ;;  %v1460_v53 = vadd.f32 0.112945676, %v1459_v60 }
 0x46b   :  { %11118 = vst [vmem:[#allocation9_spill] sm:$0xff] %v7189_v62  ;;  %v1775_v15 = vmul.f32 3.8918573e-05, %v7174_v2  ;;  %v1273_v61 = vsel %vm7200_vm13, %v7091_v10, %v1269_v42  ;;  %v1594_v55 = vand.u32 2147483647, %v7133_v44  ;;  %v1301_v27 = vmul.f32 %v1300_v48, %v7087_v25 }
 0x46c   :  { %v1618_v36 = vadd.f32 0.014752088, %v1617_v16  ;;  %v1427_v13 = vsub.f32 1.0, %v1426_v49  ;;  %v1586_v30 = vmul.f32 %v7181_v34, %v7133_v44  ;;  %v1746_v63 = vmul.f32 %v7191_v18, %v7141_v26 }
 0x46d   :  { %v7217_v58 = vmul.f32 0.5, %v7046_v50  ;;  %v1288_v60 = vmul.f32 %v1287_v45, %v7087_v25  ;;  %v1447_v46 = vadd.f32 0.0036580483, %v1446_v29  ;;  %v1605_v5 = vadd.f32 0.00028619796, %v1604_v20 }
 0x46e   :  { %v1776_v10 = vadd.f32 0.001143296, %v1775_v15  ;;  %v1278_v42 = vsel %vm7168_vm11, %v1277_v41, %v1273_v61  ;;  %v7222_v48 = vor.u32 1.1754944e-38, %v1596_v14  ;;  %v1731_v16 = vadd.f32 0.18741608, %v1730_v0 }
 0x46f   :  { %11121 = vst [vmem:[#allocation13_spill] sm:$0xff] %v7217_v58  ;;  %v1461_v49 = vmul.f32 %v1460_v53, %v7105_v8  ;;  %vm1431_vm14 = vweird.f32 %v7166_v31  ;;  %v7227_v62 = vmul.f32 0.5, %v7050_v43  ;;  %v7230_v50 = vmul.f32 0.5, %v7118_v1 }
 0x470   :  { %v1302_v45 = vadd.f32 0.4994258, %v1301_v27  ;;  %v1619_v29 = vmul.f32 %v1618_v36, %v7127_v4  ;;  %v1428_v20 = vmul.f32 %v7166_v31, %v1427_v13  ;;  %v1587_v37 = vsub.f32 1.0, %v1586_v30 }
 0x471   :  { %11122 = vst [vmem:[#allocation17_spill] sm:$0xff] %v7227_v62  ;;  %v1747_v41 = vsub.f32 1.0, %v1746_v63  ;;  %v7236_v14 = vadd.f32 %v7176_v33, %v6858_v47  ;;  %vm1430_vm15 = vweird.f32 %v7124_v57  ;;  %v1289_v0 = vadd.f32 0.05243302, %v1288_v60 }
 0x472   :  { %11123 = vst [vmem:[#allocation6_spill] sm:$0xff] %v7230_v50  ;;  %v1448_v43 = vmul.f32 %v1447_v46, %v7105_v8  ;;  %v1606_v53 = vmul.f32 %v1605_v5, %v7127_v4  ;;  %v1777_v1 = vmul.f32 %v1776_v10, %v7174_v2  ;;  %v7243_v15 = vmul.f32 %v1278_v42, %v7159_v38  ;;  %vm7296_vm8 = vmor %vm1430_vm15, %vm1431_vm14 }
 0x473   :  { %vm1590_vm1 = vweird.f32 %v7133_v44  ;;  %v1462_v61 = vadd.f32 0.4994258, %v1461_v49  ;;  %v1764_v27 = vmul.f32 2.1237322e-06, %v7174_v2  ;;  %v7249_v47 = vadd.f32 %v7176_v33, %v6861_v6 }
 0x474   :  { %v1732_v36 = vmul.f32 %v1731_v16, %v6931_v11  ;;  %v1303_v46 = vmul.f32 %v1302_v45, %v7087_v25  ;;  %v1620_v13 = vadd.f32 0.112945676, %v1619_v29  ;;  %v1778_v30 = vadd.f32 0.014752088, %v1777_v1 }
 0x475   :  { %v1429_v63 = vadd.f32 %v7166_v31, %v1428_v20  ;;  %v1588_v38 = vmul.f32 %v7181_v34, %v1587_v37  ;;  %vm1591_vm2 = vweird.f32 %v7181_v34  ;;  %v1748_v60 = vmul.f32 %v7191_v18, %v1747_v41 }
 0x476   :  { %v1290_v5 = vmul.f32 %v1289_v0, %v7087_v25  ;;  %v1449_v10 = vadd.f32 0.05243302, %v1448_v43  ;;  %v1607_v42 = vadd.f32 0.0036580483, %v1606_v53  ;;  %v7259_v6 = vmul.f32 0.70710677, %v7236_v14  ;;  %vm7309_vm9 = vmor %vm1590_vm1, %vm1591_vm2 }
 0x477   :  { %vm1750_vm3 = vweird.f32 %v7141_v26  ;;  %v1463_v11 = vmul.f32 %v1462_v61, %v7105_v8  ;;  %v1765_v16 = vadd.f32 0.00028619796, %v1764_v27  ;;  %v7264_v49 = vmul.f32 0.70710677, %v7249_v47 }
 0x478   :  { %v11124_v45 = vand.u32 2147483647, %v7124_v57  ;;  %v7272_v20 = vadd.f32 1.0, %v1303_v46  ;;  %v1621_v37 = vmul.f32 %v1620_v13, %v7127_v4  ;;  %v1779_v41 = vmul.f32 %v1778_v30, %v7174_v2 }
 0x479   :  { %v7278_v0 = vadd.f32 %v7176_v33, %v6866_v12  ;;  %v1589_v43 = vadd.f32 %v7181_v34, %v1588_v38  ;;  %vm7281_vm6 = vcmp.eq.f32.partialorder %v1594_v55, 8.507059e+37  ;;  %v1749_v1 = vadd.f32 %v7191_v18, %v1748_v60 }
 0x47a   :  { %vm7268_vm5 = vcmp.eq.f32.partialorder %v11124_v45, 8.507059e+37  ;;  %vm1751_vm7 = vweird.f32 %v7191_v18  ;;  %v1756_v61 = vand.u32 2147483648, %v7141_v26  ;;  %v1291_v27 = vadd.f32 0.18741608, %v1290_v5 }
 0x47b   :  { %v1450_v46 = vmul.f32 %v1449_v10, %v7105_v8  ;;  %v1608_v13 = vmul.f32 %v1607_v42, %v7127_v4  ;;  %v1322_v12 = vmul.f32 %v7259_v6, %v7259_v6  ;;  %v7300_v30 = vadd.f32 1.0, %v1463_v11  ;;  %vm7326_vm10 = vmor %vm1750_vm3, %vm1751_vm7 }
 0x47c   :  { %v1766_v38 = vmul.f32 %v1765_v16, %v7174_v2  ;;  %v1780_v60 = vadd.f32 0.112945676, %v1779_v41  ;;  %v1482_v5 = vmul.f32 %v7264_v49, %v7264_v49  ;;  %5463 = vrcp.f32 %v7272_v20 }
 0x47d   :  { %v1622_v57 = vadd.f32 0.4994258, %v1621_v37  ;;  %v7315_v42 = vmul.f32 0.70710677, %v7278_v0  ;;  %v7317_v11 = vmin.f32 %v1322_v12, 16.0  ;;  %v1433_v16 = vsel %vm7296_vm8, %v7166_v31, %v1429_v63 }
 0x47e   :  { %v1733_v45 = vadd.f32 1.1283791, %v1732_v36  ;;  %v1754_v37 = vand.u32 2147483647, %v7141_v26  ;;  %v1757_v41 = vor.u32 1.1754944e-38, %v1756_v61  ;;  %v1593_v12 = vsel %vm7309_vm9, %v7181_v34, %v1589_v43 }
 0x47f   :  { %v1753_v31 = vsel %vm7326_vm10, %v7191_v18, %v1749_v1  ;;  %v1609_v36 = vadd.f32 0.05243302, %v1608_v13  ;;  %v7337_v63 = vmin.f32 %v1482_v5, 16.0  ;;  %v1292_v55 = vmul.f32 %v1291_v27, %v7087_v25 }
 0x480   :  { %v1451_v62 = vadd.f32 0.18741608, %v1450_v46  ;;  %v1781_v58 = vmul.f32 %v1780_v60, %v7174_v2  ;;  %v1335_v50 = vmul.f32 3.8918573e-05, %v7317_v11  ;;  %5465 = vrcp.f32 %v7300_v30 }
 0x481   :  { %v1623_v26 = vmul.f32 %v1622_v57, %v7127_v4  ;;  %v1767_v61 = vadd.f32 0.0036580483, %v1766_v38  ;;  %v1642_v34 = vmul.f32 %v7315_v42, %v7315_v42  ;;  %v1438_v18 = vsel %vm7268_vm5, %v7186_v23, %v1433_v16 }
 0x482   :  { %v1734_v43 = vmul.f32 %v1733_v45, %v6884_v32  ;;  %vm1755_vm11 = vcmp.eq.f32.partialorder %v1754_v37, 8.507059e+37  ;;  %v1336_v25 = vadd.f32 0.001143296, %v1335_v50  ;;  %v7350_v1 = vpop.eup %5463  ;;  %v1598_v27 = vsel %vm7281_vm6, %v7222_v48, %v1593_v12 }
 0x483   :  { %v1758_v46 = vsel %vm1755_vm11, %v1757_v41, %v1753_v31  ;;  %v1610_v13 = vmul.f32 %v1609_v36, %v7127_v4  ;;  %v1495_v38 = vmul.f32 3.8918573e-05, %v7337_v63  ;;  %v1293_v60 = vadd.f32 1.1283791, %v1292_v55 }
 0x484   :  { %v1452_v5 = vmul.f32 %v1451_v62, %v7105_v8  ;;  %v1782_v29 = vadd.f32 0.4994258, %v1781_v58  ;;  %v1337_v23 = vmul.f32 %v1336_v25, %v7317_v11  ;;  %v7360_v32 = vmul.f32 %v1438_v18, %v7163_v9 }
 0x485   :  { %v7362_v50 = vadd.f32 1.0, %v1623_v26  ;;  %v1768_v10 = vmul.f32 %v1767_v61, %v7174_v2  ;;  %v7365_v53 = vmin.f32 %v1642_v34, 16.0  ;;  %v7368_v48 = vmul.f32 %v1598_v27, %v7194_v40 }
 0x486   :  { %v1306_v57 = vmul.f32 %v7350_v1, %v7272_v20  ;;  %v7374_v8 = vadd.f32 %v7176_v33, %v6874_v21  ;;  %v1338_v62 = vadd.f32 0.014752088, %v1337_v23  ;;  %v7376_v58 = vpop.eup %5465  ;;  %v7378_v9 = vmul.f32 %v1758_v46, %v1734_v43 }
 0x487   :  { %v1611_v16 = vadd.f32 0.18741608, %v1610_v13  ;;  %v1324_v45 = vmul.f32 2.1237322e-06, %v7317_v11  ;;  %v1496_v44 = vadd.f32 0.001143296, %v1495_v38  ;;  %v7382_v37 = vmul.f32 %v1293_v60, %v7064_v56 }
 0x488   :  { %11135 = vst [vmem:[#allocation10_spill] sm:$0xff] %v7374_v8  ;;  %v1453_v40 = vadd.f32 1.1283791, %v1452_v5  ;;  %v1783_v41 = vmul.f32 %v1782_v29, %v7174_v2  ;;  %v1339_v12 = vmul.f32 %v1338_v62, %v7317_v11  ;;  %5467 = vrcp.f32 %v7362_v50 }
 0x489   :  { %v1769_v21 = vadd.f32 0.05243302, %v1768_v10  ;;  %v1497_v33 = vmul.f32 %v1496_v44, %v7337_v63  ;;  %v1655_v31 = vmul.f32 3.8918573e-05, %v7365_v53  ;;  %v1307_v36 = vsub.f32 1.0, %v1306_v57 }
 0x48a   :  { %v1466_v55 = vmul.f32 %v7376_v58, %v7300_v30  ;;  %v7392_v26 = vmul.f32 0.70710677, %v7374_v8  ;;  %v1484_v56 = vmul.f32 2.1237322e-06, %v7337_v63  ;;  %v1612_v61 = vmul.f32 %v1611_v16, %v7127_v4 }
 0x48b   :  { %v1325_v34 = vadd.f32 0.00028619796, %v1324_v45  ;;  %v1498_v18 = vadd.f32 0.014752088, %v1497_v33  ;;  %v1656_v43 = vadd.f32 0.001143296, %v1655_v31  ;;  %vm1310_vm12 = vweird.f32 %v7272_v20 }
 0x48c   :  { %v1314_v25 = vand.u32 2147483647, %v7272_v20  ;;  %v1316_v27 = vand.u32 2147483648, %v7272_v20  ;;  %v7398_v46 = vadd.f32 1.0, %v1783_v41  ;;  %v1340_v13 = vadd.f32 0.112945676, %v1339_v12 }
 0x48d   :  { %v1476_v38 = vand.u32 2147483648, %v7300_v30  ;;  %v1770_v60 = vmul.f32 %v1769_v21, %v7174_v2  ;;  %v1499_v5 = vmul.f32 %v1498_v18, %v7337_v63  ;;  %v1657_v4 = vmul.f32 %v1656_v43, %v7365_v53 }
 0x48e   :  { %v7406_v29 = vmul.f32 %v1453_v40, %v7068_v19  ;;  %v1467_v23 = vsub.f32 1.0, %v1466_v55  ;;  %v1474_v10 = vand.u32 2147483647, %v7300_v30  ;;  %v1485_v57 = vadd.f32 0.00028619796, %v1484_v56  ;;  %v7409_v62 = vpop.eup %5467 }
 0x48f   :  { %v1308_v16 = vmul.f32 %v7350_v1, %v1307_v36  ;;  %v1326_v45 = vmul.f32 %v1325_v34, %v7317_v11  ;;  %v1500_v44 = vadd.f32 0.112945676, %v1499_v5  ;;  %v1802_v41 = vmul.f32 %v7392_v26, %v7392_v26 }
 0x490   :  { %vm1470_vm13 = vweird.f32 %v7300_v30  ;;  %v1613_v12 = vadd.f32 1.1283791, %v1612_v61  ;;  %5469 = vrcp.f32 %v7398_v46  ;;  %v1341_v19 = vmul.f32 %v1340_v13, %v7317_v11 }
 0x491   :  { %v1658_v40 = vadd.f32 0.014752088, %v1657_v4  ;;  %vm1311_vm14 = vweird.f32 %v7350_v1  ;;  %v1317_v21 = vor.u32 1.1754944e-38, %v1316_v27  ;;  %v1477_v33 = vor.u32 1.1754944e-38, %v1476_v38 }
 0x492   :  { %v1771_v31 = vadd.f32 0.18741608, %v1770_v60  ;;  %vm7419_vm15 = vcmp.eq.f32.partialorder %v1314_v25, 8.507059e+37  ;;  %v1468_v55 = vmul.f32 %v7376_v58, %v1467_v23  ;;  %v1486_v56 = vmul.f32 %v1485_v57, %v7337_v63  ;;  %vm7455_vm3 = vmor %vm1310_vm12, %vm1311_vm14 }
 0x493   :  { %v1501_v61 = vmul.f32 %v1500_v44, %v7337_v63  ;;  %v1659_v34 = vmul.f32 %v1658_v40, %v7365_v53  ;;  %v1309_v18 = vadd.f32 %v7350_v1, %v1308_v16  ;;  %v1626_v43 = vmul.f32 %v7409_v62, %v7362_v50 }
 0x494   :  { %v1327_v27 = vadd.f32 0.0036580483, %v1326_v45  ;;  %v7430_v13 = vmin.f32 %v1802_v41, 16.0  ;;  %vm7432_vm1 = vcmp.eq.f32.partialorder %v1474_v10, 8.507059e+37  ;;  %v7437_v38 = vmul.f32 %v1613_v12, %v7071_v39 }
 0x495   :  { %v7440_v60 = vmul.f32 0.5, %v7249_v47  ;;  %v1342_v5 = vadd.f32 0.4994258, %v1341_v19  ;;  %v1644_v4 = vmul.f32 2.1237322e-06, %v7365_v53  ;;  %vm1471_vm2 = vweird.f32 %v7376_v58 }
 0x496   :  { %v1636_v23 = vand.u32 2147483648, %v7362_v50  ;;  %v1772_v57 = vmul.f32 %v1771_v31, %v7174_v2  ;;  %v7447_v10 = vmul.f32 0.5, %v7278_v0  ;;  %v7449_v16 = vpop.eup %5469  ;;  %v1469_v47 = vadd.f32 %v7376_v58, %v1468_v55  ;;  %vm7472_vm5 = vmor %vm1470_vm13, %vm1471_vm2 }
 0x497   :  { %v1487_v45 = vadd.f32 0.0036580483, %v1486_v56  ;;  %v1502_v44 = vadd.f32 0.4994258, %v1501_v61  ;;  %v1660_v41 = vadd.f32 0.112945676, %v1659_v34  ;;  %v1313_v2 = vsel %vm7455_vm3, %v7350_v1, %v1309_v18 }
 0x498   :  { %v1627_v0 = vsub.f32 1.0, %v1626_v43  ;;  %v1328_v12 = vmul.f32 %v1327_v27, %v7317_v11  ;;  %v1804_v19 = vmul.f32 2.1237322e-06, %v7430_v13  ;;  %v1343_v20 = vmul.f32 %v1342_v5, %v7317_v11 }
 0x499   :  { %v1645_v40 = vadd.f32 0.00028619796, %v1644_v4  ;;  %v1661_v31 = vmul.f32 %v1660_v41, %v7365_v53  ;;  %v1815_v8 = vmul.f32 3.8918573e-05, %v7430_v13  ;;  %vm1631_vm6 = vweird.f32 %v7409_v62 }
 0x49a   :  { %v1634_v1 = vand.u32 2147483647, %v7362_v50  ;;  %v7478_v56 = vor.u32 1.1754944e-38, %v1636_v23  ;;  %v1786_v61 = vmul.f32 %v7449_v16, %v7398_v46  ;;  %v1473_v34 = vsel %vm7472_vm5, %v7376_v58, %v1469_v47 }
 0x49b   :  { %vm1630_vm7 = vweird.f32 %v7362_v50  ;;  %v1773_v30 = vadd.f32 1.1283791, %v1772_v57  ;;  %v1488_v18 = vmul.f32 %v1487_v45, %v7337_v63  ;;  %v1503_v43 = vmul.f32 %v1502_v44, %v7337_v63 }
 0x49c   :  { %v7490_v27 = vsel %vm7419_vm15, %v1317_v21, %v1313_v2  ;;  %v1628_v5 = vmul.f32 %v7409_v62, %v1627_v0  ;;  %v1329_v4 = vadd.f32 0.05243302, %v1328_v12  ;;  %v1662_v23 = vadd.f32 0.4994258, %v1661_v31  ;;  %vm7527_vm9 = vmor %vm1630_vm7, %vm1631_vm6 }
 0x49d   :  { %v7493_v39 = vadd.f32 1.0, %v1343_v20  ;;  %v1646_v41 = vmul.f32 %v1645_v40, %v7365_v53  ;;  %v1805_v58 = vadd.f32 0.00028619796, %v1804_v19  ;;  %v1816_v47 = vadd.f32 0.001143296, %v1815_v8 }
 0x49e   :  { %v1478_v57 = vsel %vm7432_vm1, %v1477_v33, %v1473_v34  ;;  %v1787_v45 = vsub.f32 1.0, %v1786_v61  ;;  %v1663_v44 = vmul.f32 %v1662_v23, %v7365_v53  ;;  %v5162_v36 = vclamps-f32 %v7378_v9, 1.0 }
 0x49f   :  { %v1489_v21 = vadd.f32 0.05243302, %v1488_v18  ;;  %v7500_v2 = vadd.f32 1.0, %v1503_v43  ;;  %v1817_v0 = vmul.f32 %v1816_v47, %v7430_v13  ;;  %v5158_v12 = vclamps-f32 %v7368_v48, 1.0 }
 0x4a0   :  { %v7505_v20 = vadd.f32 %v7409_v62, %v1628_v5  ;;  %v1330_v8 = vmul.f32 %v1329_v4, %v7317_v11  ;;  %v7508_v19 = vadd.f32 1.0, %v1663_v44  ;;  %v1855_v33 = vadd.f32 1.0, %v5162_v36 }
 0x4a1   :  { %5471 = vrcp.f32 %v7493_v39  ;;  %v1647_v25 = vadd.f32 0.0036580483, %v1646_v41  ;;  %v1806_v9 = vmul.f32 %v1805_v58, %v7430_v13  ;;  %v1818_v40 = vadd.f32 0.014752088, %v1817_v0 }
 0x4a2   :  { %v7513_v31 = vmul.f32 %v1478_v57, %v7406_v29  ;;  %v7516_v55 = vmul.f32 %v1773_v30, %v7136_v3  ;;  %5473 = vrcp.f32 %v7508_v19  ;;  %v1851_v48 = vadd.f32 1.0, %v5158_v12 }
 0x4a3   :  { %v1788_v61 = vmul.f32 %v7449_v16, %v1787_v45  ;;  %vm1790_vm8 = vweird.f32 %v7398_v46  ;;  %v1490_v34 = vmul.f32 %v1489_v21, %v7337_v63  ;;  %5475 = vrcp.f32 %v7500_v2 }
 0x4a4   :  { %v1794_v3 = vand.u32 2147483647, %v7398_v46  ;;  %v1331_v30 = vadd.f32 0.18741608, %v1330_v8  ;;  %v1819_v18 = vmul.f32 %v1818_v40, %v7430_v13  ;;  %v7534_v43 = vmul.f32 %v1855_v33, %v6915_v22 }
 0x4a5   :  { %v1633_v5 = vsel %vm7527_vm9, %v7409_v62, %v7505_v20  ;;  %v1796_v4 = vand.u32 2147483648, %v7398_v46  ;;  %v1648_v23 = vmul.f32 %v1647_v25, %v7365_v53  ;;  %v1807_v41 = vadd.f32 0.0036580483, %v1806_v9  ;;  %v11153_v20 = vld [vmem:[#allocation5_spill] sm:$0xff] }
 0x4a6   :  { %vm1791_vm10 = vweird.f32 %v7449_v16  ;;  %v1820_v58 = vadd.f32 0.112945676, %v1819_v18  ;;  %2086 = vrot.lane.b32.xlu2 %v7534_v43, %s5710_s0  ;;  %1992 = vrot.lane.b32.xlu0 %v7534_v43, %s5711_s23  ;;  %v7548_v22 = vmul.f32 %v1851_v48, %v6913_v7  ;;  %v5154_v47 = vclamps-f32 %v7360_v32, 1.0 }
 0x4a7   :  { %v7551_v57 = vpop.eup %5471  ;;  %v1789_v45 = vadd.f32 %v7449_v16, %v1788_v61  ;;  %v1491_v44 = vadd.f32 0.18741608, %v1490_v34  ;;  %v5150_v36 = vclamps-f32 %v7243_v15, 1.0  ;;  %v5161_v21 = vclamps-f32 %v7145_v28, 1.0  ;;  %vm7580_vm13 = vmor %vm1790_vm8, %vm1791_vm10 }
 0x4a8   :  { %v7556_v0 = vpop.eup %5473  ;;  %vm7558_vm11 = vcmp.eq.f32.partialorder %v1794_v3, 8.507059e+37  ;;  %v1332_v7 = vmul.f32 %v1331_v30, %v7317_v11  ;;  %v1821_v8 = vmul.f32 %v1820_v58, %v7430_v13  ;;  %1990 = vrot.lane.b32.xlu1 %v7548_v22, %s5711_s23  ;;  %v5157_v32 = vclamps-f32 %v7094_v24, 1.0 }
 0x4a9   :  { %v7567_v33 = vpop.eup %5475  ;;  %v1649_v15 = vadd.f32 0.05243302, %v1648_v23  ;;  %v1808_v28 = vmul.f32 %v1807_v41, %v7430_v13  ;;  %v1843_v25 = vadd.f32 1.0, %v5150_v36  ;;  %v1854_v9 = vadd.f32 1.0, %v5161_v21 }
 0x4aa   :  { %vm7572_vm12 = vcmp.eq.f32.partialorder %v1634_v1, 8.507059e+37  ;;  %v1346_v24 = vmul.f32 %v7551_v57, %v7493_v39  ;;  %v1822_v48 = vadd.f32 0.4994258, %v1821_v8  ;;  %v1847_v61 = vadd.f32 1.0, %v5154_v47 }
 0x4ab   :  { %v1850_v34 = vadd.f32 1.0, %v5157_v32  ;;  %v1793_v50 = vsel %vm7580_vm13, %v7449_v16, %v1789_v45  ;;  %v1797_v1 = vor.u32 1.1754944e-38, %v1796_v4  ;;  %v1492_v3 = vmul.f32 %v1491_v44, %v7337_v63 }
 0x4ac   :  { %v1666_v46 = vmul.f32 %v7556_v0, %v7508_v19  ;;  %v1506_v30 = vmul.f32 %v7567_v33, %v7500_v2  ;;  %v1823_v18 = vmul.f32 %v1822_v48, %v7430_v13  ;;  %v7596_v23 = vmul.f32 %v1843_v25, %v6905_v51 }
 0x4ad   :  { %v1874_v41 = vlaneseq  ;;  %v1333_v58 = vadd.f32 1.1283791, %v1332_v7  ;;  %v1650_v47 = vmul.f32 %v1649_v15, %v7365_v53  ;;  %v7600_v16 = vmul.f32 %v1854_v9, %v6900_v52 }
 0x4ae   :  { %v7603_v63 = vmul.f32 %v1850_v34, %v6890_v35  ;;  %v1347_v4 = vsub.f32 1.0, %v1346_v24  ;;  %v1809_v45 = vadd.f32 0.05243302, %v1808_v28  ;;  %v7605_v44 = vadd.f32 1.0, %v1823_v18  ;;  %2084 = vrot.lane.b32.xlu2 %v7548_v22, %s5710_s0  ;;  %1986 = vrot.lane.b32.xlu0 %v7596_v23, %s5711_s23 }
 0x4af   :  { %v7610_v51 = vmul.f32 %v1847_v61, %v6911_v59  ;;  %v1798_v52 = vsel %vm7558_vm11, %v1797_v1, %v1793_v50  ;;  %v1356_v36 = vand.u32 2147483648, %v7493_v39  ;;  %v1667_v35 = vsub.f32 1.0, %v1666_v46 }
 0x4b0   :  { %v5153_v21 = vclamps-f32 %v7080_v17, 1.0  ;;  %v1493_v7 = vadd.f32 1.1283791, %v1492_v3  ;;  %v1507_v8 = vsub.f32 1.0, %v1506_v30  ;;  %5477 = vrcp.f32 %v7605_v44 }
 0x4b1   :  { %1988 = vrot.lane.b32.xlu1 %v7610_v51, %s5711_s23  ;;  %v7622_v59 = vshrl.u32 %v1874_v41, 7  ;;  %v1354_v32 = vand.u32 2147483647, %v7493_v39  ;;  %v2172_v12 = vrot.slane %v7603_v63, 7  ;;  %v2176_v15 = vrot.slane %v7600_v16, 7 }
 0x4b2   :  { %v1846_v28 = vadd.f32 1.0, %v5153_v21  ;;  %v1348_v25 = vmul.f32 %v7551_v57, %v1347_v4  ;;  %v1651_v17 = vadd.f32 0.18741608, %v1650_v47  ;;  %v1810_v9 = vmul.f32 %v1809_v45, %v7430_v13 }
 0x4b3   :  { %vm2180_vm14 = vcmp.lt.s32.totalorder %v7622_v59, 1  ;;  %v7638_v11 = vsel %vm7572_vm12, %v7478_v56, %v1633_v5  ;;  %v7641_v24 = vmul.f32 %v1333_v58, %v7259_v6  ;;  %vm1350_vm15 = vweird.f32 %v7493_v39 }
 0x4b4   :  { %v1668_v48 = vmul.f32 %v7556_v0, %v1667_v35  ;;  %v7646_v61 = vmul.f32 %v1798_v52, %v7516_v55  ;;  %v1357_v34 = vor.u32 1.1754944e-38, %v1356_v36  ;;  %v7649_v29 = vmul.f32 %v1493_v7, %v7264_v49 }
 0x4b5   :  { %v1508_v62 = vmul.f32 %v7567_v33, %v1507_v8  ;;  %vm1510_vm1 = vweird.f32 %v7500_v2  ;;  %v1516_v56 = vand.u32 2147483648, %v7500_v2  ;;  %v7660_v6 = vsel %vm2180_vm14, %v2172_v12, %v2176_v15 }
 0x4b6   :  { %11152 = vst [vmem:[#allocation14_spill] sm:$0xff] %v7660_v6  ;;  %v7663_v55 = vmul.f32 %v1846_v28, %v11153_v20  ;;  %v5478_v5 = vpop.eup %5477  ;;  %v1349_v49 = vadd.f32 %v7551_v57, %v1348_v25  ;;  %vm1351_vm2 = vweird.f32 %v7551_v57  ;;  %vm7667_vm3 = vcmp.eq.f32.partialorder %v1354_v32, 8.507059e+37  ;;  %2076 = vrot.lane.b32.xlu0 %v7603_v63, %s5710_s0  ;;  %2352 = vrot.lane.b32.xlu2 %v7660_v6, %s5710_s0 }
 0x4b7   :  { %v1652_v50 = vmul.f32 %v1651_v17, %v7365_v53  ;;  %v1811_v1 = vadd.f32 0.18741608, %v1810_v9  ;;  %v1514_v3 = vand.u32 2147483647, %v7500_v2  ;;  %v1669_v46 = vadd.f32 %v7556_v0, %v1668_v48  ;;  %vm7690_vm7 = vmor %vm1350_vm15, %vm1351_vm2 }
 0x4b8   :  { %vm1671_vm5 = vweird.f32 %v7556_v0  ;;  %v1826_v30 = vmul.f32 %v5478_v5, %v7605_v44  ;;  %v1509_v18 = vadd.f32 %v7567_v33, %v1508_v62  ;;  %vm1511_vm6 = vweird.f32 %v7567_v33 }
 0x4b9   :  { %v1674_v53 = vand.u32 2147483647, %v7508_v19  ;;  %v1676_v58 = vand.u32 2147483648, %v7508_v19  ;;  %2078 = vrot.lane.b32.xlu1 %v7600_v16, %s5710_s0  ;;  %vm1670_vm8 = vweird.f32 %v7508_v19  ;;  %v2164_v45 = vrot.slane %v7111_v54, 7  ;;  %vm7709_vm10 = vmor %vm1510_vm1, %vm1511_vm6 }
 0x4ba   :  { %v1827_v4 = vsub.f32 1.0, %v1826_v30  ;;  %v2168_v52 = vrot.slane %v7663_v55, 7  ;;  %v1353_v36 = vsel %vm7690_vm7, %v7551_v57, %v1349_v49  ;;  %v1517_v35 = vor.u32 1.1754944e-38, %v1516_v56  ;;  %vm7702_vm9 = vmor %vm1670_vm8, %vm1671_vm5 }
 0x4bb   :  { %v1653_v21 = vadd.f32 1.1283791, %v1652_v50  ;;  %v1812_v7 = vmul.f32 %v1811_v1, %v7430_v13  ;;  %v1673_v57 = vsel %vm7702_vm9, %v7556_v0, %v1669_v46  ;;  %vm1831_vm11 = vweird.f32 %v5478_v5 }
 0x4bc   :  { %v1828_v8 = vmul.f32 %v5478_v5, %v1827_v4  ;;  %v1836_v32 = vand.u32 2147483648, %v7605_v44  ;;  %v1513_v28 = vsel %vm7709_vm10, %v7567_v33, %v1509_v18  ;;  %vm1675_vm12 = vcmp.eq.f32.partialorder %v1674_v53, 8.507059e+37 }
 0x4bd   :  { %v1677_v13 = vor.u32 1.1754944e-38, %v1676_v58  ;;  %v1834_v2 = vand.u32 2147483647, %v7605_v44  ;;  %vm1830_vm13 = vweird.f32 %v7605_v44  ;;  %v7728_v0 = vsel %vm2180_vm14, %v2164_v45, %v2168_v52 }
 0x4be   :  { %v1829_v25 = vadd.f32 %v5478_v5, %v1828_v8  ;;  %11162 = vst [vmem:[#allocation18_spill] sm:$0xff] %v7728_v0  ;;  %v1878_v17 = vadd.s32 24, %v7622_v59  ;;  %vm1515_vm15 = vcmp.eq.f32.partialorder %v1514_v3, 8.507059e+37  ;;  %v1654_v33 = vmul.f32 %v1653_v21, %v7315_v42  ;;  %vm1832_vm1 = vmor %vm1830_vm13, %vm1831_vm11  ;;  %1984 = vrot.lane.b32.xlu0 %v7600_v16, %s5711_s23  ;;  %2215 = vrot.lane.b32.xlu2 %v7728_v0, %s5711_s23 }
 0x4bf   :  { %v1678_v9 = vsel %vm1675_vm12, %v1677_v13, %v1673_v57  ;;  %v1813_v48 = vadd.f32 1.1283791, %v1812_v7  ;;  %v1358_v44 = vsel %vm7667_vm3, %v1357_v34, %v1353_v36  ;;  %v1518_v62 = vsel %vm1515_vm15, %v1517_v35, %v1513_v28 }
 0x4c0   :  { %v1833_v56 = vsel %vm1832_vm1, %v5478_v5, %v1829_v25  ;;  %v1837_v20 = vor.u32 1.1754944e-38, %v1836_v32  ;;  %vm1835_vm2 = vcmp.eq.f32.partialorder %v1834_v2, 8.507059e+37  ;;  %v2445_v42 = vrot.slane %v7603_v63, 1 }
 0x4c1   :  { %2074 = vrot.lane.b32.xlu1 %v7663_v55, %s5710_s0  ;;  %v2449_v49 = vrot.slane %v7600_v16, 1  ;;  %v2438_v50 = vrot.slane %v7596_v23, 1  ;;  %v1679_v1 = vmul.f32 %v1678_v9, %v1654_v33  ;;  %vm2453_vm5 = vcmp.lt.s32.totalorder %v7622_v59, 7 }
 0x4c2   :  { %v1838_v3 = vsel %vm1835_vm2, %v1837_v20, %v1833_v56  ;;  %v1904_v46 = vand.u32 15, %v1878_v17  ;;  %v1639_v34 = vmul.f32 %v7638_v11, %v7437_v38  ;;  %v1519_v5 = vmul.f32 %v1518_v62, %v7649_v29 }
 0x4c3   :  { %v1814_v40 = vmul.f32 %v1813_v48, %v7392_v26  ;;  %v2442_v30 = vrot.slane %v7610_v51, 1  ;;  %v1319_v18 = vmul.f32 %v7490_v27, %v7382_v37  ;;  %v1359_v53 = vmul.f32 %v1358_v44, %v7641_v24 }
 0x4c4   :  { %v2441_v58 = vrot.slane %v7663_v55, 1  ;;  %v2446_v47 = vrot.slane %v7548_v22, 1  ;;  %v7758_v38 = vsel %vm2453_vm5, %v2445_v42, %v2449_v49  ;;  %vm7766_vm3 = vcmp.lt.s32.totalorder %v1904_v46, 15 }
 0x4c5   :  { %v1839_v4 = vmul.f32 %v1838_v3, %v1814_v40  ;;  %11163 = vst [vmem:[#allocation7_spill] sm:$0xff] %v7758_v38  ;;  %v7764_v26 = vsel %vm2453_vm5, %v2438_v50, %v2442_v30  ;;  %v5163_v27 = vclamps-f32 %v7646_v61, 1.0  ;;  %v5160_v11 = vclamps-f32 %v1679_v1, 1.0  ;;  %v11172_v40 = vld [vmem:[#allocation10_spill] sm:$0xff] }
 0x4c6   :  { %11164 = vst [vmem:[#allocation11_spill] sm:$0xff] %v7764_v26  ;;  %v2437_v24 = vrot.slane %v7111_v54, 1  ;;  %1978 = vrot.lane.b32.xlu0 %v7111_v54, %s5711_s23  ;;  %2624 = vrot.lane.b32.xlu2 %v7758_v38, %s5710_s0  ;;  %v1883_v29 = vand.u32 15, %v7622_v59  ;;  %v5155_v36 = vclamps-f32 %v7513_v31, 1.0  ;;  %v5159_v35 = vclamps-f32 %v1639_v34, 1.0 }
 0x4c7   :  { %v5156_v21 = vclamps-f32 %v1519_v5, 1.0  ;;  %v2165_v39 = vrot.slane %v7596_v23, 7  ;;  %v5152_v7 = vclamps-f32 %v1359_v53, 1.0  ;;  %v7789_v19 = vsel %vm2453_vm5, %v2442_v30, %v2446_v47 }
 0x4c8   :  { %v7783_v61 = vsel %vm2453_vm5, %v2437_v24, %v2441_v58  ;;  %v5712_v31 = vmov 0.0   ;;  %v1877_v8 = vadd.s32 16, %v7622_v59  ;;  %v5164_v32 = vclamps-f32 %v1839_v4, 1.0 }
 0x4c9   :  { %11167 = vst [vmem:[#allocation15_spill] sm:$0xff] %v7783_v61  ;;  %2072 = vrot.lane.b32.xlu1 %v7111_v54, %s5710_s0  ;;  %v7796_v57 = vsel %vm7766_vm3, 1.0, %v5712_v31  ;;  %v1853_v28 = vadd.f32 1.0, %v5160_v11  ;;  %v2169_v13 = vrot.slane %v7610_v51, 7  ;;  %v2177_v2 = vrot.slane %v7534_v43, 7 }
 0x4ca   :  { %v1856_v25 = vadd.f32 1.0, %v5163_v27  ;;  %v1849_v17 = vadd.f32 1.0, %v5156_v21  ;;  %vm7801_vm6 = vcmp.gt.s32.totalorder %v1883_v29, 0  ;;  %v1848_v9 = vadd.f32 1.0, %v5155_v36  ;;  %v11177_v27 = vld [vmem:[#allocation17_spill] sm:$0xff] }
 0x4cb   :  { %v1852_v48 = vadd.f32 1.0, %v5159_v35  ;;  %v2466_v44 = vsel %vm2453_vm5, %v2449_v49, %v2437_v24  ;;  %v1845_v62 = vadd.f32 1.0, %v5152_v7  ;;  %v5151_v1 = vclamps-f32 %v1319_v18, 1.0  ;;  %v11175_v18 = vld [vmem:[#allocation13_spill] sm:$0xff] }
 0x4cc   :  { %v7808_v56 = vmul.f32 %v1849_v17, %v7440_v60  ;;  %v7811_v20 = vmul.f32 %v7796_v57, %v2466_v44  ;;  %v1173_v3 = vmul.f32 0.5, %v7236_v14  ;;  %v1897_v46 = vand.u32 15, %v1877_v8  ;;  %v11174_v60 = vld [vmem:[#allocation6_spill] sm:$0xff]  ;;  %v11180_v36 = vld [vmem:[#allocation9_spill] sm:$0xff] }
 0x4cd   :  { %v1857_v34 = vadd.f32 1.0, %v5164_v32  ;;  %v7815_v5 = vmul.f32 %v1853_v28, %v7447_v10  ;;  %v1185_v30 = vmul.f32 0.5, %v11172_v40  ;;  %v7822_v49 = vsel %vm2180_vm14, %v2165_v39, %v2169_v13 }
 0x4ce   :  { %11170 = vst [vmem:[#allocation19_spill] sm:$0xff] %v7811_v20  ;;  %v7825_v53 = vmul.f32 %v1856_v25, %v11174_v60  ;;  %v1844_v4 = vadd.f32 1.0, %v5151_v1  ;;  %2219 = vrot.lane.b32.xlu0 %v7660_v6, %s5711_s23  ;;  %2356 = vrot.lane.b32.xlu2 %v7822_v49, %s5710_s0  ;;  %v7834_v14 = vsel %vm7801_vm6, 1.0, %v5712_v31  ;;  %v2194_v10 = vsel %vm2180_vm14, %v2177_v2, %v2165_v39 }
 0x4cf   :  { %11171 = vst [vmem:[#allocation8_spill] sm:$0xff] %v7815_v5  ;;  %v7839_v37 = vmul.f32 %v1848_v9, %v11175_v18  ;;  %v7842_v11 = vmul.f32 %v1852_v48, %v11177_v27  ;;  %v7844_v24 = vmul.f32 %v1845_v62, %v1173_v3  ;;  %v10967_v29 = vrot.slane %v7808_v56, 7 }
 0x4d0   :  { %11173 = vst [vmem:[#allocation12_spill] sm:$0xff] %v7822_v49  ;;  %v7848_v35 = vmul.f32 %v1844_v4, %v11180_v36  ;;  %vm1929_vm7 = vcmp.gt.s32.totalorder %v1897_v46, 0  ;;  %v7852_v21 = vmul.f32 %v1857_v34, %v1185_v30  ;;  %v10956_v39 = vrot.slane %v7815_v5, 7 }
 0x4d1   :  { %11176 = vst [vmem:[#allocation16_spill] sm:$0xff] %v7839_v37  ;;  %1982 = vrot.lane.b32.xlu1 %v7603_v63, %s5711_s23  ;;  %v2173_v7 = vrot.slane %v7548_v22, 7  ;;  %v7857_v8 = vmul.f32 %v7834_v14, %v2194_v10  ;;  %v10963_v32 = vrot.slane %v7825_v53, 7  ;;  %v1876_v28 = vadd.s32 8, %v7622_v59 }
 0x4d2   :  { %11178 = vst [vmem:[#allocation20_spill] sm:$0xff] %v7842_v11  ;;  %v10957_v25 = vrot.slane %v7842_v11, 7  ;;  %v10954_v17 = vrot.slane %v7848_v35, 7  ;;  %v10955_v33 = vrot.slane %v7839_v37, 7  ;;  %v2450_v9 = vrot.slane %v7534_v43, 1 }
 0x4d3   :  { %11179 = vst [vmem:[#allocation5_spill] sm:$0xff] %v7844_v24  ;;  %v5166_v48 = vsel %vm1929_vm7, 1.0, %v5712_v31  ;;  %v10966_v44 = vrot.slane %v7844_v24, 7  ;;  %v2188_v62 = vsel %vm2180_vm14, %v10967_v29, %v10956_v39  ;;  %v10959_v1 = vrot.slane %v7852_v21, 7 }
 0x4d4   :  { %11181 = vst [vmem:[#allocation10_spill] sm:$0xff] %v7848_v35  ;;  %v10958_v3 = vrot.slane %v7848_v35, 1  ;;  %v7875_v46 = vmul.f32 %v5166_v48, %v2188_v62  ;;  %v2447_v34 = vrot.slane %v7842_v11, 1  ;;  %v7880_v40 = vsel %vm2180_vm14, %v2173_v7, %v2177_v2 }
 0x4d5   :  { %11182 = vst [vmem:[#allocation6_spill] sm:$0xff] %v7857_v8  ;;  %v2195_v30 = vsel %vm2180_vm14, %v10963_v32, %v10954_v17  ;;  %v1890_v60 = vand.u32 15, %v1876_v28  ;;  %v2187_v2 = vsel %vm2180_vm14, %v10955_v33, %v10957_v25  ;;  %v2451_v10 = vrot.slane %v7825_v53, 1 }
 0x4d6   :  { %11183 = vst [vmem:[#allocation13_spill] sm:$0xff] %v7875_v46  ;;  %2360 = vrot.lane.b32.xlu0 %v7880_v40, %s5710_s0  ;;  %2221 = vrot.lane.b32.xlu2 %v7857_v8, %s5711_s23  ;;  %v7893_v4 = vmul.f32 %v7834_v14, %v2195_v30  ;;  %v10965_v18 = vrot.slane %v7852_v21, 1  ;;  %v7903_v27 = vmul.f32 %v5166_v48, %v2187_v2  ;;  %v10960_v36 = vrot.slane %v7844_v24, 1 }
 0x4d7   :  { %v2467_v28 = vsel %vm2453_vm5, %v2450_v9, %v2438_v50  ;;  %v7914_v62 = vsel %vm2453_vm5, %v2447_v34, %v2451_v10  ;;  %v2468_v30 = vsel %vm2453_vm5, %v2451_v10, %v10958_v3  ;;  %v2196_v2 = vsel %vm2180_vm14, %v10959_v1, %v10966_v44 }
 0x4d8   :  { %11184 = vst [vmem:[#allocation17_spill] sm:$0xff] %v7893_v4  ;;  %v10964_v17 = vrot.slane %v7815_v5, 1  ;;  %v10962_v50 = vrot.slane %v7839_v37, 1  ;;  %v10961_v33 = vrot.slane %v7808_v56, 1  ;;  %v7930_v39 = vmul.f32 %v7796_v57, %v2468_v30 }
 0x4d9   :  { %11185 = vst [vmem:[#allocation9_spill] sm:$0xff] %v7903_v27  ;;  %1980 = vrot.lane.b32.xlu1 %v7663_v55, %s5711_s23  ;;  %vm1940_vm8 = vcmp.lt.s32.totalorder %v1890_v60, 15  ;;  %v7933_v25 = vmul.f32 %v7834_v14, %v2196_v2  ;;  %v2469_v10 = vsel %vm2453_vm5, %v10965_v18, %v10960_v36  ;;  %v7942_v3 = vmul.f32 %v7796_v57, %v2467_v28 }
 0x4da   :  { %11186 = vst [vmem:[#allocation21_spill] sm:$0xff] %v7914_v62  ;;  %v7945_v1 = vmul.f32 %v7796_v57, %v2469_v10  ;;  %v5167_v30 = vsel %vm1940_vm8, 1.0, %v5712_v31  ;;  %v2460_v60 = vsel %vm2453_vm5, %v10962_v50, %v2447_v34  ;;  %v2461_v2 = vsel %vm2453_vm5, %v10961_v33, %v10964_v17  ;;  %v8089_v33 = vld [vmem:[%s11203_s5 + $0x4] ss:$8 sm:$0xf] }
 0x4db   :  { %11187 = vst [vmem:[#allocation22_spill] sm:$0xff] %v7930_v39  ;;  %v7962_v57 = vmul.f32 %v5167_v30, %v2460_v60  ;;  %v7964_v31 = vmul.f32 %v5167_v30, %v2461_v2  ;;  %v2186_v34 = vsel %vm2180_vm14, %v2169_v13, %v2173_v7  ;;  %v2185_v28 = vsel %vm2180_vm14, %v2168_v52, %v2172_v12  ;;  %v8094_v50 = vld [vmem:[%s11203_s5 + $0x3] ss:$8 sm:$0xf] }
 0x4dc   :  { %11188 = vst [vmem:[#allocation23_spill] sm:$0xff] %v7933_v25  ;;  %v7978_v10 = vmul.f32 %v5166_v48, %v2186_v34  ;;  %v7980_v60 = vmul.f32 %v5166_v48, %v2185_v28  ;;  %v2193_v12 = vsel %vm2180_vm14, %v2176_v15, %v2164_v45  ;;  %v2458_v13 = vsel %vm2453_vm5, %v2441_v58, %v2445_v42 }
 0x4dd   :  { %11189 = vst [vmem:[#allocation24_spill] sm:$0xff] %v7942_v3  ;;  %v7995_v52 = vmul.f32 %v7834_v14, %v2193_v12  ;;  %v8009_v15 = vmul.f32 %v5167_v30, %v2458_v13  ;;  %v8025_v45 = vsel %vm2453_vm5, %v2446_v47, %v2450_v9  ;;  %v8076_v28 = vmul.f32 %v5167_v30, %v7789_v19 }
 0x4de   :  { %11190 = vst [vmem:[#allocation25_spill] sm:$0xff] %v7945_v1  ;;  %2490 = vrot.lane.b32.xlu0 %v7758_v38, %s5711_s23  ;;  %2500 = vrot.lane.b32.xlu2 %v7942_v3, %s5711_s23  ;;  %v8097_v19 = vand.u32 127, %v1874_v41  ;;  %v1955_v30 = vperm.slane %v8089_v33, 1  ;;  %v2033_v32 = vperm.slane %v8094_v50, 1  ;;  %v11204_v38 = vrot.slane %v7808_v56, 7 }
 0x4df   :  { %11191 = vst [vmem:[#allocation26_spill] sm:$0xff] %v7962_v57 }
 0x4e0   :  { %11192 = vst [vmem:[#allocation27_spill] sm:$0xff] %v7964_v31  ;;  %vm2012_vm9 = vcmp.lt.s32.totalorder %v8097_v19, 32  ;;  %v1975_v44 = vmul.f32 %v1955_v30, %v7534_v43 }
 0x4e1   :  { %2082 = vrot.lane.b32.xlu1 %v7610_v51, %s5710_s0  ;;  %11193 = vst [vmem:[#allocation28_spill] sm:$0xff] %v7980_v60 }
 0x4e2   :  { %11194 = vst [vmem:[#allocation29_spill] sm:$0xff] %v7995_v52 }
 0x4e3   :  { %11195 = vst [vmem:[#allocation30_spill] sm:$0xff] %v8009_v15 }
 0x4e4   :  { %11196 = vst [vmem:[#allocation31_spill] sm:$0xff] %v8025_v45 }
 0x4e5   :  { %11202 = vst [vmem:[#allocation37_spill] sm:$0xff] %v8076_v28 }
 0x4e6   :  { %2225 = vrot.lane.b32.xlu0 %v7978_v10, %s5711_s23  ;;  %2217 = vrot.lane.b32.xlu2 %v7980_v60, %s5711_s23 }
 0x4e9   :  { %2080 = vrot.lane.b32.xlu1 %v7596_v23, %s5710_s0 }
 0x4ee   :  { %2346 = vrot.lane.b32.xlu0 %v7995_v52, %s5710_s0  ;;  %2213 = vrot.lane.b32.xlu2 %v7995_v52, %s5711_s23 }
 0x4f1   :  { %2227 = vrot.lane.b32.xlu1 %v7880_v40, %s5711_s23 }
 0x4f6   :  { %2358 = vrot.lane.b32.xlu0 %v7978_v10, %s5710_s0  ;;  %2622 = vrot.lane.b32.xlu2 %v8009_v15, %s5710_s0 }
 0x4f9   :  { %2223 = vrot.lane.b32.xlu1 %v7822_v49, %s5711_s23  ;;  %v11205_v49 = vrot.slane %v7844_v24, 7 }
 0x4fe   :  { %2488 = vrot.lane.b32.xlu0 %v8009_v15, %s5711_s23  ;;  %2354 = vrot.lane.b32.xlu2 %v7857_v8, %s5710_s0 }
 0x500   :  { %v8029_v42 = vpop.permute.xlu2 %2086 }
 0x501   :  { %2498 = vrot.lane.b32.xlu1 %v8025_v45, %s5711_s23 }
 0x506   :  { %2000 = vrot.lane.b32.xlu0 %v7825_v53, %s5711_s23  ;;  %2008 = vrot.lane.b32.xlu2 %v7852_v21, %s5711_s23 }
 0x508   :  { %v8037_v58 = vpop.permute.xlu2 %2084 }
 0x509   :  { %2348 = vrot.lane.b32.xlu1 %v7728_v0, %s5710_s0  ;;  %v8127_v0 = vsel %vm2180_vm14, %v11205_v49, %v11204_v38  ;;  %v1963_v38 = vmul.f32 %v1955_v30, %v7596_v23 }
 0x50a   :  { %11206 = vst [vmem:[#allocation38_spill] sm:$0xff] %v8127_v0 }
 0x50e   :  { %2102 = vrot.lane.b32.xlu0 %v7852_v21, %s5710_s0  ;;  %2094 = vrot.lane.b32.xlu2 %v7825_v53, %s5710_s0 }
 0x510   :  { %v8045_v47 = vpop.permute.xlu2 %2352 }
 0x511   :  { %2494 = vrot.lane.b32.xlu1 %v7764_v26, %s5711_s23  ;;  %11197 = vst [vmem:[#allocation32_spill] sm:$0xff] %v8045_v47  ;;  %v11213_v47 = vrot.slane %v7842_v11, 7 }
 0x516   :  { %2006 = vrot.lane.b32.xlu0 %v7815_v5, %s5711_s23  ;;  %1996 = vrot.lane.b32.xlu2 %v7839_v37, %s5711_s23 }
 0x518   :  { %v8053_v14 = vpop.permute.xlu0 %1992  ;;  %v8055_v7 = vpop.permute.xlu2 %2215 }
 0x519   :  { %2620 = vrot.lane.b32.xlu1 %v7783_v61, %s5710_s0  ;;  %11198 = vst [vmem:[#allocation33_spill] sm:$0xff] %v8055_v7 }
 0x51a   :  { %v8057_v9 = vpop.permute.xlu1 %1990 }
 0x51b   :  { %11199 = vst [vmem:[#allocation34_spill] sm:$0xff] %v8057_v9 }
 0x51e   :  { %2100 = vrot.lane.b32.xlu0 %v7815_v5, %s5710_s0  ;;  %2092 = vrot.lane.b32.xlu2 %v7842_v11, %s5710_s0 }
 0x520   :  { %v8065_v48 = vpop.permute.xlu0 %1986  ;;  %v8067_v2 = vpop.permute.xlu2 %2624 }
 0x521   :  { %2350 = vrot.lane.b32.xlu1 %v7980_v60, %s5710_s0  ;;  %11200 = vst [vmem:[#allocation35_spill] sm:$0xff] %v8065_v48  ;;  %v11209_v60 = vrot.slane %v7852_v21, 1 }
 0x522   :  { %11201 = vst [vmem:[#allocation36_spill] sm:$0xff] %v8067_v2 }
 0x523   :  { %v8069_v34 = vpop.permute.xlu1 %1988 }
 0x526   :  { %2002 = vrot.lane.b32.xlu0 %v7844_v24, %s5711_s23  ;;  %2004 = vrot.lane.b32.xlu2 %v7808_v56, %s5711_s23 }
 0x528   :  { %v8080_v12 = vpop.permute.xlu0 %2076  ;;  %v8082_v13 = vpop.permute.xlu2 %2356 }
 0x529   :  { %2496 = vrot.lane.b32.xlu1 %v8076_v28, %s5711_s23  ;;  %v11226_v28 = vrot.slane %v7848_v35, 7 }
 0x52b   :  { %v8084_v36 = vpop.permute.xlu1 %2078 }
 0x52e   :  { %2096 = vrot.lane.b32.xlu0 %v7844_v24, %s5710_s0  ;;  %2098 = vrot.lane.b32.xlu2 %v7808_v56, %s5710_s0 }
 0x530   :  { %v8108_v17 = vpop.permute.xlu0 %1984  ;;  %v8110_v18 = vpop.permute.xlu2 %2221 }
 0x531   :  { %2626 = vrot.lane.b32.xlu1 %v7811_v20, %s5710_s0  ;;  %v2024_v41 = vsel %vm2012_vm9, %v8108_v17, %v8053_v14 }
 0x532   :  { %v2053_v29 = vmul.f32 %v2033_v32, %v2024_v41 }
 0x533   :  { %v8117_v15 = vpop.permute.xlu1 %2074 }
 0x534   :  { %v8119_v52 = vadd.f32 %v2053_v29, %v1975_v44 }
 0x536   :  { %2372 = vrot.lane.b32.xlu0 %v8127_v0, %s5710_s0  ;;  %2088 = vrot.lane.b32.xlu2 %v7848_v35, %s5710_s0 }
 0x538   :  { %v8135_v43 = vpop.permute.xlu0 %1978  ;;  %v8137_v29 = vpop.permute.xlu2 %2500 }
 0x539   :  { %2492 = vrot.lane.b32.xlu1 %v7811_v20, %s5711_s23  ;;  %11207 = vst [vmem:[#allocation39_spill] sm:$0xff] %v8137_v29  ;;  %v2021_v44 = vsel %vm2012_vm9, %v8135_v43, %v8065_v48  ;;  %v11210_v20 = vrot.slane %v7815_v5, 1  ;;  %v11212_v29 = vrot.slane %v7825_v53, 7  ;;  %v11218_v48 = vrot.slane %v7815_v5, 7 }
 0x53a   :  { %v2041_v49 = vmul.f32 %v2033_v32, %v2021_v44 }
 0x53b   :  { %v8144_v41 = vpop.permute.xlu1 %2072  ;;  %v8154_v2 = vsel %vm2453_vm5, %v11210_v20, %v11209_v60  ;;  %v8162_v23 = vsel %vm2180_vm14, %v11213_v47, %v11212_v29  ;;  %v1971_v29 = vmul.f32 %v1955_v30, %v7548_v22 }
 0x53c   :  { %11208 = vst [vmem:[#allocation40_spill] sm:$0xff] %v8144_v41  ;;  %v8146_v8 = vadd.f32 %v2041_v49, %v1963_v38  ;;  %v11217_v49 = vrot.slane %v7852_v21, 7 }
 0x53d   :  { %11211 = vst [vmem:[#allocation41_spill] sm:$0xff] %v8154_v2 }
 0x53e   :  { %11214 = vst [vmem:[#allocation42_spill] sm:$0xff] %v8162_v23  ;;  %2514 = vrot.lane.b32.xlu0 %v8154_v2, %s5711_s23  ;;  %2235 = vrot.lane.b32.xlu2 %v8162_v23, %s5711_s23 }
 0x540   :  { %v8170_v44 = vpop.permute.xlu0 %2219  ;;  %v8172_v20 = vpop.permute.xlu2 %2217 }
 0x541   :  { %1998 = vrot.lane.b32.xlu1 %v7842_v11, %s5711_s23  ;;  %11215 = vst [vmem:[#allocation43_spill] sm:$0xff] %v8170_v44  ;;  %v8187_v11 = vsel %vm2180_vm14, %v11218_v48, %v11217_v49  ;;  %v11222_v49 = vrot.slane %v7839_v37, 1 }
 0x542   :  { %11216 = vst [vmem:[#allocation44_spill] sm:$0xff] %v8172_v20 }
 0x543   :  { %v8174_v60 = vpop.permute.xlu1 %1982  ;;  %11219 = vst [vmem:[#allocation45_spill] sm:$0xff] %v8187_v11 }
 0x544   :  { %v2023_v47 = vsel %vm2012_vm9, %v8174_v60, %v8057_v9 }
 0x545   :  { %v2049_v38 = vmul.f32 %v2033_v32, %v2023_v47 }
 0x546   :  { %2648 = vrot.lane.b32.xlu0 %v8154_v2, %s5710_s0  ;;  %2243 = vrot.lane.b32.xlu2 %v8187_v11, %s5711_s23  ;;  %v11223_v2 = vrot.slane %v7848_v35, 1 }
 0x547   :  { %v8189_v6 = vadd.f32 %v2049_v38, %v1971_v29  ;;  %v1967_v29 = vmul.f32 %v1955_v30, %v7610_v51 }
 0x548   :  { %v8197_v22 = vpop.permute.xlu0 %2360  ;;  %v8199_v47 = vpop.permute.xlu2 %2213  ;;  %v8214_v9 = vsel %vm2453_vm5, %v11223_v2, %v11222_v49 }
 0x549   :  { %1994 = vrot.lane.b32.xlu1 %v7848_v35, %s5711_s23  ;;  %11220 = vst [vmem:[#allocation46_spill] sm:$0xff] %v8197_v22  ;;  %v11225_v22 = vrot.slane %v7839_v37, 7 }
 0x54a   :  { %11221 = vst [vmem:[#allocation47_spill] sm:$0xff] %v8199_v47 }
 0x54b   :  { %v8201_v5 = vpop.permute.xlu1 %1980  ;;  %11224 = vst [vmem:[#allocation48_spill] sm:$0xff] %v8214_v9  ;;  %v8222_v26 = vsel %vm2180_vm14, %v11226_v28, %v11225_v22  ;;  %vm2104_vm14 = vcmp.lt.s32.totalorder %v8097_v19, 96 }
 0x54c   :  { %v2022_v48 = vsel %vm2012_vm9, %v8201_v5, %v8069_v34  ;;  %11227 = vst [vmem:[#allocation49_spill] sm:$0xff] %v8222_v26 }
 0x54d   :  { %v2045_v38 = vmul.f32 %v2033_v32, %v2022_v48 }
 0x54e   :  { %2636 = vrot.lane.b32.xlu0 %v8214_v9, %s5710_s0  ;;  %2231 = vrot.lane.b32.xlu2 %v8222_v26, %s5711_s23 }
 0x54f   :  { %v8224_v45 = vadd.f32 %v2045_v38, %v1967_v29  ;;  %v8262_v29 = vperm.slane %v8089_v33, 0  ;;  %v8265_v38 = vperm.slane %v8094_v50, 0 }
 0x550   :  { %v8232_v51 = vpop.permute.xlu0 %2490  ;;  %v8234_v32 = vpop.permute.xlu2 %2622 }
 0x551   :  { %11228 = vst [vmem:[#allocation50_spill] sm:$0xff] %v8224_v45  ;;  %2090 = vrot.lane.b32.xlu1 %v7839_v37, %s5710_s0 }
 0x552   :  { %11229 = vst [vmem:[#allocation51_spill] sm:$0xff] %v8232_v51 }
 0x553   :  { %11230 = vst [vmem:[#allocation52_spill] sm:$0xff] %v8234_v32  ;;  %v8236_v2 = vpop.permute.xlu1 %2082 }
 0x556   :  { %2241 = vrot.lane.b32.xlu0 %v7875_v46, %s5711_s23  ;;  %2376 = vrot.lane.b32.xlu2 %v8187_v11, %s5710_s0 }
 0x558   :  { %v8244_v28 = vpop.permute.xlu0 %2225  ;;  %v8246_v30 = vpop.permute.xlu2 %2354 }
 0x559   :  { %2368 = vrot.lane.b32.xlu1 %v8162_v23, %s5710_s0  ;;  %11231 = vst [vmem:[#allocation53_spill] sm:$0xff] %v8244_v28 }
 0x55a   :  { %11232 = vst [vmem:[#allocation54_spill] sm:$0xff] %v8246_v30 }
 0x55b   :  { %v8249_v22 = vpop.permute.xlu1 %2080 }
 0x55c   :  { %v8255_v48 = vsel %vm2104_vm14, %v8144_v41, %v8249_v22 }
 0x55d   :  { %11233 = vst [vmem:[#allocation55_spill] sm:$0xff] %v8255_v48 }
 0x55e   :  { %2229 = vrot.lane.b32.xlu0 %v7893_v4, %s5711_s23  ;;  %2364 = vrot.lane.b32.xlu2 %v8222_v26, %s5710_s0  ;;  %v1974_v26 = vmul.f32 %v8262_v29, %v7600_v16  ;;  %v8295_v16 = vld [vmem:[%s11203_s5] ss:$8 sm:$0xf] }
 0x55f   :  { %v8313_v11 = vperm.slane %v8295_v16, 1 }
 0x560   :  { %v8269_v49 = vpop.permute.xlu0 %2346  ;;  %v2009_v32 = vpop.permute.xlu2 %2008 }
 0x561   :  { %2239 = vrot.lane.b32.xlu1 %v8127_v0, %s5711_s23  ;;  %11234 = vst [vmem:[#allocation56_spill] sm:$0xff] %v8269_v49  ;;  %v2028_v30 = vsel %vm2012_vm9, %v2009_v32, %v8108_v17  ;;  %v5171_v49 = vld [vmem:[%s11203_s5 + $0x5] ss:$8 sm:$0xf] }
 0x562   :  { %v2052_v23 = vmul.f32 %v8265_v38, %v2028_v30  ;;  %v8290_v17 = vperm.slane %v5171_v49, 1  ;;  %v11235_v30 = vrot.slane %v7808_v56, 1 }
 0x563   :  { %v8274_v45 = vpop.permute.xlu1 %2227 }
 0x564   :  { %v2256_v37 = vsel %vm2012_vm9, %v8170_v44, %v8274_v45  ;;  %v2068_v0 = vadd.f32 %v2052_v23, %v1974_v26  ;;  %v11236_v26 = vrot.slane %v7844_v24, 1 }
 0x566   :  { %2366 = vrot.lane.b32.xlu0 %v7903_v27, %s5710_s0  ;;  %2506 = vrot.lane.b32.xlu2 %v7914_v62, %s5711_s23  ;;  %v8303_v23 = vsel %vm2453_vm5, %v11236_v26, %v11235_v30  ;;  %v2284_v30 = vmul.f32 %v8313_v11, %v2256_v37 }
 0x567   :  { %11237 = vst [vmem:[#allocation57_spill] sm:$0xff] %v8303_v23 }
 0x568   :  { %v8307_v35 = vpop.permute.xlu0 %2358  ;;  %v2095_v48 = vpop.permute.xlu2 %2094 }
 0x569   :  { %2510 = vrot.lane.b32.xlu1 %v8303_v23, %s5711_s23  ;;  %11238 = vst [vmem:[#allocation58_spill] sm:$0xff] %v8307_v35  ;;  %v2112_v51 = vsel %vm2104_vm14, %v8029_v42, %v2095_v48 }
 0x56a   :  { %v2145_v24 = vmul.f32 %v8290_v17, %v2112_v51 }
 0x56b   :  { %v8315_v44 = vpop.permute.xlu1 %2223 }
 0x56c   :  { %v8322_v59 = vsel %vm2012_vm9, %v8055_v7, %v8315_v44  ;;  %v2161_v26 = vadd.f32 %v2145_v24, %v8119_v52  ;;  %v8342_v24 = vperm.slane %v8089_v33, 2  ;;  %v8348_v52 = vperm.slane %v5171_v49, 0 }
 0x56d   :  { %11239 = vst [vmem:[#allocation59_spill] sm:$0xff] %v8322_v59 }
 0x56e   :  { %v2300_v35 = vadd.f32 %v2284_v30, %v2161_v26  ;;  %2508 = vrot.lane.b32.xlu0 %v7930_v39, %s5711_s23  ;;  %2502 = vrot.lane.b32.xlu2 %v8214_v9, %s5711_s23  ;;  %v2116_v30 = vsel %vm2104_vm14, %v8084_v36, %v8029_v42 }
 0x56f   :  { %v2144_v59 = vmul.f32 %v8348_v52, %v2116_v30 }
 0x570   :  { %v8332_v51 = vpop.permute.xlu0 %2488  ;;  %v1997_v41 = vpop.permute.xlu2 %1996 }
 0x571   :  { %2644 = vrot.lane.b32.xlu1 %v8303_v23, %s5710_s0  ;;  %11240 = vst [vmem:[#allocation60_spill] sm:$0xff] %v8332_v51  ;;  %v8337_v7 = vsel %vm2012_vm9, %v8069_v34, %v1997_v41  ;;  %v8355_v34 = vperm.slane %v8094_v50, 2  ;;  %v1976_v51 = vmul.f32 %v8342_v24, %v7825_v53  ;;  %v8392_v53 = vperm.slane %v8089_v33, 3 }
 0x572   :  { %11241 = vst [vmem:[#allocation61_spill] sm:$0xff] %v8337_v7  ;;  %v8400_v30 = vadd.f32 %v2144_v59, %v2068_v0  ;;  %v8407_v33 = vperm.slane %v5171_v49, 2 }
 0x573   :  { %v8339_v37 = vpop.permute.xlu1 %2498  ;;  %11243 = vst [vmem:[#allocation63_spill] sm:$0xff] %v8355_v34  ;;  %v1977_v0 = vmul.f32 %v8392_v53, %v7852_v21 }
 0x574   :  { %11242 = vst [vmem:[#allocation62_spill] sm:$0xff] %v8339_v37  ;;  %v8377_v37 = vperm.slane %v8094_v50, 3 }
 0x576   :  { %2237 = vrot.lane.b32.xlu0 %v7933_v25, %s5711_s23  ;;  %2640 = vrot.lane.b32.xlu2 %v7914_v62, %s5710_s0  ;;  %v2255_v62 = vsel %vm2012_vm9, %v8172_v20, %v8244_v28 }
 0x578   :  { %v2001_v26 = vpop.permute.xlu0 %2000  ;;  %v8359_v23 = vpop.permute.xlu2 %2092 }
 0x579   :  { %2233 = vrot.lane.b32.xlu1 %v7903_v27, %s5711_s23  ;;  %v2016_v9 = vsel %vm2012_vm9, %v2001_v26, %v2009_v32  ;;  %v2020_v42 = vsel %vm2012_vm9, %v8053_v14, %v2001_v26  ;;  %v2111_v27 = vsel %vm2104_vm14, %v8037_v58, %v8359_v23  ;;  %v2280_v26 = vmul.f32 %v8313_v11, %v2255_v62 }
 0x57a   :  { %v2054_v28 = vmul.f32 %v8355_v34, %v2020_v42  ;;  %v2141_v20 = vmul.f32 %v8290_v17, %v2111_v27  ;;  %v8398_v27 = vld [vmem:[%s11203_s5 + $0x1] ss:$8 sm:$0xf]  ;;  %v2055_v7 = vmul.f32 %v8377_v37, %v2016_v9  ;;  %v8409_v62 = vperm.slane %v5171_v49, 3 }
 0x57b   :  { %v8381_v32 = vpop.permute.xlu1 %2348 }
 0x57c   :  { %v8388_v14 = vsel %vm2104_vm14, %v8381_v32, %v8082_v13  ;;  %v2070_v50 = vadd.f32 %v2054_v28, %v1976_v51  ;;  %v2157_v42 = vadd.f32 %v2141_v20, %v8189_v6  ;;  %v8412_v6 = vperm.slane %v8398_v27, 1 }
 0x57d   :  { %11244 = vst [vmem:[#allocation64_spill] sm:$0xff] %v8388_v14  ;;  %v1966_v20 = vmul.f32 %v8262_v29, %v7663_v55 }
 0x57e   :  { %v2296_v34 = vadd.f32 %v2280_v26, %v2157_v42  ;;  %2516 = vrot.lane.b32.xlu0 %v7945_v1, %s5711_s23  ;;  %2362 = vrot.lane.b32.xlu2 %v7893_v4, %s5710_s0  ;;  %v2071_v26 = vadd.f32 %v2055_v7, %v1977_v0  ;;  %v1969_v7 = vmul.f32 %v8392_v53, %v7808_v56 }
 0x57f   :  { %v1970_v56 = vmul.f32 %v8262_v29, %v7603_v63 }
 0x580   :  { %v2103_v9 = vpop.permute.xlu0 %2102  ;;  %v2005_v28 = vpop.permute.xlu2 %2004 }
 0x581   :  { %2374 = vrot.lane.b32.xlu1 %v7875_v46, %s5710_s0  ;;  %v2108_v59 = vsel %vm2104_vm14, %v2095_v48, %v2103_v9  ;;  %v2120_v49 = vsel %vm2104_vm14, %v2103_v9, %v8084_v36  ;;  %v2014_v51 = vsel %vm2012_vm9, %v1997_v41, %v2005_v28  ;;  %v2026_v21 = vsel %vm2012_vm9, %v2005_v28, %v8201_v5 }
 0x582   :  { %v2146_v42 = vmul.f32 %v8407_v33, %v2108_v59  ;;  %v2147_v55 = vmul.f32 %v8409_v62, %v2120_v49  ;;  %v2044_v4 = vmul.f32 %v8265_v38, %v2026_v21  ;;  %v2327_v41 = vmul.f32 %v8412_v6, %v7880_v40 }
 0x583   :  { %v8433_v46 = vpop.permute.xlu1 %2494  ;;  %v2047_v9 = vmul.f32 %v8377_v37, %v2014_v51  ;;  %v2253_v21 = vsel %vm2012_vm9, %v8199_v47, %v8110_v18 }
 0x584   :  { %11245 = vst [vmem:[#allocation65_spill] sm:$0xff] %v8433_v46  ;;  %v2162_v48 = vadd.f32 %v2146_v42, %v2070_v50  ;;  %v8435_v14 = vadd.f32 %v2147_v55, %v2071_v26  ;;  %v2060_v36 = vadd.f32 %v2044_v4, %v1966_v20  ;;  %v8444_v5 = vadd.f32 %v2327_v41, %v2300_v35 }
 0x585   :  { %v2063_v0 = vadd.f32 %v2047_v9, %v1969_v7  ;;  %v2272_v7 = vmul.f32 %v8313_v11, %v2253_v21 }
 0x586   :  { %2370 = vrot.lane.b32.xlu0 %v7933_v25, %s5710_s0  ;;  %2504 = vrot.lane.b32.xlu2 %v7962_v57, %s5711_s23 }
 0x588   :  { %v8450_v4 = vpop.permute.xlu0 %2006  ;;  %v8452_v50 = vpop.permute.xlu2 %2098 }
 0x589   :  { %2642 = vrot.lane.b32.xlu1 %v7930_v39, %s5710_s0  ;;  %v2027_v40 = vsel %vm2012_vm9, %v8450_v4, %v8174_v60  ;;  %v2118_v35 = vsel %vm2104_vm14, %v8452_v50, %v8117_v15 }
 0x58a   :  { %v2048_v20 = vmul.f32 %v8265_v38, %v2027_v40  ;;  %v2139_v28 = vmul.f32 %v8409_v62, %v2118_v35 }
 0x58b   :  { %v8466_v59 = vpop.permute.xlu1 %2620 }
 0x58c   :  { %11246 = vst [vmem:[#allocation66_spill] sm:$0xff] %v8466_v59  ;;  %v2064_v49 = vadd.f32 %v2048_v20, %v1970_v56  ;;  %v8468_v51 = vadd.f32 %v2139_v28, %v2063_v0  ;;  %v1962_v28 = vmul.f32 %v8262_v29, %v7111_v54  ;;  %v8542_v54 = vperm.slane %v8295_v16, 0  ;;  %v11258_v59 = vld [vmem:[#allocation55_spill] sm:$0xff] }
 0x58d   :  { %v8545_v29 = vperm.slane %v8295_v16, 3 }
 0x58e   :  { %2512 = vrot.lane.b32.xlu0 %v7964_v31, %s5711_s23  ;;  %2650 = vrot.lane.b32.xlu2 %v7945_v1, %s5710_s0 }
 0x590   :  { %v2101_v60 = vpop.permute.xlu0 %2100  ;;  %v2089_v63 = vpop.permute.xlu2 %2088 }
 0x591   :  { %2646 = vrot.lane.b32.xlu1 %v7964_v31, %s5710_s0  ;;  %v8483_v26 = vsel %vm2104_vm14, %v8359_v23, %v2101_v60  ;;  %v8488_v42 = vsel %vm2104_vm14, %v2101_v60, %v8080_v12  ;;  %v2109_v55 = vsel %vm2104_vm14, %v8249_v22, %v2089_v63  ;;  %v2323_v23 = vmul.f32 %v8412_v6, %v7978_v10 }
 0x592   :  { %v2133_v41 = vmul.f32 %v8290_v17, %v2109_v55  ;;  %v8507_v22 = vperm.slane %v8295_v16, 2 }
 0x593   :  { %v8494_v9 = vpop.permute.xlu1 %2350  ;;  %v8509_v0 = vadd.f32 %v2323_v23, %v2296_v34 }
 0x594   :  { %v2149_v40 = vadd.f32 %v2133_v41, %v8146_v8  ;;  %v2114_v8 = vsel %vm2104_vm14, %v8117_v15, %v8236_v2 }
 0x595   :  { %v2136_v55 = vmul.f32 %v8348_v52, %v2114_v8 }
 0x596   :  { %v8500_v35 = vadd.f32 %v2272_v7, %v2149_v40  ;;  %2638 = vrot.lane.b32.xlu0 %v7962_v57, %s5710_s0  ;;  %2486 = vrot.lane.b32.xlu2 %v7783_v61, %s5711_s23 }
 0x597   :  { %v8535_v40 = vadd.f32 %v2136_v55, %v2060_v36  ;;  %v11249_v36 = vld [vmem:[#allocation37_spill] sm:$0xff] }
 0x598   :  { %v8517_v10 = vpop.permute.xlu0 %2002  ;;  %v2236_v56 = vpop.permute.xlu2 %2235 }
 0x599   :  { %2634 = vrot.lane.b32.xlu1 %v7942_v3, %s5710_s0  ;;  %v2025_v20 = vsel %vm2012_vm9, %v8517_v10, %v8135_v43  ;;  %v2252_v34 = vsel %vm2012_vm9, %v8274_v45, %v2236_v56  ;;  %v11247_v43 = vld [vmem:[#allocation31_spill] sm:$0xff] }
 0x59a   :  { %v2040_v15 = vmul.f32 %v8265_v38, %v2025_v20  ;;  %v2285_v60 = vmul.f32 %v8507_v22, %v2252_v34  ;;  %v11248_v45 = vld [vmem:[#allocation11_spill] sm:$0xff]  ;;  %v8548_v38 = vperm.slane %v8398_v27, 0  ;;  %v11250_v34 = vld [vmem:[#allocation40_spill] sm:$0xff] }
 0x59b   :  { %v8530_v21 = vpop.permute.xlu1 %2496 }
 0x59c   :  { %v2056_v41 = vadd.f32 %v2040_v15, %v1962_v28  ;;  %v8533_v7 = vadd.f32 %v2285_v60, %v2162_v48  ;;  %v2115_v48 = vsel %vm2104_vm14, %v8080_v12, %v8037_v58  ;;  %v11251_v15 = vld [vmem:[#allocation43_spill] sm:$0xff] }
 0x59e   :  { %2632 = vrot.lane.b32.xlu0 %v11247_v43, %s5710_s0  ;;  %2628 = vrot.lane.b32.xlu2 %v11248_v45, %s5710_s0 }
 0x5a0   :  { %v2097_v23 = vpop.permute.xlu0 %2096  ;;  %v2244_v8 = vpop.permute.xlu2 %2243 }
 0x5a1   :  { %2630 = vrot.lane.b32.xlu1 %v11249_v36, %s5710_s0  ;;  %v2105_v20 = vsel %vm2104_vm14, %v2089_v63, %v2097_v23  ;;  %v8561_v16 = vsel %vm2104_vm14, %v2097_v23, %v11250_v34  ;;  %v2248_v28 = vsel %vm2012_vm9, %v2236_v56, %v2244_v8  ;;  %v2260_v58 = vsel %vm2012_vm9, %v2244_v8, %v11251_v15  ;;  %v11253_v36 = vld [vmem:[#allocation14_spill] sm:$0xff] }
 0x5a2   :  { %v2283_v12 = vmul.f32 %v8542_v54, %v2260_v58  ;;  %v2286_v60 = vmul.f32 %v8545_v29, %v2248_v28  ;;  %v2140_v63 = vmul.f32 %v8348_v52, %v2115_v48  ;;  %v2326_v43 = vmul.f32 %v8548_v38, %v11253_v36 }
 0x5a3   :  { %v8570_v55 = vpop.permute.xlu1 %2626 }
 0x5a4   :  { %11252 = vst [vmem:[#allocation40_spill] sm:$0xff] %v8570_v55  ;;  %v2299_v23 = vadd.f32 %v2283_v12, %v8400_v30  ;;  %v2302_v34 = vadd.f32 %v2286_v60, %v8435_v14  ;;  %v8577_v56 = vadd.f32 %v2140_v63, %v2064_v49  ;;  %v8593_v14 = vperm.slane %v8398_v27, 3  ;;  %v8598_v30 = vld [vmem:[%s11203_s5 + $0x2] ss:$8 sm:$0xf] }
 0x5a5   :  { %v11254_v49 = vld [vmem:[#allocation45_spill] sm:$0xff]  ;;  %v11257_v60 = vld [vmem:[#allocation32_spill] sm:$0xff]  ;;  %v2132_v55 = vmul.f32 %v8348_v52, %v11258_v59 }
 0x5a6   :  { %v2342_v3 = vadd.f32 %v2326_v43, %v2299_v23  ;;  %v2329_v43 = vmul.f32 %v8593_v14, %v11254_v49 }
 0x5a7   :  { %v8624_v46 = vadd.f32 %v2132_v55, %v2056_v41 }
 0x5a8   :  { %v2373_v57 = vpop.permute.xlu0 %2372  ;;  %v8579_v8 = vpop.permute.xlu2 %2231  ;;  %v2345_v23 = vadd.f32 %v2329_v43, %v2302_v34  ;;  %v11261_v34 = vld [vmem:[#allocation36_spill] sm:$0xff] }
 0x5a9   :  { %v8584_v28 = vsel %vm2104_vm14, %v2373_v57, %v8381_v32  ;;  %v2250_v48 = vsel %vm2012_vm9, %v8315_v44, %v8579_v8  ;;  %v8603_v32 = vperm.slane %v8598_v30, 3  ;;  %v11255_v44 = vld [vmem:[#allocation51_spill] sm:$0xff]  ;;  %11260 = vst [vmem:[#allocation45_spill] sm:$0xff] %v8624_v46 }
 0x5ab   :  { %v8590_v36 = vpop.permute.xlu1 %2492 }
 0x5b0   :  { %v2515_v15 = vpop.permute.xlu0 %2514  ;;  %v8605_v58 = vpop.permute.xlu2 %2376 }
 0x5b1   :  { %v8610_v12 = vsel %vm2012_vm9, %v2515_v15, %v11255_v44  ;;  %v2393_v63 = vsel %vm2104_vm14, %v8605_v58, %v11257_v60 }
 0x5b2   :  { %11256 = vst [vmem:[#allocation43_spill] sm:$0xff] %v8610_v12  ;;  %v2420_v31 = vmul.f32 %v8603_v32, %v2393_v63  ;;  %v8629_v12 = vperm.slane %v8598_v30, 0  ;;  %v11264_v63 = vld [vmem:[#allocation35_spill] sm:$0xff] }
 0x5b3   :  { %v1999_v49 = vpop.permute.xlu1 %1998 }
 0x5b4   :  { %v2015_v1 = vsel %vm2012_vm9, %v1999_v49, %v8450_v4  ;;  %v8622_v25 = vadd.f32 %v2420_v31, %v2345_v23  ;;  %v11263_v4 = vld [vmem:[#allocation46_spill] sm:$0xff] }
 0x5b5   :  { %v2389_v59 = vsel %vm2104_vm14, %v11257_v60, %v11263_v4  ;;  %v8660_v60 = vperm.slane %v8398_v27, 2  ;;  %v11273_v27 = vld [vmem:[#allocation28_spill] sm:$0xff] }
 0x5b6   :  { %11259 = vst [vmem:[#allocation14_spill] sm:$0xff] %v8622_v25  ;;  %v11266_v25 = vld [vmem:[#allocation63_spill] sm:$0xff] }
 0x5b7   :  { %11267 = vst [vmem:[#allocation32_spill] sm:$0xff] %v8660_v60 }
 0x5b8   :  { %v8626_v39 = vpop.permute.xlu0 %2648  ;;  %v2365_v47 = vpop.permute.xlu2 %2364 }
 0x5b9   :  { %v8635_v43 = vsel %vm2104_vm14, %v8626_v39, %v11261_v34  ;;  %v2379_v52 = vsel %vm2104_vm14, %v2365_v47, %v2373_v57  ;;  %v8642_v31 = vsel %vm2104_vm14, %v8082_v13, %v2365_v47  ;;  %v11265_v57 = vld [vmem:[#allocation10_spill] sm:$0xff]  ;;  %v2417_v47 = vmul.f32 %v8629_v12, %v2389_v59 }
 0x5ba   :  { %11262 = vst [vmem:[#allocation51_spill] sm:$0xff] %v8635_v43  ;;  %v1964_v34 = vmul.f32 %v8342_v24, %v11265_v57  ;;  %v2134_v43 = vmul.f32 %v8407_v33, %v2105_v20 }
 0x5bb   :  { %v1995_v41 = vpop.permute.xlu1 %1994  ;;  %v8662_v61 = vadd.f32 %v2417_v47, %v2342_v3  ;;  %v2322_v3 = vmul.f32 %v8548_v38, %v11273_v27  ;;  %v11276_v47 = vld [vmem:[#allocation5_spill] sm:$0xff] }
 0x5bc   :  { %v2013_v55 = vsel %vm2012_vm9, %v1995_v41, %v8517_v10  ;;  %v2017_v23 = vsel %vm2012_vm9, %v11264_v63, %v1995_v41  ;;  %v11269_v10 = vld [vmem:[#allocation61_spill] sm:$0xff] }
 0x5bd   :  { %v2042_v13 = vmul.f32 %v11266_v25, %v2017_v23  ;;  %11268 = vst [vmem:[#allocation55_spill] sm:$0xff] %v8662_v61  ;;  %v2046_v45 = vmul.f32 %v11266_v25, %v11269_v10  ;;  %v2043_v41 = vmul.f32 %v8377_v37, %v2013_v55  ;;  %v1965_v10 = vmul.f32 %v8392_v53, %v11276_v47 }
 0x5bf   :  { %v2058_v46 = vadd.f32 %v2042_v13, %v1964_v34  ;;  %v11274_v34 = vld [vmem:[#allocation16_spill] sm:$0xff]  ;;  %v11275_v13 = vld [vmem:[#allocation34_spill] sm:$0xff]  ;;  %v2059_v47 = vadd.f32 %v2043_v41, %v1965_v10 }
 0x5c0   :  { %v8667_v63 = vpop.permute.xlu0 %2636  ;;  %v8669_v57 = vpop.permute.xlu2 %2506  ;;  %v1968_v59 = vmul.f32 %v8342_v24, %v11274_v34  ;;  %v2019_v55 = vsel %vm2012_vm9, %v11275_v13, %v1999_v49  ;;  %v8700_v49 = vld [vmem:[%s11203_s5 + $0x6] ss:$8 sm:$0xf] }
 0x5c1   :  { %11270 = vst [vmem:[#allocation46_spill] sm:$0xff] %v8667_v63  ;;  %v8671_v23 = vadd.f32 %v2134_v43, %v2058_v46  ;;  %v8676_v20 = vsel %vm2012_vm9, %v8669_v57, %v2515_v15  ;;  %v11277_v43 = vld [vmem:[#allocation42_spill] sm:$0xff]  ;;  %v11278_v63 = vld [vmem:[#allocation49_spill] sm:$0xff]  ;;  %v8716_v10 = vperm.slane %v8700_v49, 1 }
 0x5c2   :  { %11271 = vst [vmem:[#allocation35_spill] sm:$0xff] %v8669_v57  ;;  %v2328_v61 = vmul.f32 %v8660_v60, %v11277_v43  ;;  %v2320_v15 = vmul.f32 %v8660_v60, %v11278_v63  ;;  %v2062_v13 = vadd.f32 %v2046_v45, %v1968_v59  ;;  %v11279_v63 = vld [vmem:[#allocation59_spill] sm:$0xff]  ;;  %v2051_v60 = vmul.f32 %v8377_v37, %v2015_v1  ;;  %v11280_v41 = vld [vmem:[#allocation50_spill] sm:$0xff]  ;;  %v11282_v37 = vld [vmem:[#allocation8_spill] sm:$0xff] }
 0x5c3   :  { %11272 = vst [vmem:[#allocation10_spill] sm:$0xff] %v8676_v20  ;;  %v2091_v46 = vpop.permute.xlu1 %2090  ;;  %v2276_v57 = vmul.f32 %v8313_v11, %v11279_v63  ;;  %v2277_v45 = vmul.f32 %v8507_v22, %v2250_v48  ;;  %v2142_v11 = vmul.f32 %v8407_v33, %v8483_v26  ;;  %v11284_v63 = vld [vmem:[#allocation44_spill] sm:$0xff] }
 0x5c4   :  { %v2106_v27 = vsel %vm2104_vm14, %v2091_v46, %v8452_v50  ;;  %v2110_v34 = vsel %vm2104_vm14, %v8236_v2, %v2091_v46  ;;  %v2050_v50 = vmul.f32 %v11266_v25, %v2019_v55  ;;  %v8709_v2 = vperm.slane %v8598_v30, 2  ;;  %v11281_v25 = vld [vmem:[#allocation20_spill] sm:$0xff] }
 0x5c5   :  { %v2137_v43 = vmul.f32 %v8290_v17, %v2110_v34  ;;  %v2138_v20 = vmul.f32 %v8407_v33, %v2106_v27  ;;  %v2135_v46 = vmul.f32 %v8409_v62, %v8561_v16  ;;  %v1972_v1 = vmul.f32 %v8342_v24, %v11281_v25 }
 0x5c6   :  { %v1973_v55 = vmul.f32 %v8392_v53, %v11282_v37  ;;  %v2143_v16 = vmul.f32 %v8409_v62, %v8488_v42  ;;  %v2398_v62 = vperm.slane %v8598_v30, 1  ;;  %v2411_v42 = vmul.f32 %v8709_v2, %v2379_v52 }
 0x5c7   :  { %v2153_v59 = vadd.f32 %v2137_v43, %v11280_v41  ;;  %v2154_v17 = vadd.f32 %v2138_v20, %v2062_v13  ;;  %v8730_v13 = vadd.f32 %v2135_v46, %v2059_v47  ;;  %v11283_v43 = vld [vmem:[#allocation58_spill] sm:$0xff]  ;;  %v2066_v24 = vadd.f32 %v2050_v50, %v1972_v1 }
 0x5c8   :  { %v8726_v34 = vpop.permute.xlu0 %2241  ;;  %v8728_v20 = vpop.permute.xlu2 %2502  ;;  %v2388_v33 = vsel %vm2104_vm14, %v8494_v9, %v11283_v43  ;;  %v2067_v26 = vadd.f32 %v2051_v60, %v1973_v55  ;;  %v2344_v60 = vadd.f32 %v2328_v61, %v8533_v7 }
 0x5c9   :  { %v2292_v27 = vadd.f32 %v2276_v57, %v2153_v59  ;;  %v2293_v48 = vadd.f32 %v2277_v45, %v2154_v17  ;;  %v2259_v53 = vsel %vm2012_vm9, %v8726_v34, %v11284_v63  ;;  %v11285_v45 = vld [vmem:[#allocation39_spill] sm:$0xff]  ;;  %v2413_v25 = vmul.f32 %v8629_v12, %v2388_v33 }
 0x5ca   :  { %v2279_v57 = vmul.f32 %v8542_v54, %v2259_v53  ;;  %v2529_v41 = vsel %vm2012_vm9, %v8590_v36, %v11285_v45  ;;  %v8759_v1 = vadd.f32 %v2142_v11, %v2066_v24  ;;  %v8761_v61 = vadd.f32 %v2143_v16, %v2067_v26  ;;  %v11288_v24 = vld [vmem:[#allocation33_spill] sm:$0xff] }
 0x5cb   :  { %v2369_v47 = vpop.permute.xlu1 %2368  ;;  %v2336_v46 = vadd.f32 %v2320_v15, %v2293_v48  ;;  %v2558_v7 = vmul.f32 %v8716_v10, %v2529_v41  ;;  %v11290_v41 = vld [vmem:[#allocation62_spill] sm:$0xff] }
 0x5cc   :  { %v2381_v50 = vsel %vm2104_vm14, %v2369_v47, %v8605_v58  ;;  %v2385_v30 = vsel %vm2104_vm14, %v11263_v4, %v2369_v47  ;;  %v2295_v52 = vadd.f32 %v2279_v57, %v8577_v56  ;;  %v11289_v47 = vld [vmem:[#allocation6_spill] sm:$0xff] }
 0x5cd   :  { %v2418_v59 = vmul.f32 %v2398_v62, %v2385_v30  ;;  %v2419_v15 = vmul.f32 %v8709_v2, %v2381_v50  ;;  %v8756_v17 = vadd.f32 %v2411_v42, %v2336_v46  ;;  %v2315_v46 = vmul.f32 %v8412_v6, %v11289_v47  ;;  %v11291_v50 = vld [vmem:[#allocation18_spill] sm:$0xff] }
 0x5ce   :  { %v2338_v58 = vadd.f32 %v2322_v3, %v2295_v52  ;;  %v2318_v30 = vmul.f32 %v8548_v38, %v11291_v50 }
 0x5cf   :  { %v2434_v37 = vadd.f32 %v2418_v59, %v8444_v5  ;;  %v2435_v55 = vadd.f32 %v2419_v15, %v2344_v60  ;;  %v11293_v59 = vld [vmem:[#allocation38_spill] sm:$0xff] }
 0x5d0   :  { %v8765_v4 = vadd.f32 %v2413_v25, %v2338_v58  ;;  %v8769_v48 = vpop.permute.xlu0 %2229  ;;  %v8771_v63 = vpop.permute.xlu2 %2640  ;;  %v2331_v25 = vadd.f32 %v2315_v46, %v8500_v35  ;;  %v11296_v35 = vld [vmem:[#allocation60_spill] sm:$0xff] }
 0x5d1   :  { %v8767_v56 = vadd.f32 %v2558_v7, %v2434_v37  ;;  %11287 = vst [vmem:[#allocation61_spill] sm:$0xff] %v8771_v63  ;;  %v2249_v11 = vsel %vm2012_vm9, %v8110_v18, %v8769_v48  ;;  %v8781_v3 = vsel %vm2104_vm14, %v8771_v63, %v8626_v39  ;;  %v11294_v37 = vld [vmem:[#allocation12_spill] sm:$0xff]  ;;  %v2527_v47 = vsel %vm2012_vm9, %v11296_v35, %v8530_v21  ;;  %v11323_v35 = vld [vmem:[#allocation22_spill] sm:$0xff] }
 0x5d2   :  { %v2273_v5 = vmul.f32 %v8507_v22, %v2249_v11  ;;  %v2319_v11 = vmul.f32 %v8412_v6, %v11294_v37  ;;  %v2412_v6 = vmul.f32 %v8603_v32, %v8584_v28  ;;  %v2550_v28 = vmul.f32 %v8716_v10, %v2527_v47  ;;  %v11303_v37 = vld [vmem:[#allocation46_spill] sm:$0xff]  ;;  %v11308_v47 = vld [vmem:[#allocation11_spill] sm:$0xff] }
 0x5d3   :  { %11286 = vst [vmem:[#allocation63_spill] sm:$0xff] %v8767_v56  ;;  %v2240_v16 = vpop.permute.xlu1 %2239  ;;  %v11318_v56 = vld [vmem:[#allocation47_spill] sm:$0xff] }
 0x5d4   :  { %v2246_v33 = vsel %vm2012_vm9, %v8579_v8, %v2240_v16  ;;  %v2258_v26 = vsel %vm2012_vm9, %v2240_v16, %v11288_v24  ;;  %v8791_v53 = vadd.f32 %v2273_v5, %v8671_v23  ;;  %v2528_v8 = vsel %vm2012_vm9, %v11255_v44, %v11290_v41 }
 0x5d5   :  { %v2275_v18 = vmul.f32 %v8542_v54, %v2258_v26  ;;  %v2278_v42 = vmul.f32 %v8545_v29, %v2246_v33  ;;  %v2321_v44 = vmul.f32 %v8593_v14, %v11293_v59  ;;  %v2554_v5 = vmul.f32 %v8716_v10, %v2528_v8 }
 0x5d6   :  { %v2335_v26 = vadd.f32 %v2319_v11, %v2292_v27  ;;  %v8843_v27 = vperm.slane %v8700_v49, 2 }
 0x5d7   :  { %v2291_v39 = vadd.f32 %v2275_v18, %v8535_v40  ;;  %v2294_v57 = vadd.f32 %v2278_v42, %v8468_v51  ;;  %v11292_v40 = vld [vmem:[#allocation54_spill] sm:$0xff]  ;;  %v11295_v18 = vld [vmem:[#allocation64_spill] sm:$0xff] }
 0x5d8   :  { %v8803_v60 = vpop.permute.xlu0 %2366  ;;  %v8805_v23 = vpop.permute.xlu2 %2362  ;;  %v2409_v42 = vmul.f32 %v8629_v12, %v11295_v18  ;;  %v11307_v18 = vld [vmem:[#allocation29_spill] sm:$0xff] }
 0x5d9   :  { %v2384_v51 = vsel %vm2104_vm14, %v11283_v43, %v8803_v60  ;;  %v2382_v52 = vsel %vm2104_vm14, %v11292_v40, %v8805_v23  ;;  %v2334_v43 = vadd.f32 %v2318_v30, %v2291_v39  ;;  %v2337_v16 = vadd.f32 %v2321_v44, %v2294_v57 }
 0x5da   :  { %v2414_v15 = vmul.f32 %v2398_v62, %v2384_v51  ;;  %v2406_v7 = vmul.f32 %v2398_v62, %v2382_v52  ;;  %v2410_v39 = vmul.f32 %v2398_v62, %v8642_v31 }
 0x5db   :  { %v8820_v58 = vpop.permute.xlu1 %2510  ;;  %v8849_v50 = vadd.f32 %v2409_v42, %v2334_v43  ;;  %v8851_v30 = vadd.f32 %v2412_v6, %v2337_v16  ;;  %v2314_v42 = vmul.f32 %v8548_v38, %v11307_v18  ;;  %v11312_v38 = vld [vmem:[#allocation48_spill] sm:$0xff] }
 0x5dc   :  { %v2430_v33 = vadd.f32 %v2414_v15, %v8509_v0  ;;  %v8826_v24 = vadd.f32 %v2406_v7, %v2331_v25  ;;  %v5175_v0 = vld [vmem:[%s11203_s5 + $0x7] ss:$8 sm:$0xf]  ;;  %v2426_v62 = vadd.f32 %v2410_v39, %v2335_v26 }
 0x5dd   :  { %11299 = vst [vmem:[#allocation34_spill] sm:$0xff] %v8849_v50  ;;  %v8862_v52 = vperm.slane %v5175_v0, 0  ;;  %v8864_v59 = vperm.slane %v5175_v0, 1  ;;  %v8870_v7 = vperm.slane %v5175_v0, 3  ;;  %v11309_v39 = vld [vmem:[#allocation15_spill] sm:$0xff]  ;;  %v11315_v18 = vld [vmem:[#allocation32_spill] sm:$0xff] }
 0x5de   :  { %v8836_v46 = vadd.f32 %v2554_v5, %v2430_v33  ;;  %11300 = vst [vmem:[#allocation5_spill] sm:$0xff] %v8851_v30  ;;  %v8881_v11 = vadd.f32 %v2550_v28, %v2426_v62  ;;  %v8883_v5 = vperm.slane %v5175_v0, 2  ;;  %v11306_v33 = vld [vmem:[#allocation7_spill] sm:$0xff]  ;;  %v11310_v0 = vld [vmem:[#allocation41_spill] sm:$0xff] }
 0x5df   :  { %11301 = vst [vmem:[#allocation42_spill] sm:$0xff] %v8862_v52  ;;  %v2596_v26 = vmul.f32 %v8862_v52, %v11306_v33  ;;  %v8896_v6 = vmul.f32 %v8864_v59, %v11308_v47  ;;  %v8900_v28 = vmul.f32 %v8862_v52, %v11309_v39  ;;  %v11314_v33 = vld [vmem:[#allocation17_spill] sm:$0xff] }
 0x5e0   :  { %11297 = vst [vmem:[#allocation28_spill] sm:$0xff] %v8836_v46  ;;  %v8845_v57 = vpop.permute.xlu0 %2508  ;;  %v8847_v8 = vpop.permute.xlu2 %2504  ;;  %v8915_v62 = vmul.f32 %v8883_v5, %v11312_v38  ;;  %v8921_v47 = vmul.f32 %v11315_v18, %v11314_v33  ;;  %v11316_v39 = vld [vmem:[#allocation9_spill] sm:$0xff] }
 0x5e1   :  { %11298 = vst [vmem:[#allocation16_spill] sm:$0xff] %v8847_v8  ;;  %v2525_v51 = vsel %vm2012_vm9, %v11285_v45, %v8845_v57  ;;  %v2523_v31 = vsel %vm2012_vm9, %v8530_v21, %v8847_v8  ;;  %v8873_v45 = vperm.slane %v8700_v49, 0  ;;  %v11317_v46 = vld [vmem:[#allocation21_spill] sm:$0xff]  ;;  %v11324_v8 = vld [vmem:[#allocation35_spill] sm:$0xff] }
 0x5e2   :  { %11302 = vst [vmem:[#allocation49_spill] sm:$0xff] %v8864_v59  ;;  %v2559_v44 = vmul.f32 %v8843_v27, %v2525_v51  ;;  %v2551_v15 = vmul.f32 %v8843_v27, %v2523_v31  ;;  %v8911_v31 = vld [vmem:[%s11203_s5 + $0x20] ss:$8 sm:$0xf]  ;;  %v8929_v63 = vmul.f32 %v8883_v5, %v11317_v46  ;;  %s5713_s5 = smov [#allocation2]  }
 0x5e3   :  { %v8868_v25 = vpop.permute.xlu1 %2644  ;;  %11304 = vst [vmem:[#allocation59_spill] sm:$0xff] %v8881_v11 }
 0x5e4   :  { %v8879_v21 = vsel %vm2104_vm14, %v11303_v37, %v8868_v25  ;;  %v8885_v43 = vadd.f32 %v2559_v44, %v2435_v55  ;;  %v8888_v16 = vadd.f32 %v2551_v15, %v8756_v17  ;;  %v8904_v55 = vmul.f32 %v8870_v7, %v11310_v0  ;;  %v11311_v17 = vld [vmem:[#allocation43_spill] sm:$0xff]  ;;  %v11313_v44 = vld [vmem:[#allocation13_spill] sm:$0xff] }
 0x5e5   :  { %v2553_v51 = vmul.f32 %v8873_v45, %v11311_v17  ;;  %v2325_v15 = vmul.f32 %v8593_v14, %v11313_v44  ;;  %v2324_v0 = vmul.f32 %v11315_v18, %v11316_v39  ;;  %v8943_v39 = vperm.slane %v8911_v31, 3 }
 0x5e6   :  { %11305 = vst [vmem:[#allocation50_spill] sm:$0xff] %v8888_v16  ;;  %v11319_v16 = vld [vmem:[#allocation56_spill] sm:$0xff] }
 0x5e7   :  { %v2569_v33 = vadd.f32 %v2553_v51, %v8765_v4  ;;  %v2386_v18 = vsel %vm2104_vm14, %v11319_v16, %v11292_v40 }
 0x5e8   :  { %v2238_v17 = vpop.permute.xlu0 %2237  ;;  %v8925_v11 = vpop.permute.xlu2 %2650 }
 0x5e9   :  { %v2245_v38 = vsel %vm2012_vm9, %v8769_v48, %v2238_v17  ;;  %v2257_v44 = vsel %vm2012_vm9, %v2238_v17, %v11318_v56  ;;  %v8948_v48 = vperm.slane %v8700_v49, 3  ;;  %v11320_v56 = vld [vmem:[#allocation53_spill] sm:$0xff]  ;;  %v8956_v40 = vadd.f32 %v2596_v26, %v2569_v33 }
 0x5ea   :  { %v2271_v46 = vmul.f32 %v8542_v54, %v2257_v44  ;;  %v2274_v59 = vmul.f32 %v8545_v29, %v2245_v38  ;;  %v11321_v17 = vld [vmem:[#allocation45_spill] sm:$0xff] }
 0x5eb   :  { %v2234_v52 = vpop.permute.xlu1 %2233  ;;  %v11322_v49 = vld [vmem:[#allocation57_spill] sm:$0xff] }
 0x5ec   :  { %v2247_v4 = vsel %vm2012_vm9, %v2234_v52, %v8726_v34  ;;  %v2251_v51 = vsel %vm2012_vm9, %v11320_v56, %v2234_v52  ;;  %v2287_v30 = vadd.f32 %v2271_v46, %v11321_v17  ;;  %v2290_v54 = vadd.f32 %v2274_v59, %v8730_v13  ;;  %v11325_v26 = vld [vmem:[#allocation65_spill] sm:$0xff]  ;;  %v11326_v46 = vld [vmem:[#allocation23_spill] sm:$0xff] }
 0x5ed   :  { %v2281_v38 = vmul.f32 %v8507_v22, %v2251_v51  ;;  %v2282_v44 = vmul.f32 %v8545_v29, %v2247_v4  ;;  %v8964_v50 = vmul.f32 %v8870_v7, %v11322_v49  ;;  %v2602_v34 = vmul.f32 %v8883_v5, %v11323_v35  ;;  %v11327_v4 = vld [vmem:[#allocation25_spill] sm:$0xff]  ;;  %v11328_v51 = vld [vmem:[#allocation51_spill] sm:$0xff] }
 0x5ee   :  { %v2524_v52 = vsel %vm2012_vm9, %v11290_v41, %v11324_v8  ;;  %v2522_v13 = vsel %vm2012_vm9, %v11325_v26, %v8728_v20  ;;  %v2405_v22 = vmul.f32 %v8629_v12, %v2386_v18  ;;  %v2330_v29 = vadd.f32 %v2314_v42, %v2287_v30  ;;  %v11329_v30 = vld [vmem:[#allocation10_spill] sm:$0xff] }
 0x5ef   :  { %v2297_v59 = vadd.f32 %v2281_v38, %v8759_v1  ;;  %v2298_v33 = vadd.f32 %v2282_v44, %v8761_v61  ;;  %v2317_v35 = vmul.f32 %v8593_v14, %v11326_v46  ;;  %v2603_v56 = vmul.f32 %v8870_v7, %v11327_v4 }
 0x5f0   :  { %v8985_v41 = vmul.f32 %v8943_v39, %v11328_v51  ;;  %v8988_v8 = vperm.slane %v8911_v31, 2  ;;  %v2555_v12 = vmul.f32 %v8843_v27, %v2524_v52  ;;  %v2556_v1 = vmul.f32 %v8948_v48, %v11329_v30  ;;  %v2517_v42 = vpop.permute.xlu0 %2516  ;;  %v2487_v18 = vpop.permute.xlu2 %2486  ;;  %v11332_v30 = vld [vmem:[#allocation14_spill] sm:$0xff] }
 0x5f1   :  { %v2547_v61 = vmul.f32 %v8843_v27, %v2522_v13  ;;  %v2421_v14 = vadd.f32 %v2405_v22, %v2330_v29  ;;  %v2521_v17 = vsel %vm2012_vm9, %v8845_v57, %v2517_v42  ;;  %v2533_v38 = vsel %vm2012_vm9, %v2517_v42, %v8590_v36  ;;  %v11330_v29 = vld [vmem:[#allocation40_spill] sm:$0xff] }
 0x5f2   :  { %v2526_v44 = vsel %vm2012_vm9, %v2487_v18, %v11325_v26  ;;  %v2530_v49 = vsel %vm2012_vm9, %v8820_v58, %v2487_v18  ;;  %v2557_v27 = vmul.f32 %v8873_v45, %v2533_v38  ;;  %v2560_v52 = vmul.f32 %v8948_v48, %v2521_v17 }
 0x5f3   :  { %v2545_v13 = vmul.f32 %v8873_v45, %v2530_v49  ;;  %v2546_v57 = vmul.f32 %v8716_v10, %v2526_v44  ;;  %v2375_v22 = vpop.permute.xlu1 %2374  ;;  %v2518_v36 = vsel %vm2012_vm9, %v8728_v20, %v8820_v58  ;;  %v2667_v26 = vsel %vm2104_vm14, %v8925_v11, %v11330_v29  ;;  %v11331_v10 = vld [vmem:[#allocation55_spill] sm:$0xff] }
 0x5f4   :  { %v2380_v46 = vsel %vm2104_vm14, %v8803_v60, %v2375_v22  ;;  %v2392_v4 = vsel %vm2104_vm14, %v2375_v22, %v8494_v9  ;;  %v9025_v51 = vadd.f32 %v2557_v27, %v11331_v10  ;;  %v2576_v42 = vadd.f32 %v2560_v52, %v11332_v30 }
 0x5f5   :  { %v2561_v18 = vadd.f32 %v2545_v13, %v2421_v14  ;;  %v2562_v20 = vadd.f32 %v2546_v57, %v8826_v24  ;;  %v2340_v58 = vadd.f32 %v2324_v0, %v2297_v59  ;;  %v2341_v17 = vadd.f32 %v2325_v15, %v2298_v33 }
 0x5f6   :  { %v2415_v38 = vmul.f32 %v8709_v2, %v2380_v46  ;;  %v2416_v44 = vmul.f32 %v8603_v32, %v2392_v4  ;;  %v2689_v60 = vmul.f32 %v8988_v8, %v8781_v3  ;;  %v2694_v49 = vmul.f32 %v8943_v39, %v2667_v26 }
 0x5f7   :  { %v2619_v9 = vadd.f32 %v2603_v56, %v2576_v42  ;;  %v2332_v27 = vadd.f32 %v8921_v47, %v8791_v53  ;;  %v9037_v14 = vperm.slane %v8911_v31, 0  ;;  %v9040_v24 = vperm.slane %v8911_v31, 1 }
 0x5f8   :  { %v2431_v22 = vadd.f32 %v2415_v38, %v2340_v58  ;;  %v2432_v52 = vadd.f32 %v2416_v44, %v2341_v17  ;;  %v2548_v15 = vmul.f32 %v8948_v48, %v2518_v36  ;;  %v2371_v0 = vpop.permute.xlu0 %2370  ;;  %v2333_v59 = vadd.f32 %v2317_v35, %v2290_v54  ;;  %v2629_v33 = vpop.permute.xlu2 %2628  ;;  %v11334_v54 = vld [vmem:[#allocation66_spill] sm:$0xff]  ;;  %v11340_v38 = vld [vmem:[#allocation60_spill] sm:$0xff] }
 0x5f9   :  { %v2618_v3 = vadd.f32 %v2602_v34, %v8885_v43  ;;  %v9044_v13 = vadd.f32 %v2694_v49, %v2619_v9  ;;  %v2378_v53 = vsel %vm2104_vm14, %v8805_v23, %v2371_v0  ;;  %v2390_v31 = vsel %vm2104_vm14, %v2371_v0, %v11319_v16 }
 0x5fa   :  { %v2571_v56 = vadd.f32 %v2555_v12, %v2431_v22  ;;  %v2572_v57 = vadd.f32 %v2556_v1, %v2432_v52  ;;  %v2407_v47 = vmul.f32 %v8709_v2, %v2378_v53  ;;  %v2408_v36 = vmul.f32 %v8603_v32, %v2390_v31  ;;  %v11344_v22 = vld [vmem:[#allocation34_spill] sm:$0xff] }
 0x5fb   :  { %11333 = vst [vmem:[#allocation20_spill] sm:$0xff] %v9044_v13  ;;  %v2656_v43 = vsel %vm2104_vm14, %v2629_v33, %v11303_v37  ;;  %v2660_v34 = vsel %vm2104_vm14, %v11334_v54, %v2629_v33  ;;  %v2643_v35 = vpop.permute.xlu1 %2642  ;;  %2785 = vmatpush.msrb.mxu3 %v9044_v13  ;;  %v2664_v46 = vsel %vm2104_vm14, %v8868_v25, %v11334_v54  ;;  %v11347_v33 = vld [vmem:[#allocation30_spill] sm:$0xff]  ;;  %v11351_v54 = vld [vmem:[#allocation24_spill] sm:$0xff] }
 0x5fc   :  { %v2679_v23 = vmul.f32 %v9037_v14, %v2660_v34  ;;  %v2680_v12 = vmul.f32 %v9040_v24, %v2656_v43  ;;  %v2655_v2 = vsel %vm2104_vm14, %v2643_v35, %v8925_v11  ;;  %v2615_v32 = vadd.f32 %v8904_v55, %v2572_v57  ;;  %v11352_v34 = vld [vmem:[#allocation49_spill] sm:$0xff] }
 0x5fd   :  { %v2423_v16 = vadd.f32 %v2407_v47, %v2332_v27  ;;  %v2424_v1 = vadd.f32 %v2408_v36, %v2333_v59  ;;  %v2693_v37 = vmul.f32 %v8988_v8, %v2655_v2  ;;  %v2614_v26 = vadd.f32 %v8929_v63, %v2571_v56  ;;  %v11346_v59 = vld [vmem:[#allocation27_spill] sm:$0xff]  ;;  %v11350_v36 = vld [vmem:[#allocation26_spill] sm:$0xff] }
 0x5fe   :  { %v9074_v4 = vadd.f32 %v8985_v41, %v2615_v32  ;;  %v2604_v10 = vadd.f32 %v8900_v28, %v2561_v18  ;;  %v2605_v11 = vadd.f32 %v8896_v6, %v2562_v20  ;;  %v2681_v25 = vmul.f32 %v8988_v8, %v8879_v21  ;;  %v11339_v18 = vld [vmem:[#allocation16_spill] sm:$0xff] }
 0x5ff   :  { %v2563_v30 = vadd.f32 %v2547_v61, %v2423_v16  ;;  %v2564_v55 = vadd.f32 %v2548_v15, %v2424_v1  ;;  %v9078_v42 = vadd.f32 %v2693_v37, %v2618_v3  ;;  %v9080_v58 = vadd.f32 %v2689_v60, %v2614_v26  ;;  %v11345_v15 = vld [vmem:[#allocation5_spill] sm:$0xff]  ;;  %v11354_v16 = vld [vmem:[#allocation50_spill] sm:$0xff]  ;;  %v11355_v37 = vld [vmem:[#allocation63_spill] sm:$0xff] }
 0x600   :  { %11335 = vst [vmem:[#allocation8_spill] sm:$0xff] %v9074_v4  ;;  %2786 = vmatpush.msrb.mxu3 %v9074_v4  ;;  %v9083_v63 = vadd.f32 %v2679_v23, %v2604_v10  ;;  %v9085_v17 = vadd.f32 %v2680_v12, %v2605_v11  ;;  %v2682_v41 = vmul.f32 %v8943_v39, %v2664_v46  ;;  %v2513_v6 = vpop.permute.xlu0 %2512 }
 0x601   :  { %11336 = vst [vmem:[#allocation58_spill] sm:$0xff] %v9080_v58  ;;  %2765 = vmatpush.msrb.mxu2 %v9078_v42  ;;  %v2607_v28 = vadd.f32 %v8964_v50, %v2564_v55  ;;  %v2606_v61 = vadd.f32 %v8915_v62, %v2563_v30  ;;  %v2519_v20 = vsel %vm2012_vm9, %v11339_v18, %v2513_v6  ;;  %v11343_v62 = vld [vmem:[#allocation52_spill] sm:$0xff] }
 0x602   :  { %11337 = vst [vmem:[#allocation44_spill] sm:$0xff] %v9083_v63  ;;  %v2531_v44 = vsel %vm2012_vm9, %v2513_v6, %v11340_v38  ;;  %v2552_v21 = vmul.f32 %v8948_v48, %v2519_v20  ;;  %v11348_v48 = vld [vmem:[#allocation42_spill] sm:$0xff]  ;;  %v2594_v43 = vmul.f32 %v8883_v5, %v11350_v36  ;;  %v2601_v23 = vmul.f32 %v11352_v34, %v11351_v54  ;;  %v11358_v6 = vld [vmem:[#allocation31_spill] sm:$0xff]  ;;  %v11359_v20 = vld [vmem:[#allocation37_spill] sm:$0xff] }
 0x603   :  { %11338 = vst [vmem:[#allocation39_spill] sm:$0xff] %v9085_v17  ;;  %v2549_v60 = vmul.f32 %v8873_v45, %v2531_v44  ;;  %2766 = vmatpush.msrb.mxu2 %v9080_v58  ;;  %v2647_v49 = vpop.permute.xlu1 %2646  ;;  %v9102_v9 = vadd.f32 %v2682_v41, %v2607_v28  ;;  %v9104_v50 = vadd.f32 %v2681_v25, %v2606_v61  ;;  %v11357_v41 = vmov 1.0   ;;  %v11360_v44 = vld [vmem:[#allocation61_spill] sm:$0xff] }
 0x604   :  { %v2665_v27 = vsel %vm2104_vm14, %v2647_v49, %v11343_v62  ;;  %v2568_v0 = vadd.f32 %v2552_v21, %v11345_v15  ;;  %v2595_v45 = vmul.f32 %v8870_v7, %v11346_v59  ;;  %v2592_v3 = vmul.f32 %v11348_v48, %v11347_v33  ;;  %v11353_v7 = vld [vmem:[#allocation19_spill] sm:$0xff]  ;;  %v11361_v21 = vld [vmem:[#allocation36_spill] sm:$0xff] }
 0x605   :  { %11341 = vst [vmem:[#allocation33_spill] sm:$0xff] %v9102_v9  ;;  %v2565_v52 = vadd.f32 %v2549_v60, %v11344_v22  ;;  %v2686_v56 = vmul.f32 %v8943_v39, %v2665_v27  ;;  %v2600_v2 = vmul.f32 %v11348_v48, %v11353_v7  ;;  %v2610_v1 = vadd.f32 %v2594_v43, %v11354_v16  ;;  %v9236_v7 = vld [vmem:[%s10925_s16 + $0x178] sm:$0xff]  ;;  %v9252_v16 = vld [vmem:[%s10925_s16 + $0x170] sm:$0xff] }
 0x606   :  { %11342 = vst [vmem:[#allocation6_spill] sm:$0xff] %v9104_v50  ;;  %v2611_v57 = vadd.f32 %v2595_v45, %v2568_v0  ;;  %v2617_v26 = vadd.f32 %v2601_v23, %v11355_v37  ;;  %v2808_v10 = vmul.f32 %v9044_v13, %v9044_v13  ;;  %v2597_v28 = vmul.f32 %v11352_v34, %v11358_v6  ;;  %v11362_v0 = vld [vmem:[#allocation28_spill] sm:$0xff]  ;;  %v11363_v45 = vld [vmem:[#allocation59_spill] sm:$0xff]  ;;  %v9260_v37 = vld [vmem:[%s10925_s16 + $0x1e0] sm:$0xff] }
 0x607   :  { %v2608_v53 = vadd.f32 %v2592_v3, %v2565_v52  ;;  %v2616_v11 = vadd.f32 %v2600_v2, %v9025_v51  ;;  %v2807_v18 = vmul.f32 %v9078_v42, %v9078_v42  ;;  %v2593_v38 = vmul.f32 %v11352_v34, %v11359_v20  ;;  %v9320_v6 = vld [vmem:[%s10925_s16 + $0x158] sm:$0xff]  ;;  %v9344_v20 = vld [vmem:[%s10925_s16 + $0x150] sm:$0xff] }
 0x608   :  { %v2639_v31 = vpop.permute.xlu0 %2638  ;;  %v9116_v47 = vadd.f32 %v2686_v56, %v2611_v57  ;;  %v2796_v27 = vmul.f32 %v9102_v9, %v9102_v9  ;;  %v2613_v59 = vadd.f32 %v2597_v28, %v11362_v0  ;;  %v2803_v56 = vmul.f32 %v9080_v58, %v9080_v58  ;;  %v9326_v28 = vld [vmem:[%s10925_s16 + $0x68] sm:$0xff]  ;;  %v9404_v0 = vld [vmem:[%s10925_s16 + $0x1b0] sm:$0xff]  ;;  %v9548_v58 = vld [vmem:[%s10925_s16 + $0x180] sm:$0xff] }
 0x609   :  { %v2653_v12 = vsel %vm2104_vm14, %v2639_v31, %v2647_v49  ;;  %v2609_v33 = vadd.f32 %v2593_v38, %v11363_v45  ;;  %v9350_v38 = vld [vmem:[%s10925_s16 + $0x60] sm:$0xff]  ;;  %v9416_v45 = vld [vmem:[%s10925_s16 + $0x138] sm:$0xff] }
 0x60a   :  { %11349 = vst [vmem:[#allocation62_spill] sm:$0xff] %v9116_v47  ;;  %v2685_v32 = vmul.f32 %v8988_v8, %v2653_v12  ;;  %2787 = vmatpush.msrb.mxu3 %v9116_v47  ;;  %v2800_v51 = vmul.f32 %v9116_v47, %v9116_v47  ;;  %v9542_v47 = vld [vmem:[%s10925_s16 + $0x20] sm:$0xff]  ;;  %v9566_v13 = vld [vmem:[%s10925_s16 + $0x18] sm:$0xff] }
 0x60b   :  { %v2635_v39 = vpop.permute.xlu1 %2634 }
 0x60c   :  { %v2659_v5 = vsel %vm2104_vm14, %v2635_v39, %v2643_v35  ;;  %v2663_v46 = vsel %vm2104_vm14, %v11330_v29, %v2635_v39  ;;  %2788 = vmatpush.msrb.mxu3 %v9102_v9  ;;  %v9141_v55 = vadd.f32 %v2685_v32, %v2610_v1  ;;  %v2804_v35 = vmul.f32 %v9074_v4, %v9074_v4  ;;  %v9244_v32 = vld [vmem:[%s10925_s16 + $0x1e8] sm:$0xff]  ;;  %v9536_v4 = vld [vmem:[%s10925_s16 + $0x110] sm:$0xff] }
 0x60d   :  { %v2691_v8 = vmul.f32 %v9037_v14, %v2663_v46  ;;  %v2692_v30 = vmul.f32 %v9040_v24, %v2659_v5  ;;  %5180 = vmatmul.msk.f32.vlgmr.msrb.gmra.mxu3 %vm95_vm0, %v11357_v41  ;;  %v2793_v1 = vmul.f32 %v9083_v63, %v9083_v63  ;;  %v9268_v5 = vld [vmem:[%s10925_s16 + $0x168] sm:$0xff]  ;;  %v9274_v46 = vld [vmem:[%s10925_s16 + $0x1d8] sm:$0xff] }
 0x60e   :  { %11356 = vst [vmem:[#allocation18_spill] sm:$0xff] %v9141_v55  ;;  %2881 = vmatpush.msra.mxu3 %v2808_v10  ;;  %2767 = vmatpush.msrb.mxu2 %v9141_v55  ;;  %v2799_v19 = vmul.f32 %v9141_v55, %v9141_v55  ;;  %v9284_v10 = vld [vmem:[%s10925_s16 + $0x78] sm:$0xff]  ;;  %v9524_v9 = vld [vmem:[%s10925_s16 + $0x188] sm:$0xff]  ;;  %v9554_v55 = vld [vmem:[%s10925_s16 + $0xa0] sm:$0xff] }
 0x60f   :  { %v9145_v25 = vadd.f32 %v2691_v8, %v2616_v11  ;;  %v9147_v29 = vadd.f32 %v2692_v30, %v2617_v26  ;;  %v2794_v26 = vmul.f32 %v9085_v17, %v9085_v17  ;;  %v9290_v11 = vld [vmem:[%s10925_s16 + $0xf8] sm:$0xff]  ;;  %v9296_v8 = vld [vmem:[%s10925_s16 + $0x160] sm:$0xff]  ;;  %v9302_v30 = vld [vmem:[%s10925_s16 + $0x70] sm:$0xff] }
 0x610   :  { %2882 = vmatpush.msra.mxu3 %v2804_v35  ;;  %v2633_v61 = vpop.permute.xlu0 %2632  ;;  %2768 = vmatpush.msrb.mxu2 %v9104_v50  ;;  %v9308_v35 = vld [vmem:[%s10925_s16 + $0x1d0] sm:$0xff] }
 0x611   :  { %2725 = vmatpush.msra.mxu0 %v9145_v25  ;;  %2745 = vmatpush.msra.mxu1 %v9147_v29  ;;  %v2658_v60 = vsel %vm2104_vm14, %v2633_v61, %v11360_v44  ;;  %v2662_v49 = vsel %vm2104_vm14, %v11361_v21, %v2633_v61  ;;  %v2806_v34 = vmul.f32 %v9147_v29, %v9147_v29  ;;  %v9332_v61 = vld [vmem:[%s10925_s16 + $0x1c8] sm:$0xff]  ;;  %v9356_v44 = vld [vmem:[%s10925_s16 + $0x1c0] sm:$0xff] }
 0x612   :  { %2883 = vmatpush.msra.mxu3 %v2800_v51  ;;  %v2687_v22 = vmul.f32 %v9037_v14, %v2662_v49  ;;  %v2688_v52 = vmul.f32 %v9040_v24, %v2658_v60  ;;  %5179 = vmatmul.msk.f32.vlgmr.msrb.gmra.mxu2 %vm95_vm0, %v11357_v41  ;;  %v9314_v51 = vld [vmem:[%s10925_s16 + $0xf0] sm:$0xff]  ;;  %v9362_v60 = vld [vmem:[%s10925_s16 + $0xe0] sm:$0xff]  ;;  %v9368_v21 = vld [vmem:[%s10925_s16 + $0x148] sm:$0xff] }
 0x613   :  { %v2631_v15 = vpop.permute.xlu1 %2630  ;;  %2861 = vmatpush.msra.mxu2 %v2807_v18  ;;  %v9338_v18 = vld [vmem:[%s10925_s16 + $0xe8] sm:$0xff]  ;;  %v9374_v49 = vld [vmem:[%s10925_s16 + $0x58] sm:$0xff] }
 0x614   :  { %v2657_v48 = vsel %vm2104_vm14, %v2631_v15, %v2639_v31  ;;  %v2661_v3 = vsel %vm2104_vm14, %v11343_v62, %v2631_v15  ;;  %2884 = vmatpush.msra.mxu3 %v2796_v27  ;;  %v9187_v43 = vadd.f32 %v2687_v22, %v8956_v40  ;;  %v9189_v54 = vadd.f32 %v2688_v52, %v2613_v59  ;;  %v9194_v31 = vld [vmem:[%s10925_s16 + $0x1f8] sm:$0xff]  ;;  %v9214_v62 = vld [vmem:[%s10925_s16 + $0x1f0] sm:$0xff]  ;;  %v9392_v52 = vld [vmem:[%s10925_s16 + $0x140] sm:$0xff] }
 0x615   :  { %v2683_v57 = vmul.f32 %v9037_v14, %v2661_v3  ;;  %v2684_v36 = vmul.f32 %v9040_v24, %v2657_v48  ;;  %2862 = vmatpush.msra.mxu2 %v2803_v56  ;;  %v2795_v24 = vmul.f32 %v9104_v50, %v9104_v50  ;;  %5184 = vmatmul.msk.f32.vlgmr.msra.gmra.mxu3 %vm95_vm0, %v11357_v41  ;;  %v9380_v27 = vld [vmem:[%s10925_s16 + $0x1b8] sm:$0xff]  ;;  %v9398_v15 = vld [vmem:[%s10925_s16 + $0x50] sm:$0xff]  ;;  %v9428_v48 = vld [vmem:[%s10925_s16 + $0x1a8] sm:$0xff] }
 0x616   :  { %11364 = vst [vmem:[#allocation54_spill] sm:$0xff] %v9187_v43  ;;  %2949 = vmatpush.msrb.mxu3 %v9194_v31  ;;  %2726 = vmatpush.msra.mxu0 %v9187_v43  ;;  %v2801_v23 = vmul.f32 %v9187_v43, %v9187_v43  ;;  %v2802_v12 = vmul.f32 %v9189_v54, %v9189_v54  ;;  %v9386_v22 = vld [vmem:[%s10925_s16 + $0xd8] sm:$0xff]  ;;  %v9410_v59 = vld [vmem:[%s10925_s16 + $0xd0] sm:$0xff]  ;;  %v9434_v3 = vld [vmem:[%s10925_s16 + $0xc8] sm:$0xff] }
 0x617   :  { %11365 = vst [vmem:[#allocation38_spill] sm:$0xff] %v9189_v54  ;;  %2746 = vmatpush.msra.mxu1 %v9189_v54  ;;  %v9201_v14 = vadd.f32 %v2683_v57, %v2608_v53  ;;  %v9203_v40 = vadd.f32 %v2684_v36, %v2609_v33  ;;  %2863 = vmatpush.msra.mxu2 %v2799_v19  ;;  %v9422_v33 = vld [vmem:[%s10925_s16 + $0x48] sm:$0xff]  ;;  %v9440_v56 = vld [vmem:[%s10925_s16 + $0x130] sm:$0xff]  ;;  %v9446_v57 = vld [vmem:[%s10925_s16 + $0x40] sm:$0xff] }
 0x618   :  { %2950 = vmatpush.msrb.mxu3 %v9214_v62  ;;  %v2805_v53 = vmul.f32 %v9145_v25, %v9145_v25  ;;  %v9452_v36 = vld [vmem:[%s10925_s16 + $0x1a0] sm:$0xff]  ;;  %v9530_v50 = vld [vmem:[%s10925_s16 + $0xa8] sm:$0xff]  ;;  %v9585_v54 = vld [vmem:[%s10925_s16 + $0x10] sm:$0xff] }
 0x619   :  { %11366 = vst [vmem:[#allocation12_spill] sm:$0xff] %v9201_v14  ;;  %2727 = vmatpush.msra.mxu0 %v9201_v14  ;;  %2747 = vmatpush.msra.mxu1 %v9203_v40  ;;  %v2797_v2 = vmul.f32 %v9201_v14, %v9201_v14  ;;  %v2798_v39 = vmul.f32 %v9203_v40, %v9203_v40  ;;  %v9458_v19 = vld [vmem:[%s10925_s16 + $0xc0] sm:$0xff]  ;;  %v9599_v43 = vld [vmem:[%s10925_s16 + $0x8] sm:$0xff] }
 0x61a   :  { %11367 = vst [vmem:[#allocation64_spill] sm:$0xff] %v9203_v40  ;;  %2864 = vmatpush.msra.mxu2 %v2795_v24  ;;  %2951 = vmatpush.msrb.mxu3 %v9244_v32  ;;  %v9464_v24 = vld [vmem:[%s10925_s16 + $0x128] sm:$0xff]  ;;  %v5582_v14 = vld [vmem:[%s10925_s16 + $0x80] sm:$0xff] }
 0x61b   :  { %5183 = vmatmul.msk.f32.vlgmr.msra.gmra.mxu2 %vm95_vm0, %v11357_v41  ;;  %2728 = vmatpush.msra.mxu0 %v9083_v63  ;;  %v9560_v40 = vld [vmem:[%s10925_s16 + $0x108] sm:$0xff]  ;;  %v9579_v63 = vld [vmem:[%s10925_s16 + $0x100] sm:$0xff] }
 0x61c   :  { %2748 = vmatpush.msra.mxu1 %v9085_v17  ;;  %5177 = vmatmul.msk.f32.vlgmr.msra.gmra.mxu0 %vm95_vm0, %v11357_v41  ;;  %v9573_v17 = vld [vmem:[%s10925_s16 + $0x98] sm:$0xff] }
 0x61d   :  { %5178 = vmatmul.msk.f32.vlgmr.msra.gmra.mxu1 %vm95_vm0, %v11357_v41  ;;  %2821 = vmatpush.msrb.mxu0 %v2805_v53  ;;  %v9470_v53 = vld [vmem:[%s10925_s16 + $0x38] sm:$0xff] }
 0x61e   :  { %2841 = vmatpush.msrb.mxu1 %v2806_v34  ;;  %2929 = vmatpush.msrb.mxu2 %v9236_v7  ;;  %v9476_v34 = vld [vmem:[%s10925_s16 + $0x198] sm:$0xff] }
 0x61f   :  { %2822 = vmatpush.msrb.mxu0 %v2801_v23  ;;  %2952 = vmatpush.msrb.mxu3 %v9260_v37  ;;  %v9482_v23 = vld [vmem:[%s10925_s16 + $0xb8] sm:$0xff] }
 0x620   :  { %2842 = vmatpush.msrb.mxu1 %v2802_v12  ;;  %2930 = vmatpush.msrb.mxu2 %v9252_v16  ;;  %v9488_v12 = vld [vmem:[%s10925_s16 + $0x120] sm:$0xff] }
 0x621   :  { %2823 = vmatpush.msrb.mxu0 %v2797_v2  ;;  %2953 = vmatpush.msrb.mxu3 %v9274_v46  ;;  %v9494_v2 = vld [vmem:[%s10925_s16 + $0x30] sm:$0xff] }
 0x622   :  { %2843 = vmatpush.msrb.mxu1 %v2798_v39  ;;  %2931 = vmatpush.msrb.mxu2 %v9268_v5  ;;  %v9500_v39 = vld [vmem:[%s10925_s16 + $0x190] sm:$0xff] }
 0x623   :  { %2824 = vmatpush.msrb.mxu0 %v2793_v1  ;;  %2954 = vmatpush.msrb.mxu3 %v9308_v35  ;;  %v9506_v1 = vld [vmem:[%s10925_s16 + $0xb0] sm:$0xff] }
 0x624   :  { %2844 = vmatpush.msrb.mxu1 %v2794_v26  ;;  %5181 = vmatmul.msk.f32.vlgmr.msrb.gmra.mxu0 %vm95_vm0, %v11357_v41  ;;  %v9512_v26 = vld [vmem:[%s10925_s16 + $0x118] sm:$0xff] }
 0x625   :  { %5182 = vmatmul.msk.f32.vlgmr.msrb.gmra.mxu1 %vm95_vm0, %v11357_v41  ;;  %2889 = vmatpush.msra.mxu0 %v9284_v10  ;;  %v9518_v41 = vld [vmem:[%s10925_s16 + $0x28] sm:$0xff] }
 0x626   :  { %2909 = vmatpush.msra.mxu1 %v9290_v11  ;;  %2932 = vmatpush.msrb.mxu2 %v9296_v8 }
 0x627   :  { %2890 = vmatpush.msra.mxu0 %v9302_v30  ;;  %2955 = vmatpush.msrb.mxu3 %v9332_v61 }
 0x628   :  { %2910 = vmatpush.msra.mxu1 %v9314_v51  ;;  %2933 = vmatpush.msrb.mxu2 %v9320_v6 }
 0x629   :  { %2891 = vmatpush.msra.mxu0 %v9326_v28  ;;  %2956 = vmatpush.msrb.mxu3 %v9356_v44 }
 0x62a   :  { %2911 = vmatpush.msra.mxu1 %v9338_v18  ;;  %2934 = vmatpush.msrb.mxu2 %v9344_v20 }
 0x62b   :  { %2892 = vmatpush.msra.mxu0 %v9350_v38  ;;  %2957 = vmatpush.msrb.mxu3 %v9380_v27 }
 0x62c   :  { %2912 = vmatpush.msra.mxu1 %v9362_v60  ;;  %2935 = vmatpush.msrb.mxu2 %v9368_v21 }
 0x62d   :  { %2893 = vmatpush.msra.mxu0 %v9374_v49  ;;  %2958 = vmatpush.msrb.mxu3 %v9404_v0 }
 0x62e   :  { %2913 = vmatpush.msra.mxu1 %v9386_v22  ;;  %2936 = vmatpush.msrb.mxu2 %v9392_v52 }
 0x62f   :  { %2894 = vmatpush.msra.mxu0 %v9398_v15  ;;  %2959 = vmatpush.msrb.mxu3 %v9428_v48 }
 0x630   :  { %2914 = vmatpush.msra.mxu1 %v9410_v59  ;;  %2937 = vmatpush.msrb.mxu2 %v9416_v45 }
 0x631   :  { %2895 = vmatpush.msra.mxu0 %v9422_v33  ;;  %2960 = vmatpush.msrb.mxu3 %v9452_v36 }
 0x632   :  { %2915 = vmatpush.msra.mxu1 %v9434_v3  ;;  %2938 = vmatpush.msrb.mxu2 %v9440_v56 }
 0x633   :  { %2896 = vmatpush.msra.mxu0 %v9446_v57  ;;  %2961 = vmatpush.msrb.mxu3 %v9476_v34 }
 0x634   :  { %2916 = vmatpush.msra.mxu1 %v9458_v19  ;;  %2939 = vmatpush.msrb.mxu2 %v9464_v24 }
 0x635   :  { %2897 = vmatpush.msra.mxu0 %v9470_v53  ;;  %2962 = vmatpush.msrb.mxu3 %v9500_v39 }
 0x636   :  { %2917 = vmatpush.msra.mxu1 %v9482_v23  ;;  %2940 = vmatpush.msrb.mxu2 %v9488_v12 }
 0x637   :  { %2898 = vmatpush.msra.mxu0 %v9494_v2  ;;  %2963 = vmatpush.msrb.mxu3 %v9524_v9 }
 0x638   :  { %2918 = vmatpush.msra.mxu1 %v9506_v1  ;;  %2941 = vmatpush.msrb.mxu2 %v9512_v26 }
 0x639   :  { %2899 = vmatpush.msra.mxu0 %v9518_v41  ;;  %2964 = vmatpush.msrb.mxu3 %v9548_v58 }
 0x63a   :  { %2919 = vmatpush.msra.mxu1 %v9530_v50  ;;  %2942 = vmatpush.msrb.mxu2 %v9536_v4 }
 0x63b   :  { %2900 = vmatpush.msra.mxu0 %v9542_v47  ;;  %3030 = vmatpush.msra.mxu3 %v9194_v31  ;;  %v9592_v31 = vld [vmem:[%s10925_s16 + $0x90] sm:$0xff] }
 0x63c   :  { %2920 = vmatpush.msra.mxu1 %v9554_v55  ;;  %2943 = vmatpush.msrb.mxu2 %v9560_v40 }
 0x63d   :  { %2901 = vmatpush.msra.mxu0 %v9566_v13  ;;  %3031 = vmatpush.msra.mxu3 %v9214_v62  ;;  %v5581_v62 = vld [vmem:[%s10925_s16] sm:$0xff] }
 0x63e   :  { %2921 = vmatpush.msra.mxu1 %v9573_v17  ;;  %2944 = vmatpush.msrb.mxu2 %v9579_v63 }
 0x63f   :  { %2902 = vmatpush.msra.mxu0 %v9585_v54  ;;  %3032 = vmatpush.msra.mxu3 %v9244_v32 }
 0x640   :  { %3010 = vmatpush.msra.mxu2 %v9236_v7  ;;  %2922 = vmatpush.msra.mxu1 %v9592_v31  ;;  %v5580_v7 = vld [vmem:[%s10925_s16 + $0x88] sm:$0xff] }
 0x641   :  { %2903 = vmatpush.msra.mxu0 %v9599_v43  ;;  %3033 = vmatpush.msra.mxu3 %v9260_v37  ;;  %v5593_v37 = vld [vmem:[%s10926_s17 + $0x18] sm:$0xff] }
 0x642   :  { %3011 = vmatpush.msra.mxu2 %v9252_v16  ;;  %2923 = vmatpush.msra.mxu1 %v5580_v7  ;;  %v5592_v16 = vld [vmem:[%s10926_s17 + $0x48] sm:$0xff] }
 0x643   :  { %2904 = vmatpush.msra.mxu0 %v5581_v62  ;;  %3034 = vmatpush.msra.mxu3 %v9274_v46  ;;  %v5595_v46 = vld [vmem:[%s10926_s17 + $0x28] sm:$0xff] }
 0x644   :  { %3012 = vmatpush.msra.mxu2 %v9268_v5  ;;  %2924 = vmatpush.msra.mxu1 %v5582_v14  ;;  %v5594_v5 = vld [vmem:[%s10926_s17 + $0x20] sm:$0xff] }
 0x645   :  { %2970 = vmatpush.msrb.mxu0 %v9284_v10  ;;  %3035 = vmatpush.msra.mxu3 %v9308_v35  ;;  %v5596_v10 = vld [vmem:[%s10926_s17 + $0x10] sm:$0xff]  ;;  %v5598_v35 = vld [vmem:[%s10926_s17 + $0x8] sm:$0xff] }
 0x646   :  { %2990 = vmatpush.msrb.mxu1 %v9290_v11  ;;  %3013 = vmatpush.msra.mxu2 %v9296_v8  ;;  %v5597_v8 = vld [vmem:[%s10926_s17] sm:$0xff] }
 0x647   :  { %2971 = vmatpush.msrb.mxu0 %v9302_v30  ;;  %3036 = vmatpush.msra.mxu3 %v9332_v61 }
 0x648   :  { %2991 = vmatpush.msrb.mxu1 %v9314_v51  ;;  %3014 = vmatpush.msra.mxu2 %v9320_v6 }
 0x649   :  { %2972 = vmatpush.msrb.mxu0 %v9326_v28  ;;  %3037 = vmatpush.msra.mxu3 %v9356_v44 }
 0x64a   :  { %2992 = vmatpush.msrb.mxu1 %v9338_v18  ;;  %3015 = vmatpush.msra.mxu2 %v9344_v20 }
 0x64b   :  { %2973 = vmatpush.msrb.mxu0 %v9350_v38  ;;  %3038 = vmatpush.msra.mxu3 %v9380_v27 }
 0x64c   :  { %2993 = vmatpush.msrb.mxu1 %v9362_v60  ;;  %3016 = vmatpush.msra.mxu2 %v9368_v21 }
 0x64d   :  { %2974 = vmatpush.msrb.mxu0 %v9374_v49  ;;  %3039 = vmatpush.msra.mxu3 %v9404_v0 }
 0x64e   :  { %2994 = vmatpush.msrb.mxu1 %v9386_v22  ;;  %3017 = vmatpush.msra.mxu2 %v9392_v52 }
 0x64f   :  { %2975 = vmatpush.msrb.mxu0 %v9398_v15  ;;  %3040 = vmatpush.msra.mxu3 %v9428_v48 }
 0x650   :  { %2995 = vmatpush.msrb.mxu1 %v9410_v59  ;;  %3018 = vmatpush.msra.mxu2 %v9416_v45 }
 0x651   :  { %2976 = vmatpush.msrb.mxu0 %v9422_v33  ;;  %3041 = vmatpush.msra.mxu3 %v9452_v36 }
 0x652   :  { %2996 = vmatpush.msrb.mxu1 %v9434_v3  ;;  %3019 = vmatpush.msra.mxu2 %v9440_v56 }
 0x653   :  { %2977 = vmatpush.msrb.mxu0 %v9446_v57  ;;  %3042 = vmatpush.msra.mxu3 %v9476_v34 }
 0x654   :  { %2997 = vmatpush.msrb.mxu1 %v9458_v19  ;;  %3020 = vmatpush.msra.mxu2 %v9464_v24  ;;  %v2711_v24 = vld [vmem:[%s10916_s7] sm:$0x1] }
 0x655   :  { %2978 = vmatpush.msrb.mxu0 %v9470_v53  ;;  %3043 = vmatpush.msra.mxu3 %v9500_v39 }
 0x656   :  { %2998 = vmatpush.msrb.mxu1 %v9482_v23  ;;  %3021 = vmatpush.msra.mxu2 %v9488_v12  ;;  %v2712_v12 = vld [vmem:[%s10917_s8] sm:$0x1] }
 0x657   :  { %2979 = vmatpush.msrb.mxu0 %v9494_v2  ;;  %3044 = vmatpush.msra.mxu3 %v9524_v9  ;;  %v5586_v9 = vld [vmem:[%s10926_s17 + $0x38] sm:$0xff] }
 0x658   :  { %2999 = vmatpush.msrb.mxu1 %v9506_v1  ;;  %3022 = vmatpush.msra.mxu2 %v9512_v26 }
 0x659   :  { %2980 = vmatpush.msrb.mxu0 %v9518_v41  ;;  %3045 = vmatpush.msra.mxu3 %v9548_v58  ;;  %v5585_v58 = vld [vmem:[%s10926_s17 + $0x70] sm:$0xff] }
 0x65a   :  { %3000 = vmatpush.msrb.mxu1 %v9530_v50  ;;  %3023 = vmatpush.msra.mxu2 %v9536_v4 }
 0x65b   :  { %2981 = vmatpush.msrb.mxu0 %v9542_v47 }
 0x65c   :  { %3001 = vmatpush.msrb.mxu1 %v9554_v55  ;;  %3024 = vmatpush.msra.mxu2 %v9560_v40  ;;  %v5587_v55 = vld [vmem:[%s10926_s17 + $0x50] sm:$0xff] }
 0x65d   :  { %2982 = vmatpush.msrb.mxu0 %v9566_v13  ;;  %v5583_v13 = vld [vmem:[%s10926_s17 + $0x78] sm:$0xff]  ;;  %v5591_v40 = vld [vmem:[%s10926_s17 + $0x30] sm:$0xff] }
 0x65e   :  { %3002 = vmatpush.msrb.mxu1 %v9573_v17  ;;  %3025 = vmatpush.msra.mxu2 %v9579_v63  ;;  %v5584_v63 = vld [vmem:[%s10926_s17 + $0x58] sm:$0xff] }
 0x65f   :  { %2983 = vmatpush.msrb.mxu0 %v9585_v54  ;;  %v5589_v54 = vld [vmem:[%s10926_s17 + $0x68] sm:$0xff] }
 0x660   :  { %3003 = vmatpush.msrb.mxu1 %v9592_v31 }
 0x661   :  { %2984 = vmatpush.msrb.mxu0 %v9599_v43  ;;  %v5588_v43 = vld [vmem:[%s10926_s17 + $0x60] sm:$0xff] }
 0x662   :  { %3004 = vmatpush.msrb.mxu1 %v5580_v7 }
 0x663   :  { %2985 = vmatpush.msrb.mxu0 %v5581_v62 }
 0x664   :  { %3005 = vmatpush.msrb.mxu1 %v5582_v14  ;;  %v5590_v14 = vld [vmem:[%s10926_s17 + $0x40] sm:$0xff] }
 0x690   :  { %v2790_v4 = vpop.f32.mrf.mxu3 }
 0x691   :  { %2965 = vmatmul.f32.vlgmr.msrb.gmra.mxu3 %v2790_v4 }
 0x692   :  { %3142 = vmatpush.msrb.mxu3 %v5583_v13 }
 0x694   :  { %3143 = vmatpush.msrb.mxu3 %v5584_v63 }
 0x695   :  { %v2770_v17 = vpop.f32.mrf.mxu2 }
 0x696   :  { %2945 = vmatmul.f32.vlgmr.msrb.gmra.mxu2 %v2770_v17  ;;  %3144 = vmatpush.msrb.mxu3 %v5586_v9 }
 0x697   :  { %3122 = vmatpush.msrb.mxu2 %v5585_v58 }
 0x698   :  { %v2886_v41 = vpop.f32.mrf.mxu3  ;;  %3145 = vmatpush.msrb.mxu3 %v5593_v37 }
 0x699   :  { %v2730_v50 = vpop.f32.mrf.mxu0  ;;  %3123 = vmatpush.msrb.mxu2 %v5587_v55  ;;  %3046 = vmatmul.f32.vlgmr.msra.gmra.mxu3 %v2886_v41 }
 0x69a   :  { %v2750_v47 = vpop.f32.mrf.mxu1  ;;  %2905 = vmatmul.f32.vlgmr.msra.gmra.mxu0 %v2730_v50  ;;  %3225 = vmatpush.msra.mxu3 %v5583_v13 }
 0x69b   :  { %2925 = vmatmul.f32.vlgmr.msra.gmra.mxu1 %v2750_v47  ;;  %3082 = vmatpush.msra.mxu0 %v5588_v43 }
 0x69c   :  { %3102 = vmatpush.msra.mxu1 %v5589_v54  ;;  %3124 = vmatpush.msrb.mxu2 %v5591_v40 }
 0x69d   :  { %3083 = vmatpush.msra.mxu0 %v5590_v14  ;;  %3226 = vmatpush.msra.mxu3 %v5584_v63 }
 0x69e   :  { %v2866_v32 = vpop.f32.mrf.mxu2  ;;  %3103 = vmatpush.msra.mxu1 %v5592_v16  ;;  %3125 = vmatpush.msrb.mxu2 %v5596_v10 }
 0x69f   :  { %3026 = vmatmul.f32.vlgmr.msra.gmra.mxu2 %v2866_v32  ;;  %3084 = vmatpush.msra.mxu0 %v5594_v5 }
 0x6a0   :  { %3104 = vmatpush.msra.mxu1 %v5595_v46  ;;  %3205 = vmatpush.msra.mxu2 %v5585_v58 }
 0x6a1   :  { %v2826_v11 = vpop.f32.mrf.mxu0  ;;  %3085 = vmatpush.msra.mxu0 %v5597_v8  ;;  %3227 = vmatpush.msra.mxu3 %v5586_v9 }
 0x6a2   :  { %v2846_v30 = vpop.f32.mrf.mxu1  ;;  %2986 = vmatmul.f32.vlgmr.msrb.gmra.mxu0 %v2826_v11  ;;  %3105 = vmatpush.msra.mxu1 %v5598_v35 }
 0x6a3   :  { %3006 = vmatmul.f32.vlgmr.msrb.gmra.mxu1 %v2846_v30  ;;  %3165 = vmatpush.msrb.mxu0 %v5588_v43 }
 0x6a4   :  { %3185 = vmatpush.msrb.mxu1 %v5589_v54  ;;  %3206 = vmatpush.msra.mxu2 %v5587_v55 }
 0x6a5   :  { %3166 = vmatpush.msrb.mxu0 %v5590_v14  ;;  %3228 = vmatpush.msra.mxu3 %v5593_v37 }
 0x6a6   :  { %3186 = vmatpush.msrb.mxu1 %v5592_v16  ;;  %3207 = vmatpush.msra.mxu2 %v5591_v40 }
 0x6a7   :  { %3167 = vmatpush.msrb.mxu0 %v5594_v5 }
 0x6a8   :  { %3187 = vmatpush.msrb.mxu1 %v5595_v46  ;;  %3208 = vmatpush.msra.mxu2 %v5596_v10 }
 0x6a9   :  { %3168 = vmatpush.msrb.mxu0 %v5597_v8 }
 0x6aa   :  { %3188 = vmatpush.msrb.mxu1 %v5598_v35 }
 0x714   :  { %v2966_v28 = vpop.f32.mrf.mxu3 }
 0x717   :  { %v2906_v51 = vpop.f32.mrf.mxu0 }
 0x718   :  { %v2926_v6 = vpop.f32.mrf.mxu1 }
 0x719   :  { %v2927_v61 = vadd.f32 %v2926_v6, %v2906_v51  ;;  %v2946_v18 = vpop.f32.mrf.mxu2 }
 0x71b   :  { %v2947_v20 = vadd.f32 %v2946_v18, %v2927_v61  ;;  %v11368_v61 = vld [vmem:[#allocation12_spill] sm:$0xff] }
 0x71c   :  { %v3047_v27 = vpop.f32.mrf.mxu3 }
 0x71d   :  { %v2967_v38 = vadd.f32 %v2966_v28, %v2947_v20  ;;  %v11369_v20 = vld [vmem:[#allocation54_spill] sm:$0xff] }
 0x71f   :  { %v2987_v44 = vpop.f32.mrf.mxu0  ;;  %v2969_v22 = vmul.f32 0.001953125, %v2967_v38 }
 0x720   :  { %v3007_v60 = vpop.f32.mrf.mxu1 }
 0x721   :  { %v3008_v21 = vadd.f32 %v3007_v60, %v2987_v44  ;;  %v3051_v0 = vmul.f32 %v2969_v22, %v2969_v22 }
 0x722   :  { %v3027_v49 = vpop.f32.mrf.mxu2 }
 0x723   :  { %v3028_v52 = vadd.f32 %v3027_v49, %v3008_v21  ;;  %v11370_v21 = vld [vmem:[#allocation38_spill] sm:$0xff] }
 0x725   :  { %v3048_v15 = vadd.f32 %v3047_v27, %v3028_v52 }
 0x727   :  { %v3050_v59 = vmul.f32 0.001953125, %v3048_v15  ;;  %v11371_v15 = vld [vmem:[#allocation44_spill] sm:$0xff] }
 0x729   :  { %v3052_v45 = vsub.f32 %v3050_v59, %v3051_v0  ;;  %v11372_v59 = vld [vmem:[#allocation39_spill] sm:$0xff] }
 0x72b   :  { %v3053_v33 = vadd.f32 1e-05, %v3052_v45  ;;  %v11373_v45 = vld [vmem:[#allocation20_spill] sm:$0xff] }
 0x72d   :  { %5479 = vrsqrt.f32 %v3053_v33  ;;  %vm3060_vm11 = vweird.f32 %v3053_v33 }
 0x733   :  { %v5480_v48 = vpop.eup %5479 }
 0x734   :  { %v3055_v3 = vmul.f32 %v5480_v48, %v3053_v33  ;;  %vm3061_vm10 = vweird.f32 %v5480_v48 }
 0x735   :  { %vm3062_vm12 = vmor %vm3060_vm11, %vm3061_vm10 }
 0x736   :  { %v3056_v56 = vmul.f32 %v5480_v48, %v3055_v3 }
 0x738   :  { %v3057_v57 = vmul.f32 0.5, %v3056_v56 }
 0x73a   :  { %v3058_v36 = vsub.f32 1.5, %v3057_v57 }
 0x73c   :  { %v3059_v19 = vmul.f32 %v5480_v48, %v3058_v36 }
 0x73e   :  { %v3063_v53 = vsel %vm3062_vm12, %v5480_v48, %v3059_v19  ;;  %v11374_v19 = vld [vmem:[#allocation64_spill] sm:$0xff] }
 0x73f   :  { %v3064_v34 = vmul.f32 %v3063_v53, %v2711_v24  ;;  %v11375_v53 = vld [vmem:[#allocation18_spill] sm:$0xff] }
 0x741   :  { %5185 = vmatmul.msk.f32.vlgmr.msra.gmra.mxu0 %vm95_vm0, %v3064_v34  ;;  %5186 = vmatmul.msk.f32.vlgmr.msra.gmra.mxu1 %vm95_vm0, %v3064_v34  ;;  %v3065_v23 = vmul.f32 %v3064_v34, %v2969_v22 }
 0x742   :  { %5187 = vmatmul.msk.f32.vlgmr.msrb.gmra.mxu2 %vm95_vm0, %v3064_v34  ;;  %5188 = vmatmul.msk.f32.vlgmr.msrb.gmra.mxu3 %vm95_vm0, %v3064_v34 }
 0x743   :  { %v3066_v2 = vsub.f32 %v2712_v12, %v3065_v23 }
 0x749   :  { %5189 = vmatmul.msk.f32.vlgmr.msrb.gmra.mxu0 %vm95_vm0, %v3066_v2  ;;  %5190 = vmatmul.msk.f32.vlgmr.msrb.gmra.mxu1 %vm95_vm0, %v3066_v2 }
 0x74a   :  { %5191 = vmatmul.msk.f32.vlgmr.msra.gmra.mxu2 %vm95_vm0, %v3066_v2  ;;  %5192 = vmatmul.msk.f32.vlgmr.msra.gmra.mxu3 %vm95_vm0, %v3066_v2 }
 0x7be   :  { %v3087_v39 = vpop.f32.mrf.mxu0  ;;  %v3107_v1 = vpop.f32.mrf.mxu1 }
 0x7bf   :  { %v3233_v26 = vperm.slane %v3087_v39, 0  ;;  %v3234_v13 = vperm.slane %v3107_v1, 0 }
 0x7c1   :  { %v3249_v62 = vmul.f32 %v3233_v26, %v9145_v25  ;;  %v3250_v50 = vmul.f32 %v3234_v13, %v9147_v29  ;;  %v3241_v18 = vmul.f32 %v3233_v26, %v11368_v61  ;;  %v3245_v38 = vmul.f32 %v3233_v26, %v11369_v20 }
 0x7c2   :  { %v3246_v49 = vmul.f32 %v3234_v13, %v11370_v21  ;;  %v3237_v0 = vmul.f32 %v3233_v26, %v11371_v15  ;;  %v9787_v24 = vmul.f32 %v3234_v13, %v11374_v19 }
 0x7c5   :  { %v3127_v63 = vpop.f32.mrf.mxu2  ;;  %v3147_v55 = vpop.f32.mrf.mxu3 }
 0x7c6   :  { %v3170_v31 = vpop.f32.mrf.mxu0  ;;  %v3190_v4 = vpop.f32.mrf.mxu1  ;;  %v9751_v5 = vperm.slane %v3127_v63, 0  ;;  %v9757_v30 = vperm.slane %v3147_v55, 0 }
 0x7c7   :  { %v9731_v7 = vperm.slane %v3170_v31, 0  ;;  %v9740_v9 = vperm.slane %v3190_v4, 0  ;;  %v11376_v31 = vld [vmem:[#allocation58_spill] sm:$0xff] }
 0x7c8   :  { %v3251_v6 = vmul.f32 %v9751_v5, %v9078_v42  ;;  %v9773_v42 = vmul.f32 %v3234_v13, %v11372_v59  ;;  %v3252_v33 = vmul.f32 %v9757_v30, %v11373_v45  ;;  %v9791_v34 = vmul.f32 %v9751_v5, %v11375_v53 }
 0x7c9   :  { %v9735_v17 = vadd.f32 %v9731_v7, %v3249_v62  ;;  %v9746_v25 = vadd.f32 %v9740_v9, %v3250_v50  ;;  %v9778_v56 = vadd.f32 %v9731_v7, %v3245_v38  ;;  %v9781_v57 = vadd.f32 %v9740_v9, %v3246_v49 }
 0x7ca   :  { %v9784_v36 = vadd.f32 %v9731_v7, %v3241_v18  ;;  %v9803_v62 = vmul.f32 %v9751_v5, %v11376_v31 }
 0x7cb   :  { %v9738_v58 = vmul.f32 0.70710677, %v9735_v17  ;;  %v9749_v14 = vmul.f32 0.70710677, %v9746_v25  ;;  %v9806_v13 = vmul.f32 0.70710677, %v9778_v56 }
 0x7cc   :  { %v9809_v63 = vmul.f32 0.70710677, %v9781_v57 }
 0x7cd   :  { %v3785_v47 = vmul.f32 %v9738_v58, %v9738_v58  ;;  %v3210_v16 = vpop.f32.mrf.mxu2  ;;  %v3825_v46 = vmul.f32 %v9749_v14, %v9749_v14  ;;  %v3230_v35 = vpop.f32.mrf.mxu3 }
 0x7ce   :  { %v9755_v11 = vperm.slane %v3210_v16, 0  ;;  %v9769_v22 = vperm.slane %v3230_v35, 0  ;;  %v3625_v16 = vmul.f32 %v9806_v13, %v9806_v13  ;;  %v9834_v35 = vmul.f32 0.5, %v9735_v17 }
 0x7cf   :  { %v3786_v41 = vmin.f32 %v3785_v47, 16.0  ;;  %v9763_v44 = vmin.f32 %v3825_v46, 16.0 }
 0x7d0   :  { %v9767_v27 = vadd.f32 %v9755_v11, %v3251_v6  ;;  %v9798_v39 = vadd.f32 %v9769_v22, %v3252_v33  ;;  %v9836_v6 = vmin.f32 %v3625_v16, 16.0 }
 0x7d1   :  { %v3787_v43 = vmul.f32 2.1237322e-06, %v3786_v41  ;;  %v3798_v54 = vmul.f32 3.8918573e-05, %v3786_v41  ;;  %v3827_v12 = vmul.f32 2.1237322e-06, %v9763_v44 }
 0x7d2   :  { %v9795_v2 = vmul.f32 0.70710677, %v9767_v27  ;;  %v3838_v26 = vmul.f32 3.8918573e-05, %v9763_v44  ;;  %v3627_v17 = vmul.f32 2.1237322e-06, %v9836_v6 }
 0x7d3   :  { %v3788_v40 = vadd.f32 0.00028619796, %v3787_v43  ;;  %v3799_v32 = vadd.f32 0.001143296, %v3798_v54  ;;  %v3828_v4 = vadd.f32 0.00028619796, %v3827_v12  ;;  %v9859_v12 = vadd.f32 %v9731_v7, %v3237_v0 }
 0x7d4   :  { %v3839_v55 = vadd.f32 0.001143296, %v3838_v26  ;;  %v9812_v43 = vmul.f32 0.70710677, %v9784_v36  ;;  %v11377_v54 = vld [vmem:[#allocation62_spill] sm:$0xff]  ;;  %v9842_v61 = vmul.f32 %v9795_v2, %v9795_v2 }
 0x7d5   :  { %v3789_v37 = vmul.f32 %v3788_v40, %v3786_v41  ;;  %v3800_v29 = vmul.f32 %v3799_v32, %v3786_v41  ;;  %v9816_v40 = vmul.f32 %v9757_v30, %v11377_v54  ;;  %v3829_v32 = vmul.f32 %v3828_v4, %v9763_v44 }
 0x7d6   :  { %v3465_v20 = vmul.f32 %v9812_v43, %v9812_v43  ;;  %v3638_v21 = vmul.f32 3.8918573e-05, %v9836_v6 }
 0x7d7   :  { %v3790_v10 = vadd.f32 0.0036580483, %v3789_v37  ;;  %v3801_v8 = vadd.f32 0.014752088, %v3800_v29  ;;  %v3665_v37 = vmul.f32 %v9809_v63, %v9809_v63  ;;  %v11378_v29 = vld [vmem:[#allocation8_spill] sm:$0xff] }
 0x7d8   :  { %v9825_v46 = vmul.f32 %v9757_v30, %v11378_v29 }
 0x7d9   :  { %v3791_v51 = vmul.f32 %v3790_v10, %v3786_v41  ;;  %v3802_v28 = vmul.f32 %v3801_v8, %v3786_v41  ;;  %v3840_v8 = vmul.f32 %v3839_v55, %v9763_v44 }
 0x7db   :  { %v3792_v60 = vadd.f32 0.05243302, %v3791_v51  ;;  %v3803_v52 = vadd.f32 0.112945676, %v3802_v28  ;;  %v3830_v51 = vadd.f32 0.0036580483, %v3829_v32 }
 0x7dc   :  { %v9838_v28 = vmin.f32 %v3665_v37, 16.0 }
 0x7dd   :  { %v3793_v48 = vmul.f32 %v3792_v60, %v3786_v41  ;;  %v3804_v3 = vmul.f32 %v3803_v52, %v3786_v41  ;;  %v3831_v38 = vmul.f32 %v3830_v51, %v9763_v44  ;;  %v3841_v60 = vadd.f32 0.014752088, %v3840_v8 }
 0x7de   :  { %v3667_v15 = vmul.f32 2.1237322e-06, %v9838_v28  ;;  %v3678_v59 = vmul.f32 3.8918573e-05, %v9838_v28 }
 0x7df   :  { %v3794_v23 = vadd.f32 0.18741608, %v3793_v48  ;;  %v3805_v1 = vadd.f32 0.4994258, %v3804_v3  ;;  %v3832_v45 = vadd.f32 0.05243302, %v3831_v38  ;;  %v3842_v33 = vmul.f32 %v3841_v60, %v9763_v44 }
 0x7e0   :  { %v3628_v48 = vadd.f32 0.00028619796, %v3627_v17  ;;  %v3639_v3 = vadd.f32 0.001143296, %v3638_v21  ;;  %v3668_v19 = vadd.f32 0.00028619796, %v3667_v15 }
 0x7e1   :  { %v3795_v50 = vmul.f32 %v3794_v23, %v3786_v41  ;;  %v3806_v47 = vmul.f32 %v3805_v1, %v3786_v41  ;;  %v9828_v41 = vmul.f32 0.70710677, %v9798_v39  ;;  %v3679_v53 = vadd.f32 0.001143296, %v3678_v59 }
 0x7e2   :  { %v9856_v23 = vmin.f32 %v3465_v20, 16.0  ;;  %v3833_v1 = vmul.f32 %v3832_v45, %v9763_v44  ;;  %v3843_v26 = vadd.f32 0.112945676, %v3842_v33  ;;  %v3629_v31 = vmul.f32 %v3628_v48, %v9836_v6 }
 0x7e3   :  { %v9830_v10 = vadd.f32 1.0, %v3806_v47  ;;  %v3796_v18 = vadd.f32 1.1283791, %v3795_v50  ;;  %v3905_v49 = vmul.f32 %v9828_v41, %v9828_v41  ;;  %v3640_v4 = vmul.f32 %v3639_v3, %v9836_v6 }
 0x7e4   :  { %v3669_v55 = vmul.f32 %v3668_v19, %v9838_v28  ;;  %v3680_v54 = vmul.f32 %v3679_v53, %v9838_v28  ;;  %v3467_v32 = vmul.f32 2.1237322e-06, %v9856_v23  ;;  %v3834_v0 = vadd.f32 0.18741608, %v3833_v1 }
 0x7e5   :  { %5481 = vrcp.f32 %v9830_v10  ;;  %v3817_v52 = vand.u32 2147483647, %v9830_v10  ;;  %v3797_v47 = vmul.f32 %v3796_v18, %v9738_v58  ;;  %v3819_v7 = vand.u32 2147483648, %v9830_v10 }
 0x7e6   :  { %v3844_v37 = vmul.f32 %v3843_v26, %v9763_v44  ;;  %vm3813_vm13 = vweird.f32 %v9830_v10  ;;  %v3630_v29 = vadd.f32 0.0036580483, %v3629_v31  ;;  %v3641_v8 = vadd.f32 0.014752088, %v3640_v4 }
 0x7e7   :  { %v3670_v51 = vadd.f32 0.0036580483, %v3669_v55  ;;  %vm9872_vm15 = vcmp.eq.f32.partialorder %v3817_v52, 8.507059e+37  ;;  %v3681_v38 = vadd.f32 0.014752088, %v3680_v54  ;;  %v3820_v1 = vor.u32 1.1754944e-38, %v3819_v7 }
 0x7e8   :  { %v3845_v18 = vadd.f32 0.4994258, %v3844_v37  ;;  %v3631_v60 = vmul.f32 %v3630_v29, %v9836_v6  ;;  %v3642_v17 = vmul.f32 %v3641_v8, %v9836_v6  ;;  %v3468_v15 = vadd.f32 0.00028619796, %v3467_v32 }
 0x7e9   :  { %v3671_v21 = vmul.f32 %v3670_v51, %v9838_v28  ;;  %v3682_v33 = vmul.f32 %v3681_v38, %v9838_v28  ;;  %v3835_v4 = vmul.f32 %v3834_v0, %v9763_v44  ;;  %v3478_v7 = vmul.f32 3.8918573e-05, %v9856_v23 }
 0x7ea   :  { %v3846_v45 = vmul.f32 %v3845_v18, %v9763_v44  ;;  %v3632_v48 = vadd.f32 0.05243302, %v3631_v60  ;;  %v3643_v52 = vadd.f32 0.112945676, %v3642_v17  ;;  %v3469_v19 = vmul.f32 %v3468_v15, %v9856_v23 }
 0x7eb   :  { %v5482_v50 = vpop.eup %5481  ;;  %v3672_v3 = vadd.f32 0.05243302, %v3671_v21  ;;  %v3683_v31 = vadd.f32 0.112945676, %v3682_v33  ;;  %v9893_v29 = vmin.f32 %v9842_v61, 16.0  ;;  %v9897_v0 = vmin.f32 %v3905_v49, 16.0 }
 0x7ec   :  { %v3809_v16 = vmul.f32 %v5482_v50, %v9830_v10  ;;  %vm3814_vm1 = vweird.f32 %v5482_v50  ;;  %v9882_v26 = vadd.f32 1.0, %v3846_v45  ;;  %v3633_v55 = vmul.f32 %v3632_v48, %v9836_v6 }
 0x7ed   :  { %vm3815_vm2 = vmor %vm3813_vm13, %vm3814_vm1  ;;  %v3644_v54 = vmul.f32 %v3643_v52, %v9836_v6  ;;  %v3673_v32 = vmul.f32 %v3672_v3, %v9838_v28  ;;  %v3470_v37 = vadd.f32 0.0036580483, %v3469_v19  ;;  %v3684_v18 = vmul.f32 %v3683_v31, %v9838_v28 }
 0x7ee   :  { %v3810_v20 = vsub.f32 1.0, %v3809_v16  ;;  %5483 = vrcp.f32 %v9882_v26  ;;  %v3634_v8 = vadd.f32 0.18741608, %v3633_v55  ;;  %v3836_v38 = vadd.f32 1.1283791, %v3835_v4 }
 0x7ef   :  { %v3645_v44 = vadd.f32 0.4994258, %v3644_v54  ;;  %v3685_v21 = vadd.f32 0.4994258, %v3684_v18  ;;  %v3471_v58 = vmul.f32 %v3470_v37, %v9856_v23  ;;  %v3479_v15 = vadd.f32 0.001143296, %v3478_v7 }
 0x7f0   :  { %v3811_v59 = vmul.f32 %v5482_v50, %v3810_v20  ;;  %v3674_v20 = vadd.f32 0.18741608, %v3673_v32  ;;  %v3635_v60 = vmul.f32 %v3634_v8, %v9836_v6  ;;  %v3837_v3 = vmul.f32 %v3836_v38, %v9749_v14 }
 0x7f1   :  { %v3646_v61 = vmul.f32 %v3645_v44, %v9836_v6  ;;  %v3857_v6 = vand.u32 2147483647, %v9882_v26  ;;  %v3686_v48 = vmul.f32 %v3685_v21, %v9838_v28  ;;  %v3480_v52 = vmul.f32 %v3479_v15, %v9856_v23 }
 0x7f2   :  { %v3812_v53 = vadd.f32 %v5482_v50, %v3811_v59  ;;  %v3675_v49 = vmul.f32 %v3674_v20, %v9838_v28  ;;  %vm3853_vm5 = vweird.f32 %v9882_v26  ;;  %v9951_v18 = vmul.f32 0.70710677, %v9859_v12 }
 0x7f3   :  { %v9906_v59 = vadd.f32 1.0, %v3646_v61  ;;  %v9929_v4 = vadd.f32 1.0, %v3686_v48  ;;  %vm9932_vm3 = vcmp.eq.f32.partialorder %v3857_v6, 8.507059e+37 }
 0x7f4   :  { %v3816_v16 = vsel %vm3815_vm2, %v5482_v50, %v3812_v53  ;;  %v9901_v50 = vmul.f32 0.5, %v9746_v25  ;;  %v9915_v25 = vadd.f32 %v9740_v9, %v9773_v42  ;;  %v5484_v45 = vpop.eup %5483  ;;  %v3859_v53 = vand.u32 2147483648, %v9882_v26 }
 0x7f5   :  { %v3821_v10 = vsel %vm9872_vm15, %v3820_v1, %v3816_v16  ;;  %v3849_v19 = vmul.f32 %v5484_v45, %v9882_v26  ;;  %5485 = vrcp.f32 %v9906_v59  ;;  %v3472_v42 = vadd.f32 0.05243302, %v3471_v58 }
 0x7f6   :  { %v3822_v51 = vmul.f32 %v3821_v10, %v3797_v47  ;;  %v9911_v47 = vadd.f32 %v9740_v9, %v9787_v24  ;;  %v3636_v9 = vadd.f32 1.1283791, %v3635_v60  ;;  %v3657_v28 = vand.u32 2147483647, %v9906_v59 }
 0x7f7   :  { %v3850_v1 = vsub.f32 1.0, %v3849_v19  ;;  %v3676_v31 = vadd.f32 1.1283791, %v3675_v49  ;;  %v3659_v55 = vand.u32 2147483648, %v9906_v59  ;;  %vm3854_vm6 = vweird.f32 %v5484_v45 }
 0x7f8   :  { %v5205_v17 = vclamps-f32 %v3822_v51, 1.0  ;;  %v9938_v54 = vmul.f32 0.70710677, %v9911_v47  ;;  %v3860_v16 = vor.u32 1.1754944e-38, %v3859_v53  ;;  %5487 = vrcp.f32 %v9929_v4  ;;  %vm3855_vm8 = vmor %vm3853_vm5, %vm3854_vm6 }
 0x7f9   :  { %v3851_v32 = vmul.f32 %v5484_v45, %v3850_v1  ;;  %v3637_v37 = vmul.f32 %v3636_v9, %v9806_v13  ;;  %v3473_v7 = vmul.f32 %v3472_v42, %v9856_v23  ;;  %vm3653_vm7 = vweird.f32 %v9906_v59 }
 0x7fa   :  { %v3957_v33 = vadd.f32 1.0, %v5205_v17  ;;  %v3505_v8 = vmul.f32 %v9938_v54, %v9938_v54  ;;  %v9948_v20 = vmul.f32 %v3676_v31, %v9809_v63  ;;  %vm9956_vm9 = vcmp.eq.f32.partialorder %v3657_v28, 8.507059e+37 }
 0x7fb   :  { %v5486_v44 = vpop.eup %5485  ;;  %v3852_v51 = vadd.f32 %v5484_v45, %v3851_v32  ;;  %v3660_v60 = vor.u32 1.1754944e-38, %v3659_v55  ;;  %v3697_v61 = vand.u32 2147483647, %v9929_v4  ;;  %v3305_v63 = vmul.f32 %v9951_v18, %v9951_v18 }
 0x7fc   :  { %v9925_v24 = vmul.f32 %v3957_v33, %v9834_v35  ;;  %v3481_v35 = vadd.f32 0.014752088, %v3480_v52  ;;  %v3649_v13 = vmul.f32 %v5486_v44, %v9906_v59  ;;  %v9961_v58 = vmin.f32 %v3505_v8, 16.0 }
 0x7fd   :  { %v3856_v17 = vsel %vm3855_vm8, %v5484_v45, %v3852_v51  ;;  %vm3693_vm14 = vweird.f32 %v9929_v4  ;;  %v3699_v49 = vand.u32 2147483648, %v9929_v4  ;;  %v3474_v33 = vadd.f32 0.18741608, %v3473_v7 }
 0x7fe   :  { %3993 = vmatpush.msra.mxu0 %v9925_v24  ;;  %v3482_v10 = vmul.f32 %v3481_v35, %v9856_v23  ;;  %v3861_v26 = vsel %vm9932_vm3, %v3860_v16, %v3856_v17  ;;  %v3650_v15 = vsub.f32 1.0, %v3649_v13  ;;  %v5488_v6 = vpop.eup %5487  ;;  %v3507_v45 = vmul.f32 2.1237322e-06, %v9961_v58 }
 0x7ff   :  { %v3862_v48 = vmul.f32 %v3861_v26, %v3837_v3  ;;  %v3518_v19 = vmul.f32 3.8918573e-05, %v9961_v58  ;;  %vm3654_vm10 = vweird.f32 %v5486_v44  ;;  %v3689_v9 = vmul.f32 %v5488_v6, %v9929_v4 }
 0x800   :  { %v3483_v21 = vadd.f32 0.112945676, %v3482_v10  ;;  %v3651_v53 = vmul.f32 %v5486_v44, %v3650_v15  ;;  %vm9973_vm11 = vcmp.eq.f32.partialorder %v3697_v61, 8.507059e+37  ;;  %v3508_v31 = vadd.f32 0.00028619796, %v3507_v45  ;;  %vm3655_vm12 = vmor %vm3653_vm7, %vm3654_vm10 }
 0x801   :  { %v5206_v1 = vclamps-f32 %v3862_v48, 1.0  ;;  %v9977_v14 = vmin.f32 %v3305_v63, 16.0  ;;  %v3690_v55 = vsub.f32 1.0, %v3689_v9  ;;  %v3519_v35 = vadd.f32 0.001143296, %v3518_v19 }
 0x802   :  { %v3484_v52 = vmul.f32 %v3483_v21, %v9856_v23  ;;  %v3652_v3 = vadd.f32 %v5486_v44, %v3651_v53  ;;  %v9980_v32 = vmul.f32 0.70710677, %v9915_v25  ;;  %v3509_v10 = vmul.f32 %v3508_v31, %v9961_v58 }
 0x803   :  { %v3958_v16 = vadd.f32 1.0, %v5206_v1  ;;  %v3307_v8 = vmul.f32 2.1237322e-06, %v9977_v14  ;;  %v3691_v13 = vmul.f32 %v5488_v6, %v3690_v55  ;;  %vm3694_vm13 = vweird.f32 %v5488_v6 }
 0x804   :  { %v3485_v28 = vadd.f32 0.4994258, %v3484_v52  ;;  %v3656_v51 = vsel %vm3655_vm12, %v5486_v44, %v3652_v3  ;;  %v3520_v61 = vmul.f32 %v3519_v35, %v9961_v58  ;;  %v3510_v59 = vadd.f32 0.0036580483, %v3509_v10  ;;  %vm3695_vm15 = vmor %vm3693_vm14, %vm3694_vm13 }
 0x805   :  { %v9989_v17 = vmul.f32 %v3958_v16, %v9901_v50  ;;  %v3661_v21 = vsel %vm9956_vm9, %v3660_v60, %v3656_v51  ;;  %v3692_v15 = vadd.f32 %v5488_v6, %v3691_v13  ;;  %v3308_v52 = vadd.f32 0.00028619796, %v3307_v8 }
 0x806   :  { %v3486_v7 = vmul.f32 %v3485_v28, %v9856_v23  ;;  %v3662_v26 = vmul.f32 %v3661_v21, %v3637_v37  ;;  %v3521_v48 = vadd.f32 0.014752088, %v3520_v61  ;;  %v3700_v44 = vor.u32 1.1754944e-38, %v3699_v49 }
 0x807   :  { %4013 = vmatpush.msra.mxu1 %v9989_v17  ;;  %v3318_v50 = vmul.f32 3.8918573e-05, %v9977_v14  ;;  %v3345_v38 = vmul.f32 %v9980_v32, %v9980_v32  ;;  %v3696_v45 = vsel %vm3695_vm15, %v5488_v6, %v3692_v15  ;;  %v3511_v37 = vmul.f32 %v3510_v59, %v9961_v58 }
 0x808   :  { %v9993_v63 = vadd.f32 1.0, %v3486_v7  ;;  %v5201_v60 = vclamps-f32 %v3662_v26, 1.0  ;;  %v3522_v19 = vmul.f32 %v3521_v48, %v9961_v58  ;;  %v3281_v53 = vmul.f32 0.5, %v9778_v56 }
 0x809   :  { %v3701_v4 = vsel %vm9973_vm11, %v3700_v44, %v3696_v45  ;;  %v3475_v49 = vmul.f32 %v3474_v33, %v9856_v23  ;;  %v3309_v9 = vmul.f32 %v3308_v52, %v9977_v14  ;;  %v3512_v31 = vadd.f32 0.05243302, %v3511_v37 }
 0x80a   :  { %5489 = vrcp.f32 %v9993_v63  ;;  %v3953_v1 = vadd.f32 1.0, %v5201_v60  ;;  %v3702_v28 = vmul.f32 %v3701_v4, %v9948_v20  ;;  %v3523_v3 = vadd.f32 0.112945676, %v3522_v19 }
 0x80b   :  { %v3282_v6 = vmul.f32 0.5, %v9781_v57  ;;  %v3310_v55 = vadd.f32 0.0036580483, %v3309_v9  ;;  %v3319_v35 = vadd.f32 0.001143296, %v3318_v50  ;;  %v10011_v16 = vmin.f32 %v3345_v38, 16.0 }
 0x80c   :  { %v10013_v7 = vmul.f32 %v3953_v1, %v3281_v53  ;;  %v5202_v56 = vclamps-f32 %v3702_v28, 1.0  ;;  %v3513_v42 = vmul.f32 %v3512_v31, %v9961_v58  ;;  %v3524_v23 = vmul.f32 %v3523_v3, %v9961_v58 }
 0x80d   :  { %v3311_v10 = vmul.f32 %v3310_v55, %v9977_v14  ;;  %v3320_v20 = vmul.f32 %v3319_v35, %v9977_v14  ;;  %v3347_v8 = vmul.f32 2.1237322e-06, %v10011_v16  ;;  %v3358_v57 = vmul.f32 3.8918573e-05, %v10011_v16 }
 0x80e   :  { %3994 = vmatpush.msra.mxu0 %v10013_v7  ;;  %v3954_v51 = vadd.f32 1.0, %v5202_v56  ;;  %v3476_v13 = vadd.f32 1.1283791, %v3475_v49  ;;  %v3497_v21 = vand.u32 2147483647, %v9993_v63  ;;  %v10025_v59 = vmul.f32 0.5, %v9784_v36 }
 0x80f   :  { %v3499_v26 = vand.u32 2147483648, %v9993_v63  ;;  %v3525_v15 = vadd.f32 0.4994258, %v3524_v23  ;;  %v3321_v48 = vadd.f32 0.014752088, %v3320_v20  ;;  %vm3493_vm2 = vweird.f32 %v9993_v63 }
 0x810   :  { %v5490_v33 = vpop.eup %5489  ;;  %v10028_v52 = vmul.f32 %v3954_v51, %v3282_v6  ;;  %v3514_v50 = vadd.f32 0.18741608, %v3513_v42  ;;  %v3348_v38 = vadd.f32 0.00028619796, %v3347_v8  ;;  %v3312_v45 = vadd.f32 0.05243302, %v3311_v10 }
 0x811   :  { %v3489_v61 = vmul.f32 %v5490_v33, %v9993_v63  ;;  %v3526_v60 = vmul.f32 %v3525_v15, %v9961_v58  ;;  %v3322_v37 = vmul.f32 %v3321_v48, %v9977_v14  ;;  %v3359_v19 = vadd.f32 0.001143296, %v3358_v57 }
 0x812   :  { %4014 = vmatpush.msra.mxu1 %v10028_v52  ;;  %vm3494_vm1 = vweird.f32 %v5490_v33  ;;  %v3349_v36 = vmul.f32 %v3348_v38, %v10011_v16  ;;  %v3867_v4 = vmul.f32 2.1237322e-06, %v9893_v29  ;;  %v3477_v49 = vmul.f32 %v3476_v13, %v9812_v43 }
 0x813   :  { %v3490_v44 = vsub.f32 1.0, %v3489_v61  ;;  %v10036_v9 = vadd.f32 1.0, %v3526_v60  ;;  %v3323_v1 = vadd.f32 0.112945676, %v3322_v37  ;;  %v3360_v28 = vmul.f32 %v3359_v19, %v10011_v16  ;;  %vm3495_vm5 = vmor %vm3493_vm2, %vm3494_vm1 }
 0x814   :  { %v3515_v3 = vmul.f32 %v3514_v50, %v9961_v58  ;;  %v3350_v6 = vadd.f32 0.0036580483, %v3349_v36  ;;  %v3500_v55 = vor.u32 1.1754944e-38, %v3499_v26  ;;  %v3313_v35 = vmul.f32 %v3312_v45, %v9977_v14 }
 0x815   :  { %v3491_v53 = vmul.f32 %v5490_v33, %v3490_v44  ;;  %5491 = vrcp.f32 %v10036_v9  ;;  %v3868_v56 = vadd.f32 0.00028619796, %v3867_v4  ;;  %vm3498_vm3 = vcmp.eq.f32.partialorder %v3497_v21, 8.507059e+37 }
 0x816   :  { %v3324_v43 = vmul.f32 %v3323_v1, %v9977_v14  ;;  %v3351_v23 = vmul.f32 %v3350_v6, %v10011_v16  ;;  %v10046_v20 = vmul.f32 0.5, %v9911_v47  ;;  %v10049_v58 = vmul.f32 0.5, %v9859_v12 }
 0x817   :  { %v3492_v31 = vadd.f32 %v5490_v33, %v3491_v53  ;;  %v3361_v63 = vadd.f32 0.014752088, %v3360_v28  ;;  %v3516_v57 = vadd.f32 1.1283791, %v3515_v3  ;;  %v10052_v13 = vmul.f32 0.5, %v9915_v25 }
 0x818   :  { %v3325_v51 = vadd.f32 0.4994258, %v3324_v43  ;;  %v3869_v21 = vmul.f32 %v3868_v56, %v9893_v29  ;;  %v3878_v26 = vmul.f32 3.8918573e-05, %v9893_v29  ;;  %v3537_v47 = vand.u32 2147483647, %v10036_v9 }
 0x819   :  { %v3496_v42 = vsel %vm3495_vm5, %v5490_v33, %v3492_v31  ;;  %v3314_v33 = vadd.f32 0.18741608, %v3313_v35  ;;  %v3362_v61 = vmul.f32 %v3361_v63, %v10011_v16  ;;  %v3352_v48 = vadd.f32 0.05243302, %v3351_v23 }
 0x81a   :  { %v3501_v10 = vsel %vm3498_vm3, %v3500_v55, %v3496_v42  ;;  %v3326_v12 = vmul.f32 %v3325_v51, %v9977_v14  ;;  %v3870_v38 = vadd.f32 0.0036580483, %v3869_v21  ;;  %v3879_v60 = vadd.f32 0.001143296, %v3878_v26 }
 0x81b   :  { %v3502_v8 = vmul.f32 %v3501_v10, %v3477_v49  ;;  %v5492_v44 = vpop.eup %5491  ;;  %v3363_v50 = vadd.f32 0.112945676, %v3362_v61  ;;  %v10061_v25 = vadd.f32 %v9755_v11, %v9803_v62  ;;  %v3539_v19 = vand.u32 2147483648, %v10036_v9 }
 0x81c   :  { %v3529_v37 = vmul.f32 %v5492_v44, %v10036_v9  ;;  %v10065_v53 = vadd.f32 1.0, %v3326_v12  ;;  %v3315_v36 = vmul.f32 %v3314_v33, %v9977_v14  ;;  %v3871_v49 = vmul.f32 %v3870_v38, %v9893_v29 }
 0x81d   :  { %v5197_v15 = vclamps-f32 %v3502_v8, 1.0  ;;  %v3364_v4 = vmul.f32 %v3363_v50, %v10011_v16  ;;  %v3880_v1 = vmul.f32 %v3879_v60, %v9893_v29  ;;  %v3353_v31 = vmul.f32 %v3352_v48, %v10011_v16 }
 0x81e   :  { %v3530_v62 = vsub.f32 1.0, %v3529_v37  ;;  %5493 = vrcp.f32 %v10065_v53  ;;  %v3517_v3 = vmul.f32 %v3516_v57, %v9938_v54  ;;  %vm3533_vm6 = vweird.f32 %v10036_v9 }
 0x81f   :  { %v3949_v45 = vadd.f32 1.0, %v5197_v15  ;;  %vm3534_vm7 = vweird.f32 %v5492_v44  ;;  %v3365_v14 = vadd.f32 0.4994258, %v3364_v4  ;;  %v3872_v55 = vadd.f32 0.05243302, %v3871_v49 }
 0x820   :  { %v3531_v6 = vmul.f32 %v5492_v44, %v3530_v62  ;;  %v3881_v35 = vadd.f32 0.014752088, %v3880_v1  ;;  %v3907_v56 = vmul.f32 2.1237322e-06, %v9897_v0  ;;  %vm10080_vm8 = vcmp.eq.f32.partialorder %v3537_v47, 8.507059e+37  ;;  %vm3535_vm9 = vmor %vm3533_vm6, %vm3534_vm7 }
 0x821   :  { %v10072_v28 = vmul.f32 %v3949_v45, %v10025_v59  ;;  %v3540_v42 = vor.u32 1.1754944e-38, %v3539_v19  ;;  %v3316_v43 = vadd.f32 1.1283791, %v3315_v36  ;;  %v3366_v23 = vmul.f32 %v3365_v14, %v10011_v16 }
 0x822   :  { %v3532_v54 = vadd.f32 %v5492_v44, %v3531_v6  ;;  %v3354_v10 = vadd.f32 0.18741608, %v3353_v31  ;;  %v3882_v63 = vmul.f32 %v3881_v35, %v9893_v29  ;;  %v3908_v8 = vadd.f32 0.00028619796, %v3907_v56 }
 0x823   :  { %3995 = vmatpush.msra.mxu0 %v10072_v28  ;;  %v3337_v57 = vand.u32 2147483647, %v10065_v53  ;;  %v3339_v51 = vand.u32 2147483648, %v10065_v53  ;;  %v10091_v33 = vadd.f32 1.0, %v3366_v23  ;;  %v3873_v61 = vmul.f32 %v3872_v55, %v9893_v29 }
 0x824   :  { %v5494_v21 = vpop.eup %5493  ;;  %v3536_v26 = vsel %vm3535_vm9, %v5492_v44, %v3532_v54  ;;  %v3883_v15 = vadd.f32 0.112945676, %v3882_v63  ;;  %v3909_v47 = vmul.f32 %v3908_v8, %v9897_v0  ;;  %v3918_v12 = vmul.f32 3.8918573e-05, %v9897_v0 }
 0x825   :  { %v3541_v48 = vsel %vm10080_vm8, %v3540_v42, %v3536_v26  ;;  %v3317_v9 = vmul.f32 %v3316_v43, %v9951_v18  ;;  %v3329_v50 = vmul.f32 %v5494_v21, %v10065_v53  ;;  %5495 = vrcp.f32 %v10091_v33 }
 0x826   :  { %v3542_v38 = vmul.f32 %v3541_v48, %v3517_v3  ;;  %vm3333_vm14 = vweird.f32 %v10065_v53  ;;  %v3355_v60 = vmul.f32 %v3354_v10, %v10011_v16  ;;  %v10105_v44 = vadd.f32 %v9769_v22, %v9825_v46 }
 0x827   :  { %v3330_v45 = vsub.f32 1.0, %v3329_v50  ;;  %vm10107_vm10 = vcmp.eq.f32.partialorder %v3337_v57, 8.507059e+37  ;;  %v3884_v18 = vmul.f32 %v3883_v15, %v9893_v29  ;;  %v3910_v19 = vadd.f32 0.0036580483, %v3909_v47 }
 0x828   :  { %v5198_v36 = vclamps-f32 %v3542_v38, 1.0  ;;  %v3340_v4 = vor.u32 1.1754944e-38, %v3339_v51  ;;  %v3874_v49 = vadd.f32 0.18741608, %v3873_v61  ;;  %v3919_v1 = vadd.f32 0.001143296, %v3918_v12 }
 0x829   :  { %v3331_v62 = vmul.f32 %v5494_v21, %v3330_v45  ;;  %vm3334_vm11 = vweird.f32 %v5494_v21  ;;  %v3885_v31 = vadd.f32 0.4994258, %v3884_v18  ;;  %v3911_v16 = vmul.f32 %v3910_v19, %v9897_v0 }
 0x82a   :  { %v3950_v3 = vadd.f32 1.0, %v5198_v36  ;;  %v3356_v46 = vadd.f32 1.1283791, %v3355_v60  ;;  %v3920_v14 = vmul.f32 %v3919_v1, %v9897_v0  ;;  %v10115_v6 = vmul.f32 0.70710677, %v10061_v25  ;;  %vm3335_vm12 = vmor %vm3333_vm14, %vm3334_vm11 }
 0x82b   :  { %v5496_v55 = vpop.eup %5495  ;;  %v3332_v35 = vadd.f32 %v5494_v21, %v3331_v62  ;;  %v3377_v56 = vand.u32 2147483647, %v10091_v33  ;;  %v3379_v59 = vand.u32 2147483648, %v10091_v33  ;;  %v3886_v42 = vmul.f32 %v3885_v31, %v9893_v29 }
 0x82c   :  { %v10121_v43 = vmul.f32 %v3950_v3, %v10046_v20  ;;  %v3369_v23 = vmul.f32 %v5496_v55, %v10091_v33  ;;  %v3875_v54 = vmul.f32 %v3874_v49, %v9893_v29  ;;  %v3921_v10 = vadd.f32 0.014752088, %v3920_v14 }
 0x82d   :  { %v3336_v63 = vsel %vm3335_vm12, %v5494_v21, %v3332_v35  ;;  %v10127_v8 = vadd.f32 1.0, %v3886_v42  ;;  %v3912_v57 = vadd.f32 0.05243302, %v3911_v16  ;;  %v3705_v51 = vmul.f32 %v10115_v6, %v10115_v6 }
 0x82e   :  { %4015 = vmatpush.msra.mxu1 %v10121_v43  ;;  %v3341_v20 = vsel %vm10107_vm10, %v3340_v4, %v3336_v63  ;;  %v3370_v61 = vsub.f32 1.0, %v3369_v23  ;;  %v3922_v53 = vmul.f32 %v3921_v10, %v9897_v0  ;;  %v10136_v26 = vmul.f32 0.70710677, %v10105_v44 }
 0x82f   :  { %v3342_v29 = vmul.f32 %v3341_v20, %v3317_v9  ;;  %v3357_v21 = vmul.f32 %v3356_v46, %v9980_v32  ;;  %vm3373_vm13 = vweird.f32 %v10091_v33  ;;  %5497 = vrcp.f32 %v10127_v8 }
 0x830   :  { %v3371_v15 = vmul.f32 %v5496_v55, %v3370_v61  ;;  %vm3374_vm15 = vweird.f32 %v5496_v55  ;;  %v3876_v47 = vadd.f32 1.1283791, %v3875_v54  ;;  %v3923_v12 = vadd.f32 0.112945676, %v3922_v53 }
 0x831   :  { %v5193_v48 = vclamps-f32 %v3342_v29, 1.0  ;;  %vm10141_vm1 = vcmp.eq.f32.partialorder %v3377_v56, 8.507059e+37  ;;  %v10145_v38 = vmin.f32 %v3705_v51, 16.0  ;;  %v3745_v9 = vmul.f32 %v10136_v26, %v10136_v26  ;;  %vm3375_vm2 = vmor %vm3373_vm13, %vm3374_vm15  ;;  %v5599_v51 = vld [vmem:[%s10925_s16 + $0x78] sm:$0xff] }
 0x832   :  { %v3372_v60 = vadd.f32 %v5496_v55, %v3371_v15  ;;  %v3380_v32 = vor.u32 1.1754944e-38, %v3379_v59  ;;  %v3913_v45 = vmul.f32 %v3912_v57, %v9897_v0  ;;  %v3924_v37 = vmul.f32 %v3923_v12, %v9897_v0  ;;  %v5600_v12 = vld [vmem:[%s10925_s16 + $0x70] sm:$0xff] }
 0x833   :  { %v3945_v18 = vadd.f32 1.0, %v5193_v48  ;;  %v3707_v19 = vmul.f32 2.1237322e-06, %v10145_v38  ;;  %v3718_v36 = vmul.f32 3.8918573e-05, %v10145_v38  ;;  %v10155_v4 = vmin.f32 %v3745_v9, 16.0 }
 0x834   :  { %v3376_v49 = vsel %vm3375_vm2, %v5496_v55, %v3372_v60  ;;  %v3877_v1 = vmul.f32 %v3876_v47, %v9795_v2  ;;  %v3897_v62 = vand.u32 2147483647, %v10127_v8  ;;  %v3925_v31 = vadd.f32 0.4994258, %v3924_v37 }
 0x835   :  { %v5498_v16 = vpop.eup %5497  ;;  %v10160_v3 = vmul.f32 %v3945_v18, %v10049_v58  ;;  %v3381_v33 = vsel %vm10141_vm1, %v3380_v32, %v3376_v49  ;;  %v3708_v46 = vadd.f32 0.00028619796, %v3707_v19  ;;  %v3719_v14 = vadd.f32 0.001143296, %v3718_v36 }
 0x836   :  { %v3382_v35 = vmul.f32 %v3381_v33, %v3357_v21  ;;  %v3889_v56 = vmul.f32 %v5498_v16, %v10127_v8  ;;  %v3899_v59 = vand.u32 2147483648, %v10127_v8  ;;  %v3914_v55 = vadd.f32 0.18741608, %v3913_v45  ;;  %v5601_v45 = vld [vmem:[%s10925_s16 + $0x68] sm:$0xff] }
 0x837   :  { %3996 = vmatpush.msra.mxu0 %v10160_v3  ;;  %v3926_v2 = vmul.f32 %v3925_v31, %v9897_v0  ;;  %v3709_v42 = vmul.f32 %v3708_v46, %v10145_v38  ;;  %v3720_v58 = vmul.f32 %v3719_v14, %v10145_v38  ;;  %v3747_v23 = vmul.f32 2.1237322e-06, %v10155_v4 }
 0x838   :  { %v5194_v54 = vclamps-f32 %v3382_v35, 1.0  ;;  %v3890_v10 = vsub.f32 1.0, %v3889_v56  ;;  %v3758_v63 = vmul.f32 3.8918573e-05, %v10155_v4  ;;  %v10174_v57 = vadd.f32 %v9755_v11, %v9791_v34 }
 0x839   :  { %4061 = vmatpush.msrb.mxu0 %v5599_v51  ;;  %vm3894_vm5 = vweird.f32 %v5498_v16  ;;  %v10179_v20 = vadd.f32 1.0, %v3926_v2  ;;  %v3710_v61 = vadd.f32 0.0036580483, %v3709_v42  ;;  %v3721_v53 = vadd.f32 0.014752088, %v3720_v58  ;;  %v5606_v51 = vld [vmem:[%s10925_s16 + $0x50] sm:$0xff] }
 0x83a   :  { %v3946_v29 = vadd.f32 1.0, %v5194_v54  ;;  %v3891_v21 = vmul.f32 %v5498_v16, %v3890_v10  ;;  %v3748_v15 = vadd.f32 0.00028619796, %v3747_v23  ;;  %v3759_v47 = vadd.f32 0.001143296, %v3758_v63 }
 0x83b   :  { %4062 = vmatpush.msrb.mxu0 %v5600_v12  ;;  %vm3893_vm3 = vweird.f32 %v10127_v8  ;;  %vm10185_vm6 = vcmp.eq.f32.partialorder %v3897_v62, 8.507059e+37  ;;  %v3900_v48 = vor.u32 1.1754944e-38, %v3899_v59  ;;  %5499 = vrcp.f32 %v10179_v20  ;;  %v5604_v59 = vld [vmem:[%s10925_s16 + $0x58] sm:$0xff] }
 0x83c   :  { %v10191_v50 = vmul.f32 %v3946_v29, %v10052_v13  ;;  %v3892_v9 = vadd.f32 %v5498_v16, %v3891_v21  ;;  %v3711_v60 = vmul.f32 %v3710_v61, %v10145_v38  ;;  %v3722_v32 = vmul.f32 %v3721_v53, %v10145_v38  ;;  %vm3895_vm7 = vmor %vm3893_vm3, %vm3894_vm5  ;;  %v11395_v61 = vld [vmem:[#allocation6_spill] sm:$0xff] }
 0x83d   :  { %4063 = vmatpush.msrb.mxu0 %v5601_v45  ;;  %v3915_v8 = vmul.f32 %v3914_v55, %v9897_v0  ;;  %v3749_v37 = vmul.f32 %v3748_v15, %v10155_v4  ;;  %v3760_v18 = vmul.f32 %v3759_v47, %v10155_v4  ;;  %v10204_v13 = vadd.f32 %v9769_v22, %v9816_v40  ;;  %v5602_v0 = vld [vmem:[%s10925_s16 + $0x60] sm:$0xff]  ;;  %v5603_v40 = vld [vmem:[%s10925_s16 + $0xf8] sm:$0xff]  ;;  %v5607_v47 = vld [vmem:[%s10925_s16 + $0xe8] sm:$0xff] }
 0x83e   :  { %4016 = vmatpush.msra.mxu1 %v10191_v50  ;;  %v3896_v19 = vsel %vm3895_vm7, %v5498_v16, %v3892_v9  ;;  %v3712_v36 = vadd.f32 0.05243302, %v3711_v60  ;;  %v3723_v49 = vadd.f32 0.112945676, %v3722_v32  ;;  %v10208_v62 = vmul.f32 0.70710677, %v10174_v57 }
 0x83f   :  { %4064 = vmatpush.msrb.mxu0 %v5602_v0  ;;  %v3901_v31 = vsel %vm10185_vm6, %v3900_v48, %v3896_v19  ;;  %v3750_v33 = vadd.f32 0.0036580483, %v3749_v37  ;;  %v3761_v46 = vadd.f32 0.014752088, %v3760_v18  ;;  %v3287_v16 = vmul.f32 0.5, %v9767_v27  ;;  %v5608_v60 = vld [vmem:[%s10925_s16 + $0x48] sm:$0xff] }
 0x840   :  { %4081 = vmatpush.msrb.mxu1 %v5603_v40  ;;  %v3902_v14 = vmul.f32 %v3901_v31, %v3877_v1  ;;  %v3724_v35 = vmul.f32 %v3723_v49, %v10145_v38  ;;  %v3545_v56 = vmul.f32 %v10208_v62, %v10208_v62  ;;  %v3713_v2 = vmul.f32 %v3712_v36, %v10145_v38  ;;  %v5605_v1 = vld [vmem:[%s10925_s16 + $0xf0] sm:$0xff]  ;;  %v5609_v37 = vld [vmem:[%s10925_s16 + $0xe0] sm:$0xff]  ;;  %v5611_v40 = vld [vmem:[%s10925_s16 + $0xd8] sm:$0xff] }
 0x841   :  { %4065 = vmatpush.msrb.mxu0 %v5604_v59  ;;  %v10225_v55 = vpop.eup %5499  ;;  %v3751_v42 = vmul.f32 %v3750_v33, %v10155_v4  ;;  %v3762_v58 = vmul.f32 %v3761_v46, %v10155_v4  ;;  %v10231_v27 = vmul.f32 0.70710677, %v10204_v13  ;;  %v3916_v54 = vadd.f32 1.1283791, %v3915_v8  ;;  %v5610_v49 = vld [vmem:[%s10925_s16 + $0x40] sm:$0xff] }
 0x842   :  { %4082 = vmatpush.msrb.mxu1 %v5605_v1  ;;  %v5207_v23 = vclamps-f32 %v3902_v14, 1.0  ;;  %v3929_v10 = vmul.f32 %v10225_v55, %v10179_v20  ;;  %v3937_v63 = vand.u32 2147483647, %v10179_v20  ;;  %v3239_v53 = vmul.f32 %v9751_v5, %v11395_v61 }
 0x843   :  { %4066 = vmatpush.msrb.mxu0 %v5606_v51  ;;  %v3725_v29 = vadd.f32 0.4994258, %v3724_v35  ;;  %v3752_v21 = vadd.f32 0.05243302, %v3751_v42  ;;  %v3763_v15 = vadd.f32 0.112945676, %v3762_v58  ;;  %v3585_v8 = vmul.f32 %v10231_v27, %v10231_v27 }
 0x844   :  { %4083 = vmatpush.msrb.mxu1 %v5607_v47  ;;  %v3959_v12 = vadd.f32 1.0, %v5207_v23  ;;  %v3930_v34 = vsub.f32 1.0, %v3929_v10  ;;  %v3939_v48 = vand.u32 2147483648, %v10179_v20  ;;  %v10248_v9 = vmin.f32 %v3545_v56, 16.0 }
 0x845   :  { %4067 = vmatpush.msrb.mxu0 %v5608_v60  ;;  %v3714_v5 = vadd.f32 0.18741608, %v3713_v2  ;;  %v3726_v32 = vmul.f32 %v3725_v29, %v10145_v38  ;;  %v3764_v45 = vmul.f32 %v3763_v15, %v10155_v4  ;;  %vm3934_vm8 = vweird.f32 %v10225_v55  ;;  %v5616_v29 = vld [vmem:[%s10925_s16 + $0x28] sm:$0xff] }
 0x846   :  { %4084 = vmatpush.msrb.mxu1 %v5609_v37  ;;  %v10260_v18 = vmul.f32 %v3959_v12, %v3287_v16  ;;  %v3931_v19 = vmul.f32 %v10225_v55, %v3930_v34  ;;  %v3547_v36 = vmul.f32 2.1237322e-06, %v10248_v9  ;;  %v3917_v0 = vmul.f32 %v3916_v54, %v9828_v41  ;;  %v5612_v41 = vld [vmem:[%s10925_s16 + $0x38] sm:$0xff]  ;;  %v5617_v12 = vld [vmem:[%s10925_s16 + $0xc0] sm:$0xff] }
 0x847   :  { %4068 = vmatpush.msrb.mxu0 %v5610_v49  ;;  %v10269_v31 = vadd.f32 1.0, %v3726_v32  ;;  %v3753_v33 = vmul.f32 %v3752_v21, %v10155_v4  ;;  %v3765_v46 = vadd.f32 0.4994258, %v3764_v45  ;;  %vm3933_vm9 = vweird.f32 %v10179_v20  ;;  %v5613_v20 = vld [vmem:[%s10925_s16 + $0xd0] sm:$0xff]  ;;  %v11396_v21 = vld [vmem:[#allocation33_spill] sm:$0xff] }
 0x848   :  { %4085 = vmatpush.msrb.mxu1 %v5611_v40  ;;  %4033 = vmatpush.msrb.mxu2 %v10260_v18  ;;  %v3932_v16 = vadd.f32 %v10225_v55, %v3931_v19  ;;  %v3548_v14 = vadd.f32 0.00028619796, %v3547_v36  ;;  %v3558_v35 = vmul.f32 3.8918573e-05, %v10248_v9  ;;  %vm3935_vm14 = vmor %vm3933_vm9, %vm3934_vm8  ;;  %v3940_v56 = vor.u32 1.1754944e-38, %v3939_v48  ;;  %v5619_v19 = vld [vmem:[%s10925_s16 + $0xb8] sm:$0xff] }
 0x849   :  { %4069 = vmatpush.msrb.mxu0 %v5612_v41  ;;  %v3715_v59 = vmul.f32 %v3714_v5, %v10145_v38  ;;  %5501 = vrcp.f32 %v10269_v31  ;;  %v10286_v2 = vmin.f32 %v3585_v8, 16.0  ;;  %vm3938_vm10 = vcmp.eq.f32.partialorder %v3937_v63, 8.507059e+37  ;;  %v5614_v38 = vld [vmem:[%s10925_s16 + $0x30] sm:$0xff] }
 0x84a   :  { %4086 = vmatpush.msrb.mxu1 %v5613_v20  ;;  %v3936_v42 = vsel %vm3935_vm14, %v10225_v55, %v3932_v16  ;;  %v3766_v58 = vmul.f32 %v3765_v46, %v10155_v4  ;;  %v3549_v1 = vmul.f32 %v3548_v14, %v10248_v9  ;;  %v3754_v54 = vadd.f32 0.18741608, %v3753_v33  ;;  %v5615_v55 = vld [vmem:[%s10925_s16 + $0xc8] sm:$0xff] }
 0x84b   :  { %4070 = vmatpush.msrb.mxu0 %v5614_v38  ;;  %v3941_v23 = vsel %vm3938_vm10, %v3940_v56, %v3936_v42  ;;  %v3559_v10 = vadd.f32 0.001143296, %v3558_v35  ;;  %v10298_v51 = vadd.f32 %v9755_v11, %v3239_v53  ;;  %v10310_v15 = vmul.f32 %v9757_v30, %v11396_v21  ;;  %v5618_v30 = vld [vmem:[%s10925_s16 + $0x20] sm:$0xff] }
 0x84c   :  { %4087 = vmatpush.msrb.mxu1 %v5615_v55  ;;  %v3942_v63 = vmul.f32 %v3941_v23, %v3917_v0  ;;  %v10303_v61 = vadd.f32 1.0, %v3766_v58  ;;  %v3716_v47 = vadd.f32 1.1283791, %v3715_v59  ;;  %v3587_v53 = vmul.f32 2.1237322e-06, %v10286_v2 }
 0x84d   :  { %4071 = vmatpush.msrb.mxu0 %v5616_v29  ;;  %v3560_v11 = vmul.f32 %v3559_v10, %v10248_v9  ;;  %v3550_v48 = vadd.f32 0.0036580483, %v3549_v1  ;;  %v3598_v60 = vmul.f32 3.8918573e-05, %v10286_v2  ;;  %v3288_v32 = vmul.f32 0.5, %v9798_v39  ;;  %v5620_v39 = vld [vmem:[%s10925_s16 + $0x18] sm:$0xff] }
 0x84e   :  { %4088 = vmatpush.msrb.mxu1 %v5617_v12  ;;  %v5208_v34 = vclamps-f32 %v3942_v63, 1.0  ;;  %5503 = vrcp.f32 %v10303_v61  ;;  %v3755_v45 = vmul.f32 %v3754_v54, %v10155_v4  ;;  %v10327_v37 = vmul.f32 0.70710677, %v10298_v51  ;;  %v5623_v1 = vld [vmem:[%s10925_s16 + $0xa8] sm:$0xff] }
 0x84f   :  { %4072 = vmatpush.msrb.mxu0 %v5618_v30  ;;  %v10322_v5 = vpop.eup %5501  ;;  %v3561_v8 = vadd.f32 0.014752088, %v3560_v11  ;;  %v10333_v49 = vmul.f32 0.5, %v10061_v25  ;;  %v3588_v33 = vadd.f32 0.00028619796, %v3587_v53  ;;  %v3717_v4 = vmul.f32 %v3716_v47, %v10115_v6  ;;  %v5621_v25 = vld [vmem:[%s10925_s16 + $0xb0] sm:$0xff] }
 0x850   :  { %4089 = vmatpush.msrb.mxu1 %v5619_v19  ;;  %v3960_v36 = vadd.f32 1.0, %v5208_v34  ;;  %v3729_v0 = vmul.f32 %v10322_v5, %v10269_v31  ;;  %v3737_v46 = vand.u32 2147483647, %v10269_v31  ;;  %v3739_v40 = vand.u32 2147483648, %v10269_v31  ;;  %v5622_v6 = vld [vmem:[%s10925_s16 + $0x10] sm:$0xff]  ;;  %v5624_v10 = vld [vmem:[%s10925_s16 + $0x8] sm:$0xff] }
 0x851   :  { %4073 = vmatpush.msrb.mxu0 %v5620_v39  ;;  %v3562_v16 = vmul.f32 %v3561_v8, %v10248_v9  ;;  %v3551_v41 = vmul.f32 %v3550_v48, %v10248_v9  ;;  %v3599_v56 = vadd.f32 0.001143296, %v3598_v60  ;;  %v3756_v59 = vadd.f32 1.1283791, %v3755_v45  ;;  %v5625_v47 = vld [vmem:[%s10925_s16 + $0xa0] sm:$0xff]  ;;  %v5627_v8 = vld [vmem:[%s10925_s16 + $0x98] sm:$0xff] }
 0x852   :  { %4090 = vmatpush.msrb.mxu1 %v5621_v25  ;;  %v10347_v14 = vmul.f32 %v3960_v36, %v3288_v32  ;;  %v3730_v35 = vsub.f32 1.0, %v3729_v0  ;;  %v3589_v42 = vmul.f32 %v3588_v33, %v10286_v2  ;;  %v3385_v58 = vmul.f32 %v10327_v37, %v10327_v37  ;;  %v5626_v48 = vld [vmem:[%s10925_s16] sm:$0xff] }
 0x853   :  { %4074 = vmatpush.msrb.mxu0 %v5622_v6  ;;  %v3563_v20 = vadd.f32 0.112945676, %v3562_v16  ;;  %vm3733_vm11 = vweird.f32 %v10269_v31  ;;  %vm3734_vm12 = vweird.f32 %v10322_v5  ;;  %v3600_v54 = vmul.f32 %v3599_v56, %v10286_v2  ;;  %v5629_v6 = vld [vmem:[%s10925_s16 + $0x88] sm:$0xff] }
 0x854   :  { %4091 = vmatpush.msrb.mxu1 %v5623_v1  ;;  %v5504_v38 = vpop.eup %5503  ;;  %4053 = vmatpush.msrb.mxu3 %v10347_v14  ;;  %v3731_v23 = vmul.f32 %v10322_v5, %v3730_v35  ;;  %vm10367_vm13 = vcmp.eq.f32.partialorder %v3737_v46, 8.507059e+37  ;;  %v3740_v63 = vor.u32 1.1754944e-38, %v3739_v40  ;;  %v3552_v53 = vadd.f32 0.05243302, %v3551_v41  ;;  %vm3735_vm15 = vmor %vm3733_vm11, %vm3734_vm12  ;;  %v5628_v46 = vld [vmem:[%s10925_s16 + $0x90] sm:$0xff]  ;;  %v5630_v1 = vld [vmem:[%s10925_s16 + $0x80] sm:$0xff] }
 0x855   :  { %4075 = vmatpush.msrb.mxu0 %v5624_v10  ;;  %v3769_v29 = vmul.f32 %v5504_v38, %v10303_v61  ;;  %v3564_v21 = vmul.f32 %v3563_v20, %v10248_v9  ;;  %v3601_v12 = vadd.f32 0.014752088, %v3600_v54  ;;  %v10377_v34 = vmin.f32 %v3385_v58, 16.0 }
 0x856   :  { %4092 = vmatpush.msrb.mxu1 %v5625_v47  ;;  %v3732_v11 = vadd.f32 %v10322_v5, %v3731_v23  ;;  %v3757_v60 = vmul.f32 %v3756_v59, %v10136_v26  ;;  %v3590_v45 = vadd.f32 0.0036580483, %v3589_v42  ;;  %v3777_v36 = vand.u32 2147483647, %v10303_v61 }
 0x857   :  { %4076 = vmatpush.msrb.mxu0 %v5626_v48  ;;  %v3770_v30 = vsub.f32 1.0, %v3769_v29  ;;  %v3565_v32 = vadd.f32 0.4994258, %v3564_v21  ;;  %v3779_v0 = vand.u32 2147483648, %v10303_v61  ;;  %v3602_v33 = vmul.f32 %v3601_v12, %v10286_v2 }
 0x858   :  { %4093 = vmatpush.msrb.mxu1 %v5627_v8  ;;  %v3736_v19 = vsel %vm3735_vm15, %v10322_v5, %v3732_v11  ;;  %vm3774_vm1 = vweird.f32 %v5504_v38  ;;  %v3553_v5 = vmul.f32 %v3552_v53, %v10248_v9  ;;  %v3387_v25 = vmul.f32 2.1237322e-06, %v10377_v34 }
 0x859   :  { %v3741_v31 = vsel %vm10367_vm13, %v3740_v63, %v3736_v19  ;;  %v3771_v26 = vmul.f32 %v5504_v38, %v3770_v30  ;;  %v3566_v39 = vmul.f32 %v3565_v32, %v10248_v9  ;;  %v3603_v16 = vadd.f32 0.112945676, %v3602_v33 }
 0x85a   :  { %4094 = vmatpush.msrb.mxu1 %v5628_v46  ;;  %v3742_v40 = vmul.f32 %v3741_v31, %v3717_v4  ;;  %vm3773_vm2 = vweird.f32 %v10303_v61  ;;  %v3591_v56 = vmul.f32 %v3590_v45, %v10286_v2  ;;  %v3780_v4 = vor.u32 1.1754944e-38, %v3779_v0 }
 0x85b   :  { %v3772_v35 = vadd.f32 %v5504_v38, %v3771_v26  ;;  %v10403_v41 = vadd.f32 1.0, %v3566_v39  ;;  %vm3775_vm5 = vmor %vm3773_vm2, %vm3774_vm1  ;;  %v3604_v20 = vmul.f32 %v3603_v16, %v10286_v2  ;;  %v3398_v42 = vmul.f32 3.8918573e-05, %v10377_v34 }
 0x85c   :  { %4095 = vmatpush.msrb.mxu1 %v5629_v6  ;;  %v5203_v59 = vclamps-f32 %v3742_v40, 1.0  ;;  %vm3778_vm3 = vcmp.eq.f32.partialorder %v3777_v36, 8.507059e+37  ;;  %v10415_v61 = vadd.f32 %v9769_v22, %v10310_v15  ;;  %v3554_v10 = vadd.f32 0.18741608, %v3553_v5 }
 0x85d   :  { %v3776_v58 = vsel %vm3775_vm5, %v5504_v38, %v3772_v35  ;;  %5505 = vrcp.f32 %v10403_v41  ;;  %v3388_v55 = vadd.f32 0.00028619796, %v3387_v25  ;;  %v3592_v29 = vadd.f32 0.05243302, %v3591_v56 }
 0x85e   :  { %4096 = vmatpush.msrb.mxu1 %v5630_v1  ;;  %v3955_v23 = vadd.f32 1.0, %v5203_v59  ;;  %v3781_v54 = vsel %vm3778_vm3, %v3780_v4, %v3776_v58  ;;  %v3605_v21 = vadd.f32 0.4994258, %v3604_v20  ;;  %v3399_v47 = vadd.f32 0.001143296, %v3398_v42 }
 0x85f   :  { %v3782_v63 = vmul.f32 %v3781_v54, %v3757_v60  ;;  %v10425_v15 = vmul.f32 0.70710677, %v10415_v61  ;;  %v3284_v53 = vmul.f32 0.5, %v10105_v44  ;;  %v3555_v12 = vmul.f32 %v3554_v10, %v10248_v9 }
 0x860   :  { %v10421_v38 = vmul.f32 %v3955_v23, %v10333_v49  ;;  %v3606_v22 = vmul.f32 %v3605_v21, %v10286_v2  ;;  %v3389_v48 = vmul.f32 %v3388_v55, %v10377_v34  ;;  %v3400_v60 = vmul.f32 %v3399_v47, %v10377_v34 }
 0x861   :  { %v5204_v11 = vclamps-f32 %v3782_v63, 1.0  ;;  %v3593_v32 = vmul.f32 %v3592_v29, %v10286_v2  ;;  %v3425_v8 = vmul.f32 %v10425_v15, %v10425_v15  ;;  %v3556_v31 = vadd.f32 1.1283791, %v3555_v12 }
 0x862   :  { %4034 = vmatpush.msrb.mxu2 %v10421_v38  ;;  %v10433_v45 = vadd.f32 1.0, %v3606_v22  ;;  %v3401_v36 = vadd.f32 0.014752088, %v3400_v60  ;;  %v3390_v9 = vadd.f32 0.0036580483, %v3389_v48  ;;  %v3579_v26 = vand.u32 2147483648, %v10403_v41 }
 0x863   :  { %v5506_v30 = vpop.eup %5505  ;;  %v3956_v49 = vadd.f32 1.0, %v5204_v11  ;;  %v3594_v39 = vadd.f32 0.18741608, %v3593_v32  ;;  %v10444_v46 = vmin.f32 %v3425_v8, 16.0  ;;  %v3577_v5 = vand.u32 2147483647, %v10403_v41 }
 0x864   :  { %v3569_v19 = vmul.f32 %v5506_v30, %v10403_v41  ;;  %5507 = vrcp.f32 %v10433_v45  ;;  %v3402_v33 = vmul.f32 %v3401_v36, %v10377_v34  ;;  %vm3574_vm6 = vweird.f32 %v5506_v30 }
 0x865   :  { %v10438_v0 = vmul.f32 %v3956_v49, %v3284_v53  ;;  %v3427_v25 = vmul.f32 2.1237322e-06, %v10444_v46  ;;  %v3438_v35 = vmul.f32 3.8918573e-05, %v10444_v46  ;;  %vm3573_vm7 = vweird.f32 %v10403_v41 }
 0x866   :  { %v3570_v44 = vsub.f32 1.0, %v3569_v19  ;;  %v3403_v16 = vadd.f32 0.112945676, %v3402_v33  ;;  %v3391_v6 = vmul.f32 %v3390_v9, %v10377_v34  ;;  %vm3575_vm8 = vmor %vm3573_vm7, %vm3574_vm6  ;;  %v3580_v20 = vor.u32 1.1754944e-38, %v3579_v26 }
 0x867   :  { %4054 = vmatpush.msrb.mxu3 %v10438_v0  ;;  %v3595_v42 = vmul.f32 %v3594_v39, %v10286_v2  ;;  %v3428_v58 = vadd.f32 0.00028619796, %v3427_v25  ;;  %v3439_v1 = vadd.f32 0.001143296, %v3438_v35  ;;  %v3557_v23 = vmul.f32 %v3556_v31, %v10208_v62 }
 0x868   :  { %v3571_v40 = vmul.f32 %v5506_v30, %v3570_v44  ;;  %v3404_v59 = vmul.f32 %v3403_v16, %v10377_v34  ;;  %vm3578_vm9 = vcmp.eq.f32.partialorder %v3577_v5, 8.507059e+37  ;;  %v3392_v11 = vadd.f32 0.05243302, %v3391_v6  ;;  %v10473_v6 = vld [vmem:[%s10929_s20] sm:$0x3] }
 0x869   :  { %v3429_v41 = vmul.f32 %v3428_v58, %v10444_v46  ;;  %v3440_v29 = vmul.f32 %v3439_v1, %v10444_v46  ;;  %v3596_v22 = vadd.f32 1.1283791, %v3595_v42  ;;  %v3619_v2 = vand.u32 2147483648, %v10433_v45  ;;  %5209 = vmatmul.msk.f32.vlgmr.msra.gmra.mxu0 %vm95_vm0, %v10473_v6  ;;  %5210 = vmatmul.msk.f32.vlgmr.msra.gmra.mxu1 %vm95_vm0, %v10473_v6 }
 0x86a   :  { %v3572_v56 = vadd.f32 %v5506_v30, %v3571_v40  ;;  %v5508_v4 = vpop.eup %5507  ;;  %v3405_v63 = vadd.f32 0.4994258, %v3404_v59  ;;  %v3617_v60 = vand.u32 2147483647, %v10433_v45  ;;  %vm3613_vm10 = vweird.f32 %v10433_v45 }
 0x86b   :  { %v3609_v10 = vmul.f32 %v5508_v4, %v10433_v45  ;;  %v3441_v12 = vadd.f32 0.014752088, %v3440_v29  ;;  %vm3614_vm14 = vweird.f32 %v5508_v4  ;;  %v3430_v32 = vadd.f32 0.0036580483, %v3429_v41 }
 0x86c   :  { %v3576_v54 = vsel %vm3575_vm8, %v5506_v30, %v3572_v56  ;;  %v3406_v53 = vmul.f32 %v3405_v63, %v10377_v34  ;;  %v3279_v30 = vmul.f32 0.5, %v10174_v57  ;;  %v3393_v44 = vmul.f32 %v3392_v11, %v10377_v34  ;;  %vm3615_vm11 = vmor %vm3613_vm10, %vm3614_vm14 }
 0x86d   :  { %v3581_v55 = vsel %vm3578_vm9, %v3580_v20, %v3576_v54  ;;  %v3610_v47 = vsub.f32 1.0, %v3609_v10  ;;  %v3442_v8 = vmul.f32 %v3441_v12, %v10444_v46  ;;  %v3597_v9 = vmul.f32 %v3596_v22, %v10231_v27 }
 0x86e   :  { %v3582_v21 = vmul.f32 %v3581_v55, %v3557_v23  ;;  %v3407_v49 = vadd.f32 1.0, %v3406_v53  ;;  %v3620_v33 = vor.u32 1.1754944e-38, %v3619_v2  ;;  %vm3618_vm12 = vcmp.eq.f32.partialorder %v3617_v60, 8.507059e+37 }
 0x86f   :  { %v3611_v48 = vmul.f32 %v5508_v4, %v3610_v47  ;;  %v3443_v57 = vadd.f32 0.112945676, %v3442_v8  ;;  %v3431_v40 = vmul.f32 %v3430_v32, %v10444_v46  ;;  %v3394_v16 = vadd.f32 0.18741608, %v3393_v44 }
 0x870   :  { %v5199_v62 = vclamps-f32 %v3582_v21, 1.0  ;;  %5509 = vrcp.f32 %v3407_v49  ;;  %v3280_v59 = vmul.f32 0.5, %v10204_v13  ;;  %v3419_v54 = vand.u32 2147483648, %v3407_v49 }
 0x871   :  { %v3612_v36 = vadd.f32 %v5508_v4, %v3611_v48  ;;  %v3444_v45 = vmul.f32 %v3443_v57, %v10444_v46  ;;  %v3432_v56 = vadd.f32 0.05243302, %v3431_v40  ;;  %v3395_v20 = vmul.f32 %v3394_v16, %v10377_v34 }
 0x872   :  { %v3951_v19 = vadd.f32 1.0, %v5199_v62  ;;  %v3417_v63 = vand.u32 2147483647, %v3407_v49  ;;  %vm3413_vm15 = vweird.f32 %v3407_v49  ;;  %v3420_v29 = vor.u32 1.1754944e-38, %v3419_v54  ;;  %v5646_v54 = vld [vmem:[%s10925_s16 + $0x128] sm:$0xff] }
 0x873   :  { %v3616_v26 = vsel %vm3615_vm11, %v5508_v4, %v3612_v36  ;;  %v3445_v35 = vadd.f32 0.4994258, %v3444_v45  ;;  %v3433_v10 = vmul.f32 %v3432_v56, %v10444_v46  ;;  %v3396_v13 = vadd.f32 1.1283791, %v3395_v20  ;;  %v5634_v45 = vld [vmem:[%s10925_s16 + $0x160] sm:$0xff]  ;;  %v5638_v56 = vld [vmem:[%s10925_s16 + $0x148] sm:$0xff] }
 0x874   :  { %v10465_v31 = vmul.f32 %v3951_v19, %v3279_v30  ;;  %v3621_v39 = vsel %vm3618_vm12, %v3620_v33, %v3616_v26  ;;  %vm3418_vm2 = vcmp.eq.f32.partialorder %v3417_v63, 8.507059e+37  ;;  %v3275_v60 = vmul.f32 0.5, %v10298_v51  ;;  %v5631_v33 = vld [vmem:[%s10925_s16 + $0x178] sm:$0xff]  ;;  %v5651_v63 = vld [vmem:[%s10925_s16 + $0x1c0] sm:$0xff] }
 0x875   :  { %v3622_v5 = vmul.f32 %v3621_v39, %v3597_v9  ;;  %v3446_v58 = vmul.f32 %v3445_v35, %v10444_v46  ;;  %v3434_v21 = vadd.f32 0.18741608, %v3433_v10  ;;  %v3397_v47 = vmul.f32 %v3396_v13, %v10327_v37  ;;  %v5632_v39 = vld [vmem:[%s10925_s16 + $0x170] sm:$0xff]  ;;  %v5635_v35 = vld [vmem:[%s10925_s16 + $0x158] sm:$0xff]  ;;  %v5649_v13 = vld [vmem:[%s10925_s16 + $0x1c8] sm:$0xff] }
 0x876   :  { %4035 = vmatpush.msrb.mxu2 %v10465_v31  ;;  %v5510_v27 = vpop.eup %5509  ;;  %v5642_v20 = vld [vmem:[%s10925_s16 + $0x138] sm:$0xff]  ;;  %v5647_v10 = vld [vmem:[%s10925_s16 + $0x1d0] sm:$0xff]  ;;  %vm4313_vm11 = vcmask 1041408   ;;  %vm4300_vm12 = vcmask 15360  }
 0x877   :  { %v5200_v25 = vclamps-f32 %v3622_v5, 1.0  ;;  %v3409_v42 = vmul.f32 %v5510_v27, %v3407_v49  ;;  %v3447_v55 = vadd.f32 1.0, %v3446_v58  ;;  %vm3414_vm13 = vweird.f32 %v5510_v27  ;;  %v5633_v5 = vld [vmem:[%s10925_s16 + $0x168] sm:$0xff]  ;;  %v5644_v58 = vld [vmem:[%s10925_s16 + $0x130] sm:$0xff] }
 0x878   :  { %vm3415_vm1 = vmor %vm3413_vm15, %vm3414_vm13  ;;  %v3435_v12 = vmul.f32 %v3434_v21, %v10444_v46  ;;  %v5654_v21 = vld [vmem:[%s10925_s16 + $0x108] sm:$0xff] }
 0x879   :  { %v3952_v4 = vadd.f32 1.0, %v5200_v25  ;;  %v3410_v23 = vsub.f32 1.0, %v3409_v42  ;;  %5511 = vrcp.f32 %v3447_v55  ;;  %v3459_v49 = vand.u32 2147483648, %v3447_v55  ;;  %v5643_v42 = vld [vmem:[%s10925_s16 + $0x1e0] sm:$0xff] }
 0x87a   :  { %v3436_v8 = vadd.f32 1.1283791, %v3435_v12  ;;  %v3457_v37 = vand.u32 2147483647, %v3447_v55  ;;  %vm3453_vm3 = vweird.f32 %v3447_v55  ;;  %v5660_v12 = vld [vmem:[%s10925_s16 + $0x1a0] sm:$0xff] }
 0x87b   :  { %v10482_v1 = vmul.f32 %v3952_v4, %v3280_v59  ;;  %v3411_v34 = vmul.f32 %v5510_v27, %v3410_v23  ;;  %v3460_v9 = vor.u32 1.1754944e-38, %v3459_v49  ;;  %v5639_v59 = vld [vmem:[%s10925_s16 + $0x1f0] sm:$0xff]  ;;  %v5640_v4 = vld [vmem:[%s10925_s16 + $0x140] sm:$0xff]  ;;  %v5645_v23 = vld [vmem:[%s10925_s16 + $0x1d8] sm:$0xff] }
 0x87c   :  { %v3437_v51 = vmul.f32 %v3436_v8, %v10425_v15  ;;  %vm3458_vm7 = vcmp.eq.f32.partialorder %v3457_v37, 8.507059e+37  ;;  %v3276_v15 = vmul.f32 0.5, %v10415_v61  ;;  %v5637_v61 = vld [vmem:[%s10925_s16 + $0x1f8] sm:$0xff]  ;;  %v5666_v8 = vld [vmem:[%s10925_s16 + $0x180] sm:$0xff]  ;;  %v5667_v49 = vld [vmem:[%s10926_s17 + $0x68] sm:$0xff] }
 0x87d   :  { %4055 = vmatpush.msrb.mxu3 %v10482_v1  ;;  %v3412_v41 = vadd.f32 %v5510_v27, %v3411_v34  ;;  %v5650_v34 = vld [vmem:[%s10925_s16 + $0x118] sm:$0xff]  ;;  %v5669_v37 = vld [vmem:[%s10926_s17 + $0x28] sm:$0xff] }
 0x87f   :  { %v3416_v11 = vsel %vm3415_vm1, %v5510_v27, %v3412_v41  ;;  %v5512_v53 = vpop.eup %5511  ;;  %v5636_v27 = vld [vmem:[%s10925_s16 + $0x150] sm:$0xff] }
 0x880   :  { %v3421_v22 = vsel %vm3418_vm2, %v3420_v29, %v3416_v11  ;;  %v3449_v48 = vmul.f32 %v5512_v53, %v3447_v55  ;;  %vm3454_vm5 = vweird.f32 %v5512_v53  ;;  %v5648_v55 = vld [vmem:[%s10925_s16 + $0x120] sm:$0xff]  ;;  %v5652_v41 = vld [vmem:[%s10925_s16 + $0x110] sm:$0xff]  ;;  %v5653_v29 = vld [vmem:[%s10925_s16 + $0x1b8] sm:$0xff] }
 0x881   :  { %v3422_v2 = vmul.f32 %v3421_v22, %v3397_v47  ;;  %vm3455_vm6 = vmor %vm3453_vm3, %vm3454_vm5  ;;  %v5655_v47 = vld [vmem:[%s10925_s16 + $0x1b0] sm:$0xff]  ;;  %v5656_v11 = vld [vmem:[%s10925_s16 + $0x100] sm:$0xff] }
 0x882   :  { %v3450_v32 = vsub.f32 1.0, %v3449_v48  ;;  %v5657_v22 = vld [vmem:[%s10926_s17 + $0x60] sm:$0xff]  ;;  %v5662_v48 = vld [vmem:[%s10925_s16 + $0x198] sm:$0xff] }
 0x883   :  { %v5195_v62 = vclamps-f32 %v3422_v2, 1.0  ;;  %v5658_v2 = vld [vmem:[%s10925_s16 + $0x1a8] sm:$0xff] }
 0x884   :  { %v3451_v36 = vmul.f32 %v5512_v53, %v3450_v32  ;;  %v5665_v32 = vld [vmem:[%s10925_s16 + $0x188] sm:$0xff] }
 0x885   :  { %v3947_v30 = vadd.f32 1.0, %v5195_v62  ;;  %v5661_v62 = vld [vmem:[%s10926_s17 + $0x20] sm:$0xff] }
 0x886   :  { %v3452_v44 = vadd.f32 %v5512_v53, %v3451_v36  ;;  %v5668_v36 = vld [vmem:[%s10926_s17 + $0x48] sm:$0xff] }
 0x887   :  { %v10489_v19 = vmul.f32 %v3947_v30, %v3275_v60  ;;  %v5663_v60 = vld [vmem:[%s10926_s17] sm:$0xff]  ;;  %v5664_v30 = vld [vmem:[%s10925_s16 + $0x190] sm:$0xff] }
 0x888   :  { %v3456_v46 = vsel %vm3455_vm6, %v5512_v53, %v3452_v44  ;;  %v5659_v53 = vld [vmem:[%s10926_s17 + $0x40] sm:$0xff]  ;;  %v5670_v44 = vld [vmem:[%s10926_s17 + $0x8] sm:$0xff] }
 0x889   :  { %4036 = vmatpush.msrb.mxu2 %v10489_v19  ;;  %v3461_v26 = vsel %vm3458_vm7, %v3460_v9, %v3456_v46 }
 0x88a   :  { %5211 = vmatmul.msk.f32.vlgmr.msrb.gmra.mxu2 %vm95_vm0, %v10473_v6  ;;  %v3462_v57 = vmul.f32 %v3461_v26, %v3437_v51  ;;  %v4145_v26 = vld [vmem:[%s10918_s9 + $0x18] sm:$0xff] }
 0x88b   :  { %4101 = vmatpush.msra.mxu2 %v5631_v33  ;;  %4161 = vmatpush.msra.mxu0 %v4145_v26  ;;  %v4297_v26 = vld [vmem:[%s10930_s21 + $0x8] sm:$0xff] }
 0x88c   :  { %v5196_v40 = vclamps-f32 %v3462_v57, 1.0  ;;  %v4144_v57 = vld [vmem:[%s10918_s9 + $0x10] sm:$0xff] }
 0x88d   :  { %4102 = vmatpush.msra.mxu2 %v5632_v39  ;;  %v4143_v39 = vld [vmem:[%s10918_s9 + $0x8] sm:$0xff]  ;;  %4162 = vmatpush.msra.mxu0 %v4144_v57 }
 0x88e   :  { %v3948_v16 = vadd.f32 1.0, %v5196_v40  ;;  %v4142_v40 = vld [vmem:[%s10918_s9] sm:$0xff]  ;;  %v5425_v57 = vld [vmem:[%s10920_s11 + $0xa8] sm:$0xff] }
 0x88f   :  { %4103 = vmatpush.msra.mxu2 %v5633_v5  ;;  %4163 = vmatpush.msra.mxu0 %v4143_v39  ;;  %v5671_v5 = vld [vmem:[%s10926_s17 + $0x70] sm:$0xff]  ;;  %v5433_v39 = vld [vmem:[%s10920_s11 + $0xe8] sm:$0xff] }
 0x890   :  { %v10508_v25 = vmul.f32 %v3948_v16, %v3276_v15  ;;  %v5672_v15 = vld [vmem:[%s10926_s17 + $0x50] sm:$0xff] }
 0x891   :  { %4104 = vmatpush.msra.mxu2 %v5634_v45  ;;  %4164 = vmatpush.msra.mxu0 %v4142_v40  ;;  %v5673_v16 = vld [vmem:[%s10926_s17 + $0x30] sm:$0xff] }
 0x892   :  { %4056 = vmatpush.msrb.mxu3 %v10508_v25  ;;  %v5674_v45 = vld [vmem:[%s10926_s17 + $0x10] sm:$0xff] }
 0x893   :  { %4105 = vmatpush.msra.mxu2 %v5635_v35  ;;  %5212 = vmatmul.msk.f32.vlgmr.msrb.gmra.mxu3 %vm95_vm0, %v10473_v6  ;;  %v5641_v6 = vld [vmem:[%s10925_s16 + $0x1e8] sm:$0xff]  ;;  %v5410_v40 = vld [vmem:[%s10920_s11 + $0x30] sm:$0xff]  ;;  %s4987_s16 = sshll.u32 %s5713_s5, 4  ;;  %s4988_s16 = int_to_ptr.vmem [resolvable:$true] %s4987_s16 }
 0x894   :  { %4121 = vmatpush.msra.mxu3 %v5637_v61 }
 0x895   :  { %4106 = vmatpush.msra.mxu2 %v5636_v27 }
 0x896   :  { %4122 = vmatpush.msra.mxu3 %v5639_v59 }
 0x897   :  { %4107 = vmatpush.msra.mxu2 %v5638_v56 }
 0x898   :  { %4123 = vmatpush.msra.mxu3 %v5641_v6 }
 0x899   :  { %4108 = vmatpush.msra.mxu2 %v5640_v4 }
 0x89a   :  { %4124 = vmatpush.msra.mxu3 %v5643_v42  ;;  %v4170_v42 = vld [vmem:[%s10919_s10] sm:$0xff] }
 0x89b   :  { %4109 = vmatpush.msra.mxu2 %v5642_v20  ;;  %4189 = vmatpush.msra.mxu1 %v4170_v42  ;;  %v5416_v42 = vld [vmem:[%s10920_s11 + $0x60] sm:$0xff] }
 0x89c   :  { %4125 = vmatpush.msra.mxu3 %v5645_v23  ;;  %v5676_v23 = vld [vmem:[%s10926_s17 + $0x58] sm:$0xff] }
 0x89d   :  { %4110 = vmatpush.msra.mxu2 %v5644_v58  ;;  %v5675_v58 = vld [vmem:[%s10926_s17 + $0x78] sm:$0xff] }
 0x89e   :  { %4126 = vmatpush.msra.mxu3 %v5647_v10  ;;  %v5678_v10 = vld [vmem:[%s10926_s17 + $0x18] sm:$0xff] }
 0x89f   :  { %4111 = vmatpush.msra.mxu2 %v5646_v54  ;;  %v5677_v54 = vld [vmem:[%s10926_s17 + $0x38] sm:$0xff] }
 0x8a0   :  { %4127 = vmatpush.msra.mxu3 %v5649_v13 }
 0x8a1   :  { %4112 = vmatpush.msra.mxu2 %v5648_v55 }
 0x8a2   :  { %4128 = vmatpush.msra.mxu3 %v5651_v63 }
 0x8a3   :  { %4113 = vmatpush.msra.mxu2 %v5650_v34 }
 0x8a4   :  { %4129 = vmatpush.msra.mxu3 %v5653_v29 }
 0x8a5   :  { %4114 = vmatpush.msra.mxu2 %v5652_v41 }
 0x8a6   :  { %4130 = vmatpush.msra.mxu3 %v5655_v47 }
 0x8a7   :  { %4115 = vmatpush.msra.mxu2 %v5654_v21 }
 0x8a8   :  { %4131 = vmatpush.msra.mxu3 %v5658_v2 }
 0x8a9   :  { %4116 = vmatpush.msra.mxu2 %v5656_v11 }
 0x8aa   :  { %4132 = vmatpush.msra.mxu3 %v5660_v12 }
 0x8ab   :  { %4228 = vmatpush.msrb.mxu2 %v5657_v22 }
 0x8ac   :  { %4133 = vmatpush.msra.mxu3 %v5662_v48 }
 0x8ad   :  { %4229 = vmatpush.msrb.mxu2 %v5659_v53 }
 0x8ae   :  { %4134 = vmatpush.msra.mxu3 %v5664_v30  ;;  %v4296_v30 = vld [vmem:[%s10930_s21] sm:$0xff] }
 0x8af   :  { %4230 = vmatpush.msrb.mxu2 %v5661_v62 }
 0x8b0   :  { %4135 = vmatpush.msra.mxu3 %v5665_v32  ;;  %v5427_v32 = vld [vmem:[%s10920_s11 + $0xb8] sm:$0xff] }
 0x8b1   :  { %4231 = vmatpush.msrb.mxu2 %v5663_v60 }
 0x8b2   :  { %4136 = vmatpush.msra.mxu3 %v5666_v8  ;;  %v5435_v8 = vld [vmem:[%s10920_s11 + $0xf8] sm:$0xff] }
 0x8b4   :  { %4248 = vmatpush.msrb.mxu3 %v5667_v49 }
 0x8b6   :  { %4249 = vmatpush.msrb.mxu3 %v5668_v36 }
 0x8b8   :  { %4250 = vmatpush.msrb.mxu3 %v5669_v37  ;;  %v5426_v37 = vld [vmem:[%s10920_s11 + $0xb0] sm:$0xff] }
 0x8ba   :  { %4251 = vmatpush.msrb.mxu3 %v5670_v44  ;;  %v5434_v44 = vld [vmem:[%s10920_s11 + $0xf0] sm:$0xff] }
 0x8e6   :  { %v3998_v9 = vpop.f32.mrf.mxu0  ;;  %v4018_v51 = vpop.f32.mrf.mxu1 }
 0x8e7   :  { %4077 = vmatmul.f32.vlgmr.msrb.gmra.mxu0 %v3998_v9  ;;  %4097 = vmatmul.f32.vlgmr.msrb.gmra.mxu1 %v4018_v51 }
 0x8e8   :  { %4268 = vmatpush.msrb.mxu0 %v5671_v5  ;;  %4288 = vmatpush.msrb.mxu1 %v5675_v58  ;;  %v5418_v5 = vld [vmem:[%s10920_s11 + $0x70] sm:$0xff]  ;;  %v5421_v58 = vld [vmem:[%s10920_s11 + $0x88] sm:$0xff] }
 0x8ea   :  { %4269 = vmatpush.msrb.mxu0 %v5672_v15  ;;  %4289 = vmatpush.msrb.mxu1 %v5676_v23  ;;  %v5424_v15 = vld [vmem:[%s10920_s11 + $0xa0] sm:$0xff]  ;;  %v5429_v23 = vld [vmem:[%s10920_s11 + $0xc8] sm:$0xff] }
 0x8ec   :  { %4270 = vmatpush.msrb.mxu0 %v5673_v16  ;;  %4290 = vmatpush.msrb.mxu1 %v5677_v54  ;;  %v5432_v16 = vld [vmem:[%s10920_s11 + $0xe0] sm:$0xff]  ;;  %v5407_v54 = vld [vmem:[%s10920_s11 + $0x18] sm:$0xff] }
 0x8ee   :  { %4271 = vmatpush.msrb.mxu0 %v5674_v45  ;;  %4291 = vmatpush.msrb.mxu1 %v5678_v10  ;;  %v4298_v45 = vld [vmem:[%s10930_s21 + $0x10] sm:$0xff]  ;;  %v5415_v10 = vld [vmem:[%s10920_s11 + $0x58] sm:$0xff] }
 0x90d   :  { %v4038_v46 = vpop.f32.mrf.mxu2 }
 0x90e   :  { %4117 = vmatmul.f32.vlgmr.msra.gmra.mxu2 %v4038_v46  ;;  %v5411_v46 = vld [vmem:[%s10920_s11 + $0x38] sm:$0xff] }
 0x916   :  { %v4058_v33 = vpop.f32.mrf.mxu3 }
 0x917   :  { %4137 = vmatmul.f32.vlgmr.msra.gmra.mxu3 %v4058_v33  ;;  %v5419_v33 = vld [vmem:[%s10920_s11 + $0x78] sm:$0xff] }
 0x964   :  { %v4078_v35 = vpop.f32.mrf.mxu0  ;;  %v4098_v27 = vpop.f32.mrf.mxu1 }
 0x965   :  { %v4099_v61 = vadd.f32 %v4098_v27, %v4078_v35  ;;  %v5423_v35 = vld [vmem:[%s10920_s11 + $0x98] sm:$0xff] }
 0x966   :  { %v5431_v27 = vld [vmem:[%s10920_s11 + $0xd8] sm:$0xff] }
 0x991   :  { %v4118_v56 = vpop.f32.mrf.mxu2 }
 0x992   :  { %v4119_v59 = vadd.f32 %v4118_v56, %v4099_v61  ;;  %v4299_v61 = vld [vmem:[%s10930_s21 + $0x18] sm:$0xff]  ;;  %v5409_v56 = vld [vmem:[%s10920_s11 + $0x28] sm:$0xff] }
 0x99a   :  { %v4138_v4 = vpop.f32.mrf.mxu3 }
 0x99b   :  { %v4139_v6 = vadd.f32 %v4138_v4, %v4119_v59  ;;  %v5417_v59 = vld [vmem:[%s10920_s11 + $0x68] sm:$0xff]  ;;  %v5422_v4 = vld [vmem:[%s10920_s11 + $0x90] sm:$0xff] }
 0x99d   :  { %v4141_v20 = vmul.f32 0.00390625, %v4139_v6  ;;  %v5430_v6 = vld [vmem:[%s10920_s11 + $0xd0] sm:$0xff] }
 0x99f   :  { %5213 = vmatmul.msk.f32.vlgmr.msra.gmra.mxu0 %vm95_vm0, %v4141_v20  ;;  %v5408_v20 = vld [vmem:[%s10920_s11 + $0x20] sm:$0xff] }
 0xa1c   :  { %v4166_v55 = vpop.f32.mrf.mxu0 }
 0xa1d   :  { %v4169_v13 = vmax.f32 %v4166_v55, 0.0  ;;  %v5420_v55 = vld [vmem:[%s10920_s11 + $0x80] sm:$0xff] }
 0xa1f   :  { %5214 = vmatmul.msk.f32.vlgmr.msra.gmra.mxu1 %vm201_vm4, %v4169_v13  ;;  %v5428_v13 = vld [vmem:[%s10920_s11 + $0xc0] sm:$0xff] }
 0xa9c   :  { %v4191_v34 = vpop.f32.mrf.mxu1 }
 0xa9d   :  { %v5215_v63 = vmul.f32 -1.442695, %v4191_v34  ;;  %v5406_v34 = vld [vmem:[%s10920_s11 + $0x10] sm:$0xff] }
 0xa9f   :  { %5513 = vpow2.f32 %v5215_v63  ;;  %v5414_v63 = vld [vmem:[%s10920_s11 + $0x50] sm:$0xff] }
 0xaa5   :  { %v5514_v41 = vpop.eup %5513 }
 0xaa6   :  { %v4197_v29 = vadd.f32 1.0, %v5514_v41  ;;  %v5405_v41 = vld [vmem:[%s10920_s11 + $0x8] sm:$0xff] }
 0xaa8   :  { %5515 = vrcp.f32 %v4197_v29  ;;  %v4209_v22 = vand.u32 2147483648, %v4197_v29  ;;  %v4207_v53 = vand.u32 2147483647, %v4197_v29  ;;  %vm4203_vm9 = vweird.f32 %v4197_v29 }
 0xaaa   :  { %v4210_v62 = vor.u32 1.1754944e-38, %v4209_v22  ;;  %vm4208_vm10 = vcmp.eq.f32.partialorder %v4207_v53, 8.507059e+37 }
 0xaae   :  { %v5516_v21 = vpop.eup %5515 }
 0xaaf   :  { %v4199_v47 = vmul.f32 %v5516_v21, %v4197_v29  ;;  %vm4204_vm8 = vweird.f32 %v5516_v21  ;;  %v5413_v29 = vld [vmem:[%s10920_s11 + $0x48] sm:$0xff] }
 0xab0   :  { %vm4205_vm14 = vmor %vm4203_vm9, %vm4204_vm8 }
 0xab1   :  { %v4200_v11 = vsub.f32 1.0, %v4199_v47  ;;  %v5412_v47 = vld [vmem:[%s10920_s11 + $0x40] sm:$0xff] }
 0xab3   :  { %v4201_v2 = vmul.f32 %v5516_v21, %v4200_v11 }
 0xab5   :  { %v4202_v12 = vadd.f32 %v5516_v21, %v4201_v2 }
 0xab7   :  { %v4206_v48 = vsel %vm4205_vm14, %v5516_v21, %v4202_v12  ;;  %v5404_v21 = vld [vmem:[%s10920_s11] sm:$0xff] }
 0xab8   :  { %v4211_v60 = vsel %vm4208_vm10, %v4210_v62, %v4206_v48 }
 0xab9   :  { %5216 = vmatmul.msk.f32.vlgmr.msrb.gmra.mxu2 %vm95_vm0, %v4211_v60  ;;  %5217 = vmatmul.msk.f32.vlgmr.msrb.gmra.mxu3 %vm95_vm0, %v4211_v60 }
 0xaba   :  { %5218 = vmatmul.msk.f32.vlgmr.msrb.gmra.mxu0 %vm95_vm0, %v4211_v60  ;;  %5219 = vmatmul.msk.f32.vlgmr.msrb.gmra.mxu1 %vm95_vm0, %v4211_v60 }
 0xb37   :  { %v4273_v49 = vpop.f32.mrf.mxu0  ;;  %v4293_v36 = vpop.f32.mrf.mxu1 }
 0xb38   :  { %5230 = vmatpush.msk.msra.mxu0 %vm4313_vm11, %v4273_v49  ;;  %5235 = vmatpush.msk.msra.mxu1 %vm4313_vm11, %v4293_v36 }
 0xb39   :  { %5231 = vmatmul.msk.f32.vlgmr.msra.gmra.mxu0 %vm4300_vm12, %v4296_v30  ;;  %5236 = vmatmul.msk.f32.vlgmr.msra.gmra.mxu1 %vm4300_vm12, %v4296_v30 }
 0xb3a   :  { %4760 = vmatpush.bf16.msrb.mxu0 %v5427_v32  ;;  %4779 = vmatpush.bf16.msrb.mxu1 %v5435_v8 }
 0xb3c   :  { %v4233_v9 = vpop.f32.mrf.mxu2  ;;  %v4253_v51 = vpop.f32.mrf.mxu3 }
 0xb3d   :  { %5220 = vmatpush.msk.msra.mxu2 %vm4313_vm11, %v4233_v9  ;;  %5225 = vmatpush.msk.msra.mxu3 %vm4313_vm11, %v4253_v51 }
 0xb3e   :  { %5221 = vmatmul.msk.f32.vlgmr.msra.gmra.mxu2 %vm4300_vm12, %v4296_v30  ;;  %5226 = vmatmul.msk.f32.vlgmr.msra.gmra.mxu3 %vm4300_vm12, %v4296_v30 }
 0xb3f   :  { %4761 = vmatpush.bf16.msrb.mxu0 %v5426_v37  ;;  %4780 = vmatpush.bf16.msrb.mxu1 %v5434_v44 }
 0xb40   :  { %4722 = vmatpush.bf16.msrb.mxu2 %v5411_v46  ;;  %4741 = vmatpush.bf16.msrb.mxu3 %v5419_v33 }
 0xb41   :  { %5232 = vmatmul.msk.f32.gmra.mxu0 %vm4300_vm12, %v4297_v26  ;;  %5237 = vmatmul.msk.f32.gmra.mxu1 %vm4300_vm12, %v4297_v26 }
 0xb43   :  { %4762 = vmatpush.bf16.msrb.mxu0 %v5425_v57  ;;  %4781 = vmatpush.bf16.msrb.mxu1 %v5433_v39 }
 0xb44   :  { %4723 = vmatpush.bf16.msrb.mxu2 %v5410_v40  ;;  %4742 = vmatpush.bf16.msrb.mxu3 %v5418_v5 }
 0xb46   :  { %5222 = vmatmul.msk.f32.gmra.mxu2 %vm4300_vm12, %v4297_v26  ;;  %5227 = vmatmul.msk.f32.gmra.mxu3 %vm4300_vm12, %v4297_v26 }
 0xb47   :  { %4763 = vmatpush.bf16.msrb.mxu0 %v5424_v15  ;;  %4782 = vmatpush.bf16.msrb.mxu1 %v5432_v16 }
 0xb48   :  { %4724 = vmatpush.bf16.msrb.mxu2 %v5409_v56  ;;  %4743 = vmatpush.bf16.msrb.mxu3 %v5417_v59 }
 0xb49   :  { %5233 = vmatmul.msk.f32.gmra.mxu0 %vm4300_vm12, %v4298_v45  ;;  %5238 = vmatmul.msk.f32.gmra.mxu1 %vm4300_vm12, %v4298_v45 }
 0xb4b   :  { %4764 = vmatpush.bf16.msrb.mxu0 %v5423_v35  ;;  %4783 = vmatpush.bf16.msrb.mxu1 %v5431_v27 }
 0xb4c   :  { %4725 = vmatpush.bf16.msrb.mxu2 %v5408_v20  ;;  %4744 = vmatpush.bf16.msrb.mxu3 %v5416_v42 }
 0xb4e   :  { %5223 = vmatmul.msk.f32.gmra.mxu2 %vm4300_vm12, %v4298_v45  ;;  %5228 = vmatmul.msk.f32.gmra.mxu3 %vm4300_vm12, %v4298_v45 }
 0xb4f   :  { %4765 = vmatpush.bf16.msrb.mxu0 %v5422_v4  ;;  %4784 = vmatpush.bf16.msrb.mxu1 %v5430_v6 }
 0xb50   :  { %4726 = vmatpush.bf16.msrb.mxu2 %v5407_v54  ;;  %4745 = vmatpush.bf16.msrb.mxu3 %v5415_v10 }
 0xb51   :  { %5234 = vmatmul.msk.f32.gmra.mxu0 %vm4300_vm12, %v4299_v61  ;;  %5239 = vmatmul.msk.f32.gmra.mxu1 %vm4300_vm12, %v4299_v61 }
 0xb53   :  { %4766 = vmatpush.bf16.msrb.mxu0 %v5421_v58  ;;  %4785 = vmatpush.bf16.msrb.mxu1 %v5429_v23  ;;  %v4809_v58 = vld [vmem:[%s10927_s18 + $0x58] sm:$0xff] }
 0xb54   :  { %4727 = vmatpush.bf16.msrb.mxu2 %v5406_v34  ;;  %4746 = vmatpush.bf16.msrb.mxu3 %v5414_v63  ;;  %v4807_v34 = vld [vmem:[%s10927_s18 + $0x48] sm:$0xff]  ;;  %v4806_v63 = vld [vmem:[%s10927_s18 + $0x40] sm:$0xff] }
 0xb56   :  { %5224 = vmatmul.msk.f32.gmra.mxu2 %vm4300_vm12, %v4299_v61  ;;  %5229 = vmatmul.msk.f32.gmra.mxu3 %vm4300_vm12, %v4299_v61 }
 0xb57   :  { %4767 = vmatpush.bf16.msrb.mxu0 %v5420_v55  ;;  %4786 = vmatpush.bf16.msrb.mxu1 %v5428_v13  ;;  %v4808_v55 = vld [vmem:[%s10927_s18 + $0x50] sm:$0xff] }
 0xb58   :  { %4728 = vmatpush.bf16.msrb.mxu2 %v5405_v41  ;;  %4747 = vmatpush.bf16.msrb.mxu3 %v5413_v29  ;;  %v4805_v29 = vld [vmem:[%s10927_s18 + $0x38] sm:$0xff] }
 0xb5c   :  { %4729 = vmatpush.bf16.msrb.mxu2 %v5404_v21  ;;  %4748 = vmatpush.bf16.msrb.mxu3 %v5412_v47 }
 0xbb6   :  { %v4401_v11 = vpop.f32.mrf.mxu0  ;;  %v4430_v22 = vpop.f32.mrf.mxu1 }
 0xbb7   :  { %v4444_v12 = vmul.f32 %v4401_v11, %v10489_v19  ;;  %v4445_v62 = vmul.f32 %v4430_v22, %v10508_v25  ;;  %v4804_v22 = vld [vmem:[%s10927_s18 + $0x30] sm:$0xff] }
 0xbbe   :  { %v4404_v2 = vpop.f32.mrf.mxu0  ;;  %v4433_v53 = vpop.f32.mrf.mxu1 }
 0xbbf   :  { %v4448_v48 = vmul.f32 %v4404_v2, %v10465_v31  ;;  %v4449_v60 = vmul.f32 %v4433_v53, %v10482_v1 }
 0xbc1   :  { %v4460_v30 = vpack.c.bf16 %v4448_v48, %v4444_v12  ;;  %v4461_v32 = vpack.c.bf16 %v4449_v60, %v4445_v62  ;;  %v4343_v8 = vpop.f32.mrf.mxu2  ;;  %v4372_v49 = vpop.f32.mrf.mxu3  ;;  %v4803_v48 = vld [vmem:[%s10927_s18 + $0x28] sm:$0xff] }
 0xbc2   :  { %v4442_v51 = vmul.f32 %v4343_v8, %v10160_v3  ;;  %v4443_v19 = vmul.f32 %v4372_v49, %v10191_v50  ;;  %v4802_v8 = vld [vmem:[%s10927_s18 + $0x20] sm:$0xff] }
 0xbc3   :  { %4768 = vmatmul.bf16.vlgmr.msrb.gmra.mxu0 %v4460_v30  ;;  %4787 = vmatmul.bf16.vlgmr.msrb.gmra.mxu1 %v4461_v32 }
 0xbc6   :  { %v4407_v36 = vpop.f32.mrf.mxu0  ;;  %v4436_v37 = vpop.f32.mrf.mxu1 }
 0xbc7   :  { %v4452_v57 = vmul.f32 %v4407_v36, %v10421_v38  ;;  %v4453_v39 = vmul.f32 %v4436_v37, %v10438_v0 }
 0xbc9   :  { %v4346_v44 = vpop.f32.mrf.mxu2  ;;  %v4375_v9 = vpop.f32.mrf.mxu3 }
 0xbca   :  { %v4446_v25 = vmul.f32 %v4346_v44, %v10072_v28  ;;  %v4447_v31 = vmul.f32 %v4375_v9, %v10121_v43 }
 0xbcc   :  { %v4458_v46 = vpack.c.bf16 %v4446_v25, %v4442_v51  ;;  %v4459_v1 = vpack.c.bf16 %v4447_v31, %v4443_v19  ;;  %v4801_v51 = vld [vmem:[%s10927_s18 + $0x18] sm:$0xff]  ;;  %v4800_v31 = vld [vmem:[%s10927_s18 + $0x10] sm:$0xff] }
 0xbce   :  { %v4410_v33 = vpop.f32.mrf.mxu0  ;;  %v4439_v26 = vpop.f32.mrf.mxu1  ;;  %4730 = vmatmul.bf16.vlgmr.msrb.gmra.mxu2 %v4458_v46  ;;  %4749 = vmatmul.bf16.vlgmr.msrb.gmra.mxu3 %v4459_v1  ;;  %v4799_v1 = vld [vmem:[%s10927_s18 + $0x8] sm:$0xff] }
 0xbcf   :  { %v4456_v40 = vmul.f32 %v4410_v33, %v10260_v18  ;;  %v4457_v3 = vmul.f32 %v4439_v26, %v10347_v14  ;;  %v11399_v26 = vmov 1.0  }
 0xbd1   :  { %v4464_v5 = vpack.c.bf16 %v4456_v40, %v4452_v57  ;;  %v4465_v50 = vpack.c.bf16 %v4457_v3, %v4453_v39  ;;  %v4349_v15 = vpop.f32.mrf.mxu2  ;;  %v4378_v28 = vpop.f32.mrf.mxu3  ;;  %v4798_v57 = vld [vmem:[%s10927_s18] sm:$0xff] }
 0xbd2   :  { %v4450_v45 = vmul.f32 %v4349_v15, %v10013_v7  ;;  %v4451_v35 = vmul.f32 %v4378_v28, %v10028_v52  ;;  %v4813_v7 = vld [vmem:[%s10927_s18 + $0x78] sm:$0xff]  ;;  %v4810_v52 = vld [vmem:[%s10927_s18 + $0x60] sm:$0xff] }
 0xbd3   :  { %4773 = vmatmul.bf16.gmra.mxu0 %v4464_v5  ;;  %4792 = vmatmul.bf16.gmra.mxu1 %v4465_v50  ;;  %v4814_v3 = vld [vmem:[%s10928_s19] sm:$0xff] }
 0xbd4   :  { %4861 = vmatpush.msra.mxu0 %v4813_v7  ;;  %4882 = vmatpush.msra.mxu1 %v4813_v7 }
 0xbd9   :  { %v4352_v43 = vpop.f32.mrf.mxu2  ;;  %v4381_v16 = vpop.f32.mrf.mxu3 }
 0xbda   :  { %v4454_v38 = vmul.f32 %v4352_v43, %v9925_v24  ;;  %v4455_v0 = vmul.f32 %v4381_v16, %v9989_v17  ;;  %v4812_v24 = vld [vmem:[%s10927_s18 + $0x70] sm:$0xff]  ;;  %v4811_v17 = vld [vmem:[%s10927_s18 + $0x68] sm:$0xff] }
 0xbdb   :  { %4862 = vmatpush.msra.mxu0 %v4812_v24  ;;  %4883 = vmatpush.msra.mxu1 %v4812_v24 }
 0xbdc   :  { %v4462_v27 = vpack.c.bf16 %v4454_v38, %v4450_v45  ;;  %v4463_v18 = vpack.c.bf16 %v4455_v0, %v4451_v35 }
 0xbdd   :  { %4863 = vmatpush.msra.mxu0 %v4811_v17  ;;  %4884 = vmatpush.msra.mxu1 %v4811_v17 }
 0xbde   :  { %4735 = vmatmul.bf16.gmra.mxu2 %v4462_v27  ;;  %4754 = vmatmul.bf16.gmra.mxu3 %v4463_v18 }
 0xbdf   :  { %4864 = vmatpush.msra.mxu0 %v4810_v52  ;;  %4885 = vmatpush.msra.mxu1 %v4810_v52 }
 0xbe1   :  { %4865 = vmatpush.msra.mxu0 %v4809_v58  ;;  %4886 = vmatpush.msra.mxu1 %v4809_v58 }
 0xbe3   :  { %4866 = vmatpush.msra.mxu0 %v4808_v55  ;;  %4887 = vmatpush.msra.mxu1 %v4808_v55  ;;  %v5680_v55 = vld [vmem:[%s11061_s29 + $0x8] sm:$0xff] }
 0xbe5   :  { %4867 = vmatpush.msra.mxu0 %v4807_v34  ;;  %4888 = vmatpush.msra.mxu1 %v4807_v34  ;;  %v5681_v34 = vld [vmem:[%s11061_s29 + $0x10] sm:$0xff] }
 0xbe7   :  { %4868 = vmatpush.msra.mxu0 %v4806_v63  ;;  %4889 = vmatpush.msra.mxu1 %v4806_v63 }
 0xbe9   :  { %4869 = vmatpush.msra.mxu0 %v4805_v29  ;;  %4890 = vmatpush.msra.mxu1 %v4805_v29 }
 0xbeb   :  { %4870 = vmatpush.msra.mxu0 %v4804_v22  ;;  %4891 = vmatpush.msra.mxu1 %v4804_v22 }
 0xbed   :  { %4871 = vmatpush.msra.mxu0 %v4803_v48  ;;  %4892 = vmatpush.msra.mxu1 %v4803_v48 }
 0xbef   :  { %4872 = vmatpush.msra.mxu0 %v4802_v8  ;;  %4893 = vmatpush.msra.mxu1 %v4802_v8 }
 0xbf1   :  { %4873 = vmatpush.msra.mxu0 %v4801_v51  ;;  %4894 = vmatpush.msra.mxu1 %v4801_v51 }
 0xbf3   :  { %4874 = vmatpush.msra.mxu0 %v4800_v31  ;;  %4895 = vmatpush.msra.mxu1 %v4800_v31 }
 0xbf5   :  { %4875 = vmatpush.msra.mxu0 %v4799_v1  ;;  %4896 = vmatpush.msra.mxu1 %v4799_v1 }
 0xbf7   :  { %4876 = vmatpush.msra.mxu0 %v4798_v57  ;;  %4897 = vmatpush.msra.mxu1 %v4798_v57 }
 0xc40   :  { %v4769_v14 = vpop.f32.mrf.mxu0  ;;  %v10810_v61 = vpop.f32.mrf.mxu1 }
 0xc48   :  { %v4771_v4 = vpop.f32.mrf.mxu0  ;;  %v4790_v6 = vpop.f32.mrf.mxu1 }
 0xc50   :  { %v4774_v23 = vpop.f32.mrf.mxu0  ;;  %v4793_v13 = vpop.f32.mrf.mxu1 }
 0xc51   :  { %v4731_v56 = vpop.f32.mrf.mxu2  ;;  %v4750_v59 = vpop.f32.mrf.mxu3 }
 0xc52   :  { %v4751_v2 = vadd.f32 %v4750_v59, %v4731_v56 }
 0xc54   :  { %v4770_v49 = vadd.f32 %v4769_v14, %v4751_v2  ;;  %v4815_v14 = vld [vmem:[%s10921_s12] sm:$0x1] }
 0xc56   :  { %v4789_v25 = vadd.f32 %v10810_v61, %v4770_v49 }
 0xc58   :  { %v4776_v62 = vpop.f32.mrf.mxu0  ;;  %v4795_v32 = vpop.f32.mrf.mxu1  ;;  %v4837_v33 = vmul.f32 %v4789_v25, %v4789_v25 }
 0xc59   :  { %v4733_v20 = vpop.f32.mrf.mxu2  ;;  %v4752_v42 = vpop.f32.mrf.mxu3 }
 0xc5a   :  { %v4753_v21 = vadd.f32 %v4752_v42, %v4733_v20 }
 0xc5c   :  { %v4772_v60 = vadd.f32 %v4771_v4, %v4753_v21  ;;  %v4816_v4 = vld [vmem:[%s10922_s13] sm:$0x1] }
 0xc5e   :  { %v10855_v9 = vadd.f32 %v4790_v6, %v4772_v60 }
 0xc60   :  { %v4838_v46 = vmul.f32 %v10855_v9, %v10855_v9 }
 0xc61   :  { %v4736_v54 = vpop.f32.mrf.mxu2  ;;  %v4755_v10 = vpop.f32.mrf.mxu3 }
 0xc62   :  { %v4756_v41 = vadd.f32 %v4755_v10, %v4736_v54  ;;  %v5679_v54 = vld [vmem:[%s11061_s29] sm:$0xff] }
 0xc64   :  { %v4775_v53 = vadd.f32 %v4774_v23, %v4756_v41  ;;  %v5682_v41 = vld [vmem:[%s11061_s29 + $0x18] sm:$0xff]  ;;  %s5715_s29 = smov 8  }
 0xc66   :  { %v10850_v37 = vadd.f32 %v4793_v13, %v4775_v53 }
 0xc68   :  { %v4839_v19 = vmul.f32 %v10850_v37, %v10850_v37 }
 0xc69   :  { %v4738_v47 = vpop.f32.mrf.mxu2  ;;  %v4757_v11 = vpop.f32.mrf.mxu3 }
 0xc6a   :  { %v4758_v12 = vadd.f32 %v4757_v11, %v4738_v47 }
 0xc6c   :  { %v4777_v30 = vadd.f32 %v4776_v62, %v4758_v12 }
 0xc6e   :  { %v10848_v36 = vadd.f32 %v4795_v32, %v4777_v30 }
 0xc70   :  { %4829 = vmatpush.msra.mxu2 %v10848_v36  ;;  %v4840_v44 = vmul.f32 %v10848_v36, %v10848_v36 }
 0xc72   :  { %4830 = vmatpush.msra.mxu2 %v10850_v37  ;;  %4853 = vmatpush.msra.mxu3 %v4840_v44 }
 0xc74   :  { %4831 = vmatpush.msra.mxu2 %v10855_v9  ;;  %4854 = vmatpush.msra.mxu3 %v4839_v19 }
 0xc76   :  { %4832 = vmatpush.msra.mxu2 %v4789_v25  ;;  %4855 = vmatpush.msra.mxu3 %v4838_v46 }
 0xc77   :  { %5368 = vmatmul.msk.f32.vlgmr.msra.gmra.mxu2 %vm95_vm0, %v11399_v26 }
 0xc78   :  { %4856 = vmatpush.msra.mxu3 %v4837_v33  ;;  %4937 = vmatpush.msrb.mxu2 %v4814_v3 }
 0xc79   :  { %5369 = vmatmul.msk.f32.vlgmr.msra.gmra.mxu3 %vm95_vm0, %v11399_v26 }
 0xc7a   :  { %4960 = vmatpush.msrb.mxu3 %v4814_v3 }
 0xcfa   :  { %v4834_v39 = vpop.f32.mrf.mxu2 }
 0xcfb   :  { %4877 = vmatmul.f32.vlgmr.msra.gmra.mxu0 %v4834_v39 }
 0xcfc   :  { %v4858_v40 = vpop.f32.mrf.mxu3 }
 0xcfd   :  { %4898 = vmatmul.f32.vlgmr.msra.gmra.mxu1 %v4858_v40 }
 0xd78   :  { %v4878_v5 = vpop.f32.mrf.mxu0 }
 0xd79   :  { %v4881_v50 = vmul.f32 0.001953125, %v4878_v5 }
 0xd7a   :  { %v4899_v15 = vpop.f32.mrf.mxu1 }
 0xd7b   :  { %v4903_v28 = vmul.f32 %v4881_v50, %v4881_v50  ;;  %v4902_v43 = vmul.f32 0.001953125, %v4899_v15 }
 0xd7d   :  { %v4904_v16 = vsub.f32 %v4902_v43, %v4903_v28 }
 0xd7f   :  { %v4905_v45 = vadd.f32 1e-05, %v4904_v16 }
 0xd81   :  { %5517 = vrsqrt.f32 %v4905_v45  ;;  %vm4912_vm13 = vweird.f32 %v4905_v45 }
 0xd87   :  { %v5518_v35 = vpop.eup %5517 }
 0xd88   :  { %v4907_v38 = vmul.f32 %v5518_v35, %v4905_v45  ;;  %vm4913_vm0 = vweird.f32 %v5518_v35 }
 0xd89   :  { %vm4914_vm15 = vmor %vm4912_vm13, %vm4913_vm0 }
 0xd8a   :  { %v4908_v0 = vmul.f32 %v5518_v35, %v4907_v38 }
 0xd8c   :  { %v4909_v27 = vmul.f32 0.5, %v4908_v0 }
 0xd8e   :  { %v4910_v18 = vsub.f32 1.5, %v4909_v27 }
 0xd90   :  { %v4911_v61 = vmul.f32 %v5518_v35, %v4910_v18 }
 0xd92   :  { %v4915_v56 = vsel %vm4914_vm15, %v5518_v35, %v4911_v61 }
 0xd93   :  { %v4916_v59 = vmul.f32 %v4915_v56, %v4815_v14 }
 0xd95   :  { %v4917_v6 = vmul.f32 %v4916_v59, %v4881_v50  ;;  %5370 = vmatmul.msk.f32.vlgmr.msrb.gmra.mxu2 %vm201_vm4, %v4916_v59 }
 0xd97   :  { %v4918_v20 = vsub.f32 %v4816_v4, %v4917_v6 }
 0xd99   :  { %5371 = vmatmul.msk.f32.vlgmr.msrb.gmra.mxu3 %vm201_vm4, %v4918_v20 }
 0xe18   :  { %v4939_v42 = vpop.f32.mrf.mxu2 }
 0xe19   :  { %v4965_v7 = vperm.slane %v4939_v42, 0 }
 0xe1b   :  { %v4966_v24 = vmul.f32 %v4965_v7, %v4789_v25  ;;  %v4967_v17 = vmul.f32 %v4965_v7, %v10855_v9  ;;  %v4968_v52 = vmul.f32 %v4965_v7, %v10850_v37  ;;  %v4969_v58 = vmul.f32 %v4965_v7, %v10848_v36 }
 0xe1c   :  { %v4962_v23 = vpop.f32.mrf.mxu3 }
 0xe1d   :  { %v4970_v10 = vadd.f32 %v5679_v54, %v4966_v24  ;;  %v4971_v13 = vadd.f32 %v5680_v55, %v4967_v17  ;;  %v4972_v63 = vadd.f32 %v5681_v34, %v4968_v52  ;;  %v4973_v29 = vadd.f32 %v5682_v41, %v4969_v58 }
 0xe1e   :  { %v4974_v21 = vperm.slane %v4962_v23, 0 }
 0xe20   :  { %v4975_v47 = vadd.f32 %v4974_v21, %v4970_v10  ;;  %v4976_v11 = vadd.f32 %v4974_v21, %v4971_v13  ;;  %v4977_v22 = vadd.f32 %v4974_v21, %v4972_v63  ;;  %v4978_v2 = vadd.f32 %v4974_v21, %v4973_v29 }
 0xe22   :  { %4979 = vst [vmem:[#allocation2] sm:$0xff] %v4975_v47 }
 0xe23   :  { %4980 = vst [vmem:[#allocation2 + $0x8] sm:$0xff] %v4976_v11 }
 0xe24   :  { %4981 = vst [vmem:[#allocation2 + $0x10] sm:$0xff] %v4977_v22 }
 0xe25   :  { %4982 = vst [vmem:[#allocation2 + $0x18] sm:$0xff] %v4978_v2 }
 0xe26   :  { %4995 = dma.vmem_to_hbm [thread:$0]  %s4988_s16, 512, %s4990_s25, [#allocation3], %s5714_s26, %s5714_s26, %s5715_s29  }
 0xe27   :  { %5707 = dma.done.wait [#allocation3], 512  }
 0xe28   :  { %5708 = vsyncadd [#allocation3], 4294966784 }
 0xe29   :  { %5000 = vsyncpa [#allocation3], 1 }

</bundles_post_ra>
